<compile_context>
chip_gen: v5e
topology: v5e:2x2
jax: 0.10.0
libtpu: 0.0.40
codegen_flags: <defaults>
</compile_context>

<pallas_src>
import numpy as np
import jax
import jax.numpy as jnp
from jax.experimental import pallas as pl
from jax.experimental.pallas import tpu as pltpu

# ----------------------------- configuration --------------------------------
B = 2                        # batch
C_IN, IMG, PATCH = 3, 28, 4  # 28x28 image, 4x4 patches -> 7x7 grid
GRID = IMG // PATCH          # 7
SEQ = GRID * GRID + 1        # 49 patches + 1 cls token = 50
CPP = C_IN * PATCH * PATCH   # 48 (flattened patch)
D = 64                       # vision hidden (stand-in for 768)
HEADS, DH = 2, 32
LAYERS = 2
MLP_DIM = 4 * D
DET_MID = 32                 # stand-in for 256
N_CLS = 12                   # stand-in for 80 classes
DET_OUT = 4 + N_CLS
SEG_MID = 16                 # stand-in for 64
LLM_D = N_CLS                # LLM consumes det_cls channel dim as embeddings
LLM_FF = 32
VOCAB = 50
LORA_R, LORA_ALPHA = 8, 32
EPS = 1e-5

F32 = jnp.float32


# ------------------------------ in-kernel helpers ----------------------------

def _layernorm(x, g, b):
    mu = jnp.mean(x, axis=-1, keepdims=True)
    var = jnp.mean(jnp.square(x - mu), axis=-1, keepdims=True)
    return (x - mu) * jax.lax.rsqrt(var + EPS) * g + b


def _rmsnorm(x, g):
    ms = jnp.mean(x * x, axis=-1, keepdims=True)
    return x * jax.lax.rsqrt(ms + 1e-6) * g


# ------------------------- kernel 1: fused vision tower ----------------------

def _vision_kernel(patches_ref, patch_w_ref, embed_bias_ref, pre_g_ref, pre_b_ref,
                   ln1_g_ref, ln1_b_ref, wq_ref, wk_ref, wv_ref,
                   bq_ref, bk_ref, bv_ref, wo_ref, bo_ref,
                   ln2_g_ref, ln2_b_ref, fc1_w_ref, fc1_b_ref, fc2_w_ref, fc2_b_ref,
                   out_ref):
    """One batch element per grid step: patch embed + pre-LN + all CLIP layers."""
    scale = DH ** -0.5

    # Patch embedding + cls token + positional embedding + pre-LN (fused).
    # Row 0 of `patches` is all-zero, so the matmul contributes nothing there
    # and embed_bias row 0 (= cls + pos[0]) supplies the cls token.
    tok = jnp.dot(patches_ref[0, :, :], patch_w_ref[...],
                  preferred_element_type=F32)                       # (SEQ, D)
    h = _layernorm(tok + embed_bias_ref[...], pre_g_ref[...], pre_b_ref[...])

    for l in range(LAYERS):
        # ---------------- attention block ----------------
        x = _layernorm(h, ln1_g_ref[l, :, :], ln1_b_ref[l, :, :])
        attn = jnp.zeros((SEQ, D), F32)
        for hd in range(HEADS):                       # static, unrolled
            q = jnp.dot(x, wq_ref[l, hd, :, :],
                        preferred_element_type=F32) + bq_ref[l, hd, :, :]
            k = jnp.dot(x, wk_ref[l, hd, :, :],
                        preferred_element_type=F32) + bk_ref[l, hd, :, :]
            v = jnp.dot(x, wv_ref[l, hd, :, :],
                        preferred_element_type=F32) + bv_ref[l, hd, :, :]
            s = jnp.dot(q, k.T, preferred_element_type=F32) * scale  # (SEQ, SEQ)
            m = jnp.max(s, axis=-1, keepdims=True)
            e = jnp.exp(s - m)
            p = e * pl.reciprocal(jnp.sum(e, axis=-1, keepdims=True), approx=True)
            o = jnp.dot(p, v, preferred_element_type=F32)            # (SEQ, DH)
            attn = attn + jnp.dot(o, wo_ref[l, hd, :, :],
                                  preferred_element_type=F32)
        h = h + attn + bo_ref[l, :, :]

        # ---------------- MLP block ----------------
        x = _layernorm(h, ln2_g_ref[l, :, :], ln2_b_ref[l, :, :])
        m1 = jnp.dot(x, fc1_w_ref[l, :, :],
                     preferred_element_type=F32) + fc1_b_ref[l, :, :]
        m1 = m1 * jax.nn.sigmoid(1.702 * m1)          # CLIP quick_gelu (VPU/EUP)
        m2 = jnp.dot(m1, fc2_w_ref[l, :, :],
                     preferred_element_type=F32) + fc2_b_ref[l, :, :]
        h = h + m2

    out_ref[0, :, :] = h                              # == hidden_states[-1][b]


# ------------------- kernel 2: fused det/seg heads + LLM ---------------------

def _heads_llm_kernel(hidden_ref,
                      sdet_ref, det1_wk_ref, det1_b_ref, det2_w_ref, det2_b_ref,
                      mseg_ref, seg1_wk_ref, seg1_b_ref, seg2_w_ref, seg2_b_ref,
                      sel_ref, attn_ng_ref, wv_ref, wo_ref, mlp_ng_ref,
                      wg_ref, wu_ref, wd_ref, fin_ng_ref, lm_ref,
                      det_ref, seg_ref, logits_ref):
    """One batch element per grid step: det head, seg head, det_cls mean, LLM."""
    HW, HW4 = GRID * GRID, 4 * GRID * GRID

    hid = hidden_ref[0, :, :]                          # (SEQ, D), incl. cls row

    # ---- detection head: Conv3x3(D->DET_MID)+ReLU, Conv1x1 -> DET_OUT ----
    # The 3x3 conv is sum_k S_k @ hidden @ W1_k, with S_k (HW, SEQ) precomputed
    # shift matrices whose cls column is zero (so the cls token is dropped).
    det_acc = jnp.zeros((HW, DET_MID), F32)
    for k in range(9):
        shifted = jnp.dot(sdet_ref[k, :, :], hid,
                          preferred_element_type=F32)               # (HW, D)
        det_acc = det_acc + jnp.dot(shifted, det1_wk_ref[k, :, :],
                                    preferred_element_type=F32)
    det_mid = jnp.maximum(det_acc + det1_b_ref[...], 0.0)           # (HW, DET_MID)
    det = jnp.dot(det_mid, det2_w_ref[...],
                  preferred_element_type=F32) + det2_b_ref[...]     # (HW, DET_OUT)
    det_ref[0, :, :] = det

    # ---- segmentation head: Upsample x2 (folded into M_k), Conv3x3+ReLU, 1x1 ----
    seg_acc = jnp.zeros((HW4, SEG_MID), F32)
    for k in range(9):
        ups = jnp.dot(mseg_ref[k, :, :], hid,
                      preferred_element_type=F32)                   # (HW4, D)
        seg_acc = seg_acc + jnp.dot(ups, seg1_wk_ref[k, :, :],
                                    preferred_element_type=F32)
    seg_mid = jnp.maximum(seg_acc + seg1_b_ref[...], 0.0)           # (HW4, SEG_MID)
    seg = jnp.dot(seg_mid, seg2_w_ref[...],
                  preferred_element_type=F32) + seg2_b_ref[...]     # (HW4, N_CLS)
    seg_ref[0, :, :] = seg

    # ---- LLM on det_cls spatial mean (sequence length 1) ----
    det_mean = jnp.mean(det, axis=0, keepdims=True)                 # (1, DET_OUT)
    x = jnp.dot(det_mean, sel_ref[...],
                preferred_element_type=F32)                         # (1, LLM_D)

    h1 = _rmsnorm(x, attn_ng_ref[...])
    # seq_len == 1: softmax over a single key is the identity, so the attention
    # output is exactly v @ wo (q/k projections are dead code and are skipped).
    v_proj = jnp.dot(h1, wv_ref[...], preferred_element_type=F32)
    x = x + jnp.dot(v_proj, wo_ref[...], preferred_element_type=F32)

    h2 = _rmsnorm(x, mlp_ng_ref[...])
    g_ = jnp.dot(h2, wg_ref[...], preferred_element_type=F32)
    gate = g_ * jax.nn.sigmoid(g_)                                  # SiLU
    up = jnp.dot(h2, wu_ref[...], preferred_element_type=F32)
    x = x + jnp.dot(gate * up, wd_ref[...], preferred_element_type=F32)

    h3 = _rmsnorm(x, fin_ng_ref[...])
    logits_ref[0, :, :] = jnp.dot(h3, lm_ref[...],
                                  preferred_element_type=F32)       # (1, VOCAB)


# ------------------------- host-side constant builders ----------------------

def _bilinear_matrix(in_size, scale):
    """1-D bilinear interp matrix, PyTorch Upsample(align_corners=False)."""
    out_size = in_size * scale
    W = np.zeros((out_size, in_size), np.float32)
    for o in range(out_size):
        s = max((o + 0.5) / scale - 0.5, 0.0)
        i0 = min(int(np.floor(s)), in_size - 1)
        i1 = min(i0 + 1, in_size - 1)
        f = s - i0
        W[o, i0] += 1.0 - f
        W[o, i1] += f
    return W


def _shift_matrices(h, w):
    """(9, h*w, h*w) 0/1 shift matrices for a 3x3, padding=1 conv (zero pad)."""
    mats = np.zeros((9, h * w, h * w), np.float32)
    for dy in (-1, 0, 1):
        for dx in (-1, 0, 1):
            k = (dy + 1) * 3 + (dx + 1)
            for y in range(h):
                for x in range(w):
                    yy, xx = y + dy, x + dx
                    if 0 <= yy < h and 0 <= xx < w:
                        mats[k, y * w + x, yy * w + xx] = 1.0
    return mats


# ------------------------------- parameters ----------------------------------

def _init(key, shape, std=0.02):
    return std * jax.random.normal(key, shape, F32)


def init_params(key):
    """Synthetic parameters mirroring the PyTorch module's structure."""
    keys = iter(jax.random.split(key, 256))
    nk = lambda: next(keys)

    vision_layers = []
    for _ in range(LAYERS):
        vision_layers.append(dict(
            ln1_g=jnp.ones((D,)), ln1_b=jnp.zeros((D,)),
            wq=_init(nk(), (D, D)), bq=jnp.zeros((D,)),
            wk=_init(nk(), (D, D)), bk=jnp.zeros((D,)),
            wv=_init(nk(), (D, D)), bv=jnp.zeros((D,)),
            wo=_init(nk(), (D, D)), bo=jnp.zeros((D,)),
            # LoRA on k/v projections.  PEFT init: lora_B = 0 -> forward == base.
            lora_k_a=_init(nk(), (D, LORA_R)), lora_k_b=jnp.zeros((LORA_R, D)),
            lora_v_a=_init(nk(), (D, LORA_R)), lora_v_b=jnp.zeros((LORA_R, D)),
            ln2_g=jnp.ones((D,)), ln2_b=jnp.zeros((D,)),
            fc1_w=_init(nk(), (D, MLP_DIM)), fc1_b=jnp.zeros((MLP_DIM,)),
            fc2_w=_init(nk(), (MLP_DIM, D)), fc2_b=jnp.zeros((D,)),
        ))

    vision = dict(
        patch_w=_init(nk(), (D, C_IN, PATCH, PATCH)),   # PyTorch conv layout
        cls=_init(nk(), (D,)),
        pos=_init(nk(), (SEQ, D)),
        pre_ln_g=jnp.ones((D,)), pre_ln_b=jnp.zeros((D,)),
        layers=vision_layers,
    )

    clip = dict(
        vision=vision,
        det1_w=_init(nk(), (DET_MID, D, 3, 3)), det1_b=jnp.zeros((DET_MID,)),
        det2_w=_init(nk(), (DET_OUT, DET_MID, 1, 1)), det2_b=jnp.zeros((DET_OUT,)),
        seg1_w=_init(nk(), (SEG_MID, D, 3, 3)), seg1_b=jnp.zeros((SEG_MID,)),
        seg2_w=_init(nk(), (N_CLS, SEG_MID, 1, 1)), seg2_b=jnp.zeros((N_CLS,)),
    )

    llm = dict(
        attn_norm_g=jnp.ones((LLM_D,)),
        # wq/wk kept for structural fidelity; dead code at seq_len==1.
        wq=_init(nk(), (LLM_D, LLM_D)), wk=_init(nk(), (LLM_D, LLM_D)),
        wv=_init(nk(), (LLM_D, LLM_D)), wo=_init(nk(), (LLM_D, LLM_D)),
        mlp_norm_g=jnp.ones((LLM_D,)),
        w_gate=_init(nk(), (LLM_D, LLM_FF)), w_up=_init(nk(), (LLM_D, LLM_FF)),
        w_down=_init(nk(), (LLM_FF, LLM_D)),
        final_norm_g=jnp.ones((LLM_D,)),
        lm_head=_init(nk(), (LLM_D, VOCAB)),
    )
    return dict(clip=clip, llm=llm)


def prepare_inference_params(params):
    """Precompute (once, outside the forward hot path) everything the two Pallas
    kernels consume:
      - LoRA merged into the k/v projection weights,
      - q/k/v/out projections split per attention head and stacked per layer,
      - 3x3 convs lowered to 9 shift matrices (det) / shift@bilinear-upsample
        matrices (seg) so the heads are pure channels-last matmuls.
    All tensors stay float32 so every in-kernel dot is f32 x f32 -> f32
    (works on the MXU and on the interpret / CPU executor)."""
    clip = params["clip"]
    vis = clip["vision"]
    llm = params["llm"]
    layers = vis["layers"]
    lora_scale = LORA_ALPHA / LORA_R

    def per_head_w(w):                       # (D, D) -> (HEADS, D, DH)
        return w.reshape(D, HEADS, DH).transpose(1, 0, 2)

    def per_head_b(b):                       # (D,) -> (HEADS, 1, DH)
        return b.reshape(HEADS, 1, DH)

    wk_merged = [l["wk"] + lora_scale * (l["lora_k_a"] @ l["lora_k_b"]) for l in layers]
    wv_merged = [l["wv"] + lora_scale * (l["lora_v_a"] @ l["lora_v_b"]) for l in layers]

    ip = dict(
        patch_w=vis["patch_w"].reshape(D, CPP).T,                   # (CPP, D)
        embed_bias=jnp.concatenate(
            [(vis["cls"] + vis["pos"][0]).reshape(1, D), vis["pos"][1:]], axis=0),
        pre_ln_g=vis["pre_ln_g"].reshape(1, D),
        pre_ln_b=vis["pre_ln_b"].reshape(1, D),
        ln1_g=jnp.stack([l["ln1_g"].reshape(1, D) for l in layers]),
        ln1_b=jnp.stack([l["ln1_b"].reshape(1, D) for l in layers]),
        wq=jnp.stack([per_head_w(l["wq"]) for l in layers]),
        wk=jnp.stack([per_head_w(w) for w in wk_merged]),
        wv=jnp.stack([per_head_w(w) for w in wv_merged]),
        bq=jnp.stack([per_head_b(l["bq"]) for l in layers]),
        bk=jnp.stack([per_head_b(l["bk"]) for l in layers]),
        bv=jnp.stack([per_head_b(l["bv"]) for l in layers]),
        wo=jnp.stack([l["wo"].reshape(HEADS, DH, D) for l in layers]),
        bo=jnp.stack([l["bo"].reshape(1, D) for l in layers]),
        ln2_g=jnp.stack([l["ln2_g"].reshape(1, D) for l in layers]),
        ln2_b=jnp.stack([l["ln2_b"].reshape(1, D) for l in layers]),
        fc1_w=jnp.stack([l["fc1_w"] for l in layers]),
        fc1_b=jnp.stack([l["fc1_b"].reshape(1, MLP_DIM) for l in layers]),
        fc2_w=jnp.stack([l["fc2_w"] for l in layers]),
        fc2_b=jnp.stack([l["fc2_b"].reshape(1, D) for l in layers]),
    )

    # det / seg conv heads lowered to matmuls (channels-last, cls token dropped
    # by a zero leading column so the kernels consume the full hidden state).
    sdet = _shift_matrices(GRID, GRID)                         # (9, 49, 49)
    sseg = _shift_matrices(2 * GRID, 2 * GRID)                 # (9, 196, 196)
    up1 = _bilinear_matrix(GRID, 2)                            # (14, 7)
    ups_mat = np.kron(up1, up1)                                # (196, 49)
    mseg = np.einsum("kpq,qr->kpr", sseg, ups_mat)             # (9, 196, 49)
    sdet = np.concatenate([np.zeros((9, GRID * GRID, 1), np.float32), sdet], axis=2)
    mseg = np.concatenate([np.zeros((9, 4 * GRID * GRID, 1), np.float32), mseg], axis=2)
    sel = np.zeros((DET_OUT, N_CLS), np.float32)               # selects det_cls cols
    sel[4:, :] = np.eye(N_CLS, dtype=np.float32)

    ip.update(
        Sdet=jnp.asarray(sdet),
        det1_wk=clip["det1_w"].transpose(2, 3, 1, 0).reshape(9, D, DET_MID),
        det1_b=clip["det1_b"].reshape(1, DET_MID),
        det2_w=clip["det2_w"].reshape(DET_OUT, DET_MID).T,
        det2_b=clip["det2_b"].reshape(1, DET_OUT),
        Mseg=jnp.asarray(mseg),
        seg1_wk=clip["seg1_w"].transpose(2, 3, 1, 0).reshape(9, D, SEG_MID),
        seg1_b=clip["seg1_b"].reshape(1, SEG_MID),
        seg2_w=clip["seg2_w"].reshape(N_CLS, SEG_MID).T,
        seg2_b=clip["seg2_b"].reshape(1, N_CLS),
        sel=jnp.asarray(sel),
        llm_attn_norm_g=llm["attn_norm_g"].reshape(1, LLM_D),
        llm_wv=llm["wv"],
        llm_wo=llm["wo"],
        llm_mlp_norm_g=llm["mlp_norm_g"].reshape(1, LLM_D),
        llm_w_gate=llm["w_gate"],
        llm_w_up=llm["w_up"],
        llm_w_down=llm["w_down"],
        llm_final_norm_g=llm["final_norm_g"].reshape(1, LLM_D),
        llm_lm_head=llm["lm_head"],
    )
    return ip


# ------------------------------- forward pass ---------------------------------

def _wspec(shape):
    """Whole-array (broadcast across the batch grid) BlockSpec."""
    nd = len(shape)
    if nd == 2:
        return pl.BlockSpec(shape, lambda b: (0, 0))
    if nd == 3:
        return pl.BlockSpec(shape, lambda b: (0, 0, 0))
    return pl.BlockSpec(shape, lambda b: (0, 0, 0, 0))


def vision_encoder(ip, images):
    Bn = images.shape[0]
    # Patchify (channels-last rows), prepend an all-zero row per image for the
    # cls-token slot (its embedding comes entirely from embed_bias row 0).
    patches = images.reshape(Bn, C_IN, GRID, PATCH, GRID, PATCH)
    patches = patches.transpose(0, 2, 4, 1, 3, 5).reshape(Bn, GRID * GRID, CPP)
    patches = jnp.concatenate(
        [jnp.zeros((Bn, 1, CPP), patches.dtype), patches], axis=1)     # (B, SEQ, CPP)

    weights = [ip["patch_w"], ip["embed_bias"], ip["pre_ln_g"], ip["pre_ln_b"],
               ip["ln1_g"], ip["ln1_b"], ip["wq"], ip["wk"], ip["wv"],
               ip["bq"], ip["bk"], ip["bv"], ip["wo"], ip["bo"],
               ip["ln2_g"], ip["ln2_b"], ip["fc1_w"], ip["fc1_b"],
               ip["fc2_w"], ip["fc2_b"]]

    return pl.pallas_call(
        _vision_kernel,
        out_shape=jax.ShapeDtypeStruct((Bn, SEQ, D), F32),
        grid=(Bn,),
        in_specs=[pl.BlockSpec((1, SEQ, CPP), lambda b: (b, 0, 0))]
                 + [_wspec(w.shape) for w in weights],
        out_specs=pl.BlockSpec((1, SEQ, D), lambda b: (b, 0, 0)),
        compiler_params=pltpu.CompilerParams(dimension_semantics=("parallel",)),
    )(patches, *weights)


def heads_and_llm(ip, hidden):
    Bn = hidden.shape[0]
    HW, HW4 = GRID * GRID, 4 * GRID * GRID
    weights = [ip["Sdet"], ip["det1_wk"], ip["det1_b"], ip["det2_w"], ip["det2_b"],
               ip["Mseg"], ip["seg1_wk"], ip["seg1_b"], ip["seg2_w"], ip["seg2_b"],
               ip["sel"], ip["llm_attn_norm_g"], ip["llm_wv"], ip["llm_wo"],
               ip["llm_mlp_norm_g"], ip["llm_w_gate"], ip["llm_w_up"],
               ip["llm_w_down"], ip["llm_final_norm_g"], ip["llm_lm_head"]]

    det, seg, logits = pl.pallas_call(
        _heads_llm_kernel,
        out_shape=(jax.ShapeDtypeStruct((Bn, HW, DET_OUT), F32),
                   jax.ShapeDtypeStruct((Bn, HW4, N_CLS), F32),
                   jax.ShapeDtypeStruct((Bn, 1, VOCAB), F32)),
        grid=(Bn,),
        in_specs=[pl.BlockSpec((1, SEQ, D), lambda b: (b, 0, 0))]
                 + [_wspec(w.shape) for w in weights],
        out_specs=[pl.BlockSpec((1, HW, DET_OUT), lambda b: (b, 0, 0)),
                   pl.BlockSpec((1, HW4, N_CLS), lambda b: (b, 0, 0)),
                   pl.BlockSpec((1, 1, VOCAB), lambda b: (b, 0, 0))],
        compiler_params=pltpu.CompilerParams(dimension_semantics=("parallel",)),
    )(hidden, *weights)
    return det, seg, logits


def multimodal_forward(ip, images, texts):
    # TODO(synk): AutoTokenizer(texts) -> input_ids has no Pallas equivalent; the
    # original forward also passes BOTH input_ids and inputs_embeds (invalid in
    # HF), so only the inputs_embeds (det_cls spatial-mean) path is implemented.
    del texts
    Bn = images.shape[0]
    hidden = vision_encoder(ip, images)                 # pallas_call #1
    det_f, seg_f, logits = heads_and_llm(ip, hidden)    # pallas_call #2

    # Only the final outputs are transposed to NCHW (matching the PyTorch API).
    det = det_f.reshape(Bn, GRID, GRID, DET_OUT).transpose(0, 3, 1, 2)
    seg = seg_f.reshape(Bn, 2 * GRID, 2 * GRID, N_CLS).transpose(0, 3, 1, 2)
    return {"logits": logits,
            "det_bbox": det[:, :4],
            "det_cls": det[:, 4:],
            "seg_mask": seg}


# ---------------------------------- main ---------------------------------------

if __name__ == "__main__":
    key = jax.random.PRNGKey(0)
    k_params, k_img = jax.random.split(key)
    params = init_params(k_params)
    infer_params = prepare_inference_params(params)     # LoRA merge etc., done once

    images = jax.random.normal(k_img, (B, C_IN, IMG, IMG), F32)  # NCHW
    texts = ["a photo of a cat", "two dogs playing"]

    fwd = jax.jit(lambda imgs: multimodal_forward(infer_params, imgs, texts))
    out = jax.block_until_ready(fwd(images))

    assert out["logits"].shape == (B, 1, VOCAB)
    assert out["det_bbox"].shape == (B, 4, GRID, GRID)
    assert out["det_cls"].shape == (B, N_CLS, GRID, GRID)
    assert out["seg_mask"].shape == (B, N_CLS, 2 * GRID, 2 * GRID)
    assert np.all(np.isfinite(np.asarray(out["logits"])))
    print("KERNEL_OK")
</pallas_src>

<mosaic_0001>
module attributes {stable_mosaic.version = 11 : i64} {
  func.func @_vision_kernel(%arg0: i32, %arg1: memref<1x50x48xf32, #tpu.memory_space<vmem>>, %arg2: memref<48x64xf32, #tpu.memory_space<vmem>>, %arg3: memref<50x64xf32, #tpu.memory_space<vmem>>, %arg4: memref<1x64xf32, #tpu.memory_space<vmem>>, %arg5: memref<1x64xf32, #tpu.memory_space<vmem>>, %arg6: memref<2x1x64xf32, #tpu.memory_space<vmem>>, %arg7: memref<2x1x64xf32, #tpu.memory_space<vmem>>, %arg8: memref<2x2x64x32xf32, #tpu.memory_space<vmem>>, %arg9: memref<2x2x64x32xf32, #tpu.memory_space<vmem>>, %arg10: memref<2x2x64x32xf32, #tpu.memory_space<vmem>>, %arg11: memref<2x2x1x32xf32, #tpu.memory_space<vmem>>, %arg12: memref<2x2x1x32xf32, #tpu.memory_space<vmem>>, %arg13: memref<2x2x1x32xf32, #tpu.memory_space<vmem>>, %arg14: memref<2x2x32x64xf32, #tpu.memory_space<vmem>>, %arg15: memref<2x1x64xf32, #tpu.memory_space<vmem>>, %arg16: memref<2x1x64xf32, #tpu.memory_space<vmem>>, %arg17: memref<2x1x64xf32, #tpu.memory_space<vmem>>, %arg18: memref<2x64x256xf32, #tpu.memory_space<vmem>>, %arg19: memref<2x1x256xf32, #tpu.memory_space<vmem>>, %arg20: memref<2x256x64xf32, #tpu.memory_space<vmem>>, %arg21: memref<2x1x64xf32, #tpu.memory_space<vmem>>, %arg22: memref<1x50x64xf32, #tpu.memory_space<vmem>>) attributes {dimension_semantics = [#tpu.dimension_semantics<parallel>], iteration_bounds = array<i64: 2>, scalar_prefetch = 0 : i64, scratch_operands = 0 : i64, tpu.core_type = #tpu.core_type<tc>, window_params = [{transform_indices = @transform_0, window_bounds = array<i64: 1, 50, 48>}, {pipeline_mode = #tpu.pipeline_mode<synchronous>, transform_indices = @transform_1, window_bounds = array<i64: 48, 64>}, {pipeline_mode = #tpu.pipeline_mode<synchronous>, transform_indices = @transform_2, window_bounds = array<i64: 50, 64>}, {pipeline_mode = #tpu.pipeline_mode<synchronous>, transform_indices = @transform_3, window_bounds = array<i64: 1, 64>}, {pipeline_mode = #tpu.pipeline_mode<synchronous>, transform_indices = @transform_4, window_bounds = array<i64: 1, 64>}, {pipeline_mode = #tpu.pipeline_mode<synchronous>, transform_indices = @transform_5, window_bounds = array<i64: 2, 1, 64>}, {pipeline_mode = #tpu.pipeline_mode<synchronous>, transform_indices = @transform_6, window_bounds = array<i64: 2, 1, 64>}, {pipeline_mode = #tpu.pipeline_mode<synchronous>, transform_indices = @transform_7, window_bounds = array<i64: 2, 2, 64, 32>}, {pipeline_mode = #tpu.pipeline_mode<synchronous>, transform_indices = @transform_8, window_bounds = array<i64: 2, 2, 64, 32>}, {pipeline_mode = #tpu.pipeline_mode<synchronous>, transform_indices = @transform_9, window_bounds = array<i64: 2, 2, 64, 32>}, {pipeline_mode = #tpu.pipeline_mode<synchronous>, transform_indices = @transform_10, window_bounds = array<i64: 2, 2, 1, 32>}, {pipeline_mode = #tpu.pipeline_mode<synchronous>, transform_indices = @transform_11, window_bounds = array<i64: 2, 2, 1, 32>}, {pipeline_mode = #tpu.pipeline_mode<synchronous>, transform_indices = @transform_12, window_bounds = array<i64: 2, 2, 1, 32>}, {pipeline_mode = #tpu.pipeline_mode<synchronous>, transform_indices = @transform_13, window_bounds = array<i64: 2, 2, 32, 64>}, {pipeline_mode = #tpu.pipeline_mode<synchronous>, transform_indices = @transform_14, window_bounds = array<i64: 2, 1, 64>}, {pipeline_mode = #tpu.pipeline_mode<synchronous>, transform_indices = @transform_15, window_bounds = array<i64: 2, 1, 64>}, {pipeline_mode = #tpu.pipeline_mode<synchronous>, transform_indices = @transform_16, window_bounds = array<i64: 2, 1, 64>}, {pipeline_mode = #tpu.pipeline_mode<synchronous>, transform_indices = @transform_17, window_bounds = array<i64: 2, 64, 256>}, {pipeline_mode = #tpu.pipeline_mode<synchronous>, transform_indices = @transform_18, window_bounds = array<i64: 2, 1, 256>}, {pipeline_mode = #tpu.pipeline_mode<synchronous>, transform_indices = @transform_19, window_bounds = array<i64: 2, 256, 64>}, {pipeline_mode = #tpu.pipeline_mode<synchronous>, transform_indices = @transform_20, window_bounds = array<i64: 2, 1, 64>}, {transform_indices = @transform_21, window_bounds = array<i64: 1, 50, 64>}]} {
    %c0 = arith.constant 0 : index
    %c0_0 = arith.constant 0 : index
    %c0_1 = arith.constant 0 : index
    %0 = vector.load %arg1[%c0, %c0_0, %c0_1] : memref<1x50x48xf32, #tpu.memory_space<vmem>>, vector<1x50x48xf32>
    %1 = vector.shape_cast %0 : vector<1x50x48xf32> to vector<50x48xf32>
    %c0_2 = arith.constant 0 : index
    %c0_3 = arith.constant 0 : index
    %2 = vector.load %arg2[%c0_2, %c0_3] : memref<48x64xf32, #tpu.memory_space<vmem>>, vector<48x64xf32>
    %cst = arith.constant dense<0.000000e+00> : vector<50x64xf32>
    %3 = tpu.matmul %1, %2, %cst {dimension_numbers = #tpu.dot_dimension_numbers<[1], [0], [0], [1], [0, 0, 1, 1], [], []>} : vector<50x48xf32>, vector<48x64xf32>, vector<50x64xf32> -> vector<50x64xf32>
    %c0_4 = arith.constant 0 : index
    %c0_5 = arith.constant 0 : index
    %4 = vector.load %arg3[%c0_4, %c0_5] : memref<50x64xf32, #tpu.memory_space<vmem>>, vector<50x64xf32>
    %5 = arith.addf %3, %4 : vector<50x64xf32>
    %c0_6 = arith.constant 0 : index
    %c0_7 = arith.constant 0 : index
    %6 = vector.load %arg4[%c0_6, %c0_7] : memref<1x64xf32, #tpu.memory_space<vmem>>, vector<1x64xf32>
    %c0_8 = arith.constant 0 : index
    %c0_9 = arith.constant 0 : index
    %7 = vector.load %arg5[%c0_8, %c0_9] : memref<1x64xf32, #tpu.memory_space<vmem>>, vector<1x64xf32>
    %cst_10 = arith.constant dense<0.000000e+00> : vector<50xf32>
    %8 = vector.multi_reduction <add>, %5, %cst_10 [1] : vector<50x64xf32> to vector<50xf32>
    %9 = vector.shape_cast %8 : vector<50xf32> to vector<50x1xf32>
    %cst_11 = arith.constant 6.400000e+01 : f32
    %10 = vector.broadcast %cst_11 : f32 to vector<50x1xf32>
    %11 = arith.divf %9, %10 : vector<50x1xf32>
    %12 = vector.broadcast %11 : vector<50x1xf32> to vector<50x64xf32>
    %13 = arith.subf %5, %12 : vector<50x64xf32>
    %14 = arith.mulf %13, %13 : vector<50x64xf32>
    %cst_12 = arith.constant dense<0.000000e+00> : vector<50xf32>
    %15 = vector.multi_reduction <add>, %14, %cst_12 [1] : vector<50x64xf32> to vector<50xf32>
    %16 = vector.shape_cast %15 : vector<50xf32> to vector<50x1xf32>
    %cst_13 = arith.constant 6.400000e+01 : f32
    %17 = vector.broadcast %cst_13 : f32 to vector<50x1xf32>
    %18 = arith.divf %16, %17 : vector<50x1xf32>
    %19 = vector.broadcast %11 : vector<50x1xf32> to vector<50x64xf32>
    %20 = arith.subf %5, %19 : vector<50x64xf32>
    %cst_14 = arith.constant 9.99999974E-6 : f32
    %21 = vector.broadcast %cst_14 : f32 to vector<50x1xf32>
    %22 = arith.addf %18, %21 : vector<50x1xf32>
    %23 = math.rsqrt %22 : vector<50x1xf32>
    %24 = vector.broadcast %23 : vector<50x1xf32> to vector<50x64xf32>
    %25 = arith.mulf %20, %24 : vector<50x64xf32>
    %26 = vector.broadcast %6 : vector<1x64xf32> to vector<50x64xf32>
    %27 = arith.mulf %25, %26 : vector<50x64xf32>
    %28 = vector.broadcast %7 : vector<1x64xf32> to vector<50x64xf32>
    %29 = arith.addf %27, %28 : vector<50x64xf32>
    %c0_15 = arith.constant 0 : index
    %c0_16 = arith.constant 0 : index
    %c0_17 = arith.constant 0 : index
    %30 = vector.load %arg6[%c0_15, %c0_16, %c0_17] : memref<2x1x64xf32, #tpu.memory_space<vmem>>, vector<1x1x64xf32>
    %31 = vector.shape_cast %30 : vector<1x1x64xf32> to vector<1x64xf32>
    %c0_18 = arith.constant 0 : index
    %c0_19 = arith.constant 0 : index
    %c0_20 = arith.constant 0 : index
    %32 = vector.load %arg7[%c0_18, %c0_19, %c0_20] : memref<2x1x64xf32, #tpu.memory_space<vmem>>, vector<1x1x64xf32>
    %33 = vector.shape_cast %32 : vector<1x1x64xf32> to vector<1x64xf32>
    %cst_21 = arith.constant dense<0.000000e+00> : vector<50xf32>
    %34 = vector.multi_reduction <add>, %29, %cst_21 [1] : vector<50x64xf32> to vector<50xf32>
    %35 = vector.shape_cast %34 : vector<50xf32> to vector<50x1xf32>
    %cst_22 = arith.constant 6.400000e+01 : f32
    %36 = vector.broadcast %cst_22 : f32 to vector<50x1xf32>
    %37 = arith.divf %35, %36 : vector<50x1xf32>
    %38 = vector.broadcast %37 : vector<50x1xf32> to vector<50x64xf32>
    %39 = arith.subf %29, %38 : vector<50x64xf32>
    %40 = arith.mulf %39, %39 : vector<50x64xf32>
    %cst_23 = arith.constant dense<0.000000e+00> : vector<50xf32>
    %41 = vector.multi_reduction <add>, %40, %cst_23 [1] : vector<50x64xf32> to vector<50xf32>
    %42 = vector.shape_cast %41 : vector<50xf32> to vector<50x1xf32>
    %cst_24 = arith.constant 6.400000e+01 : f32
    %43 = vector.broadcast %cst_24 : f32 to vector<50x1xf32>
    %44 = arith.divf %42, %43 : vector<50x1xf32>
    %45 = vector.broadcast %37 : vector<50x1xf32> to vector<50x64xf32>
    %46 = arith.subf %29, %45 : vector<50x64xf32>
    %cst_25 = arith.constant 9.99999974E-6 : f32
    %47 = vector.broadcast %cst_25 : f32 to vector<50x1xf32>
    %48 = arith.addf %44, %47 : vector<50x1xf32>
    %49 = math.rsqrt %48 : vector<50x1xf32>
    %50 = vector.broadcast %49 : vector<50x1xf32> to vector<50x64xf32>
    %51 = arith.mulf %46, %50 : vector<50x64xf32>
    %52 = vector.broadcast %31 : vector<1x64xf32> to vector<50x64xf32>
    %53 = arith.mulf %51, %52 : vector<50x64xf32>
    %54 = vector.broadcast %33 : vector<1x64xf32> to vector<50x64xf32>
    %55 = arith.addf %53, %54 : vector<50x64xf32>
    %cst_26 = arith.constant 0.000000e+00 : f32
    %56 = vector.broadcast %cst_26 : f32 to vector<50x64xf32>
    %c0_27 = arith.constant 0 : index
    %c0_28 = arith.constant 0 : index
    %c0_29 = arith.constant 0 : index
    %c0_30 = arith.constant 0 : index
    %57 = vector.load %arg8[%c0_27, %c0_28, %c0_29, %c0_30] : memref<2x2x64x32xf32, #tpu.memory_space<vmem>>, vector<1x1x64x32xf32>
    %58 = vector.shape_cast %57 : vector<1x1x64x32xf32> to vector<64x32xf32>
    %cst_31 = arith.constant dense<0.000000e+00> : vector<50x32xf32>
    %59 = tpu.matmul %55, %58, %cst_31 {dimension_numbers = #tpu.dot_dimension_numbers<[1], [0], [0], [1], [0, 0, 1, 1], [], []>} : vector<50x64xf32>, vector<64x32xf32>, vector<50x32xf32> -> vector<50x32xf32>
    %c0_32 = arith.constant 0 : index
    %c0_33 = arith.constant 0 : index
    %c0_34 = arith.constant 0 : index
    %c0_35 = arith.constant 0 : index
    %60 = vector.load %arg11[%c0_32, %c0_33, %c0_34, %c0_35] : memref<2x2x1x32xf32, #tpu.memory_space<vmem>>, vector<1x1x1x32xf32>
    %61 = vector.shape_cast %60 : vector<1x1x1x32xf32> to vector<1x32xf32>
    %62 = vector.broadcast %61 : vector<1x32xf32> to vector<50x32xf32>
    %63 = arith.addf %59, %62 : vector<50x32xf32>
    %c0_36 = arith.constant 0 : index
    %c0_37 = arith.constant 0 : index
    %c0_38 = arith.constant 0 : index
    %c0_39 = arith.constant 0 : index
    %64 = vector.load %arg9[%c0_36, %c0_37, %c0_38, %c0_39] : memref<2x2x64x32xf32, #tpu.memory_space<vmem>>, vector<1x1x64x32xf32>
    %65 = vector.shape_cast %64 : vector<1x1x64x32xf32> to vector<64x32xf32>
    %cst_40 = arith.constant dense<0.000000e+00> : vector<50x32xf32>
    %66 = tpu.matmul %55, %65, %cst_40 {dimension_numbers = #tpu.dot_dimension_numbers<[1], [0], [0], [1], [0, 0, 1, 1], [], []>} : vector<50x64xf32>, vector<64x32xf32>, vector<50x32xf32> -> vector<50x32xf32>
    %c0_41 = arith.constant 0 : index
    %c0_42 = arith.constant 0 : index
    %c0_43 = arith.constant 0 : index
    %c0_44 = arith.constant 0 : index
    %67 = vector.load %arg12[%c0_41, %c0_42, %c0_43, %c0_44] : memref<2x2x1x32xf32, #tpu.memory_space<vmem>>, vector<1x1x1x32xf32>
    %68 = vector.shape_cast %67 : vector<1x1x1x32xf32> to vector<1x32xf32>
    %69 = vector.broadcast %68 : vector<1x32xf32> to vector<50x32xf32>
    %70 = arith.addf %66, %69 : vector<50x32xf32>
    %c0_45 = arith.constant 0 : index
    %c0_46 = arith.constant 0 : index
    %c0_47 = arith.constant 0 : index
    %c0_48 = arith.constant 0 : index
    %71 = vector.load %arg10[%c0_45, %c0_46, %c0_47, %c0_48] : memref<2x2x64x32xf32, #tpu.memory_space<vmem>>, vector<1x1x64x32xf32>
    %72 = vector.shape_cast %71 : vector<1x1x64x32xf32> to vector<64x32xf32>
    %cst_49 = arith.constant dense<0.000000e+00> : vector<50x32xf32>
    %73 = tpu.matmul %55, %72, %cst_49 {dimension_numbers = #tpu.dot_dimension_numbers<[1], [0], [0], [1], [0, 0, 1, 1], [], []>} : vector<50x64xf32>, vector<64x32xf32>, vector<50x32xf32> -> vector<50x32xf32>
    %c0_50 = arith.constant 0 : index
    %c0_51 = arith.constant 0 : index
    %c0_52 = arith.constant 0 : index
    %c0_53 = arith.constant 0 : index
    %74 = vector.load %arg13[%c0_50, %c0_51, %c0_52, %c0_53] : memref<2x2x1x32xf32, #tpu.memory_space<vmem>>, vector<1x1x1x32xf32>
    %75 = vector.shape_cast %74 : vector<1x1x1x32xf32> to vector<1x32xf32>
    %76 = vector.broadcast %75 : vector<1x32xf32> to vector<50x32xf32>
    %77 = arith.addf %73, %76 : vector<50x32xf32>
    %78 = tpu.transpose %70, [1, 0] : vector<50x32xf32> -> vector<32x50xf32>
    %cst_54 = arith.constant dense<0.000000e+00> : vector<50x50xf32>
    %79 = tpu.matmul %63, %78, %cst_54 {dimension_numbers = #tpu.dot_dimension_numbers<[1], [0], [0], [1], [0, 0, 1, 1], [], []>} : vector<50x32xf32>, vector<32x50xf32>, vector<50x50xf32> -> vector<50x50xf32>
    %cst_55 = arith.constant 0.176776692 : f32
    %80 = vector.broadcast %cst_55 : f32 to vector<50x50xf32>
    %81 = arith.mulf %79, %80 : vector<50x50xf32>
    %cst_56 = arith.constant dense<0xFF800000> : vector<50xf32>
    %82 = vector.multi_reduction <maximumf>, %81, %cst_56 [1] : vector<50x50xf32> to vector<50xf32>
    %83 = vector.shape_cast %82 : vector<50xf32> to vector<50x1xf32>
    %84 = vector.broadcast %83 : vector<50x1xf32> to vector<50x50xf32>
    %85 = arith.subf %81, %84 : vector<50x50xf32>
    %86 = math.exp %85 : vector<50x50xf32>
    %cst_57 = arith.constant dense<0.000000e+00> : vector<50xf32>
    %87 = vector.multi_reduction <add>, %86, %cst_57 [1] : vector<50x50xf32> to vector<50xf32>
    %88 = vector.shape_cast %87 : vector<50xf32> to vector<50x1xf32>
    %89 = tpu.reciprocal %88 {approx = true} : vector<50x1xf32> -> vector<50x1xf32>
    %90 = vector.broadcast %89 : vector<50x1xf32> to vector<50x50xf32>
    %91 = arith.mulf %86, %90 : vector<50x50xf32>
    %cst_58 = arith.constant dense<0.000000e+00> : vector<50x32xf32>
    %92 = tpu.matmul %91, %77, %cst_58 {dimension_numbers = #tpu.dot_dimension_numbers<[1], [0], [0], [1], [0, 0, 1, 1], [], []>} : vector<50x50xf32>, vector<50x32xf32>, vector<50x32xf32> -> vector<50x32xf32>
    %c0_59 = arith.constant 0 : index
    %c0_60 = arith.constant 0 : index
    %c0_61 = arith.constant 0 : index
    %c0_62 = arith.constant 0 : index
    %93 = vector.load %arg14[%c0_59, %c0_60, %c0_61, %c0_62] : memref<2x2x32x64xf32, #tpu.memory_space<vmem>>, vector<1x1x32x64xf32>
    %94 = vector.shape_cast %93 : vector<1x1x32x64xf32> to vector<32x64xf32>
    %cst_63 = arith.constant dense<0.000000e+00> : vector<50x64xf32>
    %95 = tpu.matmul %92, %94, %cst_63 {dimension_numbers = #tpu.dot_dimension_numbers<[1], [0], [0], [1], [0, 0, 1, 1], [], []>} : vector<50x32xf32>, vector<32x64xf32>, vector<50x64xf32> -> vector<50x64xf32>
    %96 = arith.addf %56, %95 : vector<50x64xf32>
    %c0_64 = arith.constant 0 : index
    %c1 = arith.constant 1 : index
    %c0_65 = arith.constant 0 : index
    %c0_66 = arith.constant 0 : index
    %97 = vector.load %arg8[%c0_64, %c1, %c0_65, %c0_66] : memref<2x2x64x32xf32, #tpu.memory_space<vmem>>, vector<1x1x64x32xf32>
    %98 = vector.shape_cast %97 : vector<1x1x64x32xf32> to vector<64x32xf32>
    %cst_67 = arith.constant dense<0.000000e+00> : vector<50x32xf32>
    %99 = tpu.matmul %55, %98, %cst_67 {dimension_numbers = #tpu.dot_dimension_numbers<[1], [0], [0], [1], [0, 0, 1, 1], [], []>} : vector<50x64xf32>, vector<64x32xf32>, vector<50x32xf32> -> vector<50x32xf32>
    %c0_68 = arith.constant 0 : index
    %c1_69 = arith.constant 1 : index
    %c0_70 = arith.constant 0 : index
    %c0_71 = arith.constant 0 : index
    %100 = vector.load %arg11[%c0_68, %c1_69, %c0_70, %c0_71] : memref<2x2x1x32xf32, #tpu.memory_space<vmem>>, vector<1x1x1x32xf32>
    %101 = vector.shape_cast %100 : vector<1x1x1x32xf32> to vector<1x32xf32>
    %102 = vector.broadcast %101 : vector<1x32xf32> to vector<50x32xf32>
    %103 = arith.addf %99, %102 : vector<50x32xf32>
    %c0_72 = arith.constant 0 : index
    %c1_73 = arith.constant 1 : index
    %c0_74 = arith.constant 0 : index
    %c0_75 = arith.constant 0 : index
    %104 = vector.load %arg9[%c0_72, %c1_73, %c0_74, %c0_75] : memref<2x2x64x32xf32, #tpu.memory_space<vmem>>, vector<1x1x64x32xf32>
    %105 = vector.shape_cast %104 : vector<1x1x64x32xf32> to vector<64x32xf32>
    %cst_76 = arith.constant dense<0.000000e+00> : vector<50x32xf32>
    %106 = tpu.matmul %55, %105, %cst_76 {dimension_numbers = #tpu.dot_dimension_numbers<[1], [0], [0], [1], [0, 0, 1, 1], [], []>} : vector<50x64xf32>, vector<64x32xf32>, vector<50x32xf32> -> vector<50x32xf32>
    %c0_77 = arith.constant 0 : index
    %c1_78 = arith.constant 1 : index
    %c0_79 = arith.constant 0 : index
    %c0_80 = arith.constant 0 : index
    %107 = vector.load %arg12[%c0_77, %c1_78, %c0_79, %c0_80] : memref<2x2x1x32xf32, #tpu.memory_space<vmem>>, vector<1x1x1x32xf32>
    %108 = vector.shape_cast %107 : vector<1x1x1x32xf32> to vector<1x32xf32>
    %109 = vector.broadcast %108 : vector<1x32xf32> to vector<50x32xf32>
    %110 = arith.addf %106, %109 : vector<50x32xf32>
    %c0_81 = arith.constant 0 : index
    %c1_82 = arith.constant 1 : index
    %c0_83 = arith.constant 0 : index
    %c0_84 = arith.constant 0 : index
    %111 = vector.load %arg10[%c0_81, %c1_82, %c0_83, %c0_84] : memref<2x2x64x32xf32, #tpu.memory_space<vmem>>, vector<1x1x64x32xf32>
    %112 = vector.shape_cast %111 : vector<1x1x64x32xf32> to vector<64x32xf32>
    %cst_85 = arith.constant dense<0.000000e+00> : vector<50x32xf32>
    %113 = tpu.matmul %55, %112, %cst_85 {dimension_numbers = #tpu.dot_dimension_numbers<[1], [0], [0], [1], [0, 0, 1, 1], [], []>} : vector<50x64xf32>, vector<64x32xf32>, vector<50x32xf32> -> vector<50x32xf32>
    %c0_86 = arith.constant 0 : index
    %c1_87 = arith.constant 1 : index
    %c0_88 = arith.constant 0 : index
    %c0_89 = arith.constant 0 : index
    %114 = vector.load %arg13[%c0_86, %c1_87, %c0_88, %c0_89] : memref<2x2x1x32xf32, #tpu.memory_space<vmem>>, vector<1x1x1x32xf32>
    %115 = vector.shape_cast %114 : vector<1x1x1x32xf32> to vector<1x32xf32>
    %116 = vector.broadcast %115 : vector<1x32xf32> to vector<50x32xf32>
    %117 = arith.addf %113, %116 : vector<50x32xf32>
    %118 = tpu.transpose %110, [1, 0] : vector<50x32xf32> -> vector<32x50xf32>
    %cst_90 = arith.constant dense<0.000000e+00> : vector<50x50xf32>
    %119 = tpu.matmul %103, %118, %cst_90 {dimension_numbers = #tpu.dot_dimension_numbers<[1], [0], [0], [1], [0, 0, 1, 1], [], []>} : vector<50x32xf32>, vector<32x50xf32>, vector<50x50xf32> -> vector<50x50xf32>
    %cst_91 = arith.constant 0.176776692 : f32
    %120 = vector.broadcast %cst_91 : f32 to vector<50x50xf32>
    %121 = arith.mulf %119, %120 : vector<50x50xf32>
    %cst_92 = arith.constant dense<0xFF800000> : vector<50xf32>
    %122 = vector.multi_reduction <maximumf>, %121, %cst_92 [1] : vector<50x50xf32> to vector<50xf32>
    %123 = vector.shape_cast %122 : vector<50xf32> to vector<50x1xf32>
    %124 = vector.broadcast %123 : vector<50x1xf32> to vector<50x50xf32>
    %125 = arith.subf %121, %124 : vector<50x50xf32>
    %126 = math.exp %125 : vector<50x50xf32>
    %cst_93 = arith.constant dense<0.000000e+00> : vector<50xf32>
    %127 = vector.multi_reduction <add>, %126, %cst_93 [1] : vector<50x50xf32> to vector<50xf32>
    %128 = vector.shape_cast %127 : vector<50xf32> to vector<50x1xf32>
    %129 = tpu.reciprocal %128 {approx = true} : vector<50x1xf32> -> vector<50x1xf32>
    %130 = vector.broadcast %129 : vector<50x1xf32> to vector<50x50xf32>
    %131 = arith.mulf %126, %130 : vector<50x50xf32>
    %cst_94 = arith.constant dense<0.000000e+00> : vector<50x32xf32>
    %132 = tpu.matmul %131, %117, %cst_94 {dimension_numbers = #tpu.dot_dimension_numbers<[1], [0], [0], [1], [0, 0, 1, 1], [], []>} : vector<50x50xf32>, vector<50x32xf32>, vector<50x32xf32> -> vector<50x32xf32>
    %c0_95 = arith.constant 0 : index
    %c1_96 = arith.constant 1 : index
    %c0_97 = arith.constant 0 : index
    %c0_98 = arith.constant 0 : index
    %133 = vector.load %arg14[%c0_95, %c1_96, %c0_97, %c0_98] : memref<2x2x32x64xf32, #tpu.memory_space<vmem>>, vector<1x1x32x64xf32>
    %134 = vector.shape_cast %133 : vector<1x1x32x64xf32> to vector<32x64xf32>
    %cst_99 = arith.constant dense<0.000000e+00> : vector<50x64xf32>
    %135 = tpu.matmul %132, %134, %cst_99 {dimension_numbers = #tpu.dot_dimension_numbers<[1], [0], [0], [1], [0, 0, 1, 1], [], []>} : vector<50x32xf32>, vector<32x64xf32>, vector<50x64xf32> -> vector<50x64xf32>
    %136 = arith.addf %96, %135 : vector<50x64xf32>
    %137 = arith.addf %29, %136 : vector<50x64xf32>
    %c0_100 = arith.constant 0 : index
    %c0_101 = arith.constant 0 : index
    %c0_102 = arith.constant 0 : index
    %138 = vector.load %arg15[%c0_100, %c0_101, %c0_102] : memref<2x1x64xf32, #tpu.memory_space<vmem>>, vector<1x1x64xf32>
    %139 = vector.shape_cast %138 : vector<1x1x64xf32> to vector<1x64xf32>
    %140 = vector.broadcast %139 : vector<1x64xf32> to vector<50x64xf32>
    %141 = arith.addf %137, %140 : vector<50x64xf32>
    %c0_103 = arith.constant 0 : index
    %c0_104 = arith.constant 0 : index
    %c0_105 = arith.constant 0 : index
    %142 = vector.load %arg16[%c0_103, %c0_104, %c0_105] : memref<2x1x64xf32, #tpu.memory_space<vmem>>, vector<1x1x64xf32>
    %143 = vector.shape_cast %142 : vector<1x1x64xf32> to vector<1x64xf32>
    %c0_106 = arith.constant 0 : index
    %c0_107 = arith.constant 0 : index
    %c0_108 = arith.constant 0 : index
    %144 = vector.load %arg17[%c0_106, %c0_107, %c0_108] : memref<2x1x64xf32, #tpu.memory_space<vmem>>, vector<1x1x64xf32>
    %145 = vector.shape_cast %144 : vector<1x1x64xf32> to vector<1x64xf32>
    %cst_109 = arith.constant dense<0.000000e+00> : vector<50xf32>
    %146 = vector.multi_reduction <add>, %141, %cst_109 [1] : vector<50x64xf32> to vector<50xf32>
    %147 = vector.shape_cast %146 : vector<50xf32> to vector<50x1xf32>
    %cst_110 = arith.constant 6.400000e+01 : f32
    %148 = vector.broadcast %cst_110 : f32 to vector<50x1xf32>
    %149 = arith.divf %147, %148 : vector<50x1xf32>
    %150 = vector.broadcast %149 : vector<50x1xf32> to vector<50x64xf32>
    %151 = arith.subf %141, %150 : vector<50x64xf32>
    %152 = arith.mulf %151, %151 : vector<50x64xf32>
    %cst_111 = arith.constant dense<0.000000e+00> : vector<50xf32>
    %153 = vector.multi_reduction <add>, %152, %cst_111 [1] : vector<50x64xf32> to vector<50xf32>
    %154 = vector.shape_cast %153 : vector<50xf32> to vector<50x1xf32>
    %cst_112 = arith.constant 6.400000e+01 : f32
    %155 = vector.broadcast %cst_112 : f32 to vector<50x1xf32>
    %156 = arith.divf %154, %155 : vector<50x1xf32>
    %157 = vector.broadcast %149 : vector<50x1xf32> to vector<50x64xf32>
    %158 = arith.subf %141, %157 : vector<50x64xf32>
    %cst_113 = arith.constant 9.99999974E-6 : f32
    %159 = vector.broadcast %cst_113 : f32 to vector<50x1xf32>
    %160 = arith.addf %156, %159 : vector<50x1xf32>
    %161 = math.rsqrt %160 : vector<50x1xf32>
    %162 = vector.broadcast %161 : vector<50x1xf32> to vector<50x64xf32>
    %163 = arith.mulf %158, %162 : vector<50x64xf32>
    %164 = vector.broadcast %143 : vector<1x64xf32> to vector<50x64xf32>
    %165 = arith.mulf %163, %164 : vector<50x64xf32>
    %166 = vector.broadcast %145 : vector<1x64xf32> to vector<50x64xf32>
    %167 = arith.addf %165, %166 : vector<50x64xf32>
    %c0_114 = arith.constant 0 : index
    %c0_115 = arith.constant 0 : index
    %c0_116 = arith.constant 0 : index
    %168 = vector.load %arg18[%c0_114, %c0_115, %c0_116] : memref<2x64x256xf32, #tpu.memory_space<vmem>>, vector<1x64x256xf32>
    %169 = vector.shape_cast %168 : vector<1x64x256xf32> to vector<64x256xf32>
    %cst_117 = arith.constant dense<0.000000e+00> : vector<50x256xf32>
    %170 = tpu.matmul %167, %169, %cst_117 {dimension_numbers = #tpu.dot_dimension_numbers<[1], [0], [0], [1], [0, 0, 1, 1], [], []>} : vector<50x64xf32>, vector<64x256xf32>, vector<50x256xf32> -> vector<50x256xf32>
    %c0_118 = arith.constant 0 : index
    %c0_119 = arith.constant 0 : index
    %c0_120 = arith.constant 0 : index
    %171 = vector.load %arg19[%c0_118, %c0_119, %c0_120] : memref<2x1x256xf32, #tpu.memory_space<vmem>>, vector<1x1x256xf32>
    %172 = vector.shape_cast %171 : vector<1x1x256xf32> to vector<1x256xf32>
    %173 = vector.broadcast %172 : vector<1x256xf32> to vector<50x256xf32>
    %174 = arith.addf %170, %173 : vector<50x256xf32>
    %cst_121 = arith.constant 1.702000e+00 : f32
    %175 = vector.broadcast %cst_121 : f32 to vector<50x256xf32>
    %176 = arith.mulf %175, %174 : vector<50x256xf32>
    %177 = arith.negf %176 : vector<50x256xf32>
    %178 = math.exp %177 : vector<50x256xf32>
    %cst_122 = arith.constant 1.000000e+00 : f32
    %179 = vector.broadcast %cst_122 : f32 to vector<50x256xf32>
    %180 = arith.addf %179, %178 : vector<50x256xf32>
    %181 = arith.divf %179, %180 : vector<50x256xf32>
    %182 = arith.mulf %174, %181 : vector<50x256xf32>
    %c0_123 = arith.constant 0 : index
    %c0_124 = arith.constant 0 : index
    %c0_125 = arith.constant 0 : index
    %183 = vector.load %arg20[%c0_123, %c0_124, %c0_125] : memref<2x256x64xf32, #tpu.memory_space<vmem>>, vector<1x256x64xf32>
    %184 = vector.shape_cast %183 : vector<1x256x64xf32> to vector<256x64xf32>
    %cst_126 = arith.constant dense<0.000000e+00> : vector<50x64xf32>
    %185 = tpu.matmul %182, %184, %cst_126 {dimension_numbers = #tpu.dot_dimension_numbers<[1], [0], [0], [1], [0, 0, 1, 1], [], []>} : vector<50x256xf32>, vector<256x64xf32>, vector<50x64xf32> -> vector<50x64xf32>
    %c0_127 = arith.constant 0 : index
    %c0_128 = arith.constant 0 : index
    %c0_129 = arith.constant 0 : index
    %186 = vector.load %arg21[%c0_127, %c0_128, %c0_129] : memref<2x1x64xf32, #tpu.memory_space<vmem>>, vector<1x1x64xf32>
    %187 = vector.shape_cast %186 : vector<1x1x64xf32> to vector<1x64xf32>
    %188 = vector.broadcast %187 : vector<1x64xf32> to vector<50x64xf32>
    %189 = arith.addf %185, %188 : vector<50x64xf32>
    %190 = arith.addf %141, %189 : vector<50x64xf32>
    %c1_130 = arith.constant 1 : index
    %c0_131 = arith.constant 0 : index
    %c0_132 = arith.constant 0 : index
    %191 = vector.load %arg6[%c1_130, %c0_131, %c0_132] : memref<2x1x64xf32, #tpu.memory_space<vmem>>, vector<1x1x64xf32>
    %192 = vector.shape_cast %191 : vector<1x1x64xf32> to vector<1x64xf32>
    %c1_133 = arith.constant 1 : index
    %c0_134 = arith.constant 0 : index
    %c0_135 = arith.constant 0 : index
    %193 = vector.load %arg7[%c1_133, %c0_134, %c0_135] : memref<2x1x64xf32, #tpu.memory_space<vmem>>, vector<1x1x64xf32>
    %194 = vector.shape_cast %193 : vector<1x1x64xf32> to vector<1x64xf32>
    %cst_136 = arith.constant dense<0.000000e+00> : vector<50xf32>
    %195 = vector.multi_reduction <add>, %190, %cst_136 [1] : vector<50x64xf32> to vector<50xf32>
    %196 = vector.shape_cast %195 : vector<50xf32> to vector<50x1xf32>
    %cst_137 = arith.constant 6.400000e+01 : f32
    %197 = vector.broadcast %cst_137 : f32 to vector<50x1xf32>
    %198 = arith.divf %196, %197 : vector<50x1xf32>
    %199 = vector.broadcast %198 : vector<50x1xf32> to vector<50x64xf32>
    %200 = arith.subf %190, %199 : vector<50x64xf32>
    %201 = arith.mulf %200, %200 : vector<50x64xf32>
    %cst_138 = arith.constant dense<0.000000e+00> : vector<50xf32>
    %202 = vector.multi_reduction <add>, %201, %cst_138 [1] : vector<50x64xf32> to vector<50xf32>
    %203 = vector.shape_cast %202 : vector<50xf32> to vector<50x1xf32>
    %cst_139 = arith.constant 6.400000e+01 : f32
    %204 = vector.broadcast %cst_139 : f32 to vector<50x1xf32>
    %205 = arith.divf %203, %204 : vector<50x1xf32>
    %206 = vector.broadcast %198 : vector<50x1xf32> to vector<50x64xf32>
    %207 = arith.subf %190, %206 : vector<50x64xf32>
    %cst_140 = arith.constant 9.99999974E-6 : f32
    %208 = vector.broadcast %cst_140 : f32 to vector<50x1xf32>
    %209 = arith.addf %205, %208 : vector<50x1xf32>
    %210 = math.rsqrt %209 : vector<50x1xf32>
    %211 = vector.broadcast %210 : vector<50x1xf32> to vector<50x64xf32>
    %212 = arith.mulf %207, %211 : vector<50x64xf32>
    %213 = vector.broadcast %192 : vector<1x64xf32> to vector<50x64xf32>
    %214 = arith.mulf %212, %213 : vector<50x64xf32>
    %215 = vector.broadcast %194 : vector<1x64xf32> to vector<50x64xf32>
    %216 = arith.addf %214, %215 : vector<50x64xf32>
    %cst_141 = arith.constant 0.000000e+00 : f32
    %217 = vector.broadcast %cst_141 : f32 to vector<50x64xf32>
    %c1_142 = arith.constant 1 : index
    %c0_143 = arith.constant 0 : index
    %c0_144 = arith.constant 0 : index
    %c0_145 = arith.constant 0 : index
    %218 = vector.load %arg8[%c1_142, %c0_143, %c0_144, %c0_145] : memref<2x2x64x32xf32, #tpu.memory_space<vmem>>, vector<1x1x64x32xf32>
    %219 = vector.shape_cast %218 : vector<1x1x64x32xf32> to vector<64x32xf32>
    %cst_146 = arith.constant dense<0.000000e+00> : vector<50x32xf32>
    %220 = tpu.matmul %216, %219, %cst_146 {dimension_numbers = #tpu.dot_dimension_numbers<[1], [0], [0], [1], [0, 0, 1, 1], [], []>} : vector<50x64xf32>, vector<64x32xf32>, vector<50x32xf32> -> vector<50x32xf32>
    %c1_147 = arith.constant 1 : index
    %c0_148 = arith.constant 0 : index
    %c0_149 = arith.constant 0 : index
    %c0_150 = arith.constant 0 : index
    %221 = vector.load %arg11[%c1_147, %c0_148, %c0_149, %c0_150] : memref<2x2x1x32xf32, #tpu.memory_space<vmem>>, vector<1x1x1x32xf32>
    %222 = vector.shape_cast %221 : vector<1x1x1x32xf32> to vector<1x32xf32>
    %223 = vector.broadcast %222 : vector<1x32xf32> to vector<50x32xf32>
    %224 = arith.addf %220, %223 : vector<50x32xf32>
    %c1_151 = arith.constant 1 : index
    %c0_152 = arith.constant 0 : index
    %c0_153 = arith.constant 0 : index
    %c0_154 = arith.constant 0 : index
    %225 = vector.load %arg9[%c1_151, %c0_152, %c0_153, %c0_154] : memref<2x2x64x32xf32, #tpu.memory_space<vmem>>, vector<1x1x64x32xf32>
    %226 = vector.shape_cast %225 : vector<1x1x64x32xf32> to vector<64x32xf32>
    %cst_155 = arith.constant dense<0.000000e+00> : vector<50x32xf32>
    %227 = tpu.matmul %216, %226, %cst_155 {dimension_numbers = #tpu.dot_dimension_numbers<[1], [0], [0], [1], [0, 0, 1, 1], [], []>} : vector<50x64xf32>, vector<64x32xf32>, vector<50x32xf32> -> vector<50x32xf32>
    %c1_156 = arith.constant 1 : index
    %c0_157 = arith.constant 0 : index
    %c0_158 = arith.constant 0 : index
    %c0_159 = arith.constant 0 : index
    %228 = vector.load %arg12[%c1_156, %c0_157, %c0_158, %c0_159] : memref<2x2x1x32xf32, #tpu.memory_space<vmem>>, vector<1x1x1x32xf32>
    %229 = vector.shape_cast %228 : vector<1x1x1x32xf32> to vector<1x32xf32>
    %230 = vector.broadcast %229 : vector<1x32xf32> to vector<50x32xf32>
    %231 = arith.addf %227, %230 : vector<50x32xf32>
    %c1_160 = arith.constant 1 : index
    %c0_161 = arith.constant 0 : index
    %c0_162 = arith.constant 0 : index
    %c0_163 = arith.constant 0 : index
    %232 = vector.load %arg10[%c1_160, %c0_161, %c0_162, %c0_163] : memref<2x2x64x32xf32, #tpu.memory_space<vmem>>, vector<1x1x64x32xf32>
    %233 = vector.shape_cast %232 : vector<1x1x64x32xf32> to vector<64x32xf32>
    %cst_164 = arith.constant dense<0.000000e+00> : vector<50x32xf32>
    %234 = tpu.matmul %216, %233, %cst_164 {dimension_numbers = #tpu.dot_dimension_numbers<[1], [0], [0], [1], [0, 0, 1, 1], [], []>} : vector<50x64xf32>, vector<64x32xf32>, vector<50x32xf32> -> vector<50x32xf32>
    %c1_165 = arith.constant 1 : index
    %c0_166 = arith.constant 0 : index
    %c0_167 = arith.constant 0 : index
    %c0_168 = arith.constant 0 : index
    %235 = vector.load %arg13[%c1_165, %c0_166, %c0_167, %c0_168] : memref<2x2x1x32xf32, #tpu.memory_space<vmem>>, vector<1x1x1x32xf32>
    %236 = vector.shape_cast %235 : vector<1x1x1x32xf32> to vector<1x32xf32>
    %237 = vector.broadcast %236 : vector<1x32xf32> to vector<50x32xf32>
    %238 = arith.addf %234, %237 : vector<50x32xf32>
    %239 = tpu.transpose %231, [1, 0] : vector<50x32xf32> -> vector<32x50xf32>
    %cst_169 = arith.constant dense<0.000000e+00> : vector<50x50xf32>
    %240 = tpu.matmul %224, %239, %cst_169 {dimension_numbers = #tpu.dot_dimension_numbers<[1], [0], [0], [1], [0, 0, 1, 1], [], []>} : vector<50x32xf32>, vector<32x50xf32>, vector<50x50xf32> -> vector<50x50xf32>
    %cst_170 = arith.constant 0.176776692 : f32
    %241 = vector.broadcast %cst_170 : f32 to vector<50x50xf32>
    %242 = arith.mulf %240, %241 : vector<50x50xf32>
    %cst_171 = arith.constant dense<0xFF800000> : vector<50xf32>
    %243 = vector.multi_reduction <maximumf>, %242, %cst_171 [1] : vector<50x50xf32> to vector<50xf32>
    %244 = vector.shape_cast %243 : vector<50xf32> to vector<50x1xf32>
    %245 = vector.broadcast %244 : vector<50x1xf32> to vector<50x50xf32>
    %246 = arith.subf %242, %245 : vector<50x50xf32>
    %247 = math.exp %246 : vector<50x50xf32>
    %cst_172 = arith.constant dense<0.000000e+00> : vector<50xf32>
    %248 = vector.multi_reduction <add>, %247, %cst_172 [1] : vector<50x50xf32> to vector<50xf32>
    %249 = vector.shape_cast %248 : vector<50xf32> to vector<50x1xf32>
    %250 = tpu.reciprocal %249 {approx = true} : vector<50x1xf32> -> vector<50x1xf32>
    %251 = vector.broadcast %250 : vector<50x1xf32> to vector<50x50xf32>
    %252 = arith.mulf %247, %251 : vector<50x50xf32>
    %cst_173 = arith.constant dense<0.000000e+00> : vector<50x32xf32>
    %253 = tpu.matmul %252, %238, %cst_173 {dimension_numbers = #tpu.dot_dimension_numbers<[1], [0], [0], [1], [0, 0, 1, 1], [], []>} : vector<50x50xf32>, vector<50x32xf32>, vector<50x32xf32> -> vector<50x32xf32>
    %c1_174 = arith.constant 1 : index
    %c0_175 = arith.constant 0 : index
    %c0_176 = arith.constant 0 : index
    %c0_177 = arith.constant 0 : index
    %254 = vector.load %arg14[%c1_174, %c0_175, %c0_176, %c0_177] : memref<2x2x32x64xf32, #tpu.memory_space<vmem>>, vector<1x1x32x64xf32>
    %255 = vector.shape_cast %254 : vector<1x1x32x64xf32> to vector<32x64xf32>
    %cst_178 = arith.constant dense<0.000000e+00> : vector<50x64xf32>
    %256 = tpu.matmul %253, %255, %cst_178 {dimension_numbers = #tpu.dot_dimension_numbers<[1], [0], [0], [1], [0, 0, 1, 1], [], []>} : vector<50x32xf32>, vector<32x64xf32>, vector<50x64xf32> -> vector<50x64xf32>
    %257 = arith.addf %217, %256 : vector<50x64xf32>
    %c1_179 = arith.constant 1 : index
    %c1_180 = arith.constant 1 : index
    %c0_181 = arith.constant 0 : index
    %c0_182 = arith.constant 0 : index
    %258 = vector.load %arg8[%c1_179, %c1_180, %c0_181, %c0_182] : memref<2x2x64x32xf32, #tpu.memory_space<vmem>>, vector<1x1x64x32xf32>
    %259 = vector.shape_cast %258 : vector<1x1x64x32xf32> to vector<64x32xf32>
    %cst_183 = arith.constant dense<0.000000e+00> : vector<50x32xf32>
    %260 = tpu.matmul %216, %259, %cst_183 {dimension_numbers = #tpu.dot_dimension_numbers<[1], [0], [0], [1], [0, 0, 1, 1], [], []>} : vector<50x64xf32>, vector<64x32xf32>, vector<50x32xf32> -> vector<50x32xf32>
    %c1_184 = arith.constant 1 : index
    %c1_185 = arith.constant 1 : index
    %c0_186 = arith.constant 0 : index
    %c0_187 = arith.constant 0 : index
    %261 = vector.load %arg11[%c1_184, %c1_185, %c0_186, %c0_187] : memref<2x2x1x32xf32, #tpu.memory_space<vmem>>, vector<1x1x1x32xf32>
    %262 = vector.shape_cast %261 : vector<1x1x1x32xf32> to vector<1x32xf32>
    %263 = vector.broadcast %262 : vector<1x32xf32> to vector<50x32xf32>
    %264 = arith.addf %260, %263 : vector<50x32xf32>
    %c1_188 = arith.constant 1 : index
    %c1_189 = arith.constant 1 : index
    %c0_190 = arith.constant 0 : index
    %c0_191 = arith.constant 0 : index
    %265 = vector.load %arg9[%c1_188, %c1_189, %c0_190, %c0_191] : memref<2x2x64x32xf32, #tpu.memory_space<vmem>>, vector<1x1x64x32xf32>
    %266 = vector.shape_cast %265 : vector<1x1x64x32xf32> to vector<64x32xf32>
    %cst_192 = arith.constant dense<0.000000e+00> : vector<50x32xf32>
    %267 = tpu.matmul %216, %266, %cst_192 {dimension_numbers = #tpu.dot_dimension_numbers<[1], [0], [0], [1], [0, 0, 1, 1], [], []>} : vector<50x64xf32>, vector<64x32xf32>, vector<50x32xf32> -> vector<50x32xf32>
    %c1_193 = arith.constant 1 : index
    %c1_194 = arith.constant 1 : index
    %c0_195 = arith.constant 0 : index
    %c0_196 = arith.constant 0 : index
    %268 = vector.load %arg12[%c1_193, %c1_194, %c0_195, %c0_196] : memref<2x2x1x32xf32, #tpu.memory_space<vmem>>, vector<1x1x1x32xf32>
    %269 = vector.shape_cast %268 : vector<1x1x1x32xf32> to vector<1x32xf32>
    %270 = vector.broadcast %269 : vector<1x32xf32> to vector<50x32xf32>
    %271 = arith.addf %267, %270 : vector<50x32xf32>
    %c1_197 = arith.constant 1 : index
    %c1_198 = arith.constant 1 : index
    %c0_199 = arith.constant 0 : index
    %c0_200 = arith.constant 0 : index
    %272 = vector.load %arg10[%c1_197, %c1_198, %c0_199, %c0_200] : memref<2x2x64x32xf32, #tpu.memory_space<vmem>>, vector<1x1x64x32xf32>
    %273 = vector.shape_cast %272 : vector<1x1x64x32xf32> to vector<64x32xf32>
    %cst_201 = arith.constant dense<0.000000e+00> : vector<50x32xf32>
    %274 = tpu.matmul %216, %273, %cst_201 {dimension_numbers = #tpu.dot_dimension_numbers<[1], [0], [0], [1], [0, 0, 1, 1], [], []>} : vector<50x64xf32>, vector<64x32xf32>, vector<50x32xf32> -> vector<50x32xf32>
    %c1_202 = arith.constant 1 : index
    %c1_203 = arith.constant 1 : index
    %c0_204 = arith.constant 0 : index
    %c0_205 = arith.constant 0 : index
    %275 = vector.load %arg13[%c1_202, %c1_203, %c0_204, %c0_205] : memref<2x2x1x32xf32, #tpu.memory_space<vmem>>, vector<1x1x1x32xf32>
    %276 = vector.shape_cast %275 : vector<1x1x1x32xf32> to vector<1x32xf32>
    %277 = vector.broadcast %276 : vector<1x32xf32> to vector<50x32xf32>
    %278 = arith.addf %274, %277 : vector<50x32xf32>
    %279 = tpu.transpose %271, [1, 0] : vector<50x32xf32> -> vector<32x50xf32>
    %cst_206 = arith.constant dense<0.000000e+00> : vector<50x50xf32>
    %280 = tpu.matmul %264, %279, %cst_206 {dimension_numbers = #tpu.dot_dimension_numbers<[1], [0], [0], [1], [0, 0, 1, 1], [], []>} : vector<50x32xf32>, vector<32x50xf32>, vector<50x50xf32> -> vector<50x50xf32>
    %cst_207 = arith.constant 0.176776692 : f32
    %281 = vector.broadcast %cst_207 : f32 to vector<50x50xf32>
    %282 = arith.mulf %280, %281 : vector<50x50xf32>
    %cst_208 = arith.constant dense<0xFF800000> : vector<50xf32>
    %283 = vector.multi_reduction <maximumf>, %282, %cst_208 [1] : vector<50x50xf32> to vector<50xf32>
    %284 = vector.shape_cast %283 : vector<50xf32> to vector<50x1xf32>
    %285 = vector.broadcast %284 : vector<50x1xf32> to vector<50x50xf32>
    %286 = arith.subf %282, %285 : vector<50x50xf32>
    %287 = math.exp %286 : vector<50x50xf32>
    %cst_209 = arith.constant dense<0.000000e+00> : vector<50xf32>
    %288 = vector.multi_reduction <add>, %287, %cst_209 [1] : vector<50x50xf32> to vector<50xf32>
    %289 = vector.shape_cast %288 : vector<50xf32> to vector<50x1xf32>
    %290 = tpu.reciprocal %289 {approx = true} : vector<50x1xf32> -> vector<50x1xf32>
    %291 = vector.broadcast %290 : vector<50x1xf32> to vector<50x50xf32>
    %292 = arith.mulf %287, %291 : vector<50x50xf32>
    %cst_210 = arith.constant dense<0.000000e+00> : vector<50x32xf32>
    %293 = tpu.matmul %292, %278, %cst_210 {dimension_numbers = #tpu.dot_dimension_numbers<[1], [0], [0], [1], [0, 0, 1, 1], [], []>} : vector<50x50xf32>, vector<50x32xf32>, vector<50x32xf32> -> vector<50x32xf32>
    %c1_211 = arith.constant 1 : index
    %c1_212 = arith.constant 1 : index
    %c0_213 = arith.constant 0 : index
    %c0_214 = arith.constant 0 : index
    %294 = vector.load %arg14[%c1_211, %c1_212, %c0_213, %c0_214] : memref<2x2x32x64xf32, #tpu.memory_space<vmem>>, vector<1x1x32x64xf32>
    %295 = vector.shape_cast %294 : vector<1x1x32x64xf32> to vector<32x64xf32>
    %cst_215 = arith.constant dense<0.000000e+00> : vector<50x64xf32>
    %296 = tpu.matmul %293, %295, %cst_215 {dimension_numbers = #tpu.dot_dimension_numbers<[1], [0], [0], [1], [0, 0, 1, 1], [], []>} : vector<50x32xf32>, vector<32x64xf32>, vector<50x64xf32> -> vector<50x64xf32>
    %297 = arith.addf %257, %296 : vector<50x64xf32>
    %298 = arith.addf %190, %297 : vector<50x64xf32>
    %c1_216 = arith.constant 1 : index
    %c0_217 = arith.constant 0 : index
    %c0_218 = arith.constant 0 : index
    %299 = vector.load %arg15[%c1_216, %c0_217, %c0_218] : memref<2x1x64xf32, #tpu.memory_space<vmem>>, vector<1x1x64xf32>
    %300 = vector.shape_cast %299 : vector<1x1x64xf32> to vector<1x64xf32>
    %301 = vector.broadcast %300 : vector<1x64xf32> to vector<50x64xf32>
    %302 = arith.addf %298, %301 : vector<50x64xf32>
    %c1_219 = arith.constant 1 : index
    %c0_220 = arith.constant 0 : index
    %c0_221 = arith.constant 0 : index
    %303 = vector.load %arg16[%c1_219, %c0_220, %c0_221] : memref<2x1x64xf32, #tpu.memory_space<vmem>>, vector<1x1x64xf32>
    %304 = vector.shape_cast %303 : vector<1x1x64xf32> to vector<1x64xf32>
    %c1_222 = arith.constant 1 : index
    %c0_223 = arith.constant 0 : index
    %c0_224 = arith.constant 0 : index
    %305 = vector.load %arg17[%c1_222, %c0_223, %c0_224] : memref<2x1x64xf32, #tpu.memory_space<vmem>>, vector<1x1x64xf32>
    %306 = vector.shape_cast %305 : vector<1x1x64xf32> to vector<1x64xf32>
    %cst_225 = arith.constant dense<0.000000e+00> : vector<50xf32>
    %307 = vector.multi_reduction <add>, %302, %cst_225 [1] : vector<50x64xf32> to vector<50xf32>
    %308 = vector.shape_cast %307 : vector<50xf32> to vector<50x1xf32>
    %cst_226 = arith.constant 6.400000e+01 : f32
    %309 = vector.broadcast %cst_226 : f32 to vector<50x1xf32>
    %310 = arith.divf %308, %309 : vector<50x1xf32>
    %311 = vector.broadcast %310 : vector<50x1xf32> to vector<50x64xf32>
    %312 = arith.subf %302, %311 : vector<50x64xf32>
    %313 = arith.mulf %312, %312 : vector<50x64xf32>
    %cst_227 = arith.constant dense<0.000000e+00> : vector<50xf32>
    %314 = vector.multi_reduction <add>, %313, %cst_227 [1] : vector<50x64xf32> to vector<50xf32>
    %315 = vector.shape_cast %314 : vector<50xf32> to vector<50x1xf32>
    %cst_228 = arith.constant 6.400000e+01 : f32
    %316 = vector.broadcast %cst_228 : f32 to vector<50x1xf32>
    %317 = arith.divf %315, %316 : vector<50x1xf32>
    %318 = vector.broadcast %310 : vector<50x1xf32> to vector<50x64xf32>
    %319 = arith.subf %302, %318 : vector<50x64xf32>
    %cst_229 = arith.constant 9.99999974E-6 : f32
    %320 = vector.broadcast %cst_229 : f32 to vector<50x1xf32>
    %321 = arith.addf %317, %320 : vector<50x1xf32>
    %322 = math.rsqrt %321 : vector<50x1xf32>
    %323 = vector.broadcast %322 : vector<50x1xf32> to vector<50x64xf32>
    %324 = arith.mulf %319, %323 : vector<50x64xf32>
    %325 = vector.broadcast %304 : vector<1x64xf32> to vector<50x64xf32>
    %326 = arith.mulf %324, %325 : vector<50x64xf32>
    %327 = vector.broadcast %306 : vector<1x64xf32> to vector<50x64xf32>
    %328 = arith.addf %326, %327 : vector<50x64xf32>
    %c1_230 = arith.constant 1 : index
    %c0_231 = arith.constant 0 : index
    %c0_232 = arith.constant 0 : index
    %329 = vector.load %arg18[%c1_230, %c0_231, %c0_232] : memref<2x64x256xf32, #tpu.memory_space<vmem>>, vector<1x64x256xf32>
    %330 = vector.shape_cast %329 : vector<1x64x256xf32> to vector<64x256xf32>
    %cst_233 = arith.constant dense<0.000000e+00> : vector<50x256xf32>
    %331 = tpu.matmul %328, %330, %cst_233 {dimension_numbers = #tpu.dot_dimension_numbers<[1], [0], [0], [1], [0, 0, 1, 1], [], []>} : vector<50x64xf32>, vector<64x256xf32>, vector<50x256xf32> -> vector<50x256xf32>
    %c1_234 = arith.constant 1 : index
    %c0_235 = arith.constant 0 : index
    %c0_236 = arith.constant 0 : index
    %332 = vector.load %arg19[%c1_234, %c0_235, %c0_236] : memref<2x1x256xf32, #tpu.memory_space<vmem>>, vector<1x1x256xf32>
    %333 = vector.shape_cast %332 : vector<1x1x256xf32> to vector<1x256xf32>
    %334 = vector.broadcast %333 : vector<1x256xf32> to vector<50x256xf32>
    %335 = arith.addf %331, %334 : vector<50x256xf32>
    %cst_237 = arith.constant 1.702000e+00 : f32
    %336 = vector.broadcast %cst_237 : f32 to vector<50x256xf32>
    %337 = arith.mulf %336, %335 : vector<50x256xf32>
    %338 = arith.negf %337 : vector<50x256xf32>
    %339 = math.exp %338 : vector<50x256xf32>
    %cst_238 = arith.constant 1.000000e+00 : f32
    %340 = vector.broadcast %cst_238 : f32 to vector<50x256xf32>
    %341 = arith.addf %340, %339 : vector<50x256xf32>
    %342 = arith.divf %340, %341 : vector<50x256xf32>
    %343 = arith.mulf %335, %342 : vector<50x256xf32>
    %c1_239 = arith.constant 1 : index
    %c0_240 = arith.constant 0 : index
    %c0_241 = arith.constant 0 : index
    %344 = vector.load %arg20[%c1_239, %c0_240, %c0_241] : memref<2x256x64xf32, #tpu.memory_space<vmem>>, vector<1x256x64xf32>
    %345 = vector.shape_cast %344 : vector<1x256x64xf32> to vector<256x64xf32>
    %cst_242 = arith.constant dense<0.000000e+00> : vector<50x64xf32>
    %346 = tpu.matmul %343, %345, %cst_242 {dimension_numbers = #tpu.dot_dimension_numbers<[1], [0], [0], [1], [0, 0, 1, 1], [], []>} : vector<50x256xf32>, vector<256x64xf32>, vector<50x64xf32> -> vector<50x64xf32>
    %c1_243 = arith.constant 1 : index
    %c0_244 = arith.constant 0 : index
    %c0_245 = arith.constant 0 : index
    %347 = vector.load %arg21[%c1_243, %c0_244, %c0_245] : memref<2x1x64xf32, #tpu.memory_space<vmem>>, vector<1x1x64xf32>
    %348 = vector.shape_cast %347 : vector<1x1x64xf32> to vector<1x64xf32>
    %349 = vector.broadcast %348 : vector<1x64xf32> to vector<50x64xf32>
    %350 = arith.addf %346, %349 : vector<50x64xf32>
    %351 = arith.addf %302, %350 : vector<50x64xf32>
    %c0_246 = arith.constant 0 : index
    %c0_247 = arith.constant 0 : index
    %c0_248 = arith.constant 0 : index
    %352 = vector.load %arg22[%c0_246, %c0_247, %c0_248] : memref<1x50x64xf32, #tpu.memory_space<vmem>>, vector<1x50x64xf32>
    %353 = vector.shape_cast %352 : vector<1x50x64xf32> to vector<50x64xf32>
    %354 = vector.shape_cast %351 : vector<50x64xf32> to vector<1x50x64xf32>
    tpu.vector_store %arg22[%c0_246, %c0_247, %c0_248], %354 {strides = array<i32>} : memref<1x50x64xf32, #tpu.memory_space<vmem>>, vector<1x50x64xf32>,
    return
  }
  func.func @transform_0(%arg0: i32) -> (i32, i32, i32) {
    %c0_i32 = arith.constant 0 : i32
    %c0_i32_0 = arith.constant 0 : i32
    %c0_i32_1 = arith.constant 0 : i32
    return %arg0, %c0_i32, %c0_i32_0 : i32, i32, i32
  }
  func.func @transform_1(%arg0: i32) -> (i32, i32) {
    %c0_i32 = arith.constant 0 : i32
    %c0_i32_0 = arith.constant 0 : i32
    %c0_i32_1 = arith.constant 0 : i32
    return %c0_i32, %c0_i32_0 : i32, i32
  }
  func.func @transform_2(%arg0: i32) -> (i32, i32) {
    %c0_i32 = arith.constant 0 : i32
    %c0_i32_0 = arith.constant 0 : i32
    %c0_i32_1 = arith.constant 0 : i32
    return %c0_i32, %c0_i32_0 : i32, i32
  }
  func.func @transform_3(%arg0: i32) -> (i32, i32) {
    %c0_i32 = arith.constant 0 : i32
    %c0_i32_0 = arith.constant 0 : i32
    %c0_i32_1 = arith.constant 0 : i32
    return %c0_i32, %c0_i32_0 : i32, i32
  }
  func.func @transform_4(%arg0: i32) -> (i32, i32) {
    %c0_i32 = arith.constant 0 : i32
    %c0_i32_0 = arith.constant 0 : i32
    %c0_i32_1 = arith.constant 0 : i32
    return %c0_i32, %c0_i32_0 : i32, i32
  }
  func.func @transform_5(%arg0: i32) -> (i32, i32, i32) {
    %c0_i32 = arith.constant 0 : i32
    %c0_i32_0 = arith.constant 0 : i32
    %c0_i32_1 = arith.constant 0 : i32
    %c0_i32_2 = arith.constant 0 : i32
    return %c0_i32, %c0_i32_0, %c0_i32_1 : i32, i32, i32
  }
  func.func @transform_6(%arg0: i32) -> (i32, i32, i32) {
    %c0_i32 = arith.constant 0 : i32
    %c0_i32_0 = arith.constant 0 : i32
    %c0_i32_1 = arith.constant 0 : i32
    %c0_i32_2 = arith.constant 0 : i32
    return %c0_i32, %c0_i32_0, %c0_i32_1 : i32, i32, i32
  }
  func.func @transform_7(%arg0: i32) -> (i32, i32, i32, i32) {
    %c0_i32 = arith.constant 0 : i32
    %c0_i32_0 = arith.constant 0 : i32
    %c0_i32_1 = arith.constant 0 : i32
    %c0_i32_2 = arith.constant 0 : i32
    %c0_i32_3 = arith.constant 0 : i32
    return %c0_i32, %c0_i32_0, %c0_i32_1, %c0_i32_2 : i32, i32, i32, i32
  }
  func.func @transform_8(%arg0: i32) -> (i32, i32, i32, i32) {
    %c0_i32 = arith.constant 0 : i32
    %c0_i32_0 = arith.constant 0 : i32
    %c0_i32_1 = arith.constant 0 : i32
    %c0_i32_2 = arith.constant 0 : i32
    %c0_i32_3 = arith.constant 0 : i32
    return %c0_i32, %c0_i32_0, %c0_i32_1, %c0_i32_2 : i32, i32, i32, i32
  }
  func.func @transform_9(%arg0: i32) -> (i32, i32, i32, i32) {
    %c0_i32 = arith.constant 0 : i32
    %c0_i32_0 = arith.constant 0 : i32
    %c0_i32_1 = arith.constant 0 : i32
    %c0_i32_2 = arith.constant 0 : i32
    %c0_i32_3 = arith.constant 0 : i32
    return %c0_i32, %c0_i32_0, %c0_i32_1, %c0_i32_2 : i32, i32, i32, i32
  }
  func.func @transform_10(%arg0: i32) -> (i32, i32, i32, i32) {
    %c0_i32 = arith.constant 0 : i32
    %c0_i32_0 = arith.constant 0 : i32
    %c0_i32_1 = arith.constant 0 : i32
    %c0_i32_2 = arith.constant 0 : i32
    %c0_i32_3 = arith.constant 0 : i32
    return %c0_i32, %c0_i32_0, %c0_i32_1, %c0_i32_2 : i32, i32, i32, i32
  }
  func.func @transform_11(%arg0: i32) -> (i32, i32, i32, i32) {
    %c0_i32 = arith.constant 0 : i32
    %c0_i32_0 = arith.constant 0 : i32
    %c0_i32_1 = arith.constant 0 : i32
    %c0_i32_2 = arith.constant 0 : i32
    %c0_i32_3 = arith.constant 0 : i32
    return %c0_i32, %c0_i32_0, %c0_i32_1, %c0_i32_2 : i32, i32, i32, i32
  }
  func.func @transform_12(%arg0: i32) -> (i32, i32, i32, i32) {
    %c0_i32 = arith.constant 0 : i32
    %c0_i32_0 = arith.constant 0 : i32
    %c0_i32_1 = arith.constant 0 : i32
    %c0_i32_2 = arith.constant 0 : i32
    %c0_i32_3 = arith.constant 0 : i32
    return %c0_i32, %c0_i32_0, %c0_i32_1, %c0_i32_2 : i32, i32, i32, i32
  }
  func.func @transform_13(%arg0: i32) -> (i32, i32, i32, i32) {
    %c0_i32 = arith.constant 0 : i32
    %c0_i32_0 = arith.constant 0 : i32
    %c0_i32_1 = arith.constant 0 : i32
    %c0_i32_2 = arith.constant 0 : i32
    %c0_i32_3 = arith.constant 0 : i32
    return %c0_i32, %c0_i32_0, %c0_i32_1, %c0_i32_2 : i32, i32, i32, i32
  }
  func.func @transform_14(%arg0: i32) -> (i32, i32, i32) {
    %c0_i32 = arith.constant 0 : i32
    %c0_i32_0 = arith.constant 0 : i32
    %c0_i32_1 = arith.constant 0 : i32
    %c0_i32_2 = arith.constant 0 : i32
    return %c0_i32, %c0_i32_0, %c0_i32_1 : i32, i32, i32
  }
  func.func @transform_15(%arg0: i32) -> (i32, i32, i32) {
    %c0_i32 = arith.constant 0 : i32
    %c0_i32_0 = arith.constant 0 : i32
    %c0_i32_1 = arith.constant 0 : i32
    %c0_i32_2 = arith.constant 0 : i32
    return %c0_i32, %c0_i32_0, %c0_i32_1 : i32, i32, i32
  }
  func.func @transform_16(%arg0: i32) -> (i32, i32, i32) {
    %c0_i32 = arith.constant 0 : i32
    %c0_i32_0 = arith.constant 0 : i32
    %c0_i32_1 = arith.constant 0 : i32
    %c0_i32_2 = arith.constant 0 : i32
    return %c0_i32, %c0_i32_0, %c0_i32_1 : i32, i32, i32
  }
  func.func @transform_17(%arg0: i32) -> (i32, i32, i32) {
    %c0_i32 = arith.constant 0 : i32
    %c0_i32_0 = arith.constant 0 : i32
    %c0_i32_1 = arith.constant 0 : i32
    %c0_i32_2 = arith.constant 0 : i32
    return %c0_i32, %c0_i32_0, %c0_i32_1 : i32, i32, i32
  }
  func.func @transform_18(%arg0: i32) -> (i32, i32, i32) {
    %c0_i32 = arith.constant 0 : i32
    %c0_i32_0 = arith.constant 0 : i32
    %c0_i32_1 = arith.constant 0 : i32
    %c0_i32_2 = arith.constant 0 : i32
    return %c0_i32, %c0_i32_0, %c0_i32_1 : i32, i32, i32
  }
  func.func @transform_19(%arg0: i32) -> (i32, i32, i32) {
    %c0_i32 = arith.constant 0 : i32
    %c0_i32_0 = arith.constant 0 : i32
    %c0_i32_1 = arith.constant 0 : i32
    %c0_i32_2 = arith.constant 0 : i32
    return %c0_i32, %c0_i32_0, %c0_i32_1 : i32, i32, i32
  }
  func.func @transform_20(%arg0: i32) -> (i32, i32, i32) {
    %c0_i32 = arith.constant 0 : i32
    %c0_i32_0 = arith.constant 0 : i32
    %c0_i32_1 = arith.constant 0 : i32
    %c0_i32_2 = arith.constant 0 : i32
    return %c0_i32, %c0_i32_0, %c0_i32_1 : i32, i32, i32
  }
  func.func @transform_21(%arg0: i32) -> (i32, i32, i32) {
    %c0_i32 = arith.constant 0 : i32
    %c0_i32_0 = arith.constant 0 : i32
    %c0_i32_1 = arith.constant 0 : i32
    return %arg0, %c0_i32, %c0_i32_0 : i32, i32, i32
  }
}

module attributes {stable_mosaic.version = 11 : i64} {
  func.func @_heads_llm_kernel(%arg0: i32, %arg1: memref<1x50x64xf32, #tpu.memory_space<vmem>>, %arg2: memref<9x49x50xf32, #tpu.memory_space<vmem>>, %arg3: memref<9x64x32xf32, #tpu.memory_space<vmem>>, %arg4: memref<1x32xf32, #tpu.memory_space<vmem>>, %arg5: memref<32x16xf32, #tpu.memory_space<vmem>>, %arg6: memref<1x16xf32, #tpu.memory_space<vmem>>, %arg7: memref<9x196x50xf32, #tpu.memory_space<vmem>>, %arg8: memref<9x64x16xf32, #tpu.memory_space<vmem>>, %arg9: memref<1x16xf32, #tpu.memory_space<vmem>>, %arg10: memref<16x12xf32, #tpu.memory_space<vmem>>, %arg11: memref<1x12xf32, #tpu.memory_space<vmem>>, %arg12: memref<16x12xf32, #tpu.memory_space<vmem>>, %arg13: memref<1x12xf32, #tpu.memory_space<vmem>>, %arg14: memref<12x12xf32, #tpu.memory_space<vmem>>, %arg15: memref<12x12xf32, #tpu.memory_space<vmem>>, %arg16: memref<1x12xf32, #tpu.memory_space<vmem>>, %arg17: memref<12x32xf32, #tpu.memory_space<vmem>>, %arg18: memref<12x32xf32, #tpu.memory_space<vmem>>, %arg19: memref<32x12xf32, #tpu.memory_space<vmem>>, %arg20: memref<1x12xf32, #tpu.memory_space<vmem>>, %arg21: memref<12x50xf32, #tpu.memory_space<vmem>>, %arg22: memref<1x49x16xf32, #tpu.memory_space<vmem>>, %arg23: memref<1x196x12xf32, #tpu.memory_space<vmem>>, %arg24: memref<1x1x50xf32, #tpu.memory_space<vmem>>) attributes {dimension_semantics = [#tpu.dimension_semantics<parallel>], iteration_bounds = array<i64: 2>, scalar_prefetch = 0 : i64, scratch_operands = 0 : i64, tpu.core_type = #tpu.core_type<tc>, window_params = [{transform_indices = @transform_0, window_bounds = array<i64: 1, 50, 64>}, {pipeline_mode = #tpu.pipeline_mode<synchronous>, transform_indices = @transform_1, window_bounds = array<i64: 9, 49, 50>}, {pipeline_mode = #tpu.pipeline_mode<synchronous>, transform_indices = @transform_2, window_bounds = array<i64: 9, 64, 32>}, {pipeline_mode = #tpu.pipeline_mode<synchronous>, transform_indices = @transform_3, window_bounds = array<i64: 1, 32>}, {pipeline_mode = #tpu.pipeline_mode<synchronous>, transform_indices = @transform_4, window_bounds = array<i64: 32, 16>}, {pipeline_mode = #tpu.pipeline_mode<synchronous>, transform_indices = @transform_5, window_bounds = array<i64: 1, 16>}, {pipeline_mode = #tpu.pipeline_mode<synchronous>, transform_indices = @transform_6, window_bounds = array<i64: 9, 196, 50>}, {pipeline_mode = #tpu.pipeline_mode<synchronous>, transform_indices = @transform_7, window_bounds = array<i64: 9, 64, 16>}, {pipeline_mode = #tpu.pipeline_mode<synchronous>, transform_indices = @transform_8, window_bounds = array<i64: 1, 16>}, {pipeline_mode = #tpu.pipeline_mode<synchronous>, transform_indices = @transform_9, window_bounds = array<i64: 16, 12>}, {pipeline_mode = #tpu.pipeline_mode<synchronous>, transform_indices = @transform_10, window_bounds = array<i64: 1, 12>}, {pipeline_mode = #tpu.pipeline_mode<synchronous>, transform_indices = @transform_11, window_bounds = array<i64: 16, 12>}, {pipeline_mode = #tpu.pipeline_mode<synchronous>, transform_indices = @transform_12, window_bounds = array<i64: 1, 12>}, {pipeline_mode = #tpu.pipeline_mode<synchronous>, transform_indices = @transform_13, window_bounds = array<i64: 12, 12>}, {pipeline_mode = #tpu.pipeline_mode<synchronous>, transform_indices = @transform_14, window_bounds = array<i64: 12, 12>}, {pipeline_mode = #tpu.pipeline_mode<synchronous>, transform_indices = @transform_15, window_bounds = array<i64: 1, 12>}, {pipeline_mode = #tpu.pipeline_mode<synchronous>, transform_indices = @transform_16, window_bounds = array<i64: 12, 32>}, {pipeline_mode = #tpu.pipeline_mode<synchronous>, transform_indices = @transform_17, window_bounds = array<i64: 12, 32>}, {pipeline_mode = #tpu.pipeline_mode<synchronous>, transform_indices = @transform_18, window_bounds = array<i64: 32, 12>}, {pipeline_mode = #tpu.pipeline_mode<synchronous>, transform_indices = @transform_19, window_bounds = array<i64: 1, 12>}, {pipeline_mode = #tpu.pipeline_mode<synchronous>, transform_indices = @transform_20, window_bounds = array<i64: 12, 50>}, {transform_indices = @transform_21, window_bounds = array<i64: 1, 49, 16>}, {transform_indices = @transform_22, window_bounds = array<i64: 1, 196, 12>}, {transform_indices = @transform_23, window_bounds = array<i64: 1, 1, 50>}]} {
    %c0 = arith.constant 0 : index
    %c0_0 = arith.constant 0 : index
    %c0_1 = arith.constant 0 : index
    %0 = vector.load %arg1[%c0, %c0_0, %c0_1] : memref<1x50x64xf32, #tpu.memory_space<vmem>>, vector<1x50x64xf32>
    %1 = vector.shape_cast %0 : vector<1x50x64xf32> to vector<50x64xf32>
    %cst = arith.constant 0.000000e+00 : f32
    %2 = vector.broadcast %cst : f32 to vector<49x32xf32>
    %c0_2 = arith.constant 0 : index
    %c0_3 = arith.constant 0 : index
    %c0_4 = arith.constant 0 : index
    %3 = vector.load %arg2[%c0_2, %c0_3, %c0_4] : memref<9x49x50xf32, #tpu.memory_space<vmem>>, vector<1x49x50xf32>
    %4 = vector.shape_cast %3 : vector<1x49x50xf32> to vector<49x50xf32>
    %cst_5 = arith.constant dense<0.000000e+00> : vector<49x64xf32>
    %5 = tpu.matmul %4, %1, %cst_5 {dimension_numbers = #tpu.dot_dimension_numbers<[1], [0], [0], [1], [0, 0, 1, 1], [], []>} : vector<49x50xf32>, vector<50x64xf32>, vector<49x64xf32> -> vector<49x64xf32>
    %c0_6 = arith.constant 0 : index
    %c0_7 = arith.constant 0 : index
    %c0_8 = arith.constant 0 : index
    %6 = vector.load %arg3[%c0_6, %c0_7, %c0_8] : memref<9x64x32xf32, #tpu.memory_space<vmem>>, vector<1x64x32xf32>
    %7 = vector.shape_cast %6 : vector<1x64x32xf32> to vector<64x32xf32>
    %cst_9 = arith.constant dense<0.000000e+00> : vector<49x32xf32>
    %8 = tpu.matmul %5, %7, %cst_9 {dimension_numbers = #tpu.dot_dimension_numbers<[1], [0], [0], [1], [0, 0, 1, 1], [], []>} : vector<49x64xf32>, vector<64x32xf32>, vector<49x32xf32> -> vector<49x32xf32>
    %9 = arith.addf %2, %8 : vector<49x32xf32>
    %c1 = arith.constant 1 : index
    %c0_10 = arith.constant 0 : index
    %c0_11 = arith.constant 0 : index
    %10 = vector.load %arg2[%c1, %c0_10, %c0_11] : memref<9x49x50xf32, #tpu.memory_space<vmem>>, vector<1x49x50xf32>
    %11 = vector.shape_cast %10 : vector<1x49x50xf32> to vector<49x50xf32>
    %cst_12 = arith.constant dense<0.000000e+00> : vector<49x64xf32>
    %12 = tpu.matmul %11, %1, %cst_12 {dimension_numbers = #tpu.dot_dimension_numbers<[1], [0], [0], [1], [0, 0, 1, 1], [], []>} : vector<49x50xf32>, vector<50x64xf32>, vector<49x64xf32> -> vector<49x64xf32>
    %c1_13 = arith.constant 1 : index
    %c0_14 = arith.constant 0 : index
    %c0_15 = arith.constant 0 : index
    %13 = vector.load %arg3[%c1_13, %c0_14, %c0_15] : memref<9x64x32xf32, #tpu.memory_space<vmem>>, vector<1x64x32xf32>
    %14 = vector.shape_cast %13 : vector<1x64x32xf32> to vector<64x32xf32>
    %cst_16 = arith.constant dense<0.000000e+00> : vector<49x32xf32>
    %15 = tpu.matmul %12, %14, %cst_16 {dimension_numbers = #tpu.dot_dimension_numbers<[1], [0], [0], [1], [0, 0, 1, 1], [], []>} : vector<49x64xf32>, vector<64x32xf32>, vector<49x32xf32> -> vector<49x32xf32>
    %16 = arith.addf %9, %15 : vector<49x32xf32>
    %c2 = arith.constant 2 : index
    %c0_17 = arith.constant 0 : index
    %c0_18 = arith.constant 0 : index
    %17 = vector.load %arg2[%c2, %c0_17, %c0_18] : memref<9x49x50xf32, #tpu.memory_space<vmem>>, vector<1x49x50xf32>
    %18 = vector.shape_cast %17 : vector<1x49x50xf32> to vector<49x50xf32>
    %cst_19 = arith.constant dense<0.000000e+00> : vector<49x64xf32>
    %19 = tpu.matmul %18, %1, %cst_19 {dimension_numbers = #tpu.dot_dimension_numbers<[1], [0], [0], [1], [0, 0, 1, 1], [], []>} : vector<49x50xf32>, vector<50x64xf32>, vector<49x64xf32> -> vector<49x64xf32>
    %c2_20 = arith.constant 2 : index
    %c0_21 = arith.constant 0 : index
    %c0_22 = arith.constant 0 : index
    %20 = vector.load %arg3[%c2_20, %c0_21, %c0_22] : memref<9x64x32xf32, #tpu.memory_space<vmem>>, vector<1x64x32xf32>
    %21 = vector.shape_cast %20 : vector<1x64x32xf32> to vector<64x32xf32>
    %cst_23 = arith.constant dense<0.000000e+00> : vector<49x32xf32>
    %22 = tpu.matmul %19, %21, %cst_23 {dimension_numbers = #tpu.dot_dimension_numbers<[1], [0], [0], [1], [0, 0, 1, 1], [], []>} : vector<49x64xf32>, vector<64x32xf32>, vector<49x32xf32> -> vector<49x32xf32>
    %23 = arith.addf %16, %22 : vector<49x32xf32>
    %c3 = arith.constant 3 : index
    %c0_24 = arith.constant 0 : index
    %c0_25 = arith.constant 0 : index
    %24 = vector.load %arg2[%c3, %c0_24, %c0_25] : memref<9x49x50xf32, #tpu.memory_space<vmem>>, vector<1x49x50xf32>
    %25 = vector.shape_cast %24 : vector<1x49x50xf32> to vector<49x50xf32>
    %cst_26 = arith.constant dense<0.000000e+00> : vector<49x64xf32>
    %26 = tpu.matmul %25, %1, %cst_26 {dimension_numbers = #tpu.dot_dimension_numbers<[1], [0], [0], [1], [0, 0, 1, 1], [], []>} : vector<49x50xf32>, vector<50x64xf32>, vector<49x64xf32> -> vector<49x64xf32>
    %c3_27 = arith.constant 3 : index
    %c0_28 = arith.constant 0 : index
    %c0_29 = arith.constant 0 : index
    %27 = vector.load %arg3[%c3_27, %c0_28, %c0_29] : memref<9x64x32xf32, #tpu.memory_space<vmem>>, vector<1x64x32xf32>
    %28 = vector.shape_cast %27 : vector<1x64x32xf32> to vector<64x32xf32>
    %cst_30 = arith.constant dense<0.000000e+00> : vector<49x32xf32>
    %29 = tpu.matmul %26, %28, %cst_30 {dimension_numbers = #tpu.dot_dimension_numbers<[1], [0], [0], [1], [0, 0, 1, 1], [], []>} : vector<49x64xf32>, vector<64x32xf32>, vector<49x32xf32> -> vector<49x32xf32>
    %30 = arith.addf %23, %29 : vector<49x32xf32>
    %c4 = arith.constant 4 : index
    %c0_31 = arith.constant 0 : index
    %c0_32 = arith.constant 0 : index
    %31 = vector.load %arg2[%c4, %c0_31, %c0_32] : memref<9x49x50xf32, #tpu.memory_space<vmem>>, vector<1x49x50xf32>
    %32 = vector.shape_cast %31 : vector<1x49x50xf32> to vector<49x50xf32>
    %cst_33 = arith.constant dense<0.000000e+00> : vector<49x64xf32>
    %33 = tpu.matmul %32, %1, %cst_33 {dimension_numbers = #tpu.dot_dimension_numbers<[1], [0], [0], [1], [0, 0, 1, 1], [], []>} : vector<49x50xf32>, vector<50x64xf32>, vector<49x64xf32> -> vector<49x64xf32>
    %c4_34 = arith.constant 4 : index
    %c0_35 = arith.constant 0 : index
    %c0_36 = arith.constant 0 : index
    %34 = vector.load %arg3[%c4_34, %c0_35, %c0_36] : memref<9x64x32xf32, #tpu.memory_space<vmem>>, vector<1x64x32xf32>
    %35 = vector.shape_cast %34 : vector<1x64x32xf32> to vector<64x32xf32>
    %cst_37 = arith.constant dense<0.000000e+00> : vector<49x32xf32>
    %36 = tpu.matmul %33, %35, %cst_37 {dimension_numbers = #tpu.dot_dimension_numbers<[1], [0], [0], [1], [0, 0, 1, 1], [], []>} : vector<49x64xf32>, vector<64x32xf32>, vector<49x32xf32> -> vector<49x32xf32>
    %37 = arith.addf %30, %36 : vector<49x32xf32>
    %c5 = arith.constant 5 : index
    %c0_38 = arith.constant 0 : index
    %c0_39 = arith.constant 0 : index
    %38 = vector.load %arg2[%c5, %c0_38, %c0_39] : memref<9x49x50xf32, #tpu.memory_space<vmem>>, vector<1x49x50xf32>
    %39 = vector.shape_cast %38 : vector<1x49x50xf32> to vector<49x50xf32>
    %cst_40 = arith.constant dense<0.000000e+00> : vector<49x64xf32>
    %40 = tpu.matmul %39, %1, %cst_40 {dimension_numbers = #tpu.dot_dimension_numbers<[1], [0], [0], [1], [0, 0, 1, 1], [], []>} : vector<49x50xf32>, vector<50x64xf32>, vector<49x64xf32> -> vector<49x64xf32>
    %c5_41 = arith.constant 5 : index
    %c0_42 = arith.constant 0 : index
    %c0_43 = arith.constant 0 : index
    %41 = vector.load %arg3[%c5_41, %c0_42, %c0_43] : memref<9x64x32xf32, #tpu.memory_space<vmem>>, vector<1x64x32xf32>
    %42 = vector.shape_cast %41 : vector<1x64x32xf32> to vector<64x32xf32>
    %cst_44 = arith.constant dense<0.000000e+00> : vector<49x32xf32>
    %43 = tpu.matmul %40, %42, %cst_44 {dimension_numbers = #tpu.dot_dimension_numbers<[1], [0], [0], [1], [0, 0, 1, 1], [], []>} : vector<49x64xf32>, vector<64x32xf32>, vector<49x32xf32> -> vector<49x32xf32>
    %44 = arith.addf %37, %43 : vector<49x32xf32>
    %c6 = arith.constant 6 : index
    %c0_45 = arith.constant 0 : index
    %c0_46 = arith.constant 0 : index
    %45 = vector.load %arg2[%c6, %c0_45, %c0_46] : memref<9x49x50xf32, #tpu.memory_space<vmem>>, vector<1x49x50xf32>
    %46 = vector.shape_cast %45 : vector<1x49x50xf32> to vector<49x50xf32>
    %cst_47 = arith.constant dense<0.000000e+00> : vector<49x64xf32>
    %47 = tpu.matmul %46, %1, %cst_47 {dimension_numbers = #tpu.dot_dimension_numbers<[1], [0], [0], [1], [0, 0, 1, 1], [], []>} : vector<49x50xf32>, vector<50x64xf32>, vector<49x64xf32> -> vector<49x64xf32>
    %c6_48 = arith.constant 6 : index
    %c0_49 = arith.constant 0 : index
    %c0_50 = arith.constant 0 : index
    %48 = vector.load %arg3[%c6_48, %c0_49, %c0_50] : memref<9x64x32xf32, #tpu.memory_space<vmem>>, vector<1x64x32xf32>
    %49 = vector.shape_cast %48 : vector<1x64x32xf32> to vector<64x32xf32>
    %cst_51 = arith.constant dense<0.000000e+00> : vector<49x32xf32>
    %50 = tpu.matmul %47, %49, %cst_51 {dimension_numbers = #tpu.dot_dimension_numbers<[1], [0], [0], [1], [0, 0, 1, 1], [], []>} : vector<49x64xf32>, vector<64x32xf32>, vector<49x32xf32> -> vector<49x32xf32>
    %51 = arith.addf %44, %50 : vector<49x32xf32>
    %c7 = arith.constant 7 : index
    %c0_52 = arith.constant 0 : index
    %c0_53 = arith.constant 0 : index
    %52 = vector.load %arg2[%c7, %c0_52, %c0_53] : memref<9x49x50xf32, #tpu.memory_space<vmem>>, vector<1x49x50xf32>
    %53 = vector.shape_cast %52 : vector<1x49x50xf32> to vector<49x50xf32>
    %cst_54 = arith.constant dense<0.000000e+00> : vector<49x64xf32>
    %54 = tpu.matmul %53, %1, %cst_54 {dimension_numbers = #tpu.dot_dimension_numbers<[1], [0], [0], [1], [0, 0, 1, 1], [], []>} : vector<49x50xf32>, vector<50x64xf32>, vector<49x64xf32> -> vector<49x64xf32>
    %c7_55 = arith.constant 7 : index
    %c0_56 = arith.constant 0 : index
    %c0_57 = arith.constant 0 : index
    %55 = vector.load %arg3[%c7_55, %c0_56, %c0_57] : memref<9x64x32xf32, #tpu.memory_space<vmem>>, vector<1x64x32xf32>
    %56 = vector.shape_cast %55 : vector<1x64x32xf32> to vector<64x32xf32>
    %cst_58 = arith.constant dense<0.000000e+00> : vector<49x32xf32>
    %57 = tpu.matmul %54, %56, %cst_58 {dimension_numbers = #tpu.dot_dimension_numbers<[1], [0], [0], [1], [0, 0, 1, 1], [], []>} : vector<49x64xf32>, vector<64x32xf32>, vector<49x32xf32> -> vector<49x32xf32>
    %58 = arith.addf %51, %57 : vector<49x32xf32>
    %c8 = arith.constant 8 : index
    %c0_59 = arith.constant 0 : index
    %c0_60 = arith.constant 0 : index
    %59 = vector.load %arg2[%c8, %c0_59, %c0_60] : memref<9x49x50xf32, #tpu.memory_space<vmem>>, vector<1x49x50xf32>
    %60 = vector.shape_cast %59 : vector<1x49x50xf32> to vector<49x50xf32>
    %cst_61 = arith.constant dense<0.000000e+00> : vector<49x64xf32>
    %61 = tpu.matmul %60, %1, %cst_61 {dimension_numbers = #tpu.dot_dimension_numbers<[1], [0], [0], [1], [0, 0, 1, 1], [], []>} : vector<49x50xf32>, vector<50x64xf32>, vector<49x64xf32> -> vector<49x64xf32>
    %c8_62 = arith.constant 8 : index
    %c0_63 = arith.constant 0 : index
    %c0_64 = arith.constant 0 : index
    %62 = vector.load %arg3[%c8_62, %c0_63, %c0_64] : memref<9x64x32xf32, #tpu.memory_space<vmem>>, vector<1x64x32xf32>
    %63 = vector.shape_cast %62 : vector<1x64x32xf32> to vector<64x32xf32>
    %cst_65 = arith.constant dense<0.000000e+00> : vector<49x32xf32>
    %64 = tpu.matmul %61, %63, %cst_65 {dimension_numbers = #tpu.dot_dimension_numbers<[1], [0], [0], [1], [0, 0, 1, 1], [], []>} : vector<49x64xf32>, vector<64x32xf32>, vector<49x32xf32> -> vector<49x32xf32>
    %65 = arith.addf %58, %64 : vector<49x32xf32>
    %c0_66 = arith.constant 0 : index
    %c0_67 = arith.constant 0 : index
    %66 = vector.load %arg4[%c0_66, %c0_67] : memref<1x32xf32, #tpu.memory_space<vmem>>, vector<1x32xf32>
    %67 = vector.broadcast %66 : vector<1x32xf32> to vector<49x32xf32>
    %68 = arith.addf %65, %67 : vector<49x32xf32>
    %cst_68 = arith.constant 0.000000e+00 : f32
    %69 = vector.broadcast %cst_68 : f32 to vector<49x32xf32>
    %70 = arith.maximumf %68, %69 : vector<49x32xf32>
    %c0_69 = arith.constant 0 : index
    %c0_70 = arith.constant 0 : index
    %71 = vector.load %arg5[%c0_69, %c0_70] : memref<32x16xf32, #tpu.memory_space<vmem>>, vector<32x16xf32>
    %cst_71 = arith.constant dense<0.000000e+00> : vector<49x16xf32>
    %72 = tpu.matmul %70, %71, %cst_71 {dimension_numbers = #tpu.dot_dimension_numbers<[1], [0], [0], [1], [0, 0, 1, 1], [], []>} : vector<49x32xf32>, vector<32x16xf32>, vector<49x16xf32> -> vector<49x16xf32>
    %c0_72 = arith.constant 0 : index
    %c0_73 = arith.constant 0 : index
    %73 = vector.load %arg6[%c0_72, %c0_73] : memref<1x16xf32, #tpu.memory_space<vmem>>, vector<1x16xf32>
    %74 = vector.broadcast %73 : vector<1x16xf32> to vector<49x16xf32>
    %75 = arith.addf %72, %74 : vector<49x16xf32>
    %c0_74 = arith.constant 0 : index
    %c0_75 = arith.constant 0 : index
    %c0_76 = arith.constant 0 : index
    %76 = vector.load %arg22[%c0_74, %c0_75, %c0_76] : memref<1x49x16xf32, #tpu.memory_space<vmem>>, vector<1x49x16xf32>
    %77 = vector.shape_cast %76 : vector<1x49x16xf32> to vector<49x16xf32>
    %78 = vector.shape_cast %75 : vector<49x16xf32> to vector<1x49x16xf32>
    tpu.vector_store %arg22[%c0_74, %c0_75, %c0_76], %78 {strides = array<i32>} : memref<1x49x16xf32, #tpu.memory_space<vmem>>, vector<1x49x16xf32>,
    %cst_77 = arith.constant 0.000000e+00 : f32
    %79 = vector.broadcast %cst_77 : f32 to vector<196x16xf32>
    %c0_78 = arith.constant 0 : index
    %c0_79 = arith.constant 0 : index
    %c0_80 = arith.constant 0 : index
    %80 = vector.load %arg7[%c0_78, %c0_79, %c0_80] : memref<9x196x50xf32, #tpu.memory_space<vmem>>, vector<1x196x50xf32>
    %81 = vector.shape_cast %80 : vector<1x196x50xf32> to vector<196x50xf32>
    %cst_81 = arith.constant dense<0.000000e+00> : vector<196x64xf32>
    %82 = tpu.matmul %81, %1, %cst_81 {dimension_numbers = #tpu.dot_dimension_numbers<[1], [0], [0], [1], [0, 0, 1, 1], [], []>} : vector<196x50xf32>, vector<50x64xf32>, vector<196x64xf32> -> vector<196x64xf32>
    %c0_82 = arith.constant 0 : index
    %c0_83 = arith.constant 0 : index
    %c0_84 = arith.constant 0 : index
    %83 = vector.load %arg8[%c0_82, %c0_83, %c0_84] : memref<9x64x16xf32, #tpu.memory_space<vmem>>, vector<1x64x16xf32>
    %84 = vector.shape_cast %83 : vector<1x64x16xf32> to vector<64x16xf32>
    %cst_85 = arith.constant dense<0.000000e+00> : vector<196x16xf32>
    %85 = tpu.matmul %82, %84, %cst_85 {dimension_numbers = #tpu.dot_dimension_numbers<[1], [0], [0], [1], [0, 0, 1, 1], [], []>} : vector<196x64xf32>, vector<64x16xf32>, vector<196x16xf32> -> vector<196x16xf32>
    %86 = arith.addf %79, %85 : vector<196x16xf32>
    %c1_86 = arith.constant 1 : index
    %c0_87 = arith.constant 0 : index
    %c0_88 = arith.constant 0 : index
    %87 = vector.load %arg7[%c1_86, %c0_87, %c0_88] : memref<9x196x50xf32, #tpu.memory_space<vmem>>, vector<1x196x50xf32>
    %88 = vector.shape_cast %87 : vector<1x196x50xf32> to vector<196x50xf32>
    %cst_89 = arith.constant dense<0.000000e+00> : vector<196x64xf32>
    %89 = tpu.matmul %88, %1, %cst_89 {dimension_numbers = #tpu.dot_dimension_numbers<[1], [0], [0], [1], [0, 0, 1, 1], [], []>} : vector<196x50xf32>, vector<50x64xf32>, vector<196x64xf32> -> vector<196x64xf32>
    %c1_90 = arith.constant 1 : index
    %c0_91 = arith.constant 0 : index
    %c0_92 = arith.constant 0 : index
    %90 = vector.load %arg8[%c1_90, %c0_91, %c0_92] : memref<9x64x16xf32, #tpu.memory_space<vmem>>, vector<1x64x16xf32>
    %91 = vector.shape_cast %90 : vector<1x64x16xf32> to vector<64x16xf32>
    %cst_93 = arith.constant dense<0.000000e+00> : vector<196x16xf32>
    %92 = tpu.matmul %89, %91, %cst_93 {dimension_numbers = #tpu.dot_dimension_numbers<[1], [0], [0], [1], [0, 0, 1, 1], [], []>} : vector<196x64xf32>, vector<64x16xf32>, vector<196x16xf32> -> vector<196x16xf32>
    %93 = arith.addf %86, %92 : vector<196x16xf32>
    %c2_94 = arith.constant 2 : index
    %c0_95 = arith.constant 0 : index
    %c0_96 = arith.constant 0 : index
    %94 = vector.load %arg7[%c2_94, %c0_95, %c0_96] : memref<9x196x50xf32, #tpu.memory_space<vmem>>, vector<1x196x50xf32>
    %95 = vector.shape_cast %94 : vector<1x196x50xf32> to vector<196x50xf32>
    %cst_97 = arith.constant dense<0.000000e+00> : vector<196x64xf32>
    %96 = tpu.matmul %95, %1, %cst_97 {dimension_numbers = #tpu.dot_dimension_numbers<[1], [0], [0], [1], [0, 0, 1, 1], [], []>} : vector<196x50xf32>, vector<50x64xf32>, vector<196x64xf32> -> vector<196x64xf32>
    %c2_98 = arith.constant 2 : index
    %c0_99 = arith.constant 0 : index
    %c0_100 = arith.constant 0 : index
    %97 = vector.load %arg8[%c2_98, %c0_99, %c0_100] : memref<9x64x16xf32, #tpu.memory_space<vmem>>, vector<1x64x16xf32>
    %98 = vector.shape_cast %97 : vector<1x64x16xf32> to vector<64x16xf32>
    %cst_101 = arith.constant dense<0.000000e+00> : vector<196x16xf32>
    %99 = tpu.matmul %96, %98, %cst_101 {dimension_numbers = #tpu.dot_dimension_numbers<[1], [0], [0], [1], [0, 0, 1, 1], [], []>} : vector<196x64xf32>, vector<64x16xf32>, vector<196x16xf32> -> vector<196x16xf32>
    %100 = arith.addf %93, %99 : vector<196x16xf32>
    %c3_102 = arith.constant 3 : index
    %c0_103 = arith.constant 0 : index
    %c0_104 = arith.constant 0 : index
    %101 = vector.load %arg7[%c3_102, %c0_103, %c0_104] : memref<9x196x50xf32, #tpu.memory_space<vmem>>, vector<1x196x50xf32>
    %102 = vector.shape_cast %101 : vector<1x196x50xf32> to vector<196x50xf32>
    %cst_105 = arith.constant dense<0.000000e+00> : vector<196x64xf32>
    %103 = tpu.matmul %102, %1, %cst_105 {dimension_numbers = #tpu.dot_dimension_numbers<[1], [0], [0], [1], [0, 0, 1, 1], [], []>} : vector<196x50xf32>, vector<50x64xf32>, vector<196x64xf32> -> vector<196x64xf32>
    %c3_106 = arith.constant 3 : index
    %c0_107 = arith.constant 0 : index
    %c0_108 = arith.constant 0 : index
    %104 = vector.load %arg8[%c3_106, %c0_107, %c0_108] : memref<9x64x16xf32, #tpu.memory_space<vmem>>, vector<1x64x16xf32>
    %105 = vector.shape_cast %104 : vector<1x64x16xf32> to vector<64x16xf32>
    %cst_109 = arith.constant dense<0.000000e+00> : vector<196x16xf32>
    %106 = tpu.matmul %103, %105, %cst_109 {dimension_numbers = #tpu.dot_dimension_numbers<[1], [0], [0], [1], [0, 0, 1, 1], [], []>} : vector<196x64xf32>, vector<64x16xf32>, vector<196x16xf32> -> vector<196x16xf32>
    %107 = arith.addf %100, %106 : vector<196x16xf32>
    %c4_110 = arith.constant 4 : index
    %c0_111 = arith.constant 0 : index
    %c0_112 = arith.constant 0 : index
    %108 = vector.load %arg7[%c4_110, %c0_111, %c0_112] : memref<9x196x50xf32, #tpu.memory_space<vmem>>, vector<1x196x50xf32>
    %109 = vector.shape_cast %108 : vector<1x196x50xf32> to vector<196x50xf32>
    %cst_113 = arith.constant dense<0.000000e+00> : vector<196x64xf32>
    %110 = tpu.matmul %109, %1, %cst_113 {dimension_numbers = #tpu.dot_dimension_numbers<[1], [0], [0], [1], [0, 0, 1, 1], [], []>} : vector<196x50xf32>, vector<50x64xf32>, vector<196x64xf32> -> vector<196x64xf32>
    %c4_114 = arith.constant 4 : index
    %c0_115 = arith.constant 0 : index
    %c0_116 = arith.constant 0 : index
    %111 = vector.load %arg8[%c4_114, %c0_115, %c0_116] : memref<9x64x16xf32, #tpu.memory_space<vmem>>, vector<1x64x16xf32>
    %112 = vector.shape_cast %111 : vector<1x64x16xf32> to vector<64x16xf32>
    %cst_117 = arith.constant dense<0.000000e+00> : vector<196x16xf32>
    %113 = tpu.matmul %110, %112, %cst_117 {dimension_numbers = #tpu.dot_dimension_numbers<[1], [0], [0], [1], [0, 0, 1, 1], [], []>} : vector<196x64xf32>, vector<64x16xf32>, vector<196x16xf32> -> vector<196x16xf32>
    %114 = arith.addf %107, %113 : vector<196x16xf32>
    %c5_118 = arith.constant 5 : index
    %c0_119 = arith.constant 0 : index
    %c0_120 = arith.constant 0 : index
    %115 = vector.load %arg7[%c5_118, %c0_119, %c0_120] : memref<9x196x50xf32, #tpu.memory_space<vmem>>, vector<1x196x50xf32>
    %116 = vector.shape_cast %115 : vector<1x196x50xf32> to vector<196x50xf32>
    %cst_121 = arith.constant dense<0.000000e+00> : vector<196x64xf32>
    %117 = tpu.matmul %116, %1, %cst_121 {dimension_numbers = #tpu.dot_dimension_numbers<[1], [0], [0], [1], [0, 0, 1, 1], [], []>} : vector<196x50xf32>, vector<50x64xf32>, vector<196x64xf32> -> vector<196x64xf32>
    %c5_122 = arith.constant 5 : index
    %c0_123 = arith.constant 0 : index
    %c0_124 = arith.constant 0 : index
    %118 = vector.load %arg8[%c5_122, %c0_123, %c0_124] : memref<9x64x16xf32, #tpu.memory_space<vmem>>, vector<1x64x16xf32>
    %119 = vector.shape_cast %118 : vector<1x64x16xf32> to vector<64x16xf32>
    %cst_125 = arith.constant dense<0.000000e+00> : vector<196x16xf32>
    %120 = tpu.matmul %117, %119, %cst_125 {dimension_numbers = #tpu.dot_dimension_numbers<[1], [0], [0], [1], [0, 0, 1, 1], [], []>} : vector<196x64xf32>, vector<64x16xf32>, vector<196x16xf32> -> vector<196x16xf32>
    %121 = arith.addf %114, %120 : vector<196x16xf32>
    %c6_126 = arith.constant 6 : index
    %c0_127 = arith.constant 0 : index
    %c0_128 = arith.constant 0 : index
    %122 = vector.load %arg7[%c6_126, %c0_127, %c0_128] : memref<9x196x50xf32, #tpu.memory_space<vmem>>, vector<1x196x50xf32>
    %123 = vector.shape_cast %122 : vector<1x196x50xf32> to vector<196x50xf32>
    %cst_129 = arith.constant dense<0.000000e+00> : vector<196x64xf32>
    %124 = tpu.matmul %123, %1, %cst_129 {dimension_numbers = #tpu.dot_dimension_numbers<[1], [0], [0], [1], [0, 0, 1, 1], [], []>} : vector<196x50xf32>, vector<50x64xf32>, vector<196x64xf32> -> vector<196x64xf32>
    %c6_130 = arith.constant 6 : index
    %c0_131 = arith.constant 0 : index
    %c0_132 = arith.constant 0 : index
    %125 = vector.load %arg8[%c6_130, %c0_131, %c0_132] : memref<9x64x16xf32, #tpu.memory_space<vmem>>, vector<1x64x16xf32>
    %126 = vector.shape_cast %125 : vector<1x64x16xf32> to vector<64x16xf32>
    %cst_133 = arith.constant dense<0.000000e+00> : vector<196x16xf32>
    %127 = tpu.matmul %124, %126, %cst_133 {dimension_numbers = #tpu.dot_dimension_numbers<[1], [0], [0], [1], [0, 0, 1, 1], [], []>} : vector<196x64xf32>, vector<64x16xf32>, vector<196x16xf32> -> vector<196x16xf32>
    %128 = arith.addf %121, %127 : vector<196x16xf32>
    %c7_134 = arith.constant 7 : index
    %c0_135 = arith.constant 0 : index
    %c0_136 = arith.constant 0 : index
    %129 = vector.load %arg7[%c7_134, %c0_135, %c0_136] : memref<9x196x50xf32, #tpu.memory_space<vmem>>, vector<1x196x50xf32>
    %130 = vector.shape_cast %129 : vector<1x196x50xf32> to vector<196x50xf32>
    %cst_137 = arith.constant dense<0.000000e+00> : vector<196x64xf32>
    %131 = tpu.matmul %130, %1, %cst_137 {dimension_numbers = #tpu.dot_dimension_numbers<[1], [0], [0], [1], [0, 0, 1, 1], [], []>} : vector<196x50xf32>, vector<50x64xf32>, vector<196x64xf32> -> vector<196x64xf32>
    %c7_138 = arith.constant 7 : index
    %c0_139 = arith.constant 0 : index
    %c0_140 = arith.constant 0 : index
    %132 = vector.load %arg8[%c7_138, %c0_139, %c0_140] : memref<9x64x16xf32, #tpu.memory_space<vmem>>, vector<1x64x16xf32>
    %133 = vector.shape_cast %132 : vector<1x64x16xf32> to vector<64x16xf32>
    %cst_141 = arith.constant dense<0.000000e+00> : vector<196x16xf32>
    %134 = tpu.matmul %131, %133, %cst_141 {dimension_numbers = #tpu.dot_dimension_numbers<[1], [0], [0], [1], [0, 0, 1, 1], [], []>} : vector<196x64xf32>, vector<64x16xf32>, vector<196x16xf32> -> vector<196x16xf32>
    %135 = arith.addf %128, %134 : vector<196x16xf32>
    %c8_142 = arith.constant 8 : index
    %c0_143 = arith.constant 0 : index
    %c0_144 = arith.constant 0 : index
    %136 = vector.load %arg7[%c8_142, %c0_143, %c0_144] : memref<9x196x50xf32, #tpu.memory_space<vmem>>, vector<1x196x50xf32>
    %137 = vector.shape_cast %136 : vector<1x196x50xf32> to vector<196x50xf32>
    %cst_145 = arith.constant dense<0.000000e+00> : vector<196x64xf32>
    %138 = tpu.matmul %137, %1, %cst_145 {dimension_numbers = #tpu.dot_dimension_numbers<[1], [0], [0], [1], [0, 0, 1, 1], [], []>} : vector<196x50xf32>, vector<50x64xf32>, vector<196x64xf32> -> vector<196x64xf32>
    %c8_146 = arith.constant 8 : index
    %c0_147 = arith.constant 0 : index
    %c0_148 = arith.constant 0 : index
    %139 = vector.load %arg8[%c8_146, %c0_147, %c0_148] : memref<9x64x16xf32, #tpu.memory_space<vmem>>, vector<1x64x16xf32>
    %140 = vector.shape_cast %139 : vector<1x64x16xf32> to vector<64x16xf32>
    %cst_149 = arith.constant dense<0.000000e+00> : vector<196x16xf32>
    %141 = tpu.matmul %138, %140, %cst_149 {dimension_numbers = #tpu.dot_dimension_numbers<[1], [0], [0], [1], [0, 0, 1, 1], [], []>} : vector<196x64xf32>, vector<64x16xf32>, vector<196x16xf32> -> vector<196x16xf32>
    %142 = arith.addf %135, %141 : vector<196x16xf32>
    %c0_150 = arith.constant 0 : index
    %c0_151 = arith.constant 0 : index
    %143 = vector.load %arg9[%c0_150, %c0_151] : memref<1x16xf32, #tpu.memory_space<vmem>>, vector<1x16xf32>
    %144 = vector.broadcast %143 : vector<1x16xf32> to vector<196x16xf32>
    %145 = arith.addf %142, %144 : vector<196x16xf32>
    %cst_152 = arith.constant 0.000000e+00 : f32
    %146 = vector.broadcast %cst_152 : f32 to vector<196x16xf32>
    %147 = arith.maximumf %145, %146 : vector<196x16xf32>
    %c0_153 = arith.constant 0 : index
    %c0_154 = arith.constant 0 : index
    %148 = vector.load %arg10[%c0_153, %c0_154] : memref<16x12xf32, #tpu.memory_space<vmem>>, vector<16x12xf32>
    %cst_155 = arith.constant dense<0.000000e+00> : vector<196x12xf32>
    %149 = tpu.matmul %147, %148, %cst_155 {dimension_numbers = #tpu.dot_dimension_numbers<[1], [0], [0], [1], [0, 0, 1, 1], [], []>} : vector<196x16xf32>, vector<16x12xf32>, vector<196x12xf32> -> vector<196x12xf32>
    %c0_156 = arith.constant 0 : index
    %c0_157 = arith.constant 0 : index
    %150 = vector.load %arg11[%c0_156, %c0_157] : memref<1x12xf32, #tpu.memory_space<vmem>>, vector<1x12xf32>
    %151 = vector.broadcast %150 : vector<1x12xf32> to vector<196x12xf32>
    %152 = arith.addf %149, %151 : vector<196x12xf32>
    %c0_158 = arith.constant 0 : index
    %c0_159 = arith.constant 0 : index
    %c0_160 = arith.constant 0 : index
    %153 = vector.load %arg23[%c0_158, %c0_159, %c0_160] : memref<1x196x12xf32, #tpu.memory_space<vmem>>, vector<1x196x12xf32>
    %154 = vector.shape_cast %153 : vector<1x196x12xf32> to vector<196x12xf32>
    %155 = vector.shape_cast %152 : vector<196x12xf32> to vector<1x196x12xf32>
    tpu.vector_store %arg23[%c0_158, %c0_159, %c0_160], %155 {strides = array<i32>} : memref<1x196x12xf32, #tpu.memory_space<vmem>>, vector<1x196x12xf32>,
    %cst_161 = arith.constant dense<0.000000e+00> : vector<16xf32>
    %156 = vector.multi_reduction <add>, %75, %cst_161 [0] : vector<49x16xf32> to vector<16xf32>
    %157 = vector.shape_cast %156 : vector<16xf32> to vector<1x16xf32>
    %cst_162 = arith.constant 4.900000e+01 : f32
    %158 = vector.broadcast %cst_162 : f32 to vector<1x16xf32>
    %159 = arith.divf %157, %158 : vector<1x16xf32>
    %c0_163 = arith.constant 0 : index
    %c0_164 = arith.constant 0 : index
    %160 = vector.load %arg12[%c0_163, %c0_164] : memref<16x12xf32, #tpu.memory_space<vmem>>, vector<16x12xf32>
    %cst_165 = arith.constant dense<0.000000e+00> : vector<1x12xf32>
    %161 = tpu.matmul %159, %160, %cst_165 {dimension_numbers = #tpu.dot_dimension_numbers<[1], [0], [0], [1], [0, 0, 1, 1], [], []>} : vector<1x16xf32>, vector<16x12xf32>, vector<1x12xf32> -> vector<1x12xf32>
    %c0_166 = arith.constant 0 : index
    %c0_167 = arith.constant 0 : index
    %162 = vector.load %arg13[%c0_166, %c0_167] : memref<1x12xf32, #tpu.memory_space<vmem>>, vector<1x12xf32>
    %163 = arith.mulf %161, %161 : vector<1x12xf32>
    %cst_168 = arith.constant dense<0.000000e+00> : vector<1xf32>
    %164 = vector.multi_reduction <add>, %163, %cst_168 [1] : vector<1x12xf32> to vector<1xf32>
    %165 = vector.shape_cast %164 : vector<1xf32> to vector<1x1xf32>
    %cst_169 = arith.constant 1.200000e+01 : f32
    %166 = vector.broadcast %cst_169 : f32 to vector<1x1xf32>
    %167 = arith.divf %165, %166 : vector<1x1xf32>
    %cst_170 = arith.constant 9.99999997E-7 : f32
    %168 = vector.broadcast %cst_170 : f32 to vector<1x1xf32>
    %169 = arith.addf %167, %168 : vector<1x1xf32>
    %170 = math.rsqrt %169 : vector<1x1xf32>
    %171 = vector.broadcast %170 : vector<1x1xf32> to vector<1x12xf32>
    %172 = arith.mulf %161, %171 : vector<1x12xf32>
    %173 = arith.mulf %172, %162 : vector<1x12xf32>
    %c0_171 = arith.constant 0 : index
    %c0_172 = arith.constant 0 : index
    %174 = vector.load %arg14[%c0_171, %c0_172] : memref<12x12xf32, #tpu.memory_space<vmem>>, vector<12x12xf32>
    %cst_173 = arith.constant dense<0.000000e+00> : vector<1x12xf32>
    %175 = tpu.matmul %173, %174, %cst_173 {dimension_numbers = #tpu.dot_dimension_numbers<[1], [0], [0], [1], [0, 0, 1, 1], [], []>} : vector<1x12xf32>, vector<12x12xf32>, vector<1x12xf32> -> vector<1x12xf32>
    %c0_174 = arith.constant 0 : index
    %c0_175 = arith.constant 0 : index
    %176 = vector.load %arg15[%c0_174, %c0_175] : memref<12x12xf32, #tpu.memory_space<vmem>>, vector<12x12xf32>
    %cst_176 = arith.constant dense<0.000000e+00> : vector<1x12xf32>
    %177 = tpu.matmul %175, %176, %cst_176 {dimension_numbers = #tpu.dot_dimension_numbers<[1], [0], [0], [1], [0, 0, 1, 1], [], []>} : vector<1x12xf32>, vector<12x12xf32>, vector<1x12xf32> -> vector<1x12xf32>
    %178 = arith.addf %161, %177 : vector<1x12xf32>
    %c0_177 = arith.constant 0 : index
    %c0_178 = arith.constant 0 : index
    %179 = vector.load %arg16[%c0_177, %c0_178] : memref<1x12xf32, #tpu.memory_space<vmem>>, vector<1x12xf32>
    %180 = arith.mulf %178, %178 : vector<1x12xf32>
    %cst_179 = arith.constant dense<0.000000e+00> : vector<1xf32>
    %181 = vector.multi_reduction <add>, %180, %cst_179 [1] : vector<1x12xf32> to vector<1xf32>
    %182 = vector.shape_cast %181 : vector<1xf32> to vector<1x1xf32>
    %cst_180 = arith.constant 1.200000e+01 : f32
    %183 = vector.broadcast %cst_180 : f32 to vector<1x1xf32>
    %184 = arith.divf %182, %183 : vector<1x1xf32>
    %cst_181 = arith.constant 9.99999997E-7 : f32
    %185 = vector.broadcast %cst_181 : f32 to vector<1x1xf32>
    %186 = arith.addf %184, %185 : vector<1x1xf32>
    %187 = math.rsqrt %186 : vector<1x1xf32>
    %188 = vector.broadcast %187 : vector<1x1xf32> to vector<1x12xf32>
    %189 = arith.mulf %178, %188 : vector<1x12xf32>
    %190 = arith.mulf %189, %179 : vector<1x12xf32>
    %c0_182 = arith.constant 0 : index
    %c0_183 = arith.constant 0 : index
    %191 = vector.load %arg17[%c0_182, %c0_183] : memref<12x32xf32, #tpu.memory_space<vmem>>, vector<12x32xf32>
    %cst_184 = arith.constant dense<0.000000e+00> : vector<1x32xf32>
    %192 = tpu.matmul %190, %191, %cst_184 {dimension_numbers = #tpu.dot_dimension_numbers<[1], [0], [0], [1], [0, 0, 1, 1], [], []>} : vector<1x12xf32>, vector<12x32xf32>, vector<1x32xf32> -> vector<1x32xf32>
    %193 = arith.negf %192 : vector<1x32xf32>
    %194 = math.exp %193 : vector<1x32xf32>
    %cst_185 = arith.constant 1.000000e+00 : f32
    %195 = vector.broadcast %cst_185 : f32 to vector<1x32xf32>
    %196 = arith.addf %195, %194 : vector<1x32xf32>
    %197 = arith.divf %195, %196 : vector<1x32xf32>
    %198 = arith.mulf %192, %197 : vector<1x32xf32>
    %c0_186 = arith.constant 0 : index
    %c0_187 = arith.constant 0 : index
    %199 = vector.load %arg18[%c0_186, %c0_187] : memref<12x32xf32, #tpu.memory_space<vmem>>, vector<12x32xf32>
    %cst_188 = arith.constant dense<0.000000e+00> : vector<1x32xf32>
    %200 = tpu.matmul %190, %199, %cst_188 {dimension_numbers = #tpu.dot_dimension_numbers<[1], [0], [0], [1], [0, 0, 1, 1], [], []>} : vector<1x12xf32>, vector<12x32xf32>, vector<1x32xf32> -> vector<1x32xf32>
    %201 = arith.mulf %198, %200 : vector<1x32xf32>
    %c0_189 = arith.constant 0 : index
    %c0_190 = arith.constant 0 : index
    %202 = vector.load %arg19[%c0_189, %c0_190] : memref<32x12xf32, #tpu.memory_space<vmem>>, vector<32x12xf32>
    %cst_191 = arith.constant dense<0.000000e+00> : vector<1x12xf32>
    %203 = tpu.matmul %201, %202, %cst_191 {dimension_numbers = #tpu.dot_dimension_numbers<[1], [0], [0], [1], [0, 0, 1, 1], [], []>} : vector<1x32xf32>, vector<32x12xf32>, vector<1x12xf32> -> vector<1x12xf32>
    %204 = arith.addf %178, %203 : vector<1x12xf32>
    %c0_192 = arith.constant 0 : index
    %c0_193 = arith.constant 0 : index
    %205 = vector.load %arg20[%c0_192, %c0_193] : memref<1x12xf32, #tpu.memory_space<vmem>>, vector<1x12xf32>
    %206 = arith.mulf %204, %204 : vector<1x12xf32>
    %cst_194 = arith.constant dense<0.000000e+00> : vector<1xf32>
    %207 = vector.multi_reduction <add>, %206, %cst_194 [1] : vector<1x12xf32> to vector<1xf32>
    %208 = vector.shape_cast %207 : vector<1xf32> to vector<1x1xf32>
    %cst_195 = arith.constant 1.200000e+01 : f32
    %209 = vector.broadcast %cst_195 : f32 to vector<1x1xf32>
    %210 = arith.divf %208, %209 : vector<1x1xf32>
    %cst_196 = arith.constant 9.99999997E-7 : f32
    %211 = vector.broadcast %cst_196 : f32 to vector<1x1xf32>
    %212 = arith.addf %210, %211 : vector<1x1xf32>
    %213 = math.rsqrt %212 : vector<1x1xf32>
    %214 = vector.broadcast %213 : vector<1x1xf32> to vector<1x12xf32>
    %215 = arith.mulf %204, %214 : vector<1x12xf32>
    %216 = arith.mulf %215, %205 : vector<1x12xf32>
    %c0_197 = arith.constant 0 : index
    %c0_198 = arith.constant 0 : index
    %217 = vector.load %arg21[%c0_197, %c0_198] : memref<12x50xf32, #tpu.memory_space<vmem>>, vector<12x50xf32>
    %cst_199 = arith.constant dense<0.000000e+00> : vector<1x50xf32>
    %218 = tpu.matmul %216, %217, %cst_199 {dimension_numbers = #tpu.dot_dimension_numbers<[1], [0], [0], [1], [0, 0, 1, 1], [], []>} : vector<1x12xf32>, vector<12x50xf32>, vector<1x50xf32> -> vector<1x50xf32>
    %c0_200 = arith.constant 0 : index
    %c0_201 = arith.constant 0 : index
    %c0_202 = arith.constant 0 : index
    %219 = vector.load %arg24[%c0_200, %c0_201, %c0_202] : memref<1x1x50xf32, #tpu.memory_space<vmem>>, vector<1x1x50xf32>
    %220 = vector.shape_cast %219 : vector<1x1x50xf32> to vector<1x50xf32>
    %221 = vector.shape_cast %218 : vector<1x50xf32> to vector<1x1x50xf32>
    tpu.vector_store %arg24[%c0_200, %c0_201, %c0_202], %221 {strides = array<i32>} : memref<1x1x50xf32, #tpu.memory_space<vmem>>, vector<1x1x50xf32>,
    return
  }
  func.func @transform_0(%arg0: i32) -> (i32, i32, i32) {
    %c0_i32 = arith.constant 0 : i32
    %c0_i32_0 = arith.constant 0 : i32
    %c0_i32_1 = arith.constant 0 : i32
    return %arg0, %c0_i32, %c0_i32_0 : i32, i32, i32
  }
  func.func @transform_1(%arg0: i32) -> (i32, i32, i32) {
    %c0_i32 = arith.constant 0 : i32
    %c0_i32_0 = arith.constant 0 : i32
    %c0_i32_1 = arith.constant 0 : i32
    %c0_i32_2 = arith.constant 0 : i32
    return %c0_i32, %c0_i32_0, %c0_i32_1 : i32, i32, i32
  }
  func.func @transform_2(%arg0: i32) -> (i32, i32, i32) {
    %c0_i32 = arith.constant 0 : i32
    %c0_i32_0 = arith.constant 0 : i32
    %c0_i32_1 = arith.constant 0 : i32
    %c0_i32_2 = arith.constant 0 : i32
    return %c0_i32, %c0_i32_0, %c0_i32_1 : i32, i32, i32
  }
  func.func @transform_3(%arg0: i32) -> (i32, i32) {
    %c0_i32 = arith.constant 0 : i32
    %c0_i32_0 = arith.constant 0 : i32
    %c0_i32_1 = arith.constant 0 : i32
    return %c0_i32, %c0_i32_0 : i32, i32
  }
  func.func @transform_4(%arg0: i32) -> (i32, i32) {
    %c0_i32 = arith.constant 0 : i32
    %c0_i32_0 = arith.constant 0 : i32
    %c0_i32_1 = arith.constant 0 : i32
    return %c0_i32, %c0_i32_0 : i32, i32
  }
  func.func @transform_5(%arg0: i32) -> (i32, i32) {
    %c0_i32 = arith.constant 0 : i32
    %c0_i32_0 = arith.constant 0 : i32
    %c0_i32_1 = arith.constant 0 : i32
    return %c0_i32, %c0_i32_0 : i32, i32
  }
  func.func @transform_6(%arg0: i32) -> (i32, i32, i32) {
    %c0_i32 = arith.constant 0 : i32
    %c0_i32_0 = arith.constant 0 : i32
    %c0_i32_1 = arith.constant 0 : i32
    %c0_i32_2 = arith.constant 0 : i32
    return %c0_i32, %c0_i32_0, %c0_i32_1 : i32, i32, i32
  }
  func.func @transform_7(%arg0: i32) -> (i32, i32, i32) {
    %c0_i32 = arith.constant 0 : i32
    %c0_i32_0 = arith.constant 0 : i32
    %c0_i32_1 = arith.constant 0 : i32
    %c0_i32_2 = arith.constant 0 : i32
    return %c0_i32, %c0_i32_0, %c0_i32_1 : i32, i32, i32
  }
  func.func @transform_8(%arg0: i32) -> (i32, i32) {
    %c0_i32 = arith.constant 0 : i32
    %c0_i32_0 = arith.constant 0 : i32
    %c0_i32_1 = arith.constant 0 : i32
    return %c0_i32, %c0_i32_0 : i32, i32
  }
  func.func @transform_9(%arg0: i32) -> (i32, i32) {
    %c0_i32 = arith.constant 0 : i32
    %c0_i32_0 = arith.constant 0 : i32
    %c0_i32_1 = arith.constant 0 : i32
    return %c0_i32, %c0_i32_0 : i32, i32
  }
  func.func @transform_10(%arg0: i32) -> (i32, i32) {
    %c0_i32 = arith.constant 0 : i32
    %c0_i32_0 = arith.constant 0 : i32
    %c0_i32_1 = arith.constant 0 : i32
    return %c0_i32, %c0_i32_0 : i32, i32
  }
  func.func @transform_11(%arg0: i32) -> (i32, i32) {
    %c0_i32 = arith.constant 0 : i32
    %c0_i32_0 = arith.constant 0 : i32
    %c0_i32_1 = arith.constant 0 : i32
    return %c0_i32, %c0_i32_0 : i32, i32
  }
  func.func @transform_12(%arg0: i32) -> (i32, i32) {
    %c0_i32 = arith.constant 0 : i32
    %c0_i32_0 = arith.constant 0 : i32
    %c0_i32_1 = arith.constant 0 : i32
    return %c0_i32, %c0_i32_0 : i32, i32
  }
  func.func @transform_13(%arg0: i32) -> (i32, i32) {
    %c0_i32 = arith.constant 0 : i32
    %c0_i32_0 = arith.constant 0 : i32
    %c0_i32_1 = arith.constant 0 : i32
    return %c0_i32, %c0_i32_0 : i32, i32
  }
  func.func @transform_14(%arg0: i32) -> (i32, i32) {
    %c0_i32 = arith.constant 0 : i32
    %c0_i32_0 = arith.constant 0 : i32
    %c0_i32_1 = arith.constant 0 : i32
    return %c0_i32, %c0_i32_0 : i32, i32
  }
  func.func @transform_15(%arg0: i32) -> (i32, i32) {
    %c0_i32 = arith.constant 0 : i32
    %c0_i32_0 = arith.constant 0 : i32
    %c0_i32_1 = arith.constant 0 : i32
    return %c0_i32, %c0_i32_0 : i32, i32
  }
  func.func @transform_16(%arg0: i32) -> (i32, i32) {
    %c0_i32 = arith.constant 0 : i32
    %c0_i32_0 = arith.constant 0 : i32
    %c0_i32_1 = arith.constant 0 : i32
    return %c0_i32, %c0_i32_0 : i32, i32
  }
  func.func @transform_17(%arg0: i32) -> (i32, i32) {
    %c0_i32 = arith.constant 0 : i32
    %c0_i32_0 = arith.constant 0 : i32
    %c0_i32_1 = arith.constant 0 : i32
    return %c0_i32, %c0_i32_0 : i32, i32
  }
  func.func @transform_18(%arg0: i32) -> (i32, i32) {
    %c0_i32 = arith.constant 0 : i32
    %c0_i32_0 = arith.constant 0 : i32
    %c0_i32_1 = arith.constant 0 : i32
    return %c0_i32, %c0_i32_0 : i32, i32
  }
  func.func @transform_19(%arg0: i32) -> (i32, i32) {
    %c0_i32 = arith.constant 0 : i32
    %c0_i32_0 = arith.constant 0 : i32
    %c0_i32_1 = arith.constant 0 : i32
    return %c0_i32, %c0_i32_0 : i32, i32
  }
  func.func @transform_20(%arg0: i32) -> (i32, i32) {
    %c0_i32 = arith.constant 0 : i32
    %c0_i32_0 = arith.constant 0 : i32
    %c0_i32_1 = arith.constant 0 : i32
    return %c0_i32, %c0_i32_0 : i32, i32
  }
  func.func @transform_21(%arg0: i32) -> (i32, i32, i32) {
    %c0_i32 = arith.constant 0 : i32
    %c0_i32_0 = arith.constant 0 : i32
    %c0_i32_1 = arith.constant 0 : i32
    return %arg0, %c0_i32, %c0_i32_0 : i32, i32, i32
  }
  func.func @transform_22(%arg0: i32) -> (i32, i32, i32) {
    %c0_i32 = arith.constant 0 : i32
    %c0_i32_0 = arith.constant 0 : i32
    %c0_i32_1 = arith.constant 0 : i32
    return %arg0, %c0_i32, %c0_i32_0 : i32, i32, i32
  }
  func.func @transform_23(%arg0: i32) -> (i32, i32, i32) {
    %c0_i32 = arith.constant 0 : i32
    %c0_i32_0 = arith.constant 0 : i32
    %c0_i32_1 = arith.constant 0 : i32
    return %arg0, %c0_i32, %c0_i32_0 : i32, i32, i32
  }
}

</mosaic_0001>

<bundles_post_ra>
// kernel: _lambda_.2
= control target key start
LH: loop header
LB: loop body
LE: loop exit
PB: predicated region body
PF: predicated region fallthrough
CT: control target
= control target key end

     0   :  { %s7798_s0 = inlined_call_operand.vmem [shape: f32[2,50,48], index: 0, kind: input, shape index: {}]   ;;  %s7799_s1 = inlined_call_operand.hbm [shape: f32[48,64], index: 1, kind: input, shape index: {}]   ;;  %s7800_s2 = inlined_call_operand.vmem [shape: f32[50,64], index: 2, kind: input, shape index: {}]   ;;  %s7801_s3 = inlined_call_operand.vmem [shape: f32[1,64], index: 3, kind: input, shape index: {}]   ;;  %s7802_s4 = inlined_call_operand.vmem [shape: f32[1,64], index: 4, kind: input, shape index: {}]   ;;  %s7803_s5 = inlined_call_operand.vmem [shape: f32[2,1,64], index: 5, kind: input, shape index: {}, may-alias: {5,15}]   ;;  %s7804_s6 = inlined_call_operand.vmem [shape: f32[2,1,64], index: 6, kind: input, shape index: {}, may-alias: {6,14,16,20}]   ;;  %s7805_s7 = inlined_call_operand.vmem [shape: f32[2,2,64,32], index: 7, kind: input, shape index: {}]   ;;  %s7806_s8 = inlined_call_operand.vmem [shape: f32[2,2,64,32], index: 8, kind: input, shape index: {}]   ;;  %s7807_s9 = inlined_call_operand.vmem [shape: f32[2,2,64,32], index: 9, kind: input, shape index: {}]   ;;  %s7808_s10 = inlined_call_operand.vmem [shape: f32[2,2,1,32], index: 10, kind: input, shape index: {}, may-alias: {10,11,12}]   ;;  %s7809_s11 = inlined_call_operand.vmem [shape: f32[2,2,1,32], index: 11, kind: input, shape index: {}, may-alias: {10,11,12}]   ;;  %s7810_s12 = inlined_call_operand.vmem [shape: f32[2,2,1,32], index: 12, kind: input, shape index: {}, may-alias: {10,11,12}]   ;;  %s7811_s13 = inlined_call_operand.vmem [shape: f32[2,2,32,64], index: 13, kind: input, shape index: {}]   ;;  %s7812_s14 = inlined_call_operand.vmem [shape: f32[2,1,64], index: 14, kind: input, shape index: {}, may-alias: {6,14,16,20}]   ;;  %s7813_s15 = inlined_call_operand.vmem [shape: f32[2,1,64], index: 15, kind: input, shape index: {}, may-alias: {5,15}]   ;;  %s7814_s16 = inlined_call_operand.vmem [shape: f32[2,1,64], index: 16, kind: input, shape index: {}, may-alias: {6,14,16,20}]   ;;  %s7815_s17 = inlined_call_operand.hbm [shape: f32[2,64,256], index: 17, kind: input, shape index: {}]   ;;  %s7816_s18 = inlined_call_operand.vmem [shape: f32[2,1,256], index: 18, kind: input, shape index: {}]   ;;  %s7817_s19 = inlined_call_operand.vmem [shape: f32[2,256,64], index: 19, kind: input, shape index: {}]   ;;  %s7818_s20 = inlined_call_operand.vmem [shape: f32[2,1,64], index: 20, kind: input, shape index: {}, may-alias: {6,14,16,20}]   ;;  %s7819_s21 = inlined_call_operand.vmem [shape: f32[2,50,64], index: 21, kind: output, shape index: {}]  }
   0x1   :  { %7822 = sst [smem:[#allocation8_spill]] %s7798_s0 }
   0x2   :  { %7823 = sst [smem:[#allocation9_spill]] %s7799_s1 }
   0x3   :  { %7824 = sst [smem:[#allocation10_spill]] %s7800_s2 }
   0x4   :  { %7825 = sst [smem:[#allocation11_spill]] %s7801_s3 }
   0x5   :  { %7826 = sst [smem:[#allocation12_spill]] %s7802_s4 }
   0x6   :  { %7827 = sst [smem:[#allocation13_spill]] %s7803_s5 }
   0x7   :  { %26 = vsyncpa [#allocation3], 0 }
   0x8   :  { %27 = vsyncpa [#allocation5], 0  ;;  %s5653_s2 = smov 0  }
   0x9 LB: > { %s7828_s27 = sld [smem:[#allocation9_spill]]  ;;  %s4676_s28 = sadd.s32 4294967295, %s5534_s2   ;;  %s5534_s2 = sphi %s5653_s2, %s33_s2  }
   0xa   : > { %p4678_p0 = scmp.ge.s32.totalorder %s5534_s2, 1  ;;  %p510_p1 = scmp.lt.s32.totalorder %s5534_s2, 3 }
   0xb   : > { %p5119_p2 = scmp.eq.s32.totalorder %s4676_s28, 0  ;;  %s5536_s0 = smov [#allocation2]  }
   0xc   : > { %p5664_p3 = pnand %p4678_p0, %p510_p1  ;;  %s523_s4 = sshll.u32 %s5536_s0, 4  ;;  %s524_s4 = int_to_ptr.vmem [resolvable:$true] %s523_s4 }
   0xd   : > { %s580_s22 = sshll.u32 %s7815_s17, 4  ;;  %s5537_s23 = smov [#allocation4]   ;;  %s581_s22 = int_to_ptr.hbm [resolvable:$true] %s580_s22 }
   0xe   : > { %p5112_p4 = pneg %p5664_p3  ;;  %s582_s1 = sshll.u32 %s5537_s23, 4  ;;  %s583_s1 = int_to_ptr.vmem [resolvable:$true] %s582_s1 }
   0xf   : > { %s521_s3 = sshll.u32 %s7828_s27, 4  ;;  %s5538_s24 = smov 128   ;;  %s522_s3 = int_to_ptr.hbm [resolvable:$true] %s521_s3 }
  0x10   : > { %p5113_p5 = pnand %p5119_p2, %p5112_p4  ;;  %s5539_s25 = smov 8  }
  0x11   : > { %s5540_s26 = smov 256   ;;  %s5541_s27 = smov 16  }
  0x12   : > { %5115 = dma.hbm_to_vmem [thread:$0]  (!%p5113_p5), %s522_s3, 768, %s524_s4, [#allocation3], %s5538_s24, %s5538_s24, %s5539_s25  }
  0x13   : > { %5118 = dma.hbm_to_vmem [thread:$0]  (!%p5113_p5), %s581_s22, 4096, %s583_s1, [#allocation5], %s5540_s26, %s5540_s26, %s5541_s27  }
  0x14   : > { %615 = sbr.rel (%p5664_p3) target bundleno = 4770 (0x12a2), region = 104 }
  0x19   : > { %5525 = dma.done.wait (%p5119_p2), [#allocation3], 768  }
  0x1a   : > { %5527 = vsyncadd (%p5119_p2), [#allocation3], 4294966528 }
  0x1b   : > { %5529 = dma.done.wait (%p5119_p2), [#allocation5], 4096  }
  0x1c   : > { %5531 = vsyncadd (%p5119_p2), [#allocation5], 4294963200  ;;  %p681_p6 = scmp.lt.s32.totalorder %s4676_s28, 1  ;;  %v703_v0 = vld [vmem:[#allocation2 + $0x28] sm:$0xff]  ;;  %v702_v1 = vld [vmem:[#allocation2 + $0x20] sm:$0xff]  ;;  %s7830_s4 = sld [smem:[#allocation8_spill]] }
  0x1d   : > { %743 = vmatpush.msra.mxu0 %v703_v0  ;;  %5084 = vmatpush.msra.mxu1 %v703_v0  ;;  %v701_v2 = vld [vmem:[#allocation2 + $0x18] sm:$0xff]  ;;  %v700_v3 = vld [vmem:[#allocation2 + $0x10] sm:$0xff]  ;;  %v699_v4 = vld [vmem:[#allocation2 + $0x8] sm:$0xff]  ;;  %vm711_vm0 = vcmask 392192   ;;  %s7831_s23 = sld [smem:[#allocation10_spill]]  ;;  %vm773_vm1 = vcmask 523264  }
  0x1e   : > { %s7856_s28 = smov (!%p681_p6, %s4676_s28), 1  ;;  %5085 = vmatpush.msra.mxu3 %v703_v0  ;;  %v698_v5 = vld [vmem:[#allocation2] sm:$0xff]  ;;  %vm792_vm2 = vcmask 517120   ;;  %v5542_v41 = vmov 64.0   ;;  %s7832_s26 = sld [smem:[#allocation11_spill]] }
  0x1f   : > { %s5103_s3 = smul.u32 56, %s7856_s28  ;;  %744 = vmatpush.msra.mxu0 %v702_v1  ;;  %5086 = vmatpush.msra.mxu1 %v702_v1  ;;  %5164 = vrcp.f32 %v5542_v41  ;;  %s7833_s0 = sld [smem:[#allocation12_spill]] }
  0x20   : > { %5087 = vmatpush.msra.mxu3 %v702_v1  ;;  %s7834_s25 = sld [smem:[#allocation13_spill]] }
  0x21   : > { %745 = vmatpush.msra.mxu0 %v701_v2  ;;  %5088 = vmatpush.msra.mxu1 %v701_v2  ;;  %s7772_s5 = scalar_lea.vmem %s7819_s21, %s5103_s3 }
  0x22   : > { %s685_s30 = scalar_lea.vmem %s7830_s4, %s5103_s3  ;;  %5089 = vmatpush.msra.mxu3 %v701_v2 }
  0x23   : > { %746 = vmatpush.msra.mxu0 %v700_v3  ;;  %5090 = vmatpush.msra.mxu1 %v700_v3  ;;  %v691_v6 = vld [vmem:[%s685_s30] sm:$0xff]  ;;  %v697_v8 = vld [vmem:[%s685_s30 + $0x30] sm:$0x3]  ;;  %v692_v9 = vld [vmem:[%s685_s30 + $0x8] sm:$0xff] }
  0x24   : > { %v695_v7 = vld [vmem:[%s685_s30 + $0x20] sm:$0xff]  ;;  %5091 = vmatpush.msra.mxu3 %v700_v3  ;;  %v696_v10 = vld [vmem:[%s685_s30 + $0x28] sm:$0xff]  ;;  %v693_v11 = vld [vmem:[%s685_s30 + $0x10] sm:$0xff] }
  0x25   : > { %747 = vmatpush.msra.mxu0 %v699_v4  ;;  %5092 = vmatpush.msra.mxu1 %v699_v4  ;;  %v694_v12 = vld [vmem:[%s685_s30 + $0x18] sm:$0xff]  ;;  %v708_v13 = vld [vmem:[%s7831_s23 + $0x20] sm:$0xff]  ;;  %v705_v21 = vld [vmem:[%s7831_s23 + $0x8] sm:$0xff]  ;;  %v5165_v42 = vpop.eup %5164 }
  0x26   : > { %5093 = vmatpush.msra.mxu3 %v699_v4  ;;  %v704_v14 = vld [vmem:[%s7831_s23] sm:$0xff]  ;;  %v709_v22 = vld [vmem:[%s7831_s23 + $0x28] sm:$0xff]  ;;  %v706_v29 = vld [vmem:[%s7831_s23 + $0x10] sm:$0xff]  ;;  %v797_v43 = vmul.f32 64.0, %v5165_v42  ;;  %vm801_vm3 = vweird.f32 %v5165_v42 }
  0x27   : > { %748 = vmatpush.msra.mxu0 %v698_v5  ;;  %5094 = vmatpush.msra.mxu1 %v698_v5  ;;  %v707_v33 = vld [vmem:[%s7831_s23 + $0x18] sm:$0xff]  ;;  %v710_v36 = vld [vmem:[%s7831_s23 + $0x30] sm:$0x3] }
  0x28   : > { %4687 = vmatmul.msk.f32.vlgmr.msra.gmra.mxu0 %vm711_vm0, %v691_v6  ;;  %4691 = vmatmul.msk.f32.vlgmr.msra.gmra.mxu1 %vm711_vm0, %v695_v7  ;;  %v798_v44 = vsub.f32 1.0, %v797_v43  ;;  %v5780_v43 = vld [vmem:[%s7833_s0] ss:$0 sm:$0xff] }
  0x29   : > { %5095 = vmatpush.msra.mxu3 %v698_v5 }
  0x2a   : > { %4693 = vmatmul.msk.f32.vlgmr.msra.gmra.mxu3 %vm711_vm0, %v697_v8  ;;  %v799_v45 = vmul.f32 %v5165_v42, %v798_v44 }
  0x2c   : > { %v800_v46 = vadd.f32 %v5165_v42, %v799_v45 }
  0x2e   : > { %v5723_v47 = vsel %vm801_vm3, %v5165_v42, %v800_v46 }
  0x30   : > { %4688 = vmatmul.msk.f32.gmra.mxu0 %vm711_vm0, %v692_v9  ;;  %4692 = vmatmul.msk.f32.gmra.mxu1 %vm711_vm0, %v696_v10 }
  0x38   : > { %4689 = vmatmul.msk.f32.gmra.mxu0 %vm711_vm0, %v693_v11 }
  0x40   : > { %4690 = vmatmul.msk.f32.gmra.mxu0 %vm711_vm0, %v694_v12 }
  0xa5   : > { %v750_v15 = vpop.f32.mrf.mxu0  ;;  %v762_v16 = vpop.f32.mrf.mxu1 }
  0xa6   : > { %v763_v17 = vadd.f32 %v762_v16, %v708_v13  ;;  %v751_v18 = vadd.f32 %v750_v15, %v704_v14 }
  0xa8   : > { %v786_v19 = vsel %vm773_vm1, %v763_v17, 0.0  ;;  %v774_v20 = vsel %vm773_vm1, %v751_v18, 0.0 }
  0xa9   : > { %787 = vadd.xlane.f32.xlu2 %v786_v19  ;;  %775 = vadd.xlane.f32.xlu0 %v774_v20 }
  0xad   : > { %v753_v23 = vpop.f32.mrf.mxu0  ;;  %v765_v24 = vpop.f32.mrf.mxu1 }
  0xae   : > { %v754_v25 = vadd.f32 %v753_v23, %v705_v21  ;;  %v766_v26 = vadd.f32 %v765_v24, %v709_v22  ;;  %v768_v37 = vpop.f32.mrf.mxu3 }
  0xaf   : > { %v769_v39 = vadd.f32 %v768_v37, %v710_v36 }
  0xb0   : > { %v789_v27 = vsel %vm773_vm1, %v766_v26, 0.0  ;;  %v777_v28 = vsel %vm773_vm1, %v754_v25, 0.0 }
  0xb1   : > { %790 = vadd.xlane.f32.xlu2 %v789_v27  ;;  %778 = vadd.xlane.f32.xlu0 %v777_v28  ;;  %v793_v40 = vsel %vm792_vm2, %v769_v39, 0.0 }
  0xb5   : > { %v756_v30 = vpop.f32.mrf.mxu0 }
  0xb6   : > { %v757_v31 = vadd.f32 %v756_v30, %v706_v29 }
  0xb8   : > { %v780_v32 = vsel %vm773_vm1, %v757_v31, 0.0 }
  0xb9   : > { %781 = vadd.xlane.f32.xlu1 %v780_v32 }
  0xbd   : > { %v759_v34 = vpop.f32.mrf.mxu0 }
  0xbe   : > { %v760_v35 = vadd.f32 %v759_v34, %v707_v33 }
  0xc0   : > { %v783_v38 = vsel %vm773_vm1, %v760_v35, 0.0 }
  0xc1   : > { %784 = vadd.xlane.f32.xlu1 %v783_v38 }
  0xc9   : > { %794 = vadd.xlane.f32.xlu1 %v793_v40 }
 0x11c   : > { %v776_v48 = vpop.xlane.xlu0 %775  ;;  %v788_v52 = vpop.xlane.xlu2 %787 }
 0x11d   : > { %v803_v49 = vmul.f32 %v5723_v47, %v776_v48  ;;  %v807_v56 = vmul.f32 %v5723_v47, %v788_v52 }
 0x11f   : > { %v5726_v50 = vsub.f32 %v751_v18, %v803_v49  ;;  %v5737_v59 = vsub.f32 %v763_v17, %v807_v56 }
 0x121   : > { %v817_v51 = vmul.f32 %v5726_v50, %v5726_v50  ;;  %v821_v2 = vmul.f32 %v5737_v59, %v5737_v59 }
 0x123   : > { %v824_v53 = vsel %vm773_vm1, %v817_v51, 0.0  ;;  %v836_v6 = vsel %vm773_vm1, %v821_v2, 0.0 }
 0x124   : > { %825 = vadd.xlane.f32.xlu0 %v824_v53  ;;  %v779_v54 = vpop.xlane.xlu0 %778  ;;  %v791_v61 = vpop.xlane.xlu2 %790 }
 0x125   : > { %v804_v55 = vmul.f32 %v5723_v47, %v779_v54  ;;  %v808_v0 = vmul.f32 %v5723_v47, %v791_v61 }
 0x127   : > { %v5733_v57 = vsub.f32 %v754_v25, %v804_v55  ;;  %v5748_v4 = vsub.f32 %v766_v26, %v808_v0 }
 0x129   : > { %v818_v58 = vmul.f32 %v5733_v57, %v5733_v57  ;;  %v822_v10 = vmul.f32 %v5748_v4, %v5748_v4 }
 0x12b   : > { %v827_v60 = vsel %vm773_vm1, %v818_v58, 0.0  ;;  %v839_v13 = vsel %vm773_vm1, %v822_v10, 0.0 }
 0x12c   : > { %v782_v62 = vpop.xlane.xlu1 %781  ;;  %828 = vadd.xlane.f32.xlu2 %v827_v60 }
 0x12d   : > { %v805_v63 = vmul.f32 %v5723_v47, %v782_v62 }
 0x12f   : > { %v5742_v1 = vsub.f32 %v757_v31, %v805_v63 }
 0x131   : > { %v819_v3 = vmul.f32 %v5742_v1, %v5742_v1 }
 0x133   : > { %v830_v5 = vsel %vm773_vm1, %v819_v3, 0.0 }
 0x134   : > { %v785_v7 = vpop.xlane.xlu1 %784  ;;  %831 = vadd.xlane.f32.xlu0 %v830_v5  ;;  %837 = vadd.xlane.f32.xlu2 %v836_v6 }
 0x135   : > { %v806_v8 = vmul.f32 %v5723_v47, %v785_v7 }
 0x137   : > { %v5753_v9 = vsub.f32 %v760_v35, %v806_v8 }
 0x139   : > { %v820_v11 = vmul.f32 %v5753_v9, %v5753_v9 }
 0x13b   : > { %v833_v12 = vsel %vm773_vm1, %v820_v11, 0.0 }
 0x13c   : > { %834 = vadd.xlane.f32.xlu1 %v833_v12  ;;  %v795_v14 = vpop.xlane.xlu1 %794  ;;  %840 = vadd.xlane.f32.xlu0 %v839_v13 }
 0x13d   : > { %v809_v15 = vmul.f32 %v5723_v47, %v795_v14 }
 0x13f   : > { %v5762_v16 = vsub.f32 %v769_v39, %v809_v15  ;;  %v5774_v39 = vld [vmem:[%s7832_s26] ss:$0 sm:$0xff] }
 0x141   : > { %v823_v17 = vmul.f32 %v5762_v16, %v5762_v16 }
 0x143   : > { %v842_v18 = vsel %vm792_vm2, %v823_v17, 0.0 }
 0x144   : > { %843 = vadd.xlane.f32.xlu1 %v842_v18 }
 0x197   : > { %v826_v19 = vpop.xlane.xlu0 %825 }
 0x198   : > { %v845_v20 = vmul.f32 %v826_v19, %v5723_v47 }
 0x19a   : > { %v852_v21 = vadd.f32 1e-05, %v845_v20 }
 0x19c   : > { %5166 = vrsqrt.f32 %v852_v21  ;;  %vm865_vm5 = vweird.f32 %v852_v21 }
 0x19f   : > { %v829_v22 = vpop.xlane.xlu2 %828 }
 0x1a0   : > { %v846_v23 = vmul.f32 %v829_v22, %v5723_v47 }
 0x1a2   : > { %v5167_v24 = vpop.eup %5166  ;;  %v853_v25 = vadd.f32 1e-05, %v846_v23 }
 0x1a3   : > { %v860_v26 = vmul.f32 %v5167_v24, %v852_v21  ;;  %vm866_vm4 = vweird.f32 %v5167_v24 }
 0x1a4   : > { %5168 = vrsqrt.f32 %v853_v25  ;;  %vm867_vm6 = vmor %vm865_vm5, %vm866_vm4  ;;  %vm875_vm8 = vweird.f32 %v853_v25 }
 0x1a5   : > { %v861_v27 = vmul.f32 %v5167_v24, %v860_v26 }
 0x1a7   : > { %v862_v28 = vmul.f32 0.5, %v861_v27  ;;  %v838_v29 = vpop.xlane.xlu2 %837  ;;  %v832_v30 = vpop.xlane.xlu0 %831 }
 0x1a8   : > { %v849_v31 = vmul.f32 %v838_v29, %v5723_v47  ;;  %v847_v32 = vmul.f32 %v832_v30, %v5723_v47 }
 0x1a9   : > { %v863_v33 = vsub.f32 1.5, %v862_v28 }
 0x1aa   : > { %v5169_v34 = vpop.eup %5168  ;;  %v856_v35 = vadd.f32 1e-05, %v849_v31  ;;  %v854_v36 = vadd.f32 1e-05, %v847_v32 }
 0x1ab   : > { %v864_v37 = vmul.f32 %v5167_v24, %v863_v33  ;;  %v870_v38 = vmul.f32 %v5169_v34, %v853_v25  ;;  %vm876_vm7 = vweird.f32 %v5169_v34 }
 0x1ac   : > { %5170 = vrsqrt.f32 %v856_v35  ;;  %vm877_vm9 = vmor %vm875_vm8, %vm876_vm7  ;;  %vm905_vm12 = vweird.f32 %v856_v35  ;;  %vm885_vm14 = vweird.f32 %v854_v36 }
 0x1ad   : > { %v868_v40 = vsel %vm867_vm6, %v5167_v24, %v864_v37  ;;  %v871_v41 = vmul.f32 %v5169_v34, %v870_v38  ;;  %5172 = vrsqrt.f32 %v854_v36 }
 0x1ae   : > { %v929_v42 = vmul.f32 %v868_v40, %v5726_v50 }
 0x1af   : > { %v872_v44 = vmul.f32 0.5, %v871_v41  ;;  %v835_v45 = vpop.xlane.xlu1 %834  ;;  %v841_v46 = vpop.xlane.xlu0 %840 }
 0x1b0   : > { %v848_v48 = vmul.f32 %v835_v45, %v5723_v47  ;;  %v850_v49 = vmul.f32 %v841_v46, %v5723_v47  ;;  %v939_v51 = vmul.f32 %v5774_v39, %v929_v42 }
 0x1b1   : > { %v873_v52 = vsub.f32 1.5, %v872_v44 }
 0x1b2   : > { %v5171_v53 = vpop.eup %5170  ;;  %v855_v54 = vadd.f32 1e-05, %v848_v48  ;;  %v5785_v55 = vadd.f32 1e-05, %v850_v49  ;;  %v5788_v50 = vadd.f32 %v5780_v43, %v939_v51 }
 0x1b3   : > { %v5173_v56 = vpop.eup %5172  ;;  %v874_v58 = vmul.f32 %v5169_v34, %v873_v52  ;;  %v900_v60 = vmul.f32 %v5171_v53, %v856_v35  ;;  %vm906_vm10 = vweird.f32 %v5171_v53 }
 0x1b4   : > { %v880_v61 = vmul.f32 %v5173_v56, %v854_v36  ;;  %5174 = vrsqrt.f32 %v855_v54  ;;  %v958_v2 = vsel %vm773_vm1, %v5788_v50, 0.0  ;;  %vm886_vm11 = vweird.f32 %v5173_v56  ;;  %vm907_vm13 = vmor %vm905_vm12, %vm906_vm10 }
 0x1b5   : > { %v878_v62 = vsel %vm877_vm9, %v5169_v34, %v874_v58  ;;  %v901_v63 = vmul.f32 %v5171_v53, %v900_v60  ;;  %5176 = vrsqrt.f32 %v5785_v55  ;;  %959 = vadd.xlane.f32.xlu2 %v958_v2  ;;  %vm887_vm15 = vmor %vm885_vm14, %vm886_vm11  ;;  %vm895_vm4 = vweird.f32 %v855_v54 }
 0x1b6   : > { %v881_v0 = vmul.f32 %v5173_v56, %v880_v61  ;;  %v930_v3 = vmul.f32 %v878_v62, %v5733_v57  ;;  %vm915_vm6 = vweird.f32 %v5785_v55 }
 0x1b7   : > { %v902_v5 = vmul.f32 0.5, %v901_v63  ;;  %v844_v6 = vpop.xlane.xlu1 %843 }
 0x1b8   : > { %v882_v7 = vmul.f32 0.5, %v881_v0  ;;  %v851_v8 = vmul.f32 %v844_v6, %v5723_v47  ;;  %v940_v10 = vmul.f32 %v5774_v39, %v930_v3 }
 0x1b9   : > { %v903_v11 = vsub.f32 1.5, %v902_v5 }
 0x1ba   : > { %v5175_v12 = vpop.eup %5174  ;;  %v883_v13 = vsub.f32 1.5, %v882_v7  ;;  %v858_v14 = vadd.f32 1e-05, %v851_v8  ;;  %v5797_v15 = vadd.f32 %v5780_v43, %v940_v10 }
 0x1bb   : > { %v5177_v17 = vpop.eup %5176  ;;  %v904_v18 = vmul.f32 %v5171_v53, %v903_v11  ;;  %v890_v57 = vmul.f32 %v5175_v12, %v855_v54  ;;  %vm896_vm0 = vweird.f32 %v5175_v12 }
 0x1bc   : > { %v884_v19 = vmul.f32 %v5173_v56, %v883_v13  ;;  %v910_v20 = vmul.f32 %v5177_v17, %v5785_v55  ;;  %5178 = vrsqrt.f32 %v858_v14  ;;  %v961_v23 = vsel %vm773_vm1, %v5797_v15, 0.0  ;;  %vm897_vm5 = vmor %vm895_vm4, %vm896_vm0 }
 0x1bd   : > { %v908_v21 = vsel %vm907_vm13, %v5171_v53, %v904_v18  ;;  %v891_v22 = vmul.f32 %v5175_v12, %v890_v57  ;;  %962 = vadd.xlane.f32.xlu0 %v961_v23  ;;  %vm916_vm3 = vweird.f32 %v5177_v17  ;;  %vm925_vm9 = vweird.f32 %v858_v14 }
 0x1be   : > { %v888_v24 = vsel %vm887_vm15, %v5173_v56, %v884_v19  ;;  %v911_v25 = vmul.f32 %v5177_v17, %v910_v20  ;;  %v933_v26 = vmul.f32 %v908_v21, %v5737_v59  ;;  %vm917_vm7 = vmor %vm915_vm6, %vm916_vm3 }
 0x1bf   : > { %v892_v27 = vmul.f32 0.5, %v891_v22  ;;  %v931_v28 = vmul.f32 %v888_v24, %v5742_v1 }
 0x1c0   : > { %v912_v29 = vmul.f32 0.5, %v911_v25  ;;  %v943_v30 = vmul.f32 %v5774_v39, %v933_v26 }
 0x1c1   : > { %v893_v31 = vsub.f32 1.5, %v892_v27  ;;  %v941_v32 = vmul.f32 %v5774_v39, %v931_v28 }
 0x1c2   : > { %v5179_v33 = vpop.eup %5178  ;;  %v913_v34 = vsub.f32 1.5, %v912_v29  ;;  %v5807_v35 = vadd.f32 %v5780_v43, %v943_v30 }
 0x1c3   : > { %v894_v36 = vmul.f32 %v5175_v12, %v893_v31  ;;  %v920_v37 = vmul.f32 %v5179_v33, %v858_v14  ;;  %v5810_v59 = vadd.f32 %v5780_v43, %v941_v32  ;;  %vm926_vm8 = vweird.f32 %v5179_v33 }
 0x1c4   : > { %v914_v1 = vmul.f32 %v5177_v17, %v913_v34  ;;  %v970_v38 = vsel %vm773_vm1, %v5807_v35, 0.0  ;;  %vm927_vm10 = vmor %vm925_vm9, %vm926_vm8 }
 0x1c5   : > { %v898_v40 = vsel %vm897_vm5, %v5175_v12, %v894_v36  ;;  %v921_v41 = vmul.f32 %v5179_v33, %v920_v37  ;;  %v964_v42 = vsel %vm773_vm1, %v5810_v59, 0.0  ;;  %971 = vadd.xlane.f32.xlu0 %v970_v38  ;;  %v1139_v36 = vld [vmem:[%s7805_s7 + $0x38] sm:$0xff]  ;;  %v1138_v38 = vld [vmem:[%s7805_s7 + $0x30] sm:$0xff] }
 0x1c6   : > { %v918_v44 = vsel %vm917_vm7, %v5177_v17, %v914_v1  ;;  %965 = vadd.xlane.f32.xlu1 %v964_v42  ;;  %v932_v45 = vmul.f32 %v898_v40, %v5753_v9  ;;  %v1210_v37 = vld [vmem:[%s7806_s8 + $0x38] sm:$0xff]  ;;  %1173 = vmatpush.msrb.mxu1 %v1139_v36  ;;  %v1209_v40 = vld [vmem:[%s7806_s8 + $0x30] sm:$0xff]  ;;  %v1137_v42 = vld [vmem:[%s7805_s7 + $0x28] sm:$0xff] }
 0x1c7   : > { %v922_v46 = vmul.f32 0.5, %v921_v41  ;;  %v934_v48 = vmul.f32 %v918_v44, %v5748_v4  ;;  %v1260_v1 = vld [vmem:[%s7807_s9 + $0x38] sm:$0xff]  ;;  %1223 = vmatpush.msra.mxu2 %v1210_v37  ;;  %v1259_v41 = vld [vmem:[%s7807_s9 + $0x30] sm:$0xff]  ;;  %v1208_v44 = vld [vmem:[%s7806_s8 + $0x28] sm:$0xff] }
 0x1c8   : > { %v942_v49 = vmul.f32 %v5774_v39, %v932_v45  ;;  %1273 = vmatpush.msrb.mxu3 %v1260_v1  ;;  %1174 = vmatpush.msrb.mxu1 %v1138_v38  ;;  %v1258_v45 = vld [vmem:[%s7807_s9 + $0x28] sm:$0xff] }
 0x1c9   : > { %v923_v51 = vsub.f32 1.5, %v922_v46  ;;  %v944_v52 = vmul.f32 %v5774_v39, %v934_v48  ;;  %1224 = vmatpush.msra.mxu2 %v1209_v40  ;;  %v1136_v46 = vld [vmem:[%s7805_s7 + $0x20] sm:$0xff] }
 0x1ca   : > { %v5822_v53 = vadd.f32 %v5780_v43, %v942_v49  ;;  %1274 = vmatpush.msrb.mxu3 %v1259_v41  ;;  %1175 = vmatpush.msrb.mxu1 %v1137_v42  ;;  %v1207_v48 = vld [vmem:[%s7806_s8 + $0x20] sm:$0xff] }
 0x1cb   : > { %v924_v54 = vmul.f32 %v5179_v33, %v923_v51  ;;  %v5825_v55 = vadd.f32 %v5780_v43, %v944_v52  ;;  %1225 = vmatpush.msra.mxu2 %v1208_v44  ;;  %v1257_v49 = vld [vmem:[%s7807_s9 + $0x20] sm:$0xff]  ;;  %v1135_v51 = vld [vmem:[%s7805_s7 + $0x18] sm:$0xff] }
 0x1cc   : > { %v967_v9 = vsel %vm773_vm1, %v5822_v53, 0.0  ;;  %1275 = vmatpush.msrb.mxu3 %v1258_v45  ;;  %1176 = vmatpush.msrb.mxu1 %v1136_v46  ;;  %v1206_v52 = vld [vmem:[%s7806_s8 + $0x18] sm:$0xff] }
 0x1cd   : > { %v928_v56 = vsel %vm927_vm10, %v5179_v33, %v924_v54  ;;  %968 = vadd.xlane.f32.xlu2 %v967_v9  ;;  %v973_v4 = vsel %vm773_vm1, %v5825_v55, 0.0  ;;  %1226 = vmatpush.msra.mxu2 %v1207_v48  ;;  %v1256_v54 = vld [vmem:[%s7807_s9 + $0x18] sm:$0xff]  ;;  %v1134_v9 = vld [vmem:[%s7805_s7 + $0x10] sm:$0xff] }
 0x1ce   : > { %974 = vadd.xlane.f32.xlu1 %v973_v4  ;;  %v935_v58 = vmul.f32 %v928_v56, %v5762_v16  ;;  %1276 = vmatpush.msrb.mxu3 %v1257_v49  ;;  %v1205_v56 = vld [vmem:[%s7806_s8 + $0x10] sm:$0xff] }
 0x1cf   : > { %1177 = vmatpush.msrb.mxu1 %v1135_v51  ;;  %1227 = vmatpush.msra.mxu2 %v1206_v52  ;;  %v1255_v4 = vld [vmem:[%s7807_s9 + $0x10] sm:$0xff] }
 0x1d0   : > { %v945_v60 = vmul.f32 %v5774_v39, %v935_v58  ;;  %1277 = vmatpush.msrb.mxu3 %v1256_v54  ;;  %v1133_v58 = vld [vmem:[%s7805_s7 + $0x8] sm:$0xff] }
 0x1d1   : > { %1178 = vmatpush.msrb.mxu1 %v1134_v9  ;;  %1228 = vmatpush.msra.mxu2 %v1205_v56 }
 0x1d2   : > { %v5834_v61 = vadd.f32 %v5780_v43, %v945_v60  ;;  %1278 = vmatpush.msrb.mxu3 %v1255_v4  ;;  %v1204_v60 = vld [vmem:[%s7806_s8 + $0x8] sm:$0xff] }
 0x1d3   : > { %1179 = vmatpush.msrb.mxu1 %v1133_v58  ;;  %1229 = vmatpush.msra.mxu2 %v1204_v60 }
 0x1d4   : > { %v976_v62 = vsel %vm792_vm2, %v5834_v61, 0.0 }
 0x1d5   : > { %977 = vadd.xlane.f32.xlu0 %v976_v62  ;;  %v1254_v62 = vld [vmem:[%s7807_s9 + $0x8] sm:$0xff] }
 0x1d6   : > { %1279 = vmatpush.msrb.mxu3 %v1254_v62 }
 0x228   : > { %v960_v63 = vpop.xlane.xlu2 %959 }
 0x229   : > { %v979_v0 = vmul.f32 %v960_v63, %v5723_v47  ;;  %v1132_v63 = vld [vmem:[%s7805_s7] sm:$0xff] }
 0x22a   : > { %1180 = vmatpush.msrb.mxu1 %v1132_v63 }
 0x22b   : > { %v5840_v2 = vsub.f32 %v5788_v50, %v979_v0  ;;  %v1203_v0 = vld [vmem:[%s7806_s8] sm:$0xff] }
 0x22c   : > { %1230 = vmatpush.msra.mxu2 %v1203_v0 }
 0x22d   : > { %v993_v3 = vmul.f32 %v5840_v2, %v5840_v2 }
 0x22f   : > { %v1000_v16 = vsel %vm773_vm1, %v993_v3, 0.0  ;;  %v1253_v3 = vld [vmem:[%s7807_s9] sm:$0xff] }
 0x230   : > { %v963_v5 = vpop.xlane.xlu0 %962  ;;  %1001 = vadd.xlane.f32.xlu2 %v1000_v16  ;;  %1280 = vmatpush.msrb.mxu3 %v1253_v3 }
 0x231   : > { %v980_v39 = vmul.f32 %v963_v5, %v5723_v47 }
 0x233   : > { %v5847_v43 = vsub.f32 %v5797_v15, %v980_v39 }
 0x235   : > { %v994_v6 = vmul.f32 %v5847_v43, %v5847_v43 }
 0x237   : > { %v1003_v7 = vsel %vm773_vm1, %v994_v6, 0.0 }
 0x238   : > { %1004 = vadd.xlane.f32.xlu1 %v1003_v7  ;;  %v972_v10 = vpop.xlane.xlu0 %971 }
 0x239   : > { %v966_v8 = vpop.xlane.xlu1 %965  ;;  %v983_v12 = vmul.f32 %v972_v10, %v5723_v47 }
 0x23a   : > { %v981_v11 = vmul.f32 %v966_v8, %v5723_v47 }
 0x23b   : > { %v5858_v14 = vsub.f32 %v5807_v35, %v983_v12 }
 0x23c   : > { %v5855_v13 = vsub.f32 %v5810_v59, %v981_v11 }
 0x23d   : > { %v997_v18 = vmul.f32 %v5858_v14, %v5858_v14 }
 0x23e   : > { %v995_v17 = vmul.f32 %v5855_v13, %v5855_v13 }
 0x23f   : > { %v1012_v20 = vsel %vm773_vm1, %v997_v18, 0.0 }
 0x240   : > { %v969_v57 = vpop.xlane.xlu2 %968  ;;  %v1006_v19 = vsel %vm773_vm1, %v995_v17, 0.0  ;;  %1013 = vadd.xlane.f32.xlu1 %v1012_v20 }
 0x241   : > { %v982_v21 = vmul.f32 %v969_v57, %v5723_v47  ;;  %1007 = vadd.xlane.f32.xlu2 %v1006_v19  ;;  %v975_v22 = vpop.xlane.xlu1 %974 }
 0x242   : > { %v984_v23 = vmul.f32 %v975_v22, %v5723_v47 }
 0x243   : > { %v5869_v24 = vsub.f32 %v5822_v53, %v982_v21 }
 0x244   : > { %v5872_v25 = vsub.f32 %v5825_v55, %v984_v23 }
 0x245   : > { %v996_v26 = vmul.f32 %v5869_v24, %v5869_v24 }
 0x246   : > { %v998_v27 = vmul.f32 %v5872_v25, %v5872_v25 }
 0x247   : > { %v1009_v28 = vsel %vm773_vm1, %v996_v26, 0.0 }
 0x248   : > { %1010 = vadd.xlane.f32.xlu0 %v1009_v28  ;;  %v1015_v29 = vsel %vm773_vm1, %v998_v27, 0.0  ;;  %v978_v30 = vpop.xlane.xlu0 %977 }
 0x249   : > { %1016 = vadd.xlane.f32.xlu2 %v1015_v29  ;;  %v985_v31 = vmul.f32 %v978_v30, %v5723_v47  ;;  %v5968_v29 = vld [vmem:[%s7834_s25] ss:$0 sm:$0xff] }
 0x24b   : > { %v5882_v32 = vsub.f32 %v5834_v61, %v985_v31 }
 0x24d   : > { %v999_v33 = vmul.f32 %v5882_v32, %v5882_v32 }
 0x24f   : > { %v1018_v34 = vsel %vm792_vm2, %v999_v33, 0.0 }
 0x250   : > { %1019 = vadd.xlane.f32.xlu0 %v1018_v34  ;;  %v5974_v34 = vld [vmem:[%s7804_s6] ss:$0 sm:$0xff] }
 0x2a3   : > { %v1002_v16 = vpop.xlane.xlu2 %1001 }
 0x2a4   : > { %v1021_v5 = vmul.f32 %v1002_v16, %v5723_v47 }
 0x2a6   : > { %v1028_v39 = vadd.f32 1e-05, %v1021_v5 }
 0x2a8   : > { %5180 = vrsqrt.f32 %v1028_v39  ;;  %vm1041_vm12 = vweird.f32 %v1028_v39 }
 0x2ab   : > { %v1005_v6 = vpop.xlane.xlu1 %1004 }
 0x2ac   : > { %v1022_v7 = vmul.f32 %v1005_v6, %v5723_v47 }
 0x2ae   : > { %v1029_v8 = vadd.f32 1e-05, %v1022_v7  ;;  %v5181_v10 = vpop.eup %5180 }
 0x2af   : > { %v1036_v11 = vmul.f32 %v5181_v10, %v1028_v39  ;;  %vm1042_vm11 = vweird.f32 %v5181_v10 }
 0x2b0   : > { %5182 = vrsqrt.f32 %v1029_v8  ;;  %vm1043_vm13 = vmor %vm1041_vm12, %vm1042_vm11  ;;  %vm1051_vm15 = vweird.f32 %v1029_v8 }
 0x2b1   : > { %v1037_v12 = vmul.f32 %v5181_v10, %v1036_v11 }
 0x2b3   : > { %v1014_v18 = vpop.xlane.xlu1 %1013  ;;  %v1038_v57 = vmul.f32 0.5, %v1037_v12 }
 0x2b4   : > { %v1008_v17 = vpop.xlane.xlu2 %1007  ;;  %v1025_v20 = vmul.f32 %v1014_v18, %v5723_v47  ;;  %v4759_v18 = vld [vmem:[%s7806_s8 + $0x70] sm:$0xff] }
 0x2b5   : > { %v1023_v19 = vmul.f32 %v1008_v17, %v5723_v47  ;;  %v1039_v22 = vsub.f32 1.5, %v1038_v57  ;;  %v4760_v17 = vld [vmem:[%s7806_s8 + $0x78] sm:$0xff] }
 0x2b6   : > { %v5183_v21 = vpop.eup %5182  ;;  %v5963_v26 = vadd.f32 1e-05, %v1025_v20  ;;  %1611 = vmatpush.msra.mxu3 %v4760_v17 }
 0x2b7   : > { %v1030_v23 = vadd.f32 1e-05, %v1023_v19  ;;  %v1046_v27 = vmul.f32 %v5183_v21, %v1029_v8  ;;  %v1040_v28 = vmul.f32 %v5181_v10, %v1039_v22  ;;  %vm1052_vm14 = vweird.f32 %v5183_v21 }
 0x2b8   : > { %vm1053_vm0 = vmor %vm1051_vm15, %vm1052_vm14  ;;  %1612 = vmatpush.msra.mxu3 %v4759_v18  ;;  %vm1081_vm10 = vweird.f32 %v5963_v26 }
 0x2b9   : > { %5184 = vrsqrt.f32 %v1030_v23  ;;  %v1047_v30 = vmul.f32 %v5183_v21, %v1046_v27  ;;  %v1044_v31 = vsel %vm1043_vm13, %v5181_v10, %v1040_v28  ;;  %vm1061_vm4 = vweird.f32 %v1030_v23 }
 0x2ba   : > { %5186 = vrsqrt.f32 %v5963_v26  ;;  %v1105_v36 = vmul.f32 %v1044_v31, %v5840_v2 }
 0x2bb   : > { %v1011_v33 = vpop.xlane.xlu0 %1010  ;;  %v1048_v37 = vmul.f32 0.5, %v1047_v30 }
 0x2bc   : > { %v1017_v1 = vpop.xlane.xlu2 %1016  ;;  %v1024_v38 = vmul.f32 %v1011_v33, %v5723_v47  ;;  %v1115_v41 = vmul.f32 %v5968_v29, %v1105_v36  ;;  %v4757_v36 = vld [vmem:[%s7806_s8 + $0x60] sm:$0xff] }
 0x2bd   : > { %v1026_v40 = vmul.f32 %v1017_v1, %v5723_v47  ;;  %v1049_v42 = vsub.f32 1.5, %v1048_v37  ;;  %v4756_v1 = vld [vmem:[%s7806_s8 + $0x58] sm:$0xff] }
 0x2be   : > { %v5980_v44 = vadd.f32 1e-05, %v1024_v38  ;;  %v5987_v49 = vadd.f32 %v5974_v34, %v1115_v41 }
 0x2bf   : > { %v5185_v45 = vpop.eup %5184  ;;  %v5982_v46 = vadd.f32 1e-05, %v1026_v40  ;;  %v1050_v2 = vmul.f32 %v5183_v21, %v1049_v42 }
 0x2c0   : > { %v5984_v48 = vpop.eup %5186  ;;  %v1056_v51 = vmul.f32 %v5185_v45, %v1030_v23  ;;  %4694 = vmatmul.msk.f32.vlgmr.msrb.gmra.mxu1 %vm773_vm1, %v5987_v49  ;;  %4701 = vmatmul.msk.f32.vlgmr.msra.gmra.mxu2 %vm773_vm1, %v5987_v49  ;;  %vm1062_vm3 = vweird.f32 %v5185_v45  ;;  %vm1071_vm8 = vweird.f32 %v5980_v44 }
 0x2c1   : > { %v1076_v52 = vmul.f32 %v5984_v48, %v5963_v26  ;;  %5188 = vrsqrt.f32 %v5982_v46  ;;  %v1054_v54 = vsel %vm1053_vm0, %v5183_v21, %v1050_v2  ;;  %4708 = vmatmul.msk.f32.vlgmr.msrb.gmra.mxu3 %vm773_vm1, %v5987_v49  ;;  %vm1063_vm5 = vmor %vm1061_vm4, %vm1062_vm3  ;;  %vm1082_vm7 = vweird.f32 %v5984_v48  ;;  %v4755_v26 = vld [vmem:[%s7806_s8 + $0x50] sm:$0xff] }
 0x2c2   : > { %v1057_v9 = vmul.f32 %v5185_v45, %v1056_v51  ;;  %5190 = vrsqrt.f32 %v5980_v44  ;;  %v1106_v56 = vmul.f32 %v1054_v54, %v5847_v43  ;;  %vm1083_vm11 = vmor %vm1081_vm10, %vm1082_vm7  ;;  %v4754_v51 = vld [vmem:[%s7806_s8 + $0x48] sm:$0xff]  ;;  %vm1091_vm13 = vweird.f32 %v5982_v46 }
 0x2c3   : > { %v1020_v4 = vpop.xlane.xlu0 %1019  ;;  %v1077_v63 = vmul.f32 %v5984_v48, %v1076_v52  ;;  %vm1303_vm4 = vcmask 261120   ;;  %vm1410_vm7 = vcmask 402432  }
 0x2c4   : > { %v1058_v58 = vmul.f32 0.5, %v1057_v9  ;;  %v1027_v60 = vmul.f32 %v1020_v4, %v5723_v47  ;;  %v1116_v62 = vmul.f32 %v5968_v29, %v1106_v56 }
 0x2c5   : > { %v1078_v6 = vmul.f32 0.5, %v1077_v63 }
 0x2c6   : > { %v1059_v0 = vsub.f32 1.5, %v1058_v58  ;;  %v6003_v3 = vadd.f32 1e-05, %v1027_v60  ;;  %v6008_v5 = vadd.f32 %v5974_v34, %v1116_v62 }
 0x2c7   : > { %v6005_v16 = vpop.eup %5188  ;;  %v1079_v19 = vsub.f32 1.5, %v1078_v6 }
 0x2c8   : > { %v5191_v43 = vpop.eup %5190  ;;  %v1060_v39 = vmul.f32 %v5185_v45, %v1059_v0  ;;  %5192 = vrsqrt.f32 %v6003_v3  ;;  %v1086_v7 = vmul.f32 %v6005_v16, %v5982_v46  ;;  %4695 = vmatmul.msk.f32.gmra.mxu1 %vm773_vm1, %v6008_v5  ;;  %4702 = vmatmul.msk.f32.gmra.mxu2 %vm773_vm1, %v6008_v5  ;;  %vm1092_vm12 = vweird.f32 %v6005_v16 }
 0x2c9   : > { %v1066_v8 = vmul.f32 %v5191_v43, %v5980_v44  ;;  %4709 = vmatmul.msk.f32.gmra.mxu3 %vm773_vm1, %v6008_v5  ;;  %vm1072_vm6 = vweird.f32 %v5191_v43  ;;  %v1080_v28 = vmul.f32 %v5984_v48, %v1079_v19  ;;  %vm1093_vm14 = vmor %vm1091_vm13, %vm1092_vm12  ;;  %vm1101_vm0 = vweird.f32 %v6003_v3  ;;  %v5144_v19 = vld [vmem:[%s7810_s12] ss:$0 sm:$0xff] }
 0x2ca   : > { %v1064_v10 = vsel %vm1063_vm5, %v5185_v45, %v1060_v39  ;;  %v1087_v20 = vmul.f32 %v6005_v16, %v1086_v7  ;;  %vm1073_vm9 = vmor %vm1071_vm8, %vm1072_vm6  ;;  %vm1491_vm5 = vcmask 1041408   ;;  %vm1391_vm6 = vcmask 408576  }
 0x2cb   : > { %v1107_v11 = vmul.f32 %v1064_v10, %v5855_v13  ;;  %v1067_v12 = vmul.f32 %v5191_v43, %v1066_v8  ;;  %v4758_v13 = vld [vmem:[%s7806_s8 + $0x68] sm:$0xff]  ;;  %v1084_v40 = vsel %vm1083_vm11, %v5984_v48, %v1080_v28 }
 0x2cc   : > { %1613 = vmatpush.msra.mxu3 %v4758_v13  ;;  %v1088_v30 = vmul.f32 0.5, %v1087_v20  ;;  %v1109_v45 = vmul.f32 %v1084_v40, %v5858_v14  ;;  %v4753_v14 = vld [vmem:[%s7806_s8 + $0x40] sm:$0xff] }
 0x2cd   : > { %v1117_v57 = vmul.f32 %v5968_v29, %v1107_v11  ;;  %v1068_v21 = vmul.f32 0.5, %v1067_v12 }
 0x2ce   : > { %v5193_v22 = vpop.eup %5192  ;;  %1614 = vmatpush.msra.mxu3 %v4757_v36  ;;  %v1089_v41 = vsub.f32 1.5, %v1088_v30  ;;  %v1119_v52 = vmul.f32 %v5968_v29, %v1109_v45 }
 0x2cf   : > { %v6033_v23 = vadd.f32 %v5974_v34, %v1117_v57  ;;  %v1069_v27 = vsub.f32 1.5, %v1068_v21  ;;  %v1096_v33 = vmul.f32 %v5193_v22, %v6003_v3  ;;  %vm1102_vm15 = vweird.f32 %v5193_v22  ;;  %v5143_v57 = vld [vmem:[%s7809_s11] ss:$0 sm:$0xff] }
 0x2d0   : > { %1615 = vmatpush.msra.mxu3 %v4756_v1  ;;  %v6082_v56 = vadd.f32 %v5974_v34, %v1119_v52  ;;  %vm1103_vm3 = vmor %vm1101_vm0, %vm1102_vm15  ;;  %v4744_v52 = vld [vmem:[%s7805_s7 + $0x78] sm:$0xff] }
 0x2d1   : > { %v1070_v31 = vmul.f32 %v5191_v43, %v1069_v27  ;;  %4696 = vmatmul.msk.f32.gmra.mxu1 %vm773_vm1, %v6033_v23  ;;  %4703 = vmatmul.msk.f32.gmra.mxu2 %vm773_vm1, %v6033_v23  ;;  %v1097_v42 = vmul.f32 %v5193_v22, %v1096_v33 }
 0x2d2   : > { %4710 = vmatmul.msk.f32.gmra.mxu3 %vm773_vm1, %v6033_v23 }
 0x2d3   : > { %v1074_v37 = vsel %vm1073_vm9, %v5191_v43, %v1070_v31  ;;  %1616 = vmatpush.msra.mxu3 %v4755_v26  ;;  %v1098_v48 = vmul.f32 0.5, %v1097_v42 }
 0x2d4   : > { %v1108_v38 = vmul.f32 %v1074_v37, %v5869_v24  ;;  %v1090_v24 = vmul.f32 %v6005_v16, %v1089_v41 }
 0x2d5   : > { %1617 = vmatpush.msra.mxu3 %v4754_v51  ;;  %v1099_v9 = vsub.f32 1.5, %v1098_v48  ;;  %v5142_v48 = vld [vmem:[%s7808_s10] ss:$0 sm:$0xff] }
 0x2d6   : > { %v1118_v44 = vmul.f32 %v5968_v29, %v1108_v38  ;;  %v1094_v54 = vsel %vm1093_vm14, %v6005_v16, %v1090_v24 }
 0x2d7   : > { %1618 = vmatpush.msra.mxu3 %v4753_v14  ;;  %v1110_v46 = vmul.f32 %v1094_v54, %v5872_v25  ;;  %v1100_v4 = vmul.f32 %v5193_v22, %v1099_v9  ;;  %v4776_v54 = vld [vmem:[%s7807_s9 + $0x78] sm:$0xff] }
 0x2d8   : > { %v6062_v2 = vadd.f32 %v5974_v34, %v1118_v44 }
 0x2d9   : > { %v1120_v58 = vmul.f32 %v5968_v29, %v1110_v46  ;;  %v1104_v60 = vsel %vm1103_vm3, %v5193_v22, %v1100_v4  ;;  %v4743_v4 = vld [vmem:[%s7805_s7 + $0x70] sm:$0xff] }
 0x2da   : > { %4697 = vmatmul.msk.f32.gmra.mxu1 %vm773_vm1, %v6062_v2  ;;  %4704 = vmatmul.msk.f32.gmra.mxu2 %vm773_vm1, %v6062_v2  ;;  %v1111_v25 = vmul.f32 %v1104_v60, %v5882_v32  ;;  %v4742_v60 = vld [vmem:[%s7805_s7 + $0x68] sm:$0xff] }
 0x2db   : > { %4711 = vmatmul.msk.f32.gmra.mxu3 %vm773_vm1, %v6062_v2  ;;  %v6094_v62 = vadd.f32 %v5974_v34, %v1120_v58  ;;  %v4775_v58 = vld [vmem:[%s7807_s9 + $0x70] sm:$0xff] }
 0x2dc   : > { %v1121_v63 = vmul.f32 %v5968_v29, %v1111_v25  ;;  %v4774_v25 = vld [vmem:[%s7807_s9 + $0x68] sm:$0xff] }
 0x2de   : > { %v6105_v0 = vadd.f32 %v5974_v34, %v1121_v63  ;;  %v4741_v63 = vld [vmem:[%s7805_s7 + $0x60] sm:$0xff] }
 0x2e2   : > { %4698 = vmatmul.msk.f32.gmra.mxu1 %vm773_vm1, %v6082_v56  ;;  %4705 = vmatmul.msk.f32.gmra.mxu2 %vm773_vm1, %v6082_v56 }
 0x2e3   : > { %4712 = vmatmul.msk.f32.gmra.mxu3 %vm773_vm1, %v6082_v56 }
 0x2ea   : > { %4699 = vmatmul.msk.f32.gmra.mxu1 %vm773_vm1, %v6094_v62  ;;  %4706 = vmatmul.msk.f32.gmra.mxu2 %vm773_vm1, %v6094_v62 }
 0x2eb   : > { %4713 = vmatmul.msk.f32.gmra.mxu3 %vm773_vm1, %v6094_v62 }
 0x2f2   : > { %4700 = vmatmul.msk.f32.gmra.mxu1 %vm773_vm1, %v6105_v0  ;;  %4707 = vmatmul.msk.f32.gmra.mxu2 %vm773_vm1, %v6105_v0 }
 0x2f3   : > { %4714 = vmatmul.msk.f32.gmra.mxu3 %vm773_vm1, %v6105_v0 }
 0x2fb   : > { %4762 = vmatmul.msk.f32.vlgmr.msra.gmra.mxu3 %vm773_vm1, %v5987_v49 }
 0x303   : > { %4763 = vmatmul.msk.f32.gmra.mxu3 %vm773_vm1, %v6008_v5 }
 0x30b   : > { %4764 = vmatmul.msk.f32.gmra.mxu3 %vm773_vm1, %v6033_v23 }
 0x313   : > { %4765 = vmatmul.msk.f32.gmra.mxu3 %vm773_vm1, %v6062_v2 }
 0x31b   : > { %4766 = vmatmul.msk.f32.gmra.mxu3 %vm773_vm1, %v6082_v56 }
 0x323   : > { %4767 = vmatmul.msk.f32.gmra.mxu3 %vm773_vm1, %v6094_v62 }
 0x32b   : > { %4768 = vmatmul.msk.f32.gmra.mxu3 %vm773_vm1, %v6105_v0 }
 0x33d   : > { %v1182_v39 = vpop.f32.mrf.mxu1 }
 0x33e   : > { %v1183_v9 = vadd.f32 %v5142_v48, %v1182_v39 }
 0x343   : > { %v1232_v32 = vpop.f32.mrf.mxu2 }
 0x344   : > { %v1282_v29 = vpop.f32.mrf.mxu3  ;;  %v1233_v51 = vadd.f32 %v5143_v57, %v1232_v32  ;;  %v4773_v32 = vld [vmem:[%s7807_s9 + $0x60] sm:$0xff] }
 0x345   : > { %v6127_v8 = vpop.f32.mrf.mxu1  ;;  %v1283_v42 = vadd.f32 %v5144_v19, %v1282_v29 }
 0x34b   : > { %v1235_v34 = vpop.f32.mrf.mxu2 }
 0x34c   : > { %v1285_v3 = vpop.f32.mrf.mxu3  ;;  %v1236_v45 = vadd.f32 %v5143_v57, %v1235_v34 }
 0x34d   : > { %v1286_v38 = vadd.f32 %v5144_v19, %v1285_v3  ;;  %v4740_v3 = vld [vmem:[%s7805_s7 + $0x58] sm:$0xff] }
 0x34e   : > { %v6129_v17 = vpop.f32.mrf.mxu1 }
 0x354   : > { %v1238_v16 = vpop.f32.mrf.mxu2 }
 0x355   : > { %v1288_v43 = vpop.f32.mrf.mxu3  ;;  %v1239_v26 = vadd.f32 %v5143_v57, %v1238_v16  ;;  %v4772_v16 = vld [vmem:[%s7807_s9 + $0x58] sm:$0xff] }
 0x356   : > { %v1289_v1 = vadd.f32 %v5144_v19, %v1288_v43  ;;  %v1186_v43 = vadd.f32 %v5142_v48, %v6127_v8  ;;  %v4770_v8 = vld [vmem:[%s7807_s9 + $0x48] sm:$0xff] }
 0x357   : > { %v6137_v27 = vpop.f32.mrf.mxu1 }
 0x35d   : > { %v1241_v6 = vpop.f32.mrf.mxu2 }
 0x35e   : > { %v1291_v7 = vpop.f32.mrf.mxu3  ;;  %v1242_v40 = vadd.f32 %v5143_v57, %v1241_v6  ;;  %v4739_v6 = vld [vmem:[%s7805_s7 + $0x50] sm:$0xff] }
 0x35f   : > { %v1292_v33 = vadd.f32 %v5144_v19, %v1291_v7  ;;  %v6148_v41 = vpop.f32.mrf.mxu1  ;;  %v4771_v7 = vld [vmem:[%s7807_s9 + $0x50] sm:$0xff] }
 0x365   : > { %v1244_v10 = vpop.f32.mrf.mxu2 }
 0x366   : > { %v1294_v11 = vpop.f32.mrf.mxu3  ;;  %v1245_v36 = vadd.f32 %v5143_v57, %v1244_v10  ;;  %v4738_v10 = vld [vmem:[%s7805_s7 + $0x48] sm:$0xff] }
 0x367   : > { %v1295_v31 = vadd.f32 %v5144_v19, %v1294_v11  ;;  %v1197_v24 = vpop.f32.mrf.mxu1  ;;  %v4737_v11 = vld [vmem:[%s7805_s7 + $0x40] sm:$0xff] }
 0x368   : > { %v1198_v46 = vadd.f32 %v5142_v48, %v1197_v24 }
 0x36d   : > { %v1247_v12 = vpop.f32.mrf.mxu2 }
 0x36e   : > { %v1297_v18 = vpop.f32.mrf.mxu3  ;;  %v1248_v30 = vadd.f32 %v5143_v57, %v1247_v12  ;;  %v4769_v12 = vld [vmem:[%s7807_s9 + $0x40] sm:$0xff] }
 0x36f   : > { %v1298_v28 = vadd.f32 %v5144_v19, %v1297_v18  ;;  %v1200_v29 = vpop.f32.mrf.mxu1 }
 0x370   : > { %v1201_v39 = vadd.f32 %v5142_v48, %v1200_v29 }
 0x375   : > { %v1250_v20 = vpop.f32.mrf.mxu2 }
 0x376   : > { %v1251_v21 = vadd.f32 %v5143_v57, %v1250_v20  ;;  %v1300_v13 = vpop.f32.mrf.mxu3  ;;  %v1189_v57 = vadd.f32 %v5142_v48, %v6129_v17  ;;  %v1192_v20 = vadd.f32 %v5142_v48, %v6137_v27  ;;  %v1195_v17 = vadd.f32 %v5142_v48, %v6148_v41 }
 0x377   : > { %v1301_v22 = vadd.f32 %v5144_v19, %v1300_v13 }
 0x378   : > { %4715 = vmatpush.xpose.msk.msrb.mxu0 %vm1303_vm4, %v1251_v21  ;;  %5096 = vmatpush.xpose.msk.msrb.mxu2 %vm1303_vm4, %v1251_v21  ;;  %v5145_v21 = vld [vmem:[%s7809_s11 + $0x1] ss:$0 sm:$0xff] }
 0x379   : > { %4729 = vmatpush.msk.msra.mxu1 %vm1491_vm5, %v1301_v22 }
 0x37b   : > { %1505 = vmatpush.msra.mxu1 %v1298_v28 }
 0x37c   : > { %4716 = vmatpush.xpose.msk.msrb.mxu0 %vm1303_vm4, %v1248_v30  ;;  %5097 = vmatpush.xpose.msk.msrb.mxu2 %vm1303_vm4, %v1248_v30 }
 0x37d   : > { %1506 = vmatpush.msra.mxu1 %v1295_v31 }
 0x37e   : > { %v6144_v37 = vpop.f32.mrf.mxu3 }
 0x37f   : > { %1507 = vmatpush.msra.mxu1 %v1292_v33 }
 0x380   : > { %4717 = vmatpush.xpose.msk.msrb.mxu0 %vm1303_vm4, %v1245_v36  ;;  %5098 = vmatpush.xpose.msk.msrb.mxu2 %vm1303_vm4, %v1245_v36  ;;  %v1621_v36 = vadd.f32 %v5145_v21, %v6144_v37 }
 0x381   : > { %1508 = vmatpush.msra.mxu1 %v1289_v1 }
 0x383   : > { %1509 = vmatpush.msra.mxu1 %v1286_v38 }
 0x384   : > { %4718 = vmatpush.xpose.msk.msrb.mxu0 %vm1303_vm4, %v1242_v40  ;;  %5099 = vmatpush.xpose.msk.msrb.mxu2 %vm1303_vm4, %v1242_v40 }
 0x385   : > { %1510 = vmatpush.msra.mxu1 %v1283_v42 }
 0x386   : > { %v6152_v44 = vpop.f32.mrf.mxu3 }
 0x387   : > { %v1624_v33 = vadd.f32 %v5145_v21, %v6152_v44 }
 0x388   : > { %4719 = vmatpush.xpose.msk.msrb.mxu0 %vm1303_vm4, %v1239_v26  ;;  %5100 = vmatpush.xpose.msk.msrb.mxu2 %vm1303_vm4, %v1239_v26 }
 0x38c   : > { %4720 = vmatpush.xpose.msk.msrb.mxu0 %vm1303_vm4, %v1236_v45  ;;  %5101 = vmatpush.xpose.msk.msrb.mxu2 %vm1303_vm4, %v1236_v45 }
 0x38e   : > { %v6161_v14 = vpop.f32.mrf.mxu3 }
 0x38f   : > { %v1627_v31 = vadd.f32 %v5145_v21, %v6161_v14 }
 0x390   : > { %4721 = vmatpush.xpose.msk.msrb.mxu0 %vm1303_vm4, %v1233_v51  ;;  %5102 = vmatpush.xpose.msk.msrb.mxu2 %vm1303_vm4, %v1233_v51 }
 0x393   : > { %4722 = vmatmul.msk.f32.vlgmr.msrb.gmra.mxu0 %vm1303_vm4, %v1183_v9  ;;  %4727 = vmatmul.msk.f32.vlgmr.msrb.gmra.mxu2 %vm1303_vm4, %v1198_v46 }
 0x394   : > { %1559 = vmatpush.msra.mxu2 %v4744_v52  ;;  %1663 = vmatpush.msra.mxu0 %v4776_v54 }
 0x396   : > { %1560 = vmatpush.msra.mxu2 %v4743_v4  ;;  %1664 = vmatpush.msra.mxu0 %v4775_v58  ;;  %v1629_v34 = vpop.f32.mrf.mxu3 }
 0x397   : > { %v1630_v30 = vadd.f32 %v5145_v21, %v1629_v34 }
 0x398   : > { %1561 = vmatpush.msra.mxu2 %v4742_v60  ;;  %1665 = vmatpush.msra.mxu0 %v4774_v25  ;;  %v5147_v25 = vld [vmem:[%s7810_s12 + $0x1] ss:$0 sm:$0xff] }
 0x39a   : > { %1562 = vmatpush.msra.mxu2 %v4741_v63  ;;  %1666 = vmatpush.msra.mxu0 %v4773_v32 }
 0x39b   : > { %4723 = vmatmul.msk.f32.gmra.mxu0 %vm1303_vm4, %v1186_v43  ;;  %4728 = vmatmul.msk.f32.gmra.mxu2 %vm1303_vm4, %v1201_v39 }
 0x39c   : > { %1563 = vmatpush.msra.mxu2 %v4740_v3  ;;  %1667 = vmatpush.msra.mxu0 %v4772_v16 }
 0x39e   : > { %1564 = vmatpush.msra.mxu2 %v4739_v6  ;;  %1668 = vmatpush.msra.mxu0 %v4771_v7  ;;  %v1632_v18 = vpop.f32.mrf.mxu3 }
 0x39f   : > { %v1633_v27 = vadd.f32 %v5145_v21, %v1632_v18 }
 0x3a0   : > { %1565 = vmatpush.msra.mxu2 %v4738_v10  ;;  %1669 = vmatpush.msra.mxu0 %v4770_v8 }
 0x3a2   : > { %1566 = vmatpush.msra.mxu2 %v4737_v11  ;;  %1670 = vmatpush.msra.mxu0 %v4769_v12 }
 0x3a3   : > { %4724 = vmatmul.msk.f32.gmra.mxu0 %vm1303_vm4, %v1189_v57  ;;  %4746 = vmatmul.msk.f32.vlgmr.msra.gmra.mxu2 %vm773_vm1, %v5987_v49 }
 0x3a6   : > { %v1635_v19 = vpop.f32.mrf.mxu3 }
 0x3a7   : > { %v1636_v28 = vadd.f32 %v5145_v21, %v1635_v19 }
 0x3ab   : > { %4725 = vmatmul.msk.f32.gmra.mxu0 %vm1303_vm4, %v1192_v20  ;;  %4747 = vmatmul.msk.f32.gmra.mxu2 %vm773_vm1, %v6008_v5 }
 0x3ae   : > { %v1638_v13 = vpop.f32.mrf.mxu3 }
 0x3af   : > { %v1639_v22 = vadd.f32 %v5145_v21, %v1638_v13 }
 0x3b1   : > { %4785 = vmatpush.xpose.msk.msrb.mxu1 %vm1303_vm4, %v1639_v22 }
 0x3b3   : > { %4726 = vmatmul.msk.f32.gmra.mxu0 %vm1303_vm4, %v1195_v17  ;;  %4748 = vmatmul.msk.f32.gmra.mxu2 %vm773_vm1, %v6033_v23 }
 0x3b5   : > { %4786 = vmatpush.xpose.msk.msrb.mxu1 %vm1303_vm4, %v1636_v28 }
 0x3b9   : > { %4787 = vmatpush.xpose.msk.msrb.mxu1 %vm1303_vm4, %v1633_v27 }
 0x3bb   : > { %4749 = vmatmul.msk.f32.gmra.mxu2 %vm773_vm1, %v6062_v2  ;;  %4778 = vmatmul.msk.f32.vlgmr.msra.gmra.mxu0 %vm773_vm1, %v5987_v49 }
 0x3bd   : > { %4788 = vmatpush.xpose.msk.msrb.mxu1 %vm1303_vm4, %v1630_v30 }
 0x3c1   : > { %4789 = vmatpush.xpose.msk.msrb.mxu1 %vm1303_vm4, %v1627_v31 }
 0x3c3   : > { %4750 = vmatmul.msk.f32.gmra.mxu2 %vm773_vm1, %v6082_v56  ;;  %4779 = vmatmul.msk.f32.gmra.mxu0 %vm773_vm1, %v6008_v5 }
 0x3c5   : > { %4790 = vmatpush.xpose.msk.msrb.mxu1 %vm1303_vm4, %v1624_v33 }
 0x3c9   : > { %4791 = vmatpush.xpose.msk.msrb.mxu1 %vm1303_vm4, %v1621_v36 }
 0x3cb   : > { %4751 = vmatmul.msk.f32.gmra.mxu2 %vm773_vm1, %v6094_v62  ;;  %4780 = vmatmul.msk.f32.gmra.mxu0 %vm773_vm1, %v6033_v23 }
 0x3d3   : > { %4752 = vmatmul.msk.f32.gmra.mxu2 %vm773_vm1, %v6105_v0  ;;  %4781 = vmatmul.msk.f32.gmra.mxu0 %vm773_vm1, %v6062_v2 }
 0x3db   : > { %4782 = vmatmul.msk.f32.gmra.mxu0 %vm773_vm1, %v6082_v56 }
 0x3e3   : > { %4783 = vmatmul.msk.f32.gmra.mxu0 %vm773_vm1, %v6094_v62 }
 0x3eb   : > { %4784 = vmatmul.msk.f32.gmra.mxu0 %vm773_vm1, %v6105_v0 }
 0x410   : > { %v1363_v49 = vpop.f32.mrf.mxu0 }
 0x411   : > { %v1384_v5 = vmul.f32 0.17677669, %v1363_v49 }
 0x413   : > { %v1392_v23 = vsel %vm1391_vm6, %v1384_v5, -inf }
 0x414   : > { %1393 = vmax.xlane.f32.xlu1 %v1392_v23 }
 0x416   : > { %v1378_v56 = vpop.f32.mrf.mxu2 }
 0x417   : > { %v1389_v62 = vmul.f32 0.17677669, %v1378_v56 }
 0x418   : > { %v1366_v37 = vpop.f32.mrf.mxu0 }
 0x419   : > { %v1385_v1 = vmul.f32 0.17677669, %v1366_v37  ;;  %v1407_v26 = vsel %vm1391_vm6, %v1389_v62, -inf }
 0x41b   : > { %v1395_v38 = vsel %vm1391_vm6, %v1385_v1, -inf }
 0x41c   : > { %1396 = vmax.xlane.f32.xlu2 %v1395_v38 }
 0x41e   : > { %v1381_v45 = vpop.f32.mrf.mxu2 }
 0x41f   : > { %v6270_v24 = vmul.f32 0.17677669, %v1381_v45 }
 0x420   : > { %v1369_v2 = vpop.f32.mrf.mxu0 }
 0x421   : > { %v1386_v40 = vmul.f32 0.17677669, %v1369_v2  ;;  %v1411_v52 = vsel %vm1410_vm7, %v6270_v24, -inf }
 0x423   : > { %v1398_v41 = vsel %vm1391_vm6, %v1386_v40, -inf }
 0x424   : > { %1399 = vmax.xlane.f32.xlu0 %v1398_v41 }
 0x428   : > { %v1372_v42 = vpop.f32.mrf.mxu0 }
 0x429   : > { %v1387_v0 = vmul.f32 0.17677669, %v1372_v42 }
 0x42b   : > { %v1401_v44 = vsel %vm1391_vm6, %v1387_v0, -inf }
 0x42c   : > { %1408 = vmax.xlane.f32.xlu0 %v1407_v26  ;;  %1402 = vmax.xlane.f32.xlu1 %v1401_v44 }
 0x430   : > { %v1375_v48 = vpop.f32.mrf.mxu0 }
 0x431   : > { %v1388_v51 = vmul.f32 0.17677669, %v1375_v48 }
 0x433   : > { %v1404_v14 = vsel %vm1391_vm6, %v1388_v51, -inf }
 0x434   : > { %1405 = vmax.xlane.f32.xlu2 %v1404_v14  ;;  %1412 = vmax.xlane.f32.xlu1 %v1411_v52 }
 0x438   : > { %v1672_v54 = vpop.f32.mrf.mxu0 }
 0x439   : > { %v1673_v39 = vadd.f32 %v5147_v25, %v1672_v54 }
 0x440   : > { %v1675_v9 = vpop.f32.mrf.mxu0 }
 0x441   : > { %v1676_v43 = vadd.f32 %v5147_v25, %v1675_v9 }
 0x448   : > { %v1678_v46 = vpop.f32.mrf.mxu0 }
 0x449   : > { %v1679_v16 = vadd.f32 %v5147_v25, %v1678_v46 }
 0x450   : > { %v1681_v4 = vpop.f32.mrf.mxu0 }
 0x451   : > { %v1682_v3 = vadd.f32 %v5147_v25, %v1681_v4 }
 0x458   : > { %v1684_v58 = vpop.f32.mrf.mxu0 }
 0x459   : > { %v1685_v34 = vadd.f32 %v5147_v25, %v1684_v58 }
 0x460   : > { %v1687_v60 = vpop.f32.mrf.mxu0 }
 0x461   : > { %v1688_v29 = vadd.f32 %v5147_v25, %v1687_v60 }
 0x468   : > { %v1690_v63 = vpop.f32.mrf.mxu0 }
 0x469   : > { %v1691_v32 = vadd.f32 %v5147_v25, %v1690_v63 }
 0x46b   : > { %4799 = vmatpush.msk.msrb.mxu2 %vm1491_vm5, %v1691_v32 }
 0x46d   : > { %1891 = vmatpush.msrb.mxu2 %v1688_v29 }
 0x46f   : > { %1892 = vmatpush.msrb.mxu2 %v1685_v34 }
 0x471   : > { %1893 = vmatpush.msrb.mxu2 %v1682_v3 }
 0x473   : > { %1894 = vmatpush.msrb.mxu2 %v1679_v16 }
 0x475   : > { %1895 = vmatpush.msrb.mxu2 %v1676_v43  ;;  %v1568_v43 = vpop.f32.mrf.mxu2 }
 0x477   : > { %1896 = vmatpush.msrb.mxu2 %v1673_v39 }
 0x487   : > { %v1394_v6 = vpop.xlane.xlu1 %1393 }
 0x488   : > { %v1414_v7 = vsub.f32 %v1384_v5, %v1394_v6 }
 0x48a   : > { %v1421_v10 = vmul.f32 1.442695, %v1414_v7  ;;  %v1571_v7 = vpop.f32.mrf.mxu2 }
 0x48c   : > { %5194 = vpow2.f32 %v1421_v10  ;;  %v5146_v10 = vld [vmem:[%s7808_s10 + $0x1] ss:$0 sm:$0xff] }
 0x48f   : > { %v1397_v8 = vpop.xlane.xlu2 %1396 }
 0x490   : > { %v1415_v11 = vsub.f32 %v1385_v1, %v1397_v8  ;;  %v1569_v8 = vadd.f32 %v5146_v10, %v1568_v43 }
 0x492   : > { %v5195_v12 = vpop.eup %5194  ;;  %v1423_v18 = vmul.f32 1.442695, %v1415_v11  ;;  %v1574_v11 = vpop.f32.mrf.mxu2 }
 0x493   : > { %v1435_v57 = vsel %vm1391_vm6, %v5195_v12, 0.0 }
 0x494   : > { %5196 = vpow2.f32 %v1423_v18  ;;  %1436 = vadd.xlane.f32.xlu2 %v1435_v57  ;;  %v1575_v57 = vadd.f32 %v5146_v10, %v1574_v11 }
 0x497   : > { %v1400_v19 = vpop.xlane.xlu0 %1399 }
 0x498   : > { %v1416_v20 = vsub.f32 %v1386_v40, %v1400_v19  ;;  %v1536_v19 = vld [vmem:[%s7811_s13 + $0x18] sm:$0xff] }
 0x499   : > { %2016 = vmatpush.msrb.mxu0 %v1536_v19 }
 0x49a   : > { %v5197_v21 = vpop.eup %5196  ;;  %v1425_v13 = vmul.f32 1.442695, %v1416_v20  ;;  %v1577_v18 = vpop.f32.mrf.mxu2  ;;  %v1535_v20 = vld [vmem:[%s7811_s13 + $0x10] sm:$0xff] }
 0x49b   : > { %v1438_v22 = vsel %vm1391_vm6, %v5197_v21, 0.0  ;;  %2017 = vmatpush.msrb.mxu0 %v1535_v20 }
 0x49c   : > { %5198 = vpow2.f32 %v1425_v13  ;;  %1439 = vadd.xlane.f32.xlu0 %v1438_v22  ;;  %v1578_v13 = vadd.f32 %v5146_v10, %v1577_v18 }
 0x49f   : > { %v1409_v17 = vpop.xlane.xlu0 %1408  ;;  %v1403_v28 = vpop.xlane.xlu1 %1402 }
 0x4a0   : > { %v1419_v27 = vsub.f32 %v1389_v62, %v1409_v17  ;;  %v1417_v30 = vsub.f32 %v1387_v0, %v1403_v28 }
 0x4a2   : > { %v5199_v31 = vpop.eup %5198  ;;  %v1431_v33 = vmul.f32 1.442695, %v1419_v27  ;;  %v1427_v36 = vmul.f32 1.442695, %v1417_v30  ;;  %v1580_v22 = vpop.f32.mrf.mxu2  ;;  %v1533_v27 = vld [vmem:[%s7811_s13] sm:$0xff] }
 0x4a3   : > { %v1441_v49 = vsel %vm1391_vm6, %v5199_v31, 0.0  ;;  %v1581_v17 = vadd.f32 %v5146_v10, %v1580_v22 }
 0x4a4   : > { %5200 = vpow2.f32 %v1431_v33  ;;  %1442 = vadd.xlane.f32.xlu1 %v1441_v49 }
 0x4a5   : > { %5202 = vpow2.f32 %v1427_v36 }
 0x4a7   : > { %v1406_v5 = vpop.xlane.xlu2 %1405  ;;  %v1413_v23 = vpop.xlane.xlu1 %1412 }
 0x4a8   : > { %v1418_v37 = vsub.f32 %v1388_v51, %v1406_v5  ;;  %v1420_v1 = vsub.f32 %v6270_v24, %v1413_v23 }
 0x4aa   : > { %v5201_v38 = vpop.eup %5200  ;;  %v1429_v2 = vmul.f32 1.442695, %v1418_v37  ;;  %v1433_v40 = vmul.f32 1.442695, %v1420_v1  ;;  %v1583_v28 = vpop.f32.mrf.mxu2 }
 0x4ab   : > { %v5203_v56 = vpop.eup %5202  ;;  %v1450_v41 = vsel %vm1391_vm6, %v5201_v38, 0.0  ;;  %v1584_v30 = vadd.f32 %v5146_v10, %v1583_v28 }
 0x4ac   : > { %5204 = vpow2.f32 %v1429_v2  ;;  %v1444_v62 = vsel %vm1391_vm6, %v5203_v56, 0.0  ;;  %1451 = vadd.xlane.f32.xlu1 %v1450_v41 }
 0x4ad   : > { %5206 = vpow2.f32 %v1433_v40  ;;  %1445 = vadd.xlane.f32.xlu2 %v1444_v62 }
 0x4b2   : > { %v5205_v42 = vpop.eup %5204 }
 0x4b3   : > { %v5207_v0 = vpop.eup %5206  ;;  %v1447_v26 = vsel %vm1391_vm6, %v5205_v42, 0.0 }
 0x4b4   : > { %1448 = vadd.xlane.f32.xlu0 %v1447_v26  ;;  %v1453_v44 = vsel %vm1410_vm7, %v5207_v0, 0.0 }
 0x4b5   : > { %1454 = vadd.xlane.f32.xlu2 %v1453_v44 }
 0x507   : > { %v1437_v45 = vpop.xlane.xlu2 %1436 }
 0x508   : > { %5208 = vrcp.f32 %v1437_v45 }
 0x50e   : > { %v5209_v24 = vpop.eup %5208 }
 0x50f   : > { %v1463_v48 = vmul.f32 %v5209_v24, %v5195_v12  ;;  %v1440_v51 = vpop.xlane.xlu0 %1439  ;;  %v1572_v12 = vadd.f32 %v5146_v10, %v1571_v7 }
 0x510   : > { %5210 = vrcp.f32 %v1440_v51 }
 0x511   : > { %4730 = vmatmul.msk.f32.vlgmr.msra.gmra.mxu1 %vm1391_vm6, %v1463_v48 }
 0x516   : > { %v5211_v14 = vpop.eup %5210 }
 0x517   : > { %v1443_v52 = vpop.xlane.xlu1 %1442  ;;  %v1464_v54 = vmul.f32 %v5211_v14, %v5197_v21  ;;  %v1534_v21 = vld [vmem:[%s7811_s13 + $0x8] sm:$0xff] }
 0x518   : > { %5212 = vrcp.f32 %v1443_v52  ;;  %2018 = vmatpush.msrb.mxu0 %v1534_v21 }
 0x519   : > { %4731 = vmatmul.msk.f32.gmra.mxu1 %vm1391_vm6, %v1464_v54 }
 0x51a   : > { %2019 = vmatpush.msrb.mxu0 %v1533_v27 }
 0x51e   : > { %v5213_v9 = vpop.eup %5212 }
 0x51f   : > { %v1465_v46 = vmul.f32 %v5213_v9, %v5199_v31  ;;  %v1452_v63 = vpop.xlane.xlu1 %1451  ;;  %v1586_v31 = vpop.f32.mrf.mxu2 }
 0x520   : > { %v1446_v4 = vpop.xlane.xlu2 %1445  ;;  %v1587_v33 = vadd.f32 %v5146_v10, %v1586_v31 }
 0x521   : > { %5214 = vrcp.f32 %v1446_v4  ;;  %4732 = vmatmul.msk.f32.gmra.mxu1 %vm1391_vm6, %v1465_v46 }
 0x527   : > { %v5215_v58 = vpop.eup %5214  ;;  %v1449_v60 = vpop.xlane.xlu0 %1448 }
 0x528   : > { %5216 = vrcp.f32 %v1449_v60  ;;  %v1466_v25 = vmul.f32 %v5215_v58, %v5203_v56  ;;  %v1455_v34 = vpop.xlane.xlu2 %1454 }
 0x529   : > { %5218 = vrcp.f32 %v1452_v63 }
 0x52a   : > { %4733 = vmatmul.msk.f32.gmra.mxu1 %vm1391_vm6, %v1466_v25  ;;  %5220 = vrcp.f32 %v1455_v34 }
 0x52e   : > { %v5217_v32 = vpop.eup %5216 }
 0x52f   : > { %v1467_v29 = vmul.f32 %v5217_v32, %v5205_v42  ;;  %v5219_v3 = vpop.eup %5218 }
 0x530   : > { %v1468_v16 = vmul.f32 %v5219_v3, %v5201_v38  ;;  %v5221_v39 = vpop.eup %5220 }
 0x531   : > { %v1469_v6 = vmul.f32 %v5221_v39, %v5207_v0 }
 0x532   : > { %4734 = vmatmul.msk.f32.gmra.mxu1 %vm1391_vm6, %v1467_v29 }
 0x53a   : > { %4735 = vmatmul.msk.f32.gmra.mxu1 %vm1391_vm6, %v1468_v16 }
 0x542   : > { %4736 = vmatmul.msk.f32.gmra.mxu1 %vm1391_vm6, %v1469_v6 }
 0x54a   : > { %4792 = vmatmul.msk.f32.vlgmr.msrb.gmra.mxu1 %vm1303_vm4, %v1569_v8 }
 0x552   : > { %4793 = vmatmul.msk.f32.gmra.mxu1 %vm1303_vm4, %v1572_v12 }
 0x55a   : > { %4794 = vmatmul.msk.f32.gmra.mxu1 %vm1303_vm4, %v1575_v57 }
 0x562   : > { %4795 = vmatmul.msk.f32.gmra.mxu1 %vm1303_vm4, %v1578_v13 }
 0x56a   : > { %4796 = vmatmul.msk.f32.gmra.mxu1 %vm1303_vm4, %v1581_v17 }
 0x572   : > { %4797 = vmatmul.msk.f32.gmra.mxu1 %vm1303_vm4, %v1584_v30 }
 0x57a   : > { %4798 = vmatmul.msk.f32.gmra.mxu1 %vm1303_vm4, %v1587_v33 }
 0x58e   : > { %v1512_v36 = vpop.f32.mrf.mxu1 }
 0x58f   : > { %4818 = vmatmul.msk.f32.vlgmr.msrb.gmra.mxu0 %vm1303_vm4, %v1512_v36 }
 0x596   : > { %v1515_v49 = vpop.f32.mrf.mxu1 }
 0x597   : > { %4819 = vmatmul.msk.f32.gmra.mxu0 %vm1303_vm4, %v1515_v49 }
 0x59e   : > { %v1518_v5 = vpop.f32.mrf.mxu1 }
 0x59f   : > { %4820 = vmatmul.msk.f32.gmra.mxu0 %vm1303_vm4, %v1518_v5 }
 0x5a7   : > { %v1521_v23 = vpop.f32.mrf.mxu1 }
 0x5a8   : > { %4821 = vmatmul.msk.f32.gmra.mxu0 %vm1303_vm4, %v1521_v23 }
 0x5af   : > { %v1524_v37 = vpop.f32.mrf.mxu1 }
 0x5b0   : > { %4822 = vmatmul.msk.f32.gmra.mxu0 %vm1303_vm4, %v1524_v37 }
 0x5b7   : > { %v1527_v1 = vpop.f32.mrf.mxu1 }
 0x5b8   : > { %4823 = vmatmul.msk.f32.gmra.mxu0 %vm1303_vm4, %v1527_v1 }
 0x5bf   : > { %v1530_v38 = vpop.f32.mrf.mxu1 }
 0x5c0   : > { %4824 = vmatmul.msk.f32.gmra.mxu0 %vm1303_vm4, %v1530_v38 }
 0x5c7   : > { %v1752_v2 = vpop.f32.mrf.mxu1 }
 0x5c8   : > { %v1773_v40 = vmul.f32 0.17677669, %v1752_v2 }
 0x5ca   : > { %v1780_v56 = vsel %vm1391_vm6, %v1773_v40, -inf }
 0x5cb   : > { %1781 = vmax.xlane.f32.xlu0 %v1780_v56 }
 0x5cf   : > { %v1755_v41 = vpop.f32.mrf.mxu1 }
 0x5d0   : > { %v1774_v62 = vmul.f32 0.17677669, %v1755_v41 }
 0x5d2   : > { %v1783_v42 = vsel %vm1391_vm6, %v1774_v62, -inf }
 0x5d3   : > { %1784 = vmax.xlane.f32.xlu1 %v1783_v42 }
 0x5d7   : > { %v1758_v0 = vpop.f32.mrf.mxu1 }
 0x5d8   : > { %v1775_v26 = vmul.f32 0.17677669, %v1758_v0 }
 0x5da   : > { %v1786_v44 = vsel %vm1391_vm6, %v1775_v26, -inf }
 0x5db   : > { %1787 = vmax.xlane.f32.xlu2 %v1786_v44 }
 0x5df   : > { %v1761_v45 = vpop.f32.mrf.mxu1 }
 0x5e0   : > { %v1776_v24 = vmul.f32 0.17677669, %v1761_v45 }
 0x5e2   : > { %v1789_v48 = vsel %vm1391_vm6, %v1776_v24, -inf }
 0x5e3   : > { %1790 = vmax.xlane.f32.xlu0 %v1789_v48  ;;  %v4809_v48 = vld [vmem:[%s7811_s13 + $0x30] sm:$0xff] }
 0x5e7   : > { %v1764_v51 = vpop.f32.mrf.mxu1 }
 0x5e8   : > { %v1777_v14 = vmul.f32 0.17677669, %v1764_v51  ;;  %v4808_v51 = vld [vmem:[%s7811_s13 + $0x28] sm:$0xff] }
 0x5ea   : > { %v1792_v52 = vsel %vm1391_vm6, %v1777_v14, -inf }
 0x5eb   : > { %1793 = vmax.xlane.f32.xlu1 %v1792_v52 }
 0x5ef   : > { %v1767_v54 = vpop.f32.mrf.mxu1 }
 0x5f0   : > { %v1778_v9 = vmul.f32 0.17677669, %v1767_v54 }
 0x5f2   : > { %v1795_v46 = vsel %vm1391_vm6, %v1778_v9, -inf }
 0x5f3   : > { %1796 = vmax.xlane.f32.xlu2 %v1795_v46 }
 0x5f7   : > { %v1770_v4 = vpop.f32.mrf.mxu1 }
 0x5f8   : > { %v1779_v58 = vmul.f32 0.17677669, %v1770_v4 }
 0x5fa   : > { %v1798_v60 = vsel %vm1410_vm7, %v1779_v58, -inf }
 0x5fb   : > { %1799 = vmax.xlane.f32.xlu0 %v1798_v60 }
 0x63e   : > { %v1782_v25 = vpop.xlane.xlu0 %1781 }
 0x63f   : > { %v1801_v63 = vsub.f32 %v1773_v40, %v1782_v25 }
 0x641   : > { %v1808_v32 = vmul.f32 1.442695, %v1801_v63 }
 0x643   : > { %5222 = vpow2.f32 %v1808_v32 }
 0x646   : > { %v1785_v29 = vpop.xlane.xlu1 %1784 }
 0x647   : > { %v1802_v34 = vsub.f32 %v1774_v62, %v1785_v29  ;;  %v4807_v29 = vld [vmem:[%s7811_s13 + $0x20] sm:$0xff] }
 0x649   : > { %v5223_v3 = vpop.eup %5222  ;;  %v1810_v16 = vmul.f32 1.442695, %v1802_v34 }
 0x64a   : > { %v1822_v43 = vsel %vm1391_vm6, %v5223_v3, 0.0 }
 0x64b   : > { %5224 = vpow2.f32 %v1810_v16  ;;  %1823 = vadd.xlane.f32.xlu1 %v1822_v43 }
 0x64e   : > { %v1788_v39 = vpop.xlane.xlu2 %1787 }
 0x64f   : > { %v1803_v6 = vsub.f32 %v1775_v26, %v1788_v39 }
 0x651   : > { %v5225_v7 = vpop.eup %5224  ;;  %v1812_v10 = vmul.f32 1.442695, %v1803_v6 }
 0x652   : > { %v1825_v8 = vsel %vm1391_vm6, %v5225_v7, 0.0 }
 0x653   : > { %5226 = vpow2.f32 %v1812_v10  ;;  %1826 = vadd.xlane.f32.xlu2 %v1825_v8  ;;  %v2021_v10 = vpop.f32.mrf.mxu0 }
 0x656   : > { %v1791_v11 = vpop.xlane.xlu0 %1790 }
 0x657   : > { %v1804_v12 = vsub.f32 %v1776_v24, %v1791_v11  ;;  %v4810_v24 = vld [vmem:[%s7811_s13 + $0x38] sm:$0xff] }
 0x658   : > { %1957 = vmatpush.msrb.mxu3 %v4810_v24 }
 0x659   : > { %v5227_v18 = vpop.eup %5226  ;;  %v1814_v57 = vmul.f32 1.442695, %v1804_v12 }
 0x65a   : > { %v1828_v19 = vsel %vm1391_vm6, %v5227_v18, 0.0  ;;  %1958 = vmatpush.msrb.mxu3 %v4809_v48 }
 0x65b   : > { %5228 = vpow2.f32 %v1814_v57  ;;  %1829 = vadd.xlane.f32.xlu0 %v1828_v19  ;;  %v2024_v8 = vpop.f32.mrf.mxu0 }
 0x65c   : > { %1959 = vmatpush.msrb.mxu3 %v4808_v51 }
 0x65e   : > { %v1794_v20 = vpop.xlane.xlu1 %1793  ;;  %1960 = vmatpush.msrb.mxu3 %v4807_v29 }
 0x65f   : > { %v1805_v21 = vsub.f32 %v1777_v14, %v1794_v20 }
 0x661   : > { %v5229_v13 = vpop.eup %5228  ;;  %v1816_v22 = vmul.f32 1.442695, %v1805_v21 }
 0x662   : > { %v1831_v17 = vsel %vm1391_vm6, %v5229_v13, 0.0 }
 0x663   : > { %5230 = vpow2.f32 %v1816_v22  ;;  %1832 = vadd.xlane.f32.xlu1 %v1831_v17  ;;  %v2027_v21 = vpop.f32.mrf.mxu0 }
 0x666   : > { %v1797_v28 = vpop.xlane.xlu2 %1796 }
 0x667   : > { %v1806_v27 = vsub.f32 %v1778_v9, %v1797_v28 }
 0x669   : > { %v5231_v30 = vpop.eup %5230  ;;  %v1818_v31 = vmul.f32 1.442695, %v1806_v27 }
 0x66a   : > { %v1834_v33 = vsel %vm1391_vm6, %v5231_v30, 0.0 }
 0x66b   : > { %5232 = vpow2.f32 %v1818_v31  ;;  %1835 = vadd.xlane.f32.xlu2 %v1834_v33 }
 0x66e   : > { %v1800_v36 = vpop.xlane.xlu0 %1799 }
 0x66f   : > { %v1807_v49 = vsub.f32 %v1779_v58, %v1800_v36 }
 0x671   : > { %v5233_v5 = vpop.eup %5232  ;;  %v1820_v23 = vmul.f32 1.442695, %v1807_v49 }
 0x672   : > { %v1837_v37 = vsel %vm1391_vm6, %v5233_v5, 0.0 }
 0x673   : > { %5234 = vpow2.f32 %v1820_v23  ;;  %1838 = vadd.xlane.f32.xlu0 %v1837_v37 }
 0x679   : > { %v5235_v1 = vpop.eup %5234 }
 0x67a   : > { %v1840_v38 = vsel %vm1410_vm7, %v5235_v1, 0.0 }
 0x67b   : > { %1841 = vadd.xlane.f32.xlu1 %v1840_v38 }
 0x6be   : > { %v1824_v2 = vpop.xlane.xlu1 %1823 }
 0x6bf   : > { %5236 = vrcp.f32 %v1824_v2 }
 0x6c5   : > { %v5237_v40 = vpop.eup %5236 }
 0x6c6   : > { %v1850_v56 = vmul.f32 %v5237_v40, %v5223_v3  ;;  %v1827_v41 = vpop.xlane.xlu2 %1826 }
 0x6c7   : > { %5238 = vrcp.f32 %v1827_v41 }
 0x6c8   : > { %4800 = vmatmul.msk.f32.vlgmr.msrb.gmra.mxu2 %vm1391_vm6, %v1850_v56 }
 0x6cd   : > { %v5239_v62 = vpop.eup %5238 }
 0x6ce   : > { %v1830_v42 = vpop.xlane.xlu0 %1829  ;;  %v1851_v0 = vmul.f32 %v5239_v62, %v5225_v7 }
 0x6cf   : > { %5240 = vrcp.f32 %v1830_v42 }
 0x6d0   : > { %4801 = vmatmul.msk.f32.gmra.mxu2 %vm1391_vm6, %v1851_v0 }
 0x6d5   : > { %v5241_v26 = vpop.eup %5240 }
 0x6d6   : > { %v1833_v44 = vpop.xlane.xlu1 %1832  ;;  %v1852_v45 = vmul.f32 %v5241_v26, %v5227_v18  ;;  %v5148_v18 = vld [vmem:[%s7812_s14] ss:$0 sm:$0xff] }
 0x6d7   : > { %5242 = vrcp.f32 %v1833_v44 }
 0x6d8   : > { %4802 = vmatmul.msk.f32.gmra.mxu2 %vm1391_vm6, %v1852_v45 }
 0x6dd   : > { %v5243_v14 = vpop.eup %5242 }
 0x6de   : > { %v1836_v52 = vpop.xlane.xlu2 %1835  ;;  %v1853_v54 = vmul.f32 %v5243_v14, %v5229_v13 }
 0x6df   : > { %5244 = vrcp.f32 %v1836_v52 }
 0x6e0   : > { %4803 = vmatmul.msk.f32.gmra.mxu2 %vm1391_vm6, %v1853_v54 }
 0x6e5   : > { %v5245_v9 = vpop.eup %5244 }
 0x6e6   : > { %v1839_v46 = vpop.xlane.xlu0 %1838  ;;  %v1854_v4 = vmul.f32 %v5245_v9, %v5231_v30 }
 0x6e7   : > { %5246 = vrcp.f32 %v1839_v46 }
 0x6e8   : > { %4804 = vmatmul.msk.f32.gmra.mxu2 %vm1391_vm6, %v1854_v4 }
 0x6ed   : > { %v5247_v58 = vpop.eup %5246 }
 0x6ee   : > { %v1842_v60 = vpop.xlane.xlu1 %1841  ;;  %v1855_v25 = vmul.f32 %v5247_v58, %v5233_v5 }
 0x6ef   : > { %5248 = vrcp.f32 %v1842_v60 }
 0x6f0   : > { %4805 = vmatmul.msk.f32.gmra.mxu2 %vm1391_vm6, %v1855_v25 }
 0x6f5   : > { %v5249_v63 = vpop.eup %5248 }
 0x6f6   : > { %v1856_v32 = vmul.f32 %v5249_v63, %v5235_v1 }
 0x6f8   : > { %4806 = vmatmul.msk.f32.gmra.mxu2 %vm1391_vm6, %v1856_v32 }
 0x74b   : > { %v1898_v34 = vpop.f32.mrf.mxu2 }
 0x74c   : > { %4811 = vmatmul.msk.f32.vlgmr.msrb.gmra.mxu3 %vm1303_vm4, %v1898_v34 }
 0x753   : > { %v1901_v3 = vpop.f32.mrf.mxu2 }
 0x754   : > { %4812 = vmatmul.msk.f32.gmra.mxu3 %vm1303_vm4, %v1901_v3 }
 0x75b   : > { %v1904_v16 = vpop.f32.mrf.mxu2 }
 0x75c   : > { %4813 = vmatmul.msk.f32.gmra.mxu3 %vm1303_vm4, %v1904_v16 }
 0x763   : > { %v1907_v43 = vpop.f32.mrf.mxu2 }
 0x764   : > { %4814 = vmatmul.msk.f32.gmra.mxu3 %vm1303_vm4, %v1907_v43 }
 0x76b   : > { %v1910_v39 = vpop.f32.mrf.mxu2 }
 0x76c   : > { %4815 = vmatmul.msk.f32.gmra.mxu3 %vm1303_vm4, %v1910_v39 }
 0x773   : > { %v1913_v6 = vpop.f32.mrf.mxu2 }
 0x774   : > { %4816 = vmatmul.msk.f32.gmra.mxu3 %vm1303_vm4, %v1913_v6 }
 0x77b   : > { %v1916_v7 = vpop.f32.mrf.mxu2 }
 0x77c   : > { %4817 = vmatmul.msk.f32.gmra.mxu3 %vm1303_vm4, %v1916_v7 }
 0x7cf   : > { %v1962_v11 = vpop.f32.mrf.mxu3 }
 0x7d0   : > { %v2022_v12 = vadd.f32 %v2021_v10, %v1962_v11 }
 0x7d2   : > { %v2042_v57 = vadd.f32 %v2022_v12, %v5788_v50  ;;  %v2030_v50 = vpop.f32.mrf.mxu0 }
 0x7d4   : > { %v6367_v19 = vadd.f32 %v5148_v18, %v2042_v57 }
 0x7d6   : > { %v2062_v20 = vsel %vm773_vm1, %v6367_v19, 0.0 }
 0x7d7   : > { %2063 = vadd.xlane.f32.xlu2 %v2062_v20  ;;  %v1965_v13 = vpop.f32.mrf.mxu3 }
 0x7d8   : > { %v2025_v22 = vadd.f32 %v2024_v8, %v1965_v13 }
 0x7da   : > { %v2043_v17 = vadd.f32 %v2025_v22, %v5797_v15  ;;  %v2033_v37 = vpop.f32.mrf.mxu0 }
 0x7dc   : > { %v6372_v28 = vadd.f32 %v5148_v18, %v2043_v17 }
 0x7de   : > { %v2065_v27 = vsel %vm773_vm1, %v6372_v28, 0.0 }
 0x7df   : > { %2066 = vadd.xlane.f32.xlu0 %v2065_v27  ;;  %v1968_v30 = vpop.f32.mrf.mxu3 }
 0x7e0   : > { %v2028_v31 = vadd.f32 %v2027_v21, %v1968_v30 }
 0x7e2   : > { %v2044_v33 = vadd.f32 %v2028_v31, %v5810_v59  ;;  %v2036_v41 = vpop.f32.mrf.mxu0 }
 0x7e4   : > { %v6377_v36 = vadd.f32 %v5148_v18, %v2044_v33  ;;  %v2250_v33 = vld [vmem:[#allocation4 + $0x70] sm:$0xff] }
 0x7e5   : > { %2287 = vmatpush.msra.mxu1 %v2250_v33 }
 0x7e6   : > { %v2068_v49 = vsel %vm773_vm1, %v6377_v36, 0.0 }
 0x7e7   : > { %2069 = vadd.xlane.f32.xlu1 %v2068_v49  ;;  %v1971_v5 = vpop.f32.mrf.mxu3  ;;  %v2251_v49 = vld [vmem:[#allocation4 + $0x78] sm:$0xff] }
 0x7e8   : > { %v2031_v23 = vadd.f32 %v2030_v50, %v1971_v5  ;;  %2325 = vmatpush.msra.mxu2 %v2251_v49  ;;  %v2248_v5 = vld [vmem:[#allocation4 + $0x60] sm:$0xff] }
 0x7e9   : > { %2288 = vmatpush.msra.mxu1 %v2248_v5 }
 0x7ea   : > { %v2045_v15 = vadd.f32 %v2031_v23, %v5822_v53  ;;  %v2039_v45 = vpop.f32.mrf.mxu0  ;;  %v2249_v23 = vld [vmem:[#allocation4 + $0x68] sm:$0xff] }
 0x7eb   : > { %2326 = vmatpush.msra.mxu2 %v2249_v23 }
 0x7ec   : > { %v6382_v1 = vadd.f32 %v5148_v18, %v2045_v15  ;;  %v2246_v15 = vld [vmem:[#allocation4 + $0x50] sm:$0xff] }
 0x7ed   : > { %2289 = vmatpush.msra.mxu1 %v2246_v15 }
 0x7ee   : > { %v2071_v38 = vsel %vm773_vm1, %v6382_v1, 0.0 }
 0x7ef   : > { %2072 = vadd.xlane.f32.xlu2 %v2071_v38  ;;  %v1974_v2 = vpop.f32.mrf.mxu3  ;;  %v2244_v38 = vld [vmem:[#allocation4 + $0x40] sm:$0xff] }
 0x7f0   : > { %v2034_v40 = vadd.f32 %v2033_v37, %v1974_v2  ;;  %v2247_v37 = vld [vmem:[#allocation4 + $0x58] sm:$0xff]  ;;  %v2245_v2 = vld [vmem:[#allocation4 + $0x48] sm:$0xff]  ;;  %2290 = vmatpush.msra.mxu1 %v2244_v38 }
 0x7f1   : > { %2327 = vmatpush.msra.mxu2 %v2247_v37 }
 0x7f2   : > { %v2046_v59 = vadd.f32 %v2034_v40, %v5807_v35  ;;  %v2242_v40 = vld [vmem:[#allocation4 + $0x30] sm:$0xff] }
 0x7f3   : > { %2328 = vmatpush.msra.mxu2 %v2245_v2  ;;  %2291 = vmatpush.msra.mxu1 %v2242_v40 }
 0x7f4   : > { %v6387_v56 = vadd.f32 %v5148_v18, %v2046_v59  ;;  %v2243_v59 = vld [vmem:[#allocation4 + $0x38] sm:$0xff] }
 0x7f5   : > { %2329 = vmatpush.msra.mxu2 %v2243_v59 }
 0x7f6   : > { %v2074_v62 = vsel %vm773_vm1, %v6387_v56, 0.0 }
 0x7f7   : > { %2075 = vadd.xlane.f32.xlu0 %v2074_v62  ;;  %v1977_v42 = vpop.f32.mrf.mxu3  ;;  %v2241_v62 = vld [vmem:[#allocation4 + $0x28] sm:$0xff] }
 0x7f8   : > { %v2037_v53 = vadd.f32 %v2036_v41, %v1977_v42  ;;  %v2240_v41 = vld [vmem:[#allocation4 + $0x20] sm:$0xff]  ;;  %2330 = vmatpush.msra.mxu2 %v2241_v62  ;;  %v2238_v42 = vld [vmem:[#allocation4 + $0x10] sm:$0xff] }
 0x7f9   : > { %2292 = vmatpush.msra.mxu1 %v2240_v41 }
 0x7fa   : > { %v2047_v0 = vadd.f32 %v2037_v53, %v5825_v55  ;;  %v2239_v53 = vld [vmem:[#allocation4 + $0x18] sm:$0xff] }
 0x7fb   : > { %2293 = vmatpush.msra.mxu1 %v2238_v42  ;;  %2331 = vmatpush.msra.mxu2 %v2239_v53 }
 0x7fc   : > { %v6392_v26 = vadd.f32 %v5148_v18, %v2047_v0  ;;  %v2236_v0 = vld [vmem:[#allocation4] sm:$0xff] }
 0x7fd   : > { %2294 = vmatpush.msra.mxu1 %v2236_v0 }
 0x7fe   : > { %v2077_v44 = vsel %vm773_vm1, %v6392_v26, 0.0 }
 0x7ff   : > { %2078 = vadd.xlane.f32.xlu1 %v2077_v44  ;;  %v1980_v24 = vpop.f32.mrf.mxu3  ;;  %v2237_v44 = vld [vmem:[#allocation4 + $0x8] sm:$0xff] }
 0x800   : > { %v2040_v35 = vadd.f32 %v2039_v45, %v1980_v24  ;;  %2332 = vmatpush.msra.mxu2 %v2237_v44 }
 0x802   : > { %v2048_v48 = vadd.f32 %v2040_v35, %v5834_v61 }
 0x804   : > { %v6397_v51 = vadd.f32 %v5148_v18, %v2048_v48 }
 0x806   : > { %v2080_v14 = vsel %vm792_vm2, %v6397_v51, 0.0 }
 0x807   : > { %2081 = vadd.xlane.f32.xlu0 %v2080_v14 }
 0x84a   : > { %v2064_v52 = vpop.xlane.xlu2 %2063 }
 0x84b   : > { %v2083_v55 = vmul.f32 %v2064_v52, %v5723_v47 }
 0x84d   : > { %v6403_v54 = vsub.f32 %v6367_v19, %v2083_v55 }
 0x84f   : > { %v2097_v9 = vmul.f32 %v6403_v54, %v6403_v54 }
 0x851   : > { %v2104_v46 = vsel %vm773_vm1, %v2097_v9, 0.0 }
 0x852   : > { %2105 = vadd.xlane.f32.xlu2 %v2104_v46  ;;  %v2067_v4 = vpop.xlane.xlu0 %2066 }
 0x853   : > { %v2084_v61 = vmul.f32 %v2067_v4, %v5723_v47 }
 0x855   : > { %v6410_v58 = vsub.f32 %v6372_v28, %v2084_v61 }
 0x857   : > { %v2098_v60 = vmul.f32 %v6410_v58, %v6410_v58 }
 0x859   : > { %v2107_v25 = vsel %vm773_vm1, %v2098_v60, 0.0 }
 0x85a   : > { %v2070_v63 = vpop.xlane.xlu1 %2069  ;;  %2108 = vadd.xlane.f32.xlu1 %v2107_v25 }
 0x85b   : > { %v2085_v32 = vmul.f32 %v2070_v63, %v5723_v47 }
 0x85d   : > { %v6417_v29 = vsub.f32 %v6377_v36, %v2085_v32 }
 0x85f   : > { %v2099_v34 = vmul.f32 %v6417_v29, %v6417_v29 }
 0x861   : > { %v2110_v3 = vsel %vm773_vm1, %v2099_v34, 0.0 }
 0x862   : > { %2111 = vadd.xlane.f32.xlu2 %v2110_v3  ;;  %v2073_v16 = vpop.xlane.xlu2 %2072 }
 0x863   : > { %v2086_v43 = vmul.f32 %v2073_v16, %v5723_v47  ;;  %v6456_v16 = vld [vmem:[%s7813_s15] ss:$0 sm:$0xff] }
 0x865   : > { %v6424_v39 = vsub.f32 %v6382_v1, %v2086_v43 }
 0x867   : > { %v2100_v6 = vmul.f32 %v6424_v39, %v6424_v39 }
 0x869   : > { %v2113_v7 = vsel %vm773_vm1, %v2100_v6, 0.0 }
 0x86a   : > { %2114 = vadd.xlane.f32.xlu0 %v2113_v7  ;;  %v2076_v10 = vpop.xlane.xlu0 %2075 }
 0x86b   : > { %v2087_v8 = vmul.f32 %v2076_v10, %v5723_v47  ;;  %v6462_v10 = vld [vmem:[%s7814_s16] ss:$0 sm:$0xff] }
 0x86d   : > { %v6431_v11 = vsub.f32 %v6387_v56, %v2087_v8 }
 0x86f   : > { %v2101_v12 = vmul.f32 %v6431_v11, %v6431_v11 }
 0x871   : > { %v2116_v18 = vsel %vm773_vm1, %v2101_v12, 0.0 }
 0x872   : > { %v2079_v57 = vpop.xlane.xlu1 %2078  ;;  %2117 = vadd.xlane.f32.xlu1 %v2116_v18 }
 0x873   : > { %v2088_v20 = vmul.f32 %v2079_v57, %v5723_v47 }
 0x875   : > { %v6438_v21 = vsub.f32 %v6392_v26, %v2088_v20 }
 0x877   : > { %v2102_v13 = vmul.f32 %v6438_v21, %v6438_v21 }
 0x879   : > { %v2119_v22 = vsel %vm773_vm1, %v2102_v13, 0.0 }
 0x87a   : > { %2120 = vadd.xlane.f32.xlu2 %v2119_v22  ;;  %v2082_v17 = vpop.xlane.xlu0 %2081 }
 0x87b   : > { %v2089_v27 = vmul.f32 %v2082_v17, %v5723_v47 }
 0x87d   : > { %v6445_v30 = vsub.f32 %v6397_v51, %v2089_v27 }
 0x87f   : > { %v2103_v31 = vmul.f32 %v6445_v30, %v6445_v30 }
 0x881   : > { %v2122_v50 = vsel %vm792_vm2, %v2103_v31, 0.0 }
 0x882   : > { %2123 = vadd.xlane.f32.xlu0 %v2122_v50 }
 0x8c5   : > { %v2106_v45 = vpop.xlane.xlu2 %2105 }
 0x8c6   : > { %v2125_v24 = vmul.f32 %v2106_v45, %v5723_v47 }
 0x8c8   : > { %v2132_v35 = vadd.f32 1e-05, %v2125_v24 }
 0x8ca   : > { %5250 = vrsqrt.f32 %v2132_v35  ;;  %vm2145_vm9 = vweird.f32 %v2132_v35 }
 0x8cd   : > { %v2109_v48 = vpop.xlane.xlu1 %2108 }
 0x8ce   : > { %v2126_v14 = vmul.f32 %v2109_v48, %v5723_v47 }
 0x8d0   : > { %v5251_v52 = vpop.eup %5250  ;;  %v2133_v55 = vadd.f32 1e-05, %v2126_v14 }
 0x8d1   : > { %v2140_v9 = vmul.f32 %v5251_v52, %v2132_v35  ;;  %vm2146_vm8 = vweird.f32 %v5251_v52 }
 0x8d2   : > { %5252 = vrsqrt.f32 %v2133_v55  ;;  %vm2147_vm10 = vmor %vm2145_vm9, %vm2146_vm8  ;;  %vm2155_vm12 = vweird.f32 %v2133_v55 }
 0x8d3   : > { %v2141_v46 = vmul.f32 %v5251_v52, %v2140_v9 }
 0x8d5   : > { %v2142_v4 = vmul.f32 0.5, %v2141_v46  ;;  %v2112_v61 = vpop.xlane.xlu2 %2111 }
 0x8d6   : > { %v2127_v60 = vmul.f32 %v2112_v61, %v5723_v47 }
 0x8d7   : > { %v2143_v25 = vsub.f32 1.5, %v2142_v4 }
 0x8d8   : > { %v5253_v63 = vpop.eup %5252  ;;  %v2134_v32 = vadd.f32 1e-05, %v2127_v60 }
 0x8d9   : > { %v2144_v34 = vmul.f32 %v5251_v52, %v2143_v25  ;;  %v2150_v3 = vmul.f32 %v5253_v63, %v2133_v55  ;;  %vm2156_vm11 = vweird.f32 %v5253_v63 }
 0x8da   : > { %5254 = vrsqrt.f32 %v2134_v32  ;;  %vm2157_vm13 = vmor %vm2155_vm12, %vm2156_vm11  ;;  %vm2165_vm15 = vweird.f32 %v2134_v32 }
 0x8db   : > { %v2148_v43 = vsel %vm2147_vm10, %v5251_v52, %v2144_v34  ;;  %v2151_v6 = vmul.f32 %v5253_v63, %v2150_v3 }
 0x8dc   : > { %v2209_v7 = vmul.f32 %v2148_v43, %v6403_v54 }
 0x8dd   : > { %v2152_v8 = vmul.f32 0.5, %v2151_v6  ;;  %v2115_v12 = vpop.xlane.xlu0 %2114 }
 0x8de   : > { %v2219_v18 = vmul.f32 %v6456_v16, %v2209_v7  ;;  %v2128_v57 = vmul.f32 %v2115_v12, %v5723_v47 }
 0x8df   : > { %v2153_v20 = vsub.f32 1.5, %v2152_v8 }
 0x8e0   : > { %v5255_v13 = vpop.eup %5254  ;;  %v2135_v22 = vadd.f32 1e-05, %v2128_v57  ;;  %v2229_v17 = vadd.f32 %v6462_v10, %v2219_v18 }
 0x8e1   : > { %v2154_v27 = vmul.f32 %v5253_v63, %v2153_v20  ;;  %v2160_v54 = vmul.f32 %v5255_v13, %v2134_v32  ;;  %vm2166_vm14 = vweird.f32 %v5255_v13 }
 0x8e2   : > { %5256 = vrsqrt.f32 %v2135_v22  ;;  %4825 = vmatmul.msk.f32.vlgmr.msra.gmra.mxu1 %vm773_vm1, %v2229_v17  ;;  %4832 = vmatmul.msk.f32.vlgmr.msra.gmra.mxu2 %vm773_vm1, %v2229_v17  ;;  %vm2167_vm0 = vmor %vm2165_vm15, %vm2166_vm14  ;;  %vm2175_vm8 = vweird.f32 %v2135_v22 }
 0x8e3   : > { %v2158_v31 = vsel %vm2157_vm13, %v5253_v63, %v2154_v27  ;;  %v2161_v50 = vmul.f32 %v5255_v13, %v2160_v54 }
 0x8e4   : > { %v2210_v33 = vmul.f32 %v2158_v31, %v6410_v58 }
 0x8e5   : > { %v2162_v49 = vmul.f32 0.5, %v2161_v50  ;;  %v2118_v5 = vpop.xlane.xlu1 %2117 }
 0x8e6   : > { %v2129_v23 = vmul.f32 %v2118_v5, %v5723_v47  ;;  %v2220_v15 = vmul.f32 %v6456_v16, %v2210_v33 }
 0x8e7   : > { %v2163_v37 = vsub.f32 1.5, %v2162_v49 }
 0x8e8   : > { %v5257_v38 = vpop.eup %5256  ;;  %v2136_v2 = vadd.f32 1e-05, %v2129_v23  ;;  %v2230_v40 = vadd.f32 %v6462_v10, %v2220_v15 }
 0x8e9   : > { %v2164_v59 = vmul.f32 %v5255_v13, %v2163_v37  ;;  %v2170_v41 = vmul.f32 %v5257_v38, %v2135_v22  ;;  %vm2176_vm3 = vweird.f32 %v5257_v38 }
 0x8ea   : > { %5258 = vrsqrt.f32 %v2136_v2  ;;  %4826 = vmatmul.msk.f32.gmra.mxu1 %vm773_vm1, %v2230_v40  ;;  %4833 = vmatmul.msk.f32.gmra.mxu2 %vm773_vm1, %v2230_v40  ;;  %vm2177_vm9 = vmor %vm2175_vm8, %vm2176_vm3  ;;  %vm2185_vm11 = vweird.f32 %v2136_v2  ;;  %v2660_v40 = vld [vmem:[%s7817_s19 + $0x58] sm:$0xff] }
 0x8eb   : > { %v2168_v58 = vsel %vm2167_vm0, %v5255_v13, %v2164_v59  ;;  %v2171_v62 = vmul.f32 %v5257_v38, %v2170_v41  ;;  %v2679_v59 = vld [vmem:[%s7817_s19 + $0xf0] sm:$0xff] }
 0x8ec   : > { %v2211_v42 = vmul.f32 %v2168_v58, %v6417_v29  ;;  %v2659_v41 = vld [vmem:[%s7817_s19 + $0x50] sm:$0xff]  ;;  %v2678_v58 = vld [vmem:[%s7817_s19 + $0xe8] sm:$0xff] }
 0x8ed   : > { %v2172_v53 = vmul.f32 0.5, %v2171_v62  ;;  %v2121_v0 = vpop.xlane.xlu2 %2120  ;;  %v2658_v62 = vld [vmem:[%s7817_s19 + $0x48] sm:$0xff] }
 0x8ee   : > { %v2130_v44 = vmul.f32 %v2121_v0, %v5723_v47  ;;  %v2221_v45 = vmul.f32 %v6456_v16, %v2211_v42  ;;  %v2677_v42 = vld [vmem:[%s7817_s19 + $0xe0] sm:$0xff]  ;;  %v2676_v0 = vld [vmem:[%s7817_s19 + $0xd8] sm:$0xff] }
 0x8ef   : > { %v2173_v24 = vsub.f32 1.5, %v2172_v53  ;;  %v2657_v53 = vld [vmem:[%s7817_s19 + $0x40] sm:$0xff] }
 0x8f0   : > { %v5259_v35 = vpop.eup %5258  ;;  %v2137_v48 = vadd.f32 1e-05, %v2130_v44  ;;  %v2231_v14 = vadd.f32 %v6462_v10, %v2221_v45  ;;  %v2656_v44 = vld [vmem:[%s7817_s19 + $0x38] sm:$0xff]  ;;  %v2675_v45 = vld [vmem:[%s7817_s19 + $0xd0] sm:$0xff] }
 0x8f1   : > { %v2174_v52 = vmul.f32 %v5257_v38, %v2173_v24  ;;  %v2180_v55 = vmul.f32 %v5259_v35, %v2136_v2  ;;  %vm2186_vm10 = vweird.f32 %v5259_v35  ;;  %v2663_v2 = vld [vmem:[%s7817_s19 + $0x70] sm:$0xff] }
 0x8f2   : > { %5260 = vrsqrt.f32 %v2137_v48  ;;  %4827 = vmatmul.msk.f32.gmra.mxu1 %vm773_vm1, %v2231_v14  ;;  %4834 = vmatmul.msk.f32.gmra.mxu2 %vm773_vm1, %v2231_v14  ;;  %vm2187_vm12 = vmor %vm2185_vm11, %vm2186_vm10  ;;  %vm2195_vm14 = vweird.f32 %v2137_v48  ;;  %v2655_v24 = vld [vmem:[%s7817_s19 + $0x30] sm:$0xff]  ;;  %v2654_v14 = vld [vmem:[%s7817_s19 + $0x28] sm:$0xff] }
 0x8f3   : > { %v2178_v29 = vsel %vm2177_vm9, %v5257_v38, %v2174_v52  ;;  %v2181_v9 = vmul.f32 %v5259_v35, %v2180_v55  ;;  %v2664_v38 = vld [vmem:[%s7817_s19 + $0x78] sm:$0xff]  ;;  %v2673_v52 = vld [vmem:[%s7817_s19 + $0xc0] sm:$0xff] }
 0x8f4   : > { %v2212_v46 = vmul.f32 %v2178_v29, %v6424_v39  ;;  %2685 = vmatpush.msra.mxu3 %v2664_v38  ;;  %v2653_v55 = vld [vmem:[%s7817_s19 + $0x20] sm:$0xff]  ;;  %v2672_v29 = vld [vmem:[%s7817_s19 + $0xb8] sm:$0xff] }
 0x8f5   : > { %v2182_v4 = vmul.f32 0.5, %v2181_v9  ;;  %v2124_v61 = vpop.xlane.xlu0 %2123 }
 0x8f6   : > { %v2131_v60 = vmul.f32 %v2124_v61, %v5723_v47  ;;  %v2222_v25 = vmul.f32 %v6456_v16, %v2212_v46  ;;  %2686 = vmatpush.msra.mxu3 %v2663_v2  ;;  %v2652_v46 = vld [vmem:[%s7817_s19 + $0x18] sm:$0xff] }
 0x8f7   : > { %v2183_v63 = vsub.f32 1.5, %v2182_v4  ;;  %v2671_v4 = vld [vmem:[%s7817_s19 + $0xb0] sm:$0xff] }
 0x8f8   : > { %v5261_v32 = vpop.eup %5260  ;;  %v2138_v34 = vadd.f32 1e-05, %v2131_v60  ;;  %v2232_v3 = vadd.f32 %v6462_v10, %v2222_v25 }
 0x8f9   : > { %v2184_v43 = vmul.f32 %v5259_v35, %v2183_v63  ;;  %v2190_v6 = vmul.f32 %v5261_v32, %v2137_v48  ;;  %vm2196_vm13 = vweird.f32 %v5261_v32  ;;  %v2252_v48 = vld [vmem:[%s7816_s18] sm:$0x3] }
 0x8fa   : > { %5262 = vrsqrt.f32 %v2138_v34  ;;  %4828 = vmatmul.msk.f32.gmra.mxu1 %vm773_vm1, %v2232_v3  ;;  %4835 = vmatmul.msk.f32.gmra.mxu2 %vm773_vm1, %v2232_v3  ;;  %vm2197_vm15 = vmor %vm2195_vm14, %vm2196_vm13  ;;  %vm2205_vm3 = vweird.f32 %v2138_v34  ;;  %v6568_v9 = vperm.slane %v2252_v48, 0  ;;  %v6580_v63 = vperm.slane %v2252_v48, 1 }
 0x8fb   : > { %v2188_v39 = vsel %vm2187_vm12, %v5259_v35, %v2184_v43  ;;  %v2191_v7 = vmul.f32 %v5261_v32, %v2190_v6  ;;  %v2674_v35 = vld [vmem:[%s7817_s19 + $0xc8] sm:$0xff] }
 0x8fc   : > { %v2213_v8 = vmul.f32 %v2188_v39, %v6431_v11  ;;  %v2650_v6 = vld [vmem:[%s7817_s19 + $0x8] sm:$0xff]  ;;  %v2669_v39 = vld [vmem:[%s7817_s19 + $0xa0] sm:$0xff] }
 0x8fd   : > { %v2192_v12 = vmul.f32 0.5, %v2191_v7 }
 0x8fe   : > { %v2223_v18 = vmul.f32 %v6456_v16, %v2213_v8 }
 0x8ff   : > { %v2193_v57 = vsub.f32 1.5, %v2192_v12  ;;  %v2649_v12 = vld [vmem:[%s7817_s19] sm:$0xff] }
 0x900   : > { %v5263_v20 = vpop.eup %5262  ;;  %v2233_v13 = vadd.f32 %v6462_v10, %v2223_v18  ;;  %v2668_v18 = vld [vmem:[%s7817_s19 + $0x98] sm:$0xff] }
 0x901   : > { %v2194_v22 = vmul.f32 %v5261_v32, %v2193_v57  ;;  %v2200_v17 = vmul.f32 %v5263_v20, %v2138_v34  ;;  %vm2206_vm0 = vweird.f32 %v5263_v20  ;;  %v2670_v34 = vld [vmem:[%s7817_s19 + $0xa8] sm:$0xff] }
 0x902   : > { %4829 = vmatmul.msk.f32.gmra.mxu1 %vm773_vm1, %v2233_v13  ;;  %4836 = vmatmul.msk.f32.gmra.mxu2 %vm773_vm1, %v2233_v13  ;;  %vm2207_vm8 = vmor %vm2205_vm3, %vm2206_vm0  ;;  %v2667_v13 = vld [vmem:[%s7817_s19 + $0x90] sm:$0xff] }
 0x903   : > { %v2198_v27 = vsel %vm2197_vm15, %v5261_v32, %v2194_v22  ;;  %v2201_v54 = vmul.f32 %v5263_v20, %v2200_v17  ;;  %v2651_v32 = vld [vmem:[%s7817_s19 + $0x10] sm:$0xff] }
 0x904   : > { %v2214_v11 = vmul.f32 %v2198_v27, %v6438_v21  ;;  %v2666_v27 = vld [vmem:[%s7817_s19 + $0x88] sm:$0xff] }
 0x905   : > { %v2202_v31 = vmul.f32 0.5, %v2201_v54 }
 0x906   : > { %v2224_v50 = vmul.f32 %v6456_v16, %v2214_v11 }
 0x907   : > { %v2203_v33 = vsub.f32 1.5, %v2202_v31 }
 0x908   : > { %v2234_v49 = vadd.f32 %v6462_v10, %v2224_v50 }
 0x909   : > { %v2204_v5 = vmul.f32 %v5263_v20, %v2203_v33 }
 0x90a   : > { %4830 = vmatmul.msk.f32.gmra.mxu1 %vm773_vm1, %v2234_v49  ;;  %4837 = vmatmul.msk.f32.gmra.mxu2 %vm773_vm1, %v2234_v49 }
 0x90b   : > { %v2208_v23 = vsel %vm2207_vm8, %v5263_v20, %v2204_v5  ;;  %v2665_v5 = vld [vmem:[%s7817_s19 + $0x80] sm:$0xff] }
 0x90c   : > { %v2215_v15 = vmul.f32 %v2208_v23, %v6445_v30  ;;  %v2662_v30 = vld [vmem:[%s7817_s19 + $0x68] sm:$0xff] }
 0x90d   : > { %2687 = vmatpush.msra.mxu3 %v2662_v30 }
 0x90e   : > { %v2225_v37 = vmul.f32 %v6456_v16, %v2215_v15  ;;  %v2661_v16 = vld [vmem:[%s7817_s19 + $0x60] sm:$0xff] }
 0x90f   : > { %2688 = vmatpush.msra.mxu3 %v2661_v16 }
 0x910   : > { %v2235_v21 = vadd.f32 %v6462_v10, %v2225_v37  ;;  %v2680_v10 = vld [vmem:[%s7817_s19 + $0xf8] sm:$0xff] }
 0x911   : > { %2723 = vmatpush.msra.mxu0 %v2680_v10  ;;  %2689 = vmatpush.msra.mxu3 %v2660_v40 }
 0x912   : > { %4831 = vmatmul.msk.f32.gmra.mxu1 %vm773_vm1, %v2235_v21  ;;  %4838 = vmatmul.msk.f32.gmra.mxu2 %vm773_vm1, %v2235_v21 }
 0x913   : > { %2724 = vmatpush.msra.mxu0 %v2679_v59  ;;  %2690 = vmatpush.msra.mxu3 %v2659_v41 }
 0x915   : > { %2725 = vmatpush.msra.mxu0 %v2678_v58  ;;  %2691 = vmatpush.msra.mxu3 %v2658_v62 }
 0x917   : > { %2726 = vmatpush.msra.mxu0 %v2677_v42  ;;  %2692 = vmatpush.msra.mxu3 %v2657_v53 }
 0x919   : > { %2727 = vmatpush.msra.mxu0 %v2676_v0  ;;  %2693 = vmatpush.msra.mxu3 %v2656_v44 }
 0x91b   : > { %2728 = vmatpush.msra.mxu0 %v2675_v45  ;;  %2694 = vmatpush.msra.mxu3 %v2655_v24 }
 0x91d   : > { %2729 = vmatpush.msra.mxu0 %v2674_v35  ;;  %2695 = vmatpush.msra.mxu3 %v2654_v14 }
 0x91f   : > { %2730 = vmatpush.msra.mxu0 %v2673_v52  ;;  %2696 = vmatpush.msra.mxu3 %v2653_v55 }
 0x921   : > { %2731 = vmatpush.msra.mxu0 %v2672_v29  ;;  %2697 = vmatpush.msra.mxu3 %v2652_v46 }
 0x923   : > { %2732 = vmatpush.msra.mxu0 %v2671_v4  ;;  %2698 = vmatpush.msra.mxu3 %v2651_v32 }
 0x925   : > { %2733 = vmatpush.msra.mxu0 %v2670_v34  ;;  %2699 = vmatpush.msra.mxu3 %v2650_v6 }
 0x927   : > { %2734 = vmatpush.msra.mxu0 %v2669_v39  ;;  %2700 = vmatpush.msra.mxu3 %v2649_v12 }
 0x929   : > { %2735 = vmatpush.msra.mxu0 %v2668_v18 }
 0x92b   : > { %2736 = vmatpush.msra.mxu0 %v2667_v13 }
 0x92d   : > { %2737 = vmatpush.msra.mxu0 %v2666_v27 }
 0x92f   : > { %2738 = vmatpush.msra.mxu0 %v2665_v5 }
 0x95f   : > { %v2296_v61 = vpop.f32.mrf.mxu1 }
 0x960   : > { %v6577_v60 = vadd.f32 %v2296_v61, %v6568_v9 }
 0x962   : > { %v4839_v25 = vmul.f32 -1.702, %v6577_v60 }
 0x964   : > { %v2383_v3 = vmul.f32 1.442695, %v4839_v25 }
 0x965   : > { %v2334_v43 = vpop.f32.mrf.mxu2 }
 0x966   : > { %5264 = vpow2.f32 %v2383_v3  ;;  %v6595_v7 = vadd.f32 %v2334_v43, %v6580_v63 }
 0x967   : > { %v2299_v8 = vpop.f32.mrf.mxu1 }
 0x968   : > { %v4840_v57 = vmul.f32 -1.702, %v6595_v7  ;;  %v6605_v20 = vadd.f32 %v2299_v8, %v6568_v9 }
 0x96a   : > { %v2385_v22 = vmul.f32 1.442695, %v4840_v57  ;;  %v4841_v17 = vmul.f32 -1.702, %v6605_v20 }
 0x96c   : > { %v5265_v54 = vpop.eup %5264  ;;  %5266 = vpow2.f32 %v2385_v22  ;;  %v2387_v11 = vmul.f32 1.442695, %v4841_v17 }
 0x96d   : > { %v2411_v31 = vadd.f32 1.0, %v5265_v54  ;;  %v2337_v50 = vpop.f32.mrf.mxu2 }
 0x96e   : > { %5268 = vpow2.f32 %v2387_v11  ;;  %v6615_v33 = vadd.f32 %v2337_v50, %v6580_v63 }
 0x96f   : > { %5270 = vrcp.f32 %v2411_v31  ;;  %v2302_v49 = vpop.f32.mrf.mxu1  ;;  %v2434_v0 = vand.u32 2147483647, %v2411_v31  ;;  %v2436_v44 = vand.u32 2147483648, %v2411_v31  ;;  %vm2430_vm10 = vweird.f32 %v2411_v31 }
 0x970   : > { %v4842_v23 = vmul.f32 -1.702, %v6615_v33  ;;  %v6622_v15 = vadd.f32 %v2302_v49, %v6568_v9 }
 0x971   : > { %vm2435_vm12 = vcmp.eq.f32.partialorder %v2434_v0, 8.507059e+37  ;;  %v2437_v25 = vor.u32 1.1754944e-38, %v2436_v44 }
 0x972   : > { %v5267_v37 = vpop.eup %5266  ;;  %v2389_v21 = vmul.f32 1.442695, %v4842_v23  ;;  %v4843_v38 = vmul.f32 -1.702, %v6622_v15 }
 0x973   : > { %v2412_v2 = vadd.f32 1.0, %v5267_v37 }
 0x974   : > { %v5269_v30 = vpop.eup %5268  ;;  %5272 = vpow2.f32 %v2389_v21  ;;  %v2391_v16 = vmul.f32 1.442695, %v4843_v38 }
 0x975   : > { %v5271_v10 = vpop.eup %5270  ;;  %5274 = vrcp.f32 %v2412_v2  ;;  %v2340_v40 = vpop.f32.mrf.mxu2  ;;  %v6625_v41 = vadd.f32 1.0, %v5269_v30  ;;  %v2449_v39 = vand.u32 2147483647, %v2412_v2  ;;  %v2451_v8 = vand.u32 2147483648, %v2412_v2 }
 0x976   : > { %v2426_v59 = vmul.f32 %v5271_v10, %v2411_v31  ;;  %5276 = vpow2.f32 %v2391_v16  ;;  %v6628_v58 = vadd.f32 %v2340_v40, %v6580_v63  ;;  %vm2431_vm9 = vweird.f32 %v5271_v10 }
 0x977   : > { %v2305_v62 = vpop.f32.mrf.mxu1  ;;  %5278 = vrcp.f32 %v6625_v41  ;;  %vm2432_vm11 = vmor %vm2430_vm10, %vm2431_vm9  ;;  %vm2445_vm14 = vweird.f32 %v2412_v2  ;;  %v2452_v11 = vor.u32 1.1754944e-38, %v2451_v8  ;;  %vm2450_vm0 = vcmp.eq.f32.partialorder %v2449_v39, 8.507059e+37 }
 0x978   : > { %v2427_v42 = vsub.f32 1.0, %v2426_v59  ;;  %v6631_v53 = vadd.f32 %v2305_v62, %v6568_v9  ;;  %v4844_v45 = vmul.f32 -1.702, %v6628_v58 }
 0x97a   : > { %v5273_v24 = vpop.eup %5272  ;;  %v2428_v35 = vmul.f32 %v5271_v10, %v2427_v42  ;;  %v4845_v48 = vmul.f32 -1.702, %v6631_v53  ;;  %v2393_v55 = vmul.f32 1.442695, %v4844_v45 }
 0x97b   : > { %v5275_v14 = vpop.eup %5274  ;;  %v6636_v52 = vadd.f32 1.0, %v5273_v24 }
 0x97c   : > { %v5277_v29 = vpop.eup %5276  ;;  %v2429_v46 = vadd.f32 %v5271_v10, %v2428_v35  ;;  %v2441_v4 = vmul.f32 %v5275_v14, %v2412_v2  ;;  %v2395_v61 = vmul.f32 1.442695, %v4845_v48  ;;  %vm2446_vm13 = vweird.f32 %v5275_v14 }
 0x97d   : > { %5280 = vrcp.f32 %v6636_v52  ;;  %v2343_v32 = vpop.f32.mrf.mxu2  ;;  %v6639_v43 = vadd.f32 1.0, %v5277_v29  ;;  %v6643_v13 = vpop.eup %5278  ;;  %vm2447_vm15 = vmor %vm2445_vm14, %vm2446_vm13  ;;  %v2479_v38 = vand.u32 2147483647, %v6636_v52  ;;  %v2481_v2 = vand.u32 2147483648, %v6636_v52 }
 0x97e   : > { %v2433_v34 = vsel %vm2432_vm11, %v5271_v10, %v2429_v46  ;;  %v2442_v3 = vsub.f32 1.0, %v2441_v4  ;;  %5282 = vpow2.f32 %v2393_v55  ;;  %v6646_v22 = vadd.f32 %v2343_v32, %v6580_v63 }
 0x97f   : > { %v2438_v6 = vsel %vm2435_vm12, %v2437_v25, %v2433_v34  ;;  %5284 = vpow2.f32 %v2395_v61  ;;  %v2308_v12 = vpop.f32.mrf.mxu1  ;;  %v2456_v23 = vmul.f32 %v6643_v13, %v6625_v41  ;;  %vm2475_vm8 = vweird.f32 %v6636_v52 }
 0x980   : > { %v2635_v18 = vmul.f32 %v2438_v6, %v6577_v60  ;;  %v2443_v57 = vmul.f32 %v5275_v14, %v2442_v3  ;;  %5286 = vrcp.f32 %v6639_v43  ;;  %v6649_v17 = vadd.f32 %v2308_v12, %v6568_v9 }
 0x981   : > { %v4846_v60 = vmul.f32 -1.702, %v6646_v22  ;;  %v2457_v35 = vsub.f32 1.0, %v2456_v23  ;;  %vm2480_vm10 = vcmp.eq.f32.partialorder %v2479_v38, 8.507059e+37  ;;  %v2482_v55 = vor.u32 1.1754944e-38, %v2481_v2 }
 0x982   : > { %v2444_v27 = vadd.f32 %v5275_v14, %v2443_v57  ;;  %2701 = vmatmul.f32.vlgmr.msra.gmra.mxu3 %v2635_v18  ;;  %v4847_v31 = vmul.f32 -1.702, %v6649_v17  ;;  %vm2460_vm11 = vweird.f32 %v6625_v41  ;;  %v2466_v3 = vand.u32 2147483648, %v6625_v41 }
 0x983   : > { %v5281_v54 = vpop.eup %5280  ;;  %v2397_v42 = vmul.f32 1.442695, %v4846_v60  ;;  %v2458_v61 = vmul.f32 %v6643_v13, %v2457_v35  ;;  %vm2490_vm12 = vweird.f32 %v6639_v43  ;;  %v2494_v57 = vand.u32 2147483647, %v6639_v43 }
 0x984   : > { %v5283_v50 = vpop.eup %5282  ;;  %v2448_v49 = vsel %vm2447_vm15, %v5275_v14, %v2444_v27  ;;  %v2471_v5 = vmul.f32 %v5281_v54, %v6636_v52  ;;  %vm2476_vm3 = vweird.f32 %v5281_v54  ;;  %v2399_v44 = vmul.f32 1.442695, %v4847_v31 }
 0x985   : > { %v5285_v37 = vpop.eup %5284  ;;  %v2453_v21 = vsel %vm2450_vm0, %v2452_v11, %v2448_v49  ;;  %v6658_v30 = vadd.f32 1.0, %v5283_v50  ;;  %v2346_v16 = vpop.f32.mrf.mxu2  ;;  %vm2477_vm9 = vmor %vm2475_vm8, %vm2476_vm3  ;;  %v2464_v52 = vand.u32 2147483647, %v6625_v41  ;;  %vm2461_vm13 = vweird.f32 %v6643_v13 }
 0x986   : > { %v6660_v10 = vpop.eup %5286  ;;  %v2636_v40 = vmul.f32 %v2453_v21, %v6595_v7  ;;  %v2472_v59 = vsub.f32 1.0, %v2471_v5  ;;  %v6663_v62 = vadd.f32 1.0, %v5285_v37  ;;  %v6670_v24 = vadd.f32 %v2346_v16, %v6580_v63  ;;  %vm6705_vm0 = vmor %vm2460_vm11, %vm2461_vm13 }
 0x987   : > { %v2486_v0 = vmul.f32 %v6660_v10, %v6639_v43  ;;  %5288 = vrcp.f32 %v6658_v30  ;;  %v2311_v48 = vpop.f32.mrf.mxu1  ;;  %vm2491_vm14 = vweird.f32 %v6660_v10  ;;  %v2509_v49 = vand.u32 2147483647, %v6658_v30 }
 0x988   : > { %v2473_v45 = vmul.f32 %v5281_v54, %v2472_v59  ;;  %5290 = vrcp.f32 %v6663_v62  ;;  %2739 = vmatmul.f32.vlgmr.msra.gmra.mxu0 %v2636_v40  ;;  %v4848_v46 = vmul.f32 -1.702, %v6670_v24  ;;  %v6676_v4 = vadd.f32 %v2311_v48, %v6568_v9  ;;  %vm6718_vm3 = vmor %vm2490_vm12, %vm2491_vm14 }
 0x989   : > { %v2487_v7 = vsub.f32 1.0, %v2486_v0  ;;  %5292 = vpow2.f32 %v2397_v42  ;;  %v2511_v5 = vand.u32 2147483648, %v6658_v30  ;;  %v2496_v16 = vand.u32 2147483648, %v6639_v43 }
 0x98a   : > { %v2474_v14 = vadd.f32 %v5281_v54, %v2473_v45  ;;  %5294 = vpow2.f32 %v2399_v44  ;;  %v2401_v18 = vmul.f32 1.442695, %v4848_v46  ;;  %vm2505_vm8 = vweird.f32 %v6658_v30 }
 0x98b   : > { %v2488_v34 = vmul.f32 %v6660_v10, %v2487_v7  ;;  %v2467_v0 = vor.u32 1.1754944e-38, %v2466_v3  ;;  %v2512_v44 = vor.u32 1.1754944e-38, %v2511_v5  ;;  %vm2465_vm11 = vcmp.eq.f32.partialorder %v2464_v52, 8.507059e+37 }
 0x98c   : > { %v2478_v29 = vsel %vm2477_vm9, %v5281_v54, %v2474_v14  ;;  %v4849_v54 = vmul.f32 -1.702, %v6676_v4  ;;  %5296 = vpow2.f32 %v2401_v18  ;;  %vm2495_vm12 = vcmp.eq.f32.partialorder %v2494_v57, 8.507059e+37 }
 0x98d   : > { %v5289_v25 = vpop.eup %5288  ;;  %v2483_v32 = vsel %vm2480_vm10, %v2482_v55, %v2478_v29  ;;  %v2349_v6 = vpop.f32.mrf.mxu2  ;;  %v2489_v50 = vadd.f32 %v6660_v10, %v2488_v34  ;;  %vm2510_vm10 = vcmp.eq.f32.partialorder %v2509_v49, 8.507059e+37  ;;  %vm2520_vm13 = vweird.f32 %v6663_v62 }
 0x98e   : > { %v6682_v39 = vpop.eup %5290  ;;  %v2638_v8 = vmul.f32 %v2483_v32, %v6615_v33  ;;  %v2501_v12 = vmul.f32 %v5289_v25, %v6658_v30  ;;  %v2459_v33 = vadd.f32 %v6643_v13, %v2458_v61  ;;  %vm2506_vm15 = vweird.f32 %v5289_v25 }
 0x98f   : > { %v2516_v27 = vmul.f32 %v6682_v39, %v6663_v62  ;;  %v5293_v11 = vpop.eup %5292  ;;  %v2403_v38 = vmul.f32 1.442695, %v4849_v54  ;;  %vm2507_vm9 = vmor %vm2505_vm8, %vm2506_vm15  ;;  %v2493_v43 = vsel %vm6718_vm3, %v6660_v10, %v2489_v50  ;;  %v2314_v48 = vpop.f32.mrf.mxu1  ;;  %v2497_v30 = vor.u32 1.1754944e-38, %v2496_v16 }
 0x990   : > { %v2502_v60 = vsub.f32 1.0, %v2501_v12  ;;  %2742 = vmatmul.f32.gmra.mxu0 %v2638_v8  ;;  %v5295_v31 = vpop.eup %5294  ;;  %v6697_v23 = vadd.f32 1.0, %v5293_v11  ;;  %v2463_v59 = vsel %vm6705_vm0, %v6643_v13, %v2459_v33  ;;  %v6725_v13 = vadd.f32 %v2349_v6, %v6580_v63 }
 0x991   : > { %v6699_v21 = vadd.f32 1.0, %v5295_v31  ;;  %v2517_v40 = vsub.f32 1.0, %v2516_v27  ;;  %v2468_v7 = vsel %vm2465_vm11, %v2467_v0, %v2463_v59  ;;  %v2498_v10 = vsel %vm2495_vm12, %v2497_v30, %v2493_v43 }
 0x992   : > { %v2503_v37 = vmul.f32 %v5289_v25, %v2502_v60  ;;  %5298 = vrcp.f32 %v6697_v23  ;;  %v5297_v45 = vpop.eup %5296  ;;  %v2637_v32 = vmul.f32 %v2468_v7, %v6605_v20  ;;  %v4850_v52 = vmul.f32 -1.702, %v6725_v13 }
 0x993   : > { %5300 = vrcp.f32 %v6699_v21  ;;  %v2518_v55 = vmul.f32 %v6682_v39, %v2517_v40  ;;  %v6733_v61 = vadd.f32 1.0, %v5297_v45  ;;  %v6739_v3 = vadd.f32 %v2314_v48, %v6568_v9 }
 0x994   : > { %v2504_v41 = vadd.f32 %v5289_v25, %v2503_v37  ;;  %5302 = vpow2.f32 %v2403_v38  ;;  %v2526_v8 = vand.u32 2147483648, %v6663_v62  ;;  %2704 = vmatmul.f32.gmra.mxu3 %v2637_v32  ;;  %vm2521_vm14 = vweird.f32 %v6682_v39 }
 0x995   : > { %v2352_v29 = vpop.f32.mrf.mxu2  ;;  %5304 = vrcp.f32 %v6733_v61  ;;  %v2519_v12 = vadd.f32 %v6682_v39, %v2518_v55  ;;  %v2539_v9 = vand.u32 2147483647, %v6697_v23  ;;  %v2639_v27 = vmul.f32 %v2498_v10, %v6622_v15  ;;  %vm6761_vm0 = vmor %vm2520_vm13, %vm2521_vm14 }
 0x996   : > { %v2508_v35 = vsel %vm2507_vm9, %v5289_v25, %v2504_v41  ;;  %v2524_v25 = vand.u32 2147483647, %v6663_v62  ;;  %v6747_v20 = vadd.f32 %v2352_v29, %v6580_v63  ;;  %v2405_v11 = vmul.f32 1.442695, %v4850_v52 }
 0x997   : > { %v2513_v14 = vsel %vm2510_vm10, %v2512_v44, %v2508_v35  ;;  %v4851_v60 = vmul.f32 -1.702, %v6739_v3  ;;  %v2541_v63 = vand.u32 2147483648, %v6697_v23  ;;  %v2523_v37 = vsel %vm6761_vm0, %v6682_v39, %v2519_v12 }
 0x998   : > { %v2640_v46 = vmul.f32 %v2513_v14, %v6628_v58  ;;  %v5299_v34 = vpop.eup %5298  ;;  %5306 = vpow2.f32 %v2405_v11  ;;  %v4852_v15 = vmul.f32 -1.702, %v6747_v20  ;;  %vm2535_vm3 = vweird.f32 %v6697_v23 }
 0x999   : > { %v6741_v6 = vpop.eup %5300  ;;  %v2531_v58 = vmul.f32 %v5299_v34, %v6697_v23  ;;  %vm2536_vm15 = vweird.f32 %v5299_v34  ;;  %v2407_v5 = vmul.f32 1.442695, %v4851_v60  ;;  %v2527_v40 = vor.u32 1.1754944e-38, %v2526_v8 }
 0x99a   : > { %2745 = vmatmul.f32.gmra.mxu0 %v2640_v46  ;;  %v2546_v18 = vmul.f32 %v6741_v6, %v6699_v21  ;;  %v5303_v57 = vpop.eup %5302  ;;  %v2409_v16 = vmul.f32 1.442695, %v4852_v15  ;;  %vm2537_vm8 = vmor %vm2535_vm3, %vm2536_vm15  ;;  %v2542_v59 = vor.u32 1.1754944e-38, %v2541_v63  ;;  %vm2525_vm9 = vcmp.eq.f32.partialorder %v2524_v25, 8.507059e+37 }
 0x99b   : > { %v2532_v54 = vsub.f32 1.0, %v2531_v58  ;;  %v6757_v31 = vadd.f32 1.0, %v5303_v57  ;;  %v5305_v38 = vpop.eup %5304  ;;  %vm2540_vm10 = vcmp.eq.f32.partialorder %v2539_v9, 8.507059e+37  ;;  %v2528_v39 = vsel %vm2525_vm9, %v2527_v40, %v2523_v37 }
 0x99c   : > { %v2547_v33 = vsub.f32 1.0, %v2546_v18  ;;  %v2561_v42 = vmul.f32 %v5305_v38, %v6733_v61  ;;  %2707 = vmatmul.f32.gmra.mxu3 %v2639_v27  ;;  %v2556_v0 = vand.u32 2147483648, %v6699_v21  ;;  %vm2551_vm11 = vweird.f32 %v6741_v6 }
 0x99d   : > { %v2533_v49 = vmul.f32 %v5299_v34, %v2532_v54  ;;  %5308 = vrcp.f32 %v6757_v31  ;;  %v2571_v7 = vand.u32 2147483648, %v6733_v61  ;;  %vm2566_vm12 = vweird.f32 %v5305_v38 }
 0x99e   : > { %v2548_v62 = vmul.f32 %v6741_v6, %v2547_v33  ;;  %5310 = vpow2.f32 %v2407_v5  ;;  %v2562_v44 = vsub.f32 1.0, %v2561_v42  ;;  %v5307_v45 = vpop.eup %5306  ;;  %v2569_v14 = vand.u32 2147483647, %v6733_v61 }
 0x99f   : > { %v2534_v2 = vadd.f32 %v5299_v34, %v2533_v49  ;;  %5312 = vpow2.f32 %v2409_v16  ;;  %v2422_v55 = vadd.f32 1.0, %v5307_v45  ;;  %v2641_v46 = vmul.f32 %v2528_v39, %v6631_v53 }
 0x9a0   : > { %v2549_v35 = vadd.f32 %v6741_v6, %v2548_v62  ;;  %v2563_v30 = vmul.f32 %v5305_v38, %v2562_v44  ;;  %vm2550_vm13 = vweird.f32 %v6699_v21  ;;  %v2554_v32 = vand.u32 2147483647, %v6699_v21 }
 0x9a1   : > { %v2538_v41 = vsel %vm2537_vm8, %v5299_v34, %v2534_v2  ;;  %vm6784_vm14 = vmor %vm2550_vm13, %vm2551_vm11  ;;  %vm2565_vm15 = vweird.f32 %v6733_v61  ;;  %5314 = vrcp.f32 %v2422_v55  ;;  %v2572_v52 = vor.u32 1.1754944e-38, %v2571_v7 }
 0x9a2   : > { %v2543_v23 = vsel %vm2540_vm10, %v2542_v59, %v2538_v41  ;;  %v2564_v10 = vadd.f32 %v5305_v38, %v2563_v30  ;;  %v2553_v53 = vsel %vm6784_vm14, %v6741_v6, %v2549_v35  ;;  %vm2567_vm0 = vmor %vm2565_vm15, %vm2566_vm12  ;;  %v2557_v58 = vor.u32 1.1754944e-38, %v2556_v0 }
 0x9a3   : > { %v2642_v43 = vmul.f32 %v2543_v23, %v6646_v22  ;;  %v5309_v48 = vpop.eup %5308  ;;  %vm2570_vm3 = vcmp.eq.f32.partialorder %v2569_v14, 8.507059e+37  ;;  %vm2555_vm8 = vcmp.eq.f32.partialorder %v2554_v32, 8.507059e+37  ;;  %v2586_v11 = vand.u32 2147483648, %v6757_v31 }
 0x9a4   : > { %v5311_v29 = vpop.eup %5310  ;;  %v2576_v22 = vmul.f32 %v5309_v48, %v6757_v31  ;;  %v2568_v12 = vsel %vm2567_vm0, %v5305_v38, %v2564_v10  ;;  %2710 = vmatmul.f32.gmra.mxu3 %v2641_v46  ;;  %v2558_v57 = vsel %vm2555_vm8, %v2557_v58, %v2553_v53  ;;  %vm2581_vm9 = vweird.f32 %v5309_v48 }
 0x9a5   : > { %2748 = vmatmul.f32.gmra.mxu0 %v2642_v43  ;;  %v5313_v25 = vpop.eup %5312  ;;  %v6793_v8 = vadd.f32 1.0, %v5311_v29  ;;  %v2573_v18 = vsel %vm2570_vm3, %v2572_v52, %v2568_v12  ;;  %v2643_v60 = vmul.f32 %v2558_v57, %v6649_v17  ;;  %vm2580_vm10 = vweird.f32 %v6757_v31 }
 0x9a6   : > { %v2577_v21 = vsub.f32 1.0, %v2576_v22  ;;  %v6795_v9 = vadd.f32 1.0, %v5313_v25  ;;  %v2644_v6 = vmul.f32 %v2573_v18, %v6670_v24  ;;  %v2584_v63 = vand.u32 2147483647, %v6757_v31  ;;  %vm2582_vm11 = vmor %vm2580_vm10, %vm2581_vm9  ;;  %v5151_v25 = vld [vmem:[%s7818_s20] ss:$0 sm:$0xff] }
 0x9a7   : > { %5316 = vrcp.f32 %v6793_v8  ;;  %v5315_v54 = vpop.eup %5314  ;;  %v2599_v50 = vand.u32 2147483647, %v2422_v55  ;;  %v2601_v15 = vand.u32 2147483648, %v2422_v55  ;;  %v2587_v37 = vor.u32 1.1754944e-38, %v2586_v11 }
 0x9a8   : > { %v2578_v61 = vmul.f32 %v5309_v48, %v2577_v21  ;;  %5318 = vrcp.f32 %v6795_v9  ;;  %v2591_v33 = vmul.f32 %v5315_v54, %v2422_v55  ;;  %vm2585_vm12 = vcmp.eq.f32.partialorder %v2584_v63, 8.507059e+37 }
 0x9a9   : > { %vm2595_vm13 = vweird.f32 %v2422_v55  ;;  %vm2596_vm14 = vweird.f32 %v5315_v54  ;;  %vm6805_vm15 = vcmp.eq.f32.partialorder %v2599_v50, 8.507059e+37  ;;  %v2602_v42 = vor.u32 1.1754944e-38, %v2601_v15 }
 0x9aa   : > { %v2579_v27 = vadd.f32 %v5309_v48, %v2578_v61  ;;  %v2592_v24 = vsub.f32 1.0, %v2591_v33  ;;  %vm2610_vm0 = vweird.f32 %v6793_v8  ;;  %v2614_v41 = vand.u32 2147483647, %v6793_v8  ;;  %vm2597_vm3 = vmor %vm2595_vm13, %vm2596_vm14 }
 0x9ab   : > { %v2616_v23 = vand.u32 2147483648, %v6793_v8  ;;  %v2629_v43 = vand.u32 2147483647, %v6795_v9  ;;  %v2631_v35 = vand.u32 2147483648, %v6795_v9 }
 0x9ac   : > { %v2583_v5 = vsel %vm2582_vm11, %v5309_v48, %v2579_v27  ;;  %v2593_v62 = vmul.f32 %v5315_v54, %v2592_v24  ;;  %2713 = vmatmul.f32.gmra.mxu3 %v2643_v60  ;;  %vm2625_vm11 = vweird.f32 %v6795_v9 }
 0x9ad   : > { %2751 = vmatmul.f32.gmra.mxu0 %v2644_v6  ;;  %v5317_v49 = vpop.eup %5316  ;;  %v2588_v17 = vsel %vm2585_vm12, %v2587_v37, %v2583_v5  ;;  %v2617_v29 = vor.u32 1.1754944e-38, %v2616_v23  ;;  %vm2615_vm12 = vcmp.eq.f32.partialorder %v2614_v41, 8.507059e+37  ;;  %vm2630_vm14 = vcmp.eq.f32.partialorder %v2629_v43, 8.507059e+37 }
 0x9ae   : > { %v2606_v38 = vmul.f32 %v5317_v49, %v6793_v8  ;;  %v5319_v2 = vpop.eup %5318  ;;  %v2594_v59 = vadd.f32 %v5315_v54, %v2593_v62  ;;  %vm2611_vm8 = vweird.f32 %v5317_v49  ;;  %v2645_v44 = vmul.f32 %v2588_v17, %v6676_v4 }
 0x9af   : > { %v2621_v40 = vmul.f32 %v5319_v2, %v6795_v9  ;;  %vm2626_vm9 = vweird.f32 %v5319_v2  ;;  %vm2612_vm10 = vmor %vm2610_vm0, %vm2611_vm8  ;;  %v2632_v4 = vor.u32 1.1754944e-38, %v2631_v35 }
 0x9b0   : > { %v2607_v16 = vsub.f32 1.0, %v2606_v38  ;;  %v2598_v45 = vsel %vm2597_vm3, %v5315_v54, %v2594_v59  ;;  %vm2627_vm13 = vmor %vm2625_vm11, %vm2626_vm9 }
 0x9b1   : > { %v2622_v0 = vsub.f32 1.0, %v2621_v40  ;;  %v2603_v7 = vsel %vm6805_vm15, %v2602_v42, %v2598_v45 }
 0x9b2   : > { %v2608_v39 = vmul.f32 %v5317_v49, %v2607_v16  ;;  %v2646_v14 = vmul.f32 %v2603_v7, %v6725_v13 }
 0x9b3   : > { %v2623_v30 = vmul.f32 %v5319_v2, %v2622_v0 }
 0x9b4   : > { %v2609_v48 = vadd.f32 %v5317_v49, %v2608_v39  ;;  %2716 = vmatmul.f32.gmra.mxu3 %v2645_v44 }
 0x9b5   : > { %v2624_v46 = vadd.f32 %v5319_v2, %v2623_v30  ;;  %2754 = vmatmul.f32.gmra.mxu0 %v2646_v14 }
 0x9b6   : > { %v2613_v55 = vsel %vm2612_vm10, %v5317_v49, %v2609_v48 }
 0x9b7   : > { %v2618_v32 = vsel %vm2615_vm12, %v2617_v29, %v2613_v55  ;;  %v2628_v22 = vsel %vm2627_vm13, %v5319_v2, %v2624_v46 }
 0x9b8   : > { %v2633_v34 = vsel %vm2630_vm14, %v2632_v4, %v2628_v22  ;;  %v2647_v10 = vmul.f32 %v2618_v32, %v6739_v3 }
 0x9b9   : > { %v2648_v13 = vmul.f32 %v2633_v34, %v6747_v20 }
 0x9bc   : > { %2719 = vmatmul.f32.gmra.mxu3 %v2647_v10 }
 0x9bd   : > { %2757 = vmatmul.f32.gmra.mxu0 %v2648_v13 }
 0xa05   : > { %v2702_v53 = vpop.f32.mrf.mxu3  ;;  %v2740_v21 = vpop.f32.mrf.mxu0 }
 0xa06   : > { %v2703_v52 = vadd.f32 %v5151_v25, %v2702_v53 }
 0xa08   : > { %v2741_v8 = vadd.f32 %v2740_v21, %v2703_v52 }
 0xa0a   : > { %v6828_v58 = vadd.f32 %v2741_v8, %v6367_v19 }
 0xa0c   : > { %v2772_v12 = vsel %vm773_vm1, %v6828_v58, 0.0 }
 0xa0d   : > { %2773 = vadd.xlane.f32.xlu1 %v2772_v12  ;;  %v2743_v3 = vpop.f32.mrf.mxu0 }
 0xa17   : > { %v2705_v9 = vpop.f32.mrf.mxu3  ;;  %v2746_v18 = vpop.f32.mrf.mxu0 }
 0xa18   : > { %v2706_v20 = vadd.f32 %v5151_v25, %v2705_v9 }
 0xa1a   : > { %v2744_v61 = vadd.f32 %v2743_v3, %v2706_v20 }
 0xa1c   : > { %v6833_v57 = vadd.f32 %v2744_v61, %v6372_v28 }
 0xa1e   : > { %v2775_v6 = vsel %vm773_vm1, %v6833_v57, 0.0 }
 0xa1f   : > { %v2708_v27 = vpop.f32.mrf.mxu3  ;;  %2776 = vadd.xlane.f32.xlu2 %v2775_v6 }
 0xa20   : > { %v2709_v54 = vadd.f32 %v5151_v25, %v2708_v27 }
 0xa22   : > { %v2747_v19 = vadd.f32 %v2746_v18, %v2709_v54  ;;  %v2749_v11 = vpop.f32.mrf.mxu0 }
 0xa24   : > { %v6838_v60 = vadd.f32 %v2747_v19, %v6377_v36 }
 0xa26   : > { %v2778_v63 = vsel %vm773_vm1, %v6838_v60, 0.0 }
 0xa27   : > { %2779 = vadd.xlane.f32.xlu0 %v2778_v63  ;;  %v2711_v33 = vpop.f32.mrf.mxu3  ;;  %v4862_v63 = vld [vmem:[%s7805_s7 + $0xb8] sm:$0xff] }
 0xa28   : > { %v2712_v50 = vadd.f32 %v5151_v25, %v2711_v33  ;;  %v4894_v33 = vld [vmem:[%s7807_s9 + $0xb8] sm:$0xff]  ;;  %2989 = vmatpush.msrb.mxu1 %v4862_v63 }
 0xa29   : > { %3093 = vmatpush.msrb.mxu3 %v4894_v33 }
 0xa2a   : > { %v2750_v49 = vadd.f32 %v2749_v11, %v2712_v50  ;;  %v2752_v5 = vpop.f32.mrf.mxu0  ;;  %v4878_v11 = vld [vmem:[%s7806_s8 + $0xb8] sm:$0xff]  ;;  %v4877_v50 = vld [vmem:[%s7806_s8 + $0xb0] sm:$0xff] }
 0xa2b   : > { %3041 = vmatpush.msrb.mxu2 %v4878_v11 }
 0xa2c   : > { %v6843_v28 = vadd.f32 %v2750_v49, %v6382_v1  ;;  %v4861_v49 = vld [vmem:[%s7805_s7 + $0xb0] sm:$0xff] }
 0xa2d   : > { %3042 = vmatpush.msrb.mxu2 %v4877_v50  ;;  %2990 = vmatpush.msrb.mxu1 %v4861_v49 }
 0xa2e   : > { %v2781_v24 = vsel %vm773_vm1, %v6843_v28, 0.0 }
 0xa2f   : > { %v2714_v15 = vpop.f32.mrf.mxu3  ;;  %2782 = vadd.xlane.f32.xlu1 %v2781_v24 }
 0xa30   : > { %v2715_v37 = vadd.f32 %v5151_v25, %v2714_v15 }
 0xa32   : > { %v2753_v38 = vadd.f32 %v2752_v5, %v2715_v37  ;;  %v2755_v17 = vpop.f32.mrf.mxu0  ;;  %v4893_v5 = vld [vmem:[%s7807_s9 + $0xb0] sm:$0xff]  ;;  %v4876_v37 = vld [vmem:[%s7806_s8 + $0xa8] sm:$0xff] }
 0xa33   : > { %3094 = vmatpush.msrb.mxu3 %v4893_v5  ;;  %3043 = vmatpush.msrb.mxu2 %v4876_v37 }
 0xa34   : > { %v6848_v36 = vadd.f32 %v2753_v38, %v6387_v56  ;;  %v4860_v38 = vld [vmem:[%s7805_s7 + $0xa8] sm:$0xff] }
 0xa35   : > { %2991 = vmatpush.msrb.mxu1 %v4860_v38 }
 0xa36   : > { %v2784_v2 = vsel %vm773_vm1, %v6848_v36, 0.0 }
 0xa37   : > { %v2717_v62 = vpop.f32.mrf.mxu3  ;;  %2785 = vadd.xlane.f32.xlu2 %v2784_v2  ;;  %v4892_v2 = vld [vmem:[%s7807_s9 + $0xa8] sm:$0xff] }
 0xa38   : > { %v2718_v31 = vadd.f32 %v5151_v25, %v2717_v62  ;;  %3095 = vmatpush.msrb.mxu3 %v4892_v2 }
 0xa3a   : > { %v2756_v1 = vadd.f32 %v2755_v17, %v2718_v31  ;;  %v2758_v41 = vpop.f32.mrf.mxu0  ;;  %v4859_v17 = vld [vmem:[%s7805_s7 + $0xa0] sm:$0xff] }
 0xa3b   : > { %v4875_v31 = vld [vmem:[%s7806_s8 + $0xa0] sm:$0xff]  ;;  %2992 = vmatpush.msrb.mxu1 %v4859_v17 }
 0xa3c   : > { %v6853_v16 = vadd.f32 %v2756_v1, %v6392_v26  ;;  %v4891_v1 = vld [vmem:[%s7807_s9 + $0xa0] sm:$0xff]  ;;  %3044 = vmatpush.msrb.mxu2 %v4875_v31 }
 0xa3d   : > { %3096 = vmatpush.msrb.mxu3 %v4891_v1 }
 0xa3e   : > { %v2787_v40 = vsel %vm773_vm1, %v6853_v16, 0.0 }
 0xa3f   : > { %2788 = vadd.xlane.f32.xlu0 %v2787_v40  ;;  %v2720_v59 = vpop.f32.mrf.mxu3  ;;  %v4858_v40 = vld [vmem:[%s7805_s7 + $0x98] sm:$0xff] }
 0xa40   : > { %v2721_v42 = vadd.f32 %v5151_v25, %v2720_v59  ;;  %v4874_v59 = vld [vmem:[%s7806_s8 + $0x98] sm:$0xff]  ;;  %2993 = vmatpush.msrb.mxu1 %v4858_v40 }
 0xa41   : > { %3045 = vmatpush.msrb.mxu2 %v4874_v59 }
 0xa42   : > { %v2759_v56 = vadd.f32 %v2758_v41, %v2721_v42  ;;  %v4890_v42 = vld [vmem:[%s7807_s9 + $0x98] sm:$0xff]  ;;  %v4857_v41 = vld [vmem:[%s7805_s7 + $0x90] sm:$0xff] }
 0xa43   : > { %3097 = vmatpush.msrb.mxu3 %v4890_v42  ;;  %2994 = vmatpush.msrb.mxu1 %v4857_v41 }
 0xa44   : > { %v6858_v39 = vadd.f32 %v2759_v56, %v6397_v51  ;;  %v4873_v56 = vld [vmem:[%s7806_s8 + $0x90] sm:$0xff] }
 0xa45   : > { %3046 = vmatpush.msrb.mxu2 %v4873_v56 }
 0xa46   : > { %v2790_v23 = vsel %vm792_vm2, %v6858_v39, 0.0 }
 0xa47   : > { %2791 = vadd.xlane.f32.xlu2 %v2790_v23  ;;  %v4889_v23 = vld [vmem:[%s7807_s9 + $0x90] sm:$0xff] }
 0xa48   : > { %3098 = vmatpush.msrb.mxu3 %v4889_v23  ;;  %v4936_v23 = vld [vmem:[%s7805_s7 + $0xf8] sm:$0xff] }
 0xa80   : > { %v2774_v0 = vpop.xlane.xlu1 %2773 }
 0xa81   : > { %v2793_v44 = vmul.f32 %v2774_v0, %v5723_v47  ;;  %v4856_v0 = vld [vmem:[%s7805_s7 + $0x88] sm:$0xff] }
 0xa82   : > { %2995 = vmatpush.msrb.mxu1 %v4856_v0  ;;  %v4952_v0 = vld [vmem:[%s7806_s8 + $0xf8] sm:$0xff] }
 0xa83   : > { %v6864_v26 = vsub.f32 %v6828_v58, %v2793_v44  ;;  %v4872_v44 = vld [vmem:[%s7806_s8 + $0x88] sm:$0xff] }
 0xa84   : > { %3047 = vmatpush.msrb.mxu2 %v4872_v44 }
 0xa85   : > { %v2807_v45 = vmul.f32 %v6864_v26, %v6864_v26 }
 0xa87   : > { %v2814_v43 = vsel %vm773_vm1, %v2807_v45, 0.0  ;;  %v4888_v45 = vld [vmem:[%s7807_s9 + $0x88] sm:$0xff] }
 0xa88   : > { %2815 = vadd.xlane.f32.xlu1 %v2814_v43  ;;  %3099 = vmatpush.msrb.mxu3 %v4888_v45 }
 0xa92   : > { %v2777_v35 = vpop.xlane.xlu2 %2776 }
 0xa93   : > { %v2794_v51 = vmul.f32 %v2777_v35, %v5723_v47  ;;  %v4855_v35 = vld [vmem:[%s7805_s7 + $0x80] sm:$0xff] }
 0xa94   : > { %2996 = vmatpush.msrb.mxu1 %v4855_v35  ;;  %v4935_v35 = vld [vmem:[%s7805_s7 + $0xf0] sm:$0xff] }
 0xa95   : > { %v6871_v7 = vsub.f32 %v6833_v57, %v2794_v51  ;;  %v4871_v51 = vld [vmem:[%s7806_s8 + $0x80] sm:$0xff] }
 0xa96   : > { %3048 = vmatpush.msrb.mxu2 %v4871_v51  ;;  %v4951_v51 = vld [vmem:[%s7806_s8 + $0xf0] sm:$0xff] }
 0xa97   : > { %v2808_v48 = vmul.f32 %v6871_v7, %v6871_v7 }
 0xa98   : > { %3376 = vmatpush.msra.mxu2 %v4936_v23 }
 0xa99   : > { %v2817_v30 = vsel %vm773_vm1, %v2808_v48, 0.0  ;;  %v4887_v48 = vld [vmem:[%s7807_s9 + $0x80] sm:$0xff] }
 0xa9a   : > { %2818 = vadd.xlane.f32.xlu0 %v2817_v30  ;;  %v2780_v14 = vpop.xlane.xlu0 %2779  ;;  %3100 = vmatpush.msrb.mxu3 %v4887_v48 }
 0xa9b   : > { %v2795_v55 = vmul.f32 %v2780_v14, %v5723_v47  ;;  %3377 = vmatpush.msra.mxu2 %v4935_v35 }
 0xa9c   : > { %3428 = vmatpush.msra.mxu3 %v4952_v0 }
 0xa9d   : > { %v6878_v29 = vsub.f32 %v6838_v60, %v2795_v55 }
 0xa9e   : > { %3429 = vmatpush.msra.mxu3 %v4951_v51 }
 0xa9f   : > { %v2809_v46 = vmul.f32 %v6878_v29, %v6878_v29 }
 0xaa1   : > { %v2820_v4 = vsel %vm773_vm1, %v2809_v46, 0.0 }
 0xaa2   : > { %v2783_v32 = vpop.xlane.xlu1 %2782  ;;  %2821 = vadd.xlane.f32.xlu1 %v2820_v4 }
 0xaa3   : > { %v2796_v22 = vmul.f32 %v2783_v32, %v5723_v47  ;;  %v6987_v32 = vld [vmem:[%s7834_s25 + $0x1] ss:$0 sm:$0xff] }
 0xaa5   : > { %v6885_v34 = vsub.f32 %v6843_v28, %v2796_v22 }
 0xaa7   : > { %v2810_v10 = vmul.f32 %v6885_v34, %v6885_v34 }
 0xaa9   : > { %v2823_v13 = vsel %vm773_vm1, %v2810_v10, 0.0  ;;  %v6992_v10 = vld [vmem:[%s7804_s6 + $0x1] ss:$0 sm:$0xff] }
 0xaaa   : > { %v2786_v25 = vpop.xlane.xlu2 %2785  ;;  %2824 = vadd.xlane.f32.xlu2 %v2823_v13 }
 0xaab   : > { %v2797_v53 = vmul.f32 %v2786_v25, %v5723_v47 }
 0xaad   : > { %v6892_v52 = vsub.f32 %v6848_v36, %v2797_v53 }
 0xaaf   : > { %v2811_v21 = vmul.f32 %v6892_v52, %v6892_v52 }
 0xab1   : > { %v2826_v8 = vsel %vm773_vm1, %v2811_v21, 0.0 }
 0xab2   : > { %2827 = vadd.xlane.f32.xlu0 %v2826_v8  ;;  %v2789_v12 = vpop.xlane.xlu0 %2788 }
 0xab3   : > { %v2798_v3 = vmul.f32 %v2789_v12, %v5723_v47 }
 0xab5   : > { %v6899_v9 = vsub.f32 %v6853_v16, %v2798_v3 }
 0xab7   : > { %v2812_v20 = vmul.f32 %v6899_v9, %v6899_v9 }
 0xab9   : > { %v2829_v18 = vsel %vm773_vm1, %v2812_v20, 0.0 }
 0xaba   : > { %v2792_v61 = vpop.xlane.xlu2 %2791  ;;  %2830 = vadd.xlane.f32.xlu1 %v2829_v18 }
 0xabb   : > { %v2799_v6 = vmul.f32 %v2792_v61, %v5723_v47 }
 0xabd   : > { %v6906_v27 = vsub.f32 %v6858_v39, %v2799_v6 }
 0xabf   : > { %v2813_v54 = vmul.f32 %v6906_v27, %v6906_v27 }
 0xac1   : > { %v2832_v19 = vsel %vm792_vm2, %v2813_v54, 0.0 }
 0xac2   : > { %2833 = vadd.xlane.f32.xlu2 %v2832_v19 }
 0xafb   : > { %v2816_v24 = vpop.xlane.xlu1 %2815 }
 0xafc   : > { %v2835_v15 = vmul.f32 %v2816_v24, %v5723_v47 }
 0xafe   : > { %v2842_v62 = vadd.f32 1e-05, %v2835_v15 }
 0xb00   : > { %5320 = vrsqrt.f32 %v2842_v62  ;;  %vm2855_vm0 = vweird.f32 %v2842_v62 }
 0xb06   : > { %v5321_v43 = vpop.eup %5320 }
 0xb07   : > { %v2850_v30 = vmul.f32 %v5321_v43, %v2842_v62  ;;  %vm2856_vm15 = vweird.f32 %v5321_v43 }
 0xb08   : > { %vm2857_vm3 = vmor %vm2855_vm0, %vm2856_vm15 }
 0xb09   : > { %v2851_v14 = vmul.f32 %v5321_v43, %v2850_v30 }
 0xb0b   : > { %v2852_v55 = vmul.f32 0.5, %v2851_v14 }
 0xb0d   : > { %v2853_v46 = vsub.f32 1.5, %v2852_v55  ;;  %v2819_v25 = vpop.xlane.xlu0 %2818  ;;  %v4950_v55 = vld [vmem:[%s7806_s8 + $0xe8] sm:$0xff] }
 0xb0e   : > { %v2836_v21 = vmul.f32 %v2819_v25, %v5723_v47  ;;  %3430 = vmatpush.msra.mxu3 %v4950_v55 }
 0xb0f   : > { %v2854_v4 = vmul.f32 %v5321_v43, %v2853_v46 }
 0xb10   : > { %v2843_v12 = vadd.f32 1e-05, %v2836_v21  ;;  %v4949_v21 = vld [vmem:[%s7806_s8 + $0xe0] sm:$0xff] }
 0xb11   : > { %v2858_v22 = vsel %vm2857_vm3, %v5321_v43, %v2854_v4  ;;  %3431 = vmatpush.msra.mxu3 %v4949_v21 }
 0xb12   : > { %v2919_v13 = vmul.f32 %v2858_v22, %v6864_v26  ;;  %5322 = vrsqrt.f32 %v2843_v12  ;;  %vm2865_vm9 = vweird.f32 %v2843_v12 }
 0xb14   : > { %v2929_v53 = vmul.f32 %v6987_v32, %v2919_v13  ;;  %v4933_v13 = vld [vmem:[%s7805_s7 + $0xe0] sm:$0xff] }
 0xb15   : > { %v2822_v26 = vpop.xlane.xlu1 %2821 }
 0xb16   : > { %v6998_v8 = vadd.f32 %v6992_v10, %v2929_v53  ;;  %v2837_v3 = vmul.f32 %v2822_v26, %v5723_v47 }
 0xb18   : > { %4864 = vmatmul.msk.f32.vlgmr.msrb.gmra.mxu1 %vm773_vm1, %v6998_v8  ;;  %4880 = vmatmul.msk.f32.vlgmr.msrb.gmra.mxu2 %vm773_vm1, %v6998_v8  ;;  %v5323_v20 = vpop.eup %5322  ;;  %v2844_v18 = vadd.f32 1e-05, %v2837_v3  ;;  %v4932_v3 = vld [vmem:[%s7805_s7 + $0xd8] sm:$0xff] }
 0xb19   : > { %4896 = vmatmul.msk.f32.vlgmr.msrb.gmra.mxu3 %vm773_vm1, %v6998_v8  ;;  %v2860_v61 = vmul.f32 %v5323_v20, %v2843_v12  ;;  %vm2866_vm8 = vweird.f32 %v5323_v20 }
 0xb1a   : > { %5324 = vrsqrt.f32 %v2844_v18  ;;  %vm2867_vm10 = vmor %vm2865_vm9, %vm2866_vm8  ;;  %vm2875_vm12 = vweird.f32 %v2844_v18 }
 0xb1b   : > { %v2861_v6 = vmul.f32 %v5323_v20, %v2860_v61  ;;  %v4931_v61 = vld [vmem:[%s7805_s7 + $0xd0] sm:$0xff] }
 0xb1d   : > { %v2862_v54 = vmul.f32 0.5, %v2861_v6  ;;  %v2825_v19 = vpop.xlane.xlu2 %2824 }
 0xb1e   : > { %v2838_v11 = vmul.f32 %v2825_v19, %v5723_v47  ;;  %v4947_v19 = vld [vmem:[%s7806_s8 + $0xd0] sm:$0xff] }
 0xb1f   : > { %v2863_v63 = vsub.f32 1.5, %v2862_v54 }
 0xb20   : > { %v5325_v33 = vpop.eup %5324  ;;  %v2845_v50 = vadd.f32 1e-05, %v2838_v11 }
 0xb21   : > { %v2864_v49 = vmul.f32 %v5323_v20, %v2863_v63  ;;  %v2870_v5 = vmul.f32 %v5325_v33, %v2844_v18  ;;  %vm2876_vm11 = vweird.f32 %v5325_v33 }
 0xb22   : > { %5326 = vrsqrt.f32 %v2845_v50  ;;  %vm2877_vm13 = vmor %vm2875_vm12, %vm2876_vm11  ;;  %vm2885_vm15 = vweird.f32 %v2845_v50 }
 0xb23   : > { %v2868_v24 = vsel %vm2867_vm10, %v5323_v20, %v2864_v49  ;;  %v2871_v15 = vmul.f32 %v5325_v33, %v2870_v5  ;;  %v4948_v20 = vld [vmem:[%s7806_s8 + $0xd8] sm:$0xff] }
 0xb24   : > { %v2920_v37 = vmul.f32 %v2868_v24, %v6871_v7  ;;  %3432 = vmatpush.msra.mxu3 %v4948_v20  ;;  %v4929_v24 = vld [vmem:[%s7805_s7 + $0xc0] sm:$0xff] }
 0xb25   : > { %v2872_v38 = vmul.f32 0.5, %v2871_v15  ;;  %v2828_v2 = vpop.xlane.xlu0 %2827  ;;  %v5156_v20 = vld [vmem:[%s7810_s12 + $0x2] ss:$0 sm:$0xff] }
 0xb26   : > { %v2930_v62 = vmul.f32 %v6987_v32, %v2920_v37  ;;  %v2839_v17 = vmul.f32 %v2828_v2, %v5723_v47  ;;  %3433 = vmatpush.msra.mxu3 %v4947_v19 }
 0xb27   : > { %v2873_v31 = vsub.f32 1.5, %v2872_v38  ;;  %v4946_v38 = vld [vmem:[%s7806_s8 + $0xc8] sm:$0xff] }
 0xb28   : > { %v5327_v1 = vpop.eup %5326  ;;  %v7012_v40 = vadd.f32 %v6992_v10, %v2930_v62  ;;  %v7014_v59 = vadd.f32 1e-05, %v2839_v17  ;;  %v4945_v17 = vld [vmem:[%s7806_s8 + $0xc0] sm:$0xff]  ;;  %3434 = vmatpush.msra.mxu3 %v4946_v38 }
 0xb29   : > { %v2874_v42 = vmul.f32 %v5325_v33, %v2873_v31  ;;  %v2880_v41 = vmul.f32 %v5327_v1, %v2845_v50  ;;  %vm2886_vm14 = vweird.f32 %v5327_v1 }
 0xb2a   : > { %5328 = vrsqrt.f32 %v7014_v59  ;;  %4865 = vmatmul.msk.f32.gmra.mxu1 %vm773_vm1, %v7012_v40  ;;  %4881 = vmatmul.msk.f32.gmra.mxu2 %vm773_vm1, %v7012_v40  ;;  %vm2887_vm0 = vmor %vm2885_vm15, %vm2886_vm14  ;;  %vm2895_vm8 = vweird.f32 %v7014_v59 }
 0xb2b   : > { %v2878_v7 = vsel %vm2877_vm13, %v5325_v33, %v2874_v42  ;;  %v2881_v56 = vmul.f32 %v5327_v1, %v2880_v41  ;;  %4897 = vmatmul.msk.f32.gmra.mxu3 %vm773_vm1, %v7012_v40 }
 0xb2c   : > { %v2921_v44 = vmul.f32 %v2878_v7, %v6878_v29  ;;  %v4934_v29 = vld [vmem:[%s7805_s7 + $0xe8] sm:$0xff]  ;;  %3435 = vmatpush.msra.mxu3 %v4945_v17 }
 0xb2d   : > { %v2882_v45 = vmul.f32 0.5, %v2881_v56  ;;  %v2831_v43 = vpop.xlane.xlu1 %2830  ;;  %3378 = vmatpush.msra.mxu2 %v4934_v29 }
 0xb2e   : > { %v2931_v48 = vmul.f32 %v6987_v32, %v2921_v44  ;;  %v2840_v30 = vmul.f32 %v2831_v43, %v5723_v47 }
 0xb2f   : > { %v2883_v14 = vsub.f32 1.5, %v2882_v45  ;;  %3379 = vmatpush.msra.mxu2 %v4933_v13 }
 0xb30   : > { %v5329_v46 = vpop.eup %5328  ;;  %v7045_v4 = vadd.f32 %v6992_v10, %v2931_v48  ;;  %v7047_v22 = vadd.f32 1e-05, %v2840_v30 }
 0xb31   : > { %v2884_v25 = vmul.f32 %v5327_v1, %v2883_v14  ;;  %v2890_v53 = vmul.f32 %v5329_v46, %v7014_v59  ;;  %3380 = vmatpush.msra.mxu2 %v4932_v3  ;;  %vm2896_vm3 = vweird.f32 %v5329_v46  ;;  %v5155_v3 = vld [vmem:[%s7809_s11 + $0x2] ss:$0 sm:$0xff] }
 0xb32   : > { %5330 = vrsqrt.f32 %v7047_v22  ;;  %4866 = vmatmul.msk.f32.gmra.mxu1 %vm773_vm1, %v7045_v4  ;;  %4882 = vmatmul.msk.f32.gmra.mxu2 %vm773_vm1, %v7045_v4  ;;  %vm2897_vm9 = vmor %vm2895_vm8, %vm2896_vm3  ;;  %vm2905_vm11 = vweird.f32 %v7047_v22 }
 0xb33   : > { %v2888_v12 = vsel %vm2887_vm0, %v5327_v1, %v2884_v25  ;;  %v2891_v26 = vmul.f32 %v5329_v46, %v2890_v53  ;;  %4898 = vmatmul.msk.f32.gmra.mxu3 %vm773_vm1, %v7045_v4  ;;  %3381 = vmatpush.msra.mxu2 %v4931_v61 }
 0xb34   : > { %v2922_v18 = vmul.f32 %v2888_v12, %v6885_v34  ;;  %v4930_v34 = vld [vmem:[%s7805_s7 + $0xc8] sm:$0xff] }
 0xb35   : > { %v2892_v6 = vmul.f32 0.5, %v2891_v26  ;;  %v2834_v54 = vpop.xlane.xlu2 %2833  ;;  %3382 = vmatpush.msra.mxu2 %v4930_v34 }
 0xb36   : > { %v2932_v11 = vmul.f32 %v6987_v32, %v2922_v18  ;;  %v2841_v63 = vmul.f32 %v2834_v54, %v5723_v47 }
 0xb37   : > { %v2893_v33 = vsub.f32 1.5, %v2892_v6  ;;  %3383 = vmatpush.msra.mxu2 %v4929_v24 }
 0xb38   : > { %v5331_v50 = vpop.eup %5330  ;;  %v7082_v49 = vadd.f32 %v6992_v10, %v2932_v11  ;;  %v2848_v5 = vadd.f32 1e-05, %v2841_v63 }
 0xb39   : > { %v2894_v15 = vmul.f32 %v5329_v46, %v2893_v33  ;;  %v2900_v37 = vmul.f32 %v5331_v50, %v7047_v22  ;;  %vm2906_vm10 = vweird.f32 %v5331_v50 }
 0xb3a   : > { %5332 = vrsqrt.f32 %v2848_v5  ;;  %4867 = vmatmul.msk.f32.gmra.mxu1 %vm773_vm1, %v7082_v49  ;;  %4883 = vmatmul.msk.f32.gmra.mxu2 %vm773_vm1, %v7082_v49  ;;  %vm2907_vm12 = vmor %vm2905_vm11, %vm2906_vm10  ;;  %vm2915_vm14 = vweird.f32 %v2848_v5 }
 0xb3b   : > { %v2898_v2 = vsel %vm2897_vm9, %v5329_v46, %v2894_v15  ;;  %v2901_v62 = vmul.f32 %v5331_v50, %v2900_v37  ;;  %4899 = vmatmul.msk.f32.gmra.mxu3 %vm773_vm1, %v7082_v49 }
 0xb3c   : > { %v2923_v31 = vmul.f32 %v2898_v2, %v6892_v52 }
 0xb3d   : > { %v2902_v1 = vmul.f32 0.5, %v2901_v62 }
 0xb3e   : > { %v2933_v59 = vmul.f32 %v6987_v32, %v2923_v31 }
 0xb3f   : > { %v2903_v42 = vsub.f32 1.5, %v2902_v1  ;;  %v5154_v1 = vld [vmem:[%s7808_s10 + $0x2] ss:$0 sm:$0xff] }
 0xb40   : > { %v5333_v41 = vpop.eup %5332  ;;  %v7104_v7 = vadd.f32 %v6992_v10, %v2933_v59 }
 0xb41   : > { %v2904_v56 = vmul.f32 %v5331_v50, %v2903_v42  ;;  %v2910_v23 = vmul.f32 %v5333_v41, %v2848_v5  ;;  %vm2916_vm13 = vweird.f32 %v5333_v41 }
 0xb42   : > { %4868 = vmatmul.msk.f32.gmra.mxu1 %vm773_vm1, %v7104_v7  ;;  %4884 = vmatmul.msk.f32.gmra.mxu2 %vm773_vm1, %v7104_v7  ;;  %vm2917_vm15 = vmor %vm2915_vm14, %vm2916_vm13 }
 0xb43   : > { %v2908_v52 = vsel %vm2907_vm12, %v5331_v50, %v2904_v56  ;;  %v2911_v0 = vmul.f32 %v5333_v41, %v2910_v23  ;;  %4900 = vmatmul.msk.f32.gmra.mxu3 %vm773_vm1, %v7104_v7 }
 0xb44   : > { %v2924_v44 = vmul.f32 %v2908_v52, %v6899_v9 }
 0xb45   : > { %v2912_v45 = vmul.f32 0.5, %v2911_v0  ;;  %v4968_v0 = vld [vmem:[%s7807_s9 + $0xf8] sm:$0xff] }
 0xb46   : > { %v2934_v43 = vmul.f32 %v6987_v32, %v2924_v44  ;;  %v4967_v44 = vld [vmem:[%s7807_s9 + $0xf0] sm:$0xff] }
 0xb47   : > { %v2913_v35 = vsub.f32 1.5, %v2912_v45  ;;  %v4966_v45 = vld [vmem:[%s7807_s9 + $0xe8] sm:$0xff] }
 0xb48   : > { %v7116_v51 = vadd.f32 %v6992_v10, %v2934_v43 }
 0xb49   : > { %v2914_v48 = vmul.f32 %v5333_v41, %v2913_v35 }
 0xb4a   : > { %4869 = vmatmul.msk.f32.gmra.mxu1 %vm773_vm1, %v7116_v51  ;;  %4885 = vmatmul.msk.f32.gmra.mxu2 %vm773_vm1, %v7116_v51 }
 0xb4b   : > { %v2918_v30 = vsel %vm2917_vm15, %v5333_v41, %v2914_v48  ;;  %4901 = vmatmul.msk.f32.gmra.mxu3 %vm773_vm1, %v7116_v51 }
 0xb4c   : > { %v2925_v9 = vmul.f32 %v2918_v30, %v6906_v27  ;;  %v4965_v30 = vld [vmem:[%s7807_s9 + $0xe0] sm:$0xff] }
 0xb4e   : > { %v2935_v14 = vmul.f32 %v6987_v32, %v2925_v9  ;;  %v4964_v9 = vld [vmem:[%s7807_s9 + $0xd8] sm:$0xff] }
 0xb50   : > { %v7127_v29 = vadd.f32 %v6992_v10, %v2935_v14  ;;  %v4963_v14 = vld [vmem:[%s7807_s9 + $0xd0] sm:$0xff] }
 0xb52   : > { %4870 = vmatmul.msk.f32.gmra.mxu1 %vm773_vm1, %v7127_v29  ;;  %4886 = vmatmul.msk.f32.gmra.mxu2 %vm773_vm1, %v7127_v29 }
 0xb53   : > { %4902 = vmatmul.msk.f32.gmra.mxu3 %vm773_vm1, %v7127_v29 }
 0xb5a   : > { %4938 = vmatmul.msk.f32.vlgmr.msra.gmra.mxu2 %vm773_vm1, %v6998_v8 }
 0xb5b   : > { %4954 = vmatmul.msk.f32.vlgmr.msra.gmra.mxu3 %vm773_vm1, %v6998_v8 }
 0xb62   : > { %4939 = vmatmul.msk.f32.gmra.mxu2 %vm773_vm1, %v7012_v40 }
 0xb63   : > { %4955 = vmatmul.msk.f32.gmra.mxu3 %vm773_vm1, %v7012_v40 }
 0xb6a   : > { %4940 = vmatmul.msk.f32.gmra.mxu2 %vm773_vm1, %v7045_v4 }
 0xb6b   : > { %4956 = vmatmul.msk.f32.gmra.mxu3 %vm773_vm1, %v7045_v4 }
 0xb72   : > { %4941 = vmatmul.msk.f32.gmra.mxu2 %vm773_vm1, %v7082_v49 }
 0xb73   : > { %4957 = vmatmul.msk.f32.gmra.mxu3 %vm773_vm1, %v7082_v49 }
 0xb7a   : > { %4942 = vmatmul.msk.f32.gmra.mxu2 %vm773_vm1, %v7104_v7 }
 0xb7b   : > { %4958 = vmatmul.msk.f32.gmra.mxu3 %vm773_vm1, %v7104_v7 }
 0xb82   : > { %4943 = vmatmul.msk.f32.gmra.mxu2 %vm773_vm1, %v7116_v51 }
 0xb83   : > { %4959 = vmatmul.msk.f32.gmra.mxu3 %vm773_vm1, %v7116_v51 }
 0xb8a   : > { %4944 = vmatmul.msk.f32.gmra.mxu2 %vm773_vm1, %v7127_v29 }
 0xb8b   : > { %4960 = vmatmul.msk.f32.gmra.mxu3 %vm773_vm1, %v7127_v29 }
 0xb95   : > { %v2998_v15 = vpop.f32.mrf.mxu1 }
 0xb96   : > { %v2999_v41 = vadd.f32 %v5154_v1, %v2998_v15 }
 0xb9b   : > { %v3050_v27 = vpop.f32.mrf.mxu2 }
 0xb9c   : > { %v3102_v32 = vpop.f32.mrf.mxu3  ;;  %v3051_v59 = vadd.f32 %v5155_v3, %v3050_v27  ;;  %v4962_v27 = vld [vmem:[%s7807_s9 + $0xc8] sm:$0xff] }
 0xb9d   : > { %v3103_v38 = vadd.f32 %v5156_v20, %v3102_v32 }
 0xba7   : > { %v3001_v31 = vpop.f32.mrf.mxu1 }
 0xba8   : > { %v3002_v52 = vadd.f32 %v5154_v1, %v3001_v31 }
 0xbad   : > { %v3053_v10 = vpop.f32.mrf.mxu2 }
 0xbae   : > { %v3105_v55 = vpop.f32.mrf.mxu3  ;;  %v3054_v17 = vadd.f32 %v5155_v3, %v3053_v10 }
 0xbaf   : > { %v3106_v24 = vadd.f32 %v5156_v20, %v3105_v55  ;;  %v3004_v56 = vpop.f32.mrf.mxu1  ;;  %v4961_v55 = vld [vmem:[%s7807_s9 + $0xc0] sm:$0xff] }
 0xbb0   : > { %v3005_v48 = vadd.f32 %v5154_v1, %v3004_v56 }
 0xbb5   : > { %v3056_v46 = vpop.f32.mrf.mxu2 }
 0xbb6   : > { %v3108_v22 = vpop.f32.mrf.mxu3  ;;  %v3057_v2 = vadd.f32 %v5155_v3, %v3056_v46 }
 0xbb7   : > { %v3109_v5 = vadd.f32 %v5156_v20, %v3108_v22  ;;  %v3007_v35 = vpop.f32.mrf.mxu1  ;;  %v5158_v22 = vld [vmem:[%s7809_s11 + $0x3] ss:$0 sm:$0xff] }
 0xbb8   : > { %v3008_v10 = vadd.f32 %v5154_v1, %v3007_v35 }
 0xbbd   : > { %v3059_v13 = vpop.f32.mrf.mxu2 }
 0xbbe   : > { %v3111_v25 = vpop.f32.mrf.mxu3  ;;  %v3060_v37 = vadd.f32 %v5155_v3, %v3059_v13 }
 0xbbf   : > { %v3112_v34 = vadd.f32 %v5156_v20, %v3111_v25  ;;  %v3010_v46 = vpop.f32.mrf.mxu1 }
 0xbc5   : > { %v3062_v53 = vpop.f32.mrf.mxu2 }
 0xbc6   : > { %v3114_v21 = vpop.f32.mrf.mxu3  ;;  %v3063_v33 = vadd.f32 %v5155_v3, %v3062_v53  ;;  %v3011_v53 = vadd.f32 %v5154_v1, %v3010_v46 }
 0xbc7   : > { %v3115_v63 = vadd.f32 %v5156_v20, %v3114_v21 }
 0xbcd   : > { %v3065_v12 = vpop.f32.mrf.mxu2 }
 0xbce   : > { %v3117_v26 = vpop.f32.mrf.mxu3  ;;  %v3066_v11 = vadd.f32 %v5155_v3, %v3065_v12  ;;  %v3013_v12 = vpop.f32.mrf.mxu1 }
 0xbcf   : > { %v3118_v19 = vadd.f32 %v5156_v20, %v3117_v26 }
 0xbd5   : > { %v3068_v18 = vpop.f32.mrf.mxu2 }
 0xbd6   : > { %v3069_v61 = vadd.f32 %v5155_v3, %v3068_v18  ;;  %v3120_v6 = vpop.f32.mrf.mxu3  ;;  %v3014_v3 = vadd.f32 %v5154_v1, %v3013_v12  ;;  %v3016_v18 = vpop.f32.mrf.mxu1 }
 0xbd7   : > { %v3121_v54 = vadd.f32 %v5156_v20, %v3120_v6  ;;  %v3017_v6 = vadd.f32 %v5154_v1, %v3016_v18 }
 0xbd8   : > { %4903 = vmatpush.xpose.msk.msrb.mxu0 %vm1303_vm4, %v3069_v61 }
 0xbd9   : > { %4917 = vmatpush.msk.msra.mxu1 %vm1491_vm5, %v3121_v54 }
 0xbdb   : > { %3321 = vmatpush.msra.mxu1 %v3118_v19 }
 0xbdc   : > { %4904 = vmatpush.xpose.msk.msrb.mxu0 %vm1303_vm4, %v3066_v11 }
 0xbdd   : > { %3322 = vmatpush.msra.mxu1 %v3115_v63 }
 0xbde   : > { %v7172_v50 = vpop.f32.mrf.mxu3 }
 0xbdf   : > { %3323 = vmatpush.msra.mxu1 %v3112_v34  ;;  %v3438_v19 = vadd.f32 %v5158_v22, %v7172_v50 }
 0xbe0   : > { %4905 = vmatpush.xpose.msk.msrb.mxu0 %vm1303_vm4, %v3063_v33 }
 0xbe1   : > { %3324 = vmatpush.msra.mxu1 %v3109_v5 }
 0xbe3   : > { %3325 = vmatpush.msra.mxu1 %v3106_v24 }
 0xbe4   : > { %4906 = vmatpush.xpose.msk.msrb.mxu0 %vm1303_vm4, %v3060_v37 }
 0xbe5   : > { %3326 = vmatpush.msra.mxu1 %v3103_v38 }
 0xbe6   : > { %v3440_v62 = vpop.f32.mrf.mxu3 }
 0xbe7   : > { %v3441_v54 = vadd.f32 %v5158_v22, %v3440_v62 }
 0xbe8   : > { %4907 = vmatpush.xpose.msk.msrb.mxu0 %vm1303_vm4, %v3057_v2 }
 0xbec   : > { %4908 = vmatpush.xpose.msk.msrb.mxu0 %vm1303_vm4, %v3054_v17 }
 0xbee   : > { %v3443_v42 = vpop.f32.mrf.mxu3 }
 0xbef   : > { %v3444_v61 = vadd.f32 %v5158_v22, %v3443_v42 }
 0xbf0   : > { %4909 = vmatpush.xpose.msk.msrb.mxu0 %vm1303_vm4, %v3051_v59 }
 0xbf3   : > { %4910 = vmatmul.msk.f32.vlgmr.msrb.gmra.mxu0 %vm1303_vm4, %v2999_v41 }
 0xbf4   : > { %3480 = vmatpush.msra.mxu0 %v4968_v0 }
 0xbf6   : > { %v3446_v23 = vpop.f32.mrf.mxu3  ;;  %3481 = vmatpush.msra.mxu0 %v4967_v44 }
 0xbf7   : > { %v3447_v20 = vadd.f32 %v5158_v22, %v3446_v23 }
 0xbf8   : > { %3482 = vmatpush.msra.mxu0 %v4966_v45 }
 0xbfa   : > { %3483 = vmatpush.msra.mxu0 %v4965_v30 }
 0xbfb   : > { %4911 = vmatmul.msk.f32.gmra.mxu0 %vm1303_vm4, %v3002_v52  ;;  %v5159_v52 = vld [vmem:[%s7810_s12 + $0x3] ss:$0 sm:$0xff] }
 0xbfc   : > { %3484 = vmatpush.msra.mxu0 %v4964_v9 }
 0xbfe   : > { %v3449_v43 = vpop.f32.mrf.mxu3  ;;  %3485 = vmatpush.msra.mxu0 %v4963_v14 }
 0xbff   : > { %v3450_v26 = vadd.f32 %v5158_v22, %v3449_v43 }
 0xc00   : > { %3486 = vmatpush.msra.mxu0 %v4962_v27 }
 0xc02   : > { %3487 = vmatpush.msra.mxu0 %v4961_v55 }
 0xc03   : > { %4912 = vmatmul.msk.f32.gmra.mxu0 %vm1303_vm4, %v3005_v48 }
 0xc06   : > { %v3452_v32 = vpop.f32.mrf.mxu3 }
 0xc07   : > { %v3453_v21 = vadd.f32 %v5158_v22, %v3452_v32 }
 0xc0b   : > { %4913 = vmatmul.msk.f32.gmra.mxu0 %vm1303_vm4, %v3008_v10 }
 0xc0e   : > { %v3455_v13 = vpop.f32.mrf.mxu3 }
 0xc0f   : > { %v3456_v25 = vadd.f32 %v5158_v22, %v3455_v13 }
 0xc11   : > { %4977 = vmatpush.xpose.msk.msrb.mxu1 %vm1303_vm4, %v3456_v25 }
 0xc13   : > { %4914 = vmatmul.msk.f32.gmra.mxu0 %vm1303_vm4, %v3011_v53 }
 0xc15   : > { %4978 = vmatpush.xpose.msk.msrb.mxu1 %vm1303_vm4, %v3453_v21 }
 0xc19   : > { %4979 = vmatpush.xpose.msk.msrb.mxu1 %vm1303_vm4, %v3450_v26 }
 0xc1b   : > { %4915 = vmatmul.msk.f32.gmra.mxu0 %vm1303_vm4, %v3014_v3 }
 0xc1d   : > { %4980 = vmatpush.xpose.msk.msrb.mxu1 %vm1303_vm4, %v3447_v20 }
 0xc21   : > { %4981 = vmatpush.xpose.msk.msrb.mxu1 %vm1303_vm4, %v3444_v61 }
 0xc23   : > { %4916 = vmatmul.msk.f32.gmra.mxu0 %vm1303_vm4, %v3017_v6 }
 0xc25   : > { %4982 = vmatpush.xpose.msk.msrb.mxu1 %vm1303_vm4, %v3441_v54 }
 0xc29   : > { %4983 = vmatpush.xpose.msk.msrb.mxu1 %vm1303_vm4, %v3438_v19 }
 0xc2b   : > { %4970 = vmatmul.msk.f32.vlgmr.msra.gmra.mxu0 %vm773_vm1, %v6998_v8 }
 0xc33   : > { %4971 = vmatmul.msk.f32.gmra.mxu0 %vm773_vm1, %v7012_v40 }
 0xc3b   : > { %4972 = vmatmul.msk.f32.gmra.mxu0 %vm773_vm1, %v7045_v4 }
 0xc43   : > { %4973 = vmatmul.msk.f32.gmra.mxu0 %vm773_vm1, %v7082_v49 }
 0xc4b   : > { %4974 = vmatmul.msk.f32.gmra.mxu0 %vm773_vm1, %v7104_v7 }
 0xc53   : > { %4975 = vmatmul.msk.f32.gmra.mxu0 %vm773_vm1, %v7116_v51 }
 0xc5b   : > { %4976 = vmatmul.msk.f32.gmra.mxu0 %vm773_vm1, %v7127_v29 }
 0xc70   : > { %v3182_v11 = vpop.f32.mrf.mxu0 }
 0xc71   : > { %v3203_v8 = vmul.f32 0.17677669, %v3182_v11 }
 0xc73   : > { %v3210_v63 = vsel %vm1391_vm6, %v3203_v8, -inf }
 0xc74   : > { %3211 = vmax.xlane.f32.xlu0 %v3210_v63 }
 0xc78   : > { %v3185_v40 = vpop.f32.mrf.mxu0 }
 0xc79   : > { %v3204_v34 = vmul.f32 0.17677669, %v3185_v40 }
 0xc7b   : > { %v3213_v4 = vsel %vm1391_vm6, %v3204_v34, -inf }
 0xc7c   : > { %3214 = vmax.xlane.f32.xlu1 %v3213_v4 }
 0xc80   : > { %v3188_v49 = vpop.f32.mrf.mxu0 }
 0xc81   : > { %v3205_v33 = vmul.f32 0.17677669, %v3188_v49 }
 0xc83   : > { %v3216_v7 = vsel %vm1391_vm6, %v3205_v33, -inf }
 0xc84   : > { %3217 = vmax.xlane.f32.xlu2 %v3216_v7 }
 0xc88   : > { %v3191_v50 = vpop.f32.mrf.mxu0 }
 0xc89   : > { %v3206_v51 = vmul.f32 0.17677669, %v3191_v50 }
 0xc8b   : > { %v3219_v5 = vsel %vm1391_vm6, %v3206_v51, -inf }
 0xc8c   : > { %3220 = vmax.xlane.f32.xlu0 %v3219_v5 }
 0xc90   : > { %v3194_v29 = vpop.f32.mrf.mxu0 }
 0xc91   : > { %v3207_v24 = vmul.f32 0.17677669, %v3194_v29 }
 0xc93   : > { %v3222_v15 = vsel %vm1391_vm6, %v3207_v24, -inf }
 0xc94   : > { %3223 = vmax.xlane.f32.xlu1 %v3222_v15 }
 0xc98   : > { %v3197_v37 = vpop.f32.mrf.mxu0 }
 0xc99   : > { %v7243_v38 = vmul.f32 0.17677669, %v3197_v37 }
 0xc9b   : > { %v3225_v2 = vsel %vm1391_vm6, %v7243_v38, -inf }
 0xc9c   : > { %3226 = vmax.xlane.f32.xlu2 %v3225_v2 }
 0xca0   : > { %v3200_v62 = vpop.f32.mrf.mxu0 }
 0xca1   : > { %v7247_v17 = vmul.f32 0.17677669, %v3200_v62 }
 0xca3   : > { %v3228_v31 = vsel %vm1410_vm7, %v7247_v17, -inf }
 0xca4   : > { %3229 = vmax.xlane.f32.xlu0 %v3228_v31 }
 0xca8   : > { %v3489_v1 = vpop.f32.mrf.mxu0 }
 0xca9   : > { %v3490_v9 = vadd.f32 %v5159_v52, %v3489_v1 }
 0xcb0   : > { %v3492_v59 = vpop.f32.mrf.mxu0 }
 0xcb1   : > { %v3493_v30 = vadd.f32 %v5159_v52, %v3492_v59 }
 0xcb8   : > { %v3495_v42 = vpop.f32.mrf.mxu0 }
 0xcb9   : > { %v3496_v48 = vadd.f32 %v5159_v52, %v3495_v42 }
 0xcc0   : > { %v3498_v41 = vpop.f32.mrf.mxu0 }
 0xcc1   : > { %v3499_v35 = vadd.f32 %v5159_v52, %v3498_v41 }
 0xcc8   : > { %v3501_v56 = vpop.f32.mrf.mxu0 }
 0xcc9   : > { %v3502_v43 = vadd.f32 %v5159_v52, %v3501_v56 }
 0xcd0   : > { %v3504_v23 = vpop.f32.mrf.mxu0 }
 0xcd1   : > { %v3505_v45 = vadd.f32 %v5159_v52, %v3504_v23 }
 0xcd8   : > { %v3507_v0 = vpop.f32.mrf.mxu0 }
 0xcd9   : > { %v3508_v44 = vadd.f32 %v5159_v52, %v3507_v0 }
 0xcdb   : > { %4991 = vmatpush.msk.msrb.mxu2 %vm1491_vm5, %v3508_v44 }
 0xcdd   : > { %3708 = vmatpush.msrb.mxu2 %v3505_v45 }
 0xcdf   : > { %3709 = vmatpush.msrb.mxu2 %v3502_v43 }
 0xce1   : > { %3710 = vmatpush.msrb.mxu2 %v3499_v35 }
 0xce3   : > { %3711 = vmatpush.msrb.mxu2 %v3496_v48 }
 0xce5   : > { %3712 = vmatpush.msrb.mxu2 %v3493_v30  ;;  %v3385_v30 = vpop.f32.mrf.mxu2 }
 0xce7   : > { %v3212_v14 = vpop.xlane.xlu0 %3211  ;;  %3713 = vmatpush.msrb.mxu2 %v3490_v9 }
 0xce8   : > { %v3231_v27 = vsub.f32 %v3203_v8, %v3212_v14 }
 0xcea   : > { %v3238_v32 = vmul.f32 1.442695, %v3231_v27 }
 0xcec   : > { %5334 = vpow2.f32 %v3238_v32  ;;  %v5157_v32 = vld [vmem:[%s7808_s10 + $0x3] ss:$0 sm:$0xff] }
 0xced   : > { %v3388_v27 = vpop.f32.mrf.mxu2 }
 0xcef   : > { %v3215_v10 = vpop.xlane.xlu1 %3214 }
 0xcf0   : > { %v3232_v55 = vsub.f32 %v3204_v34, %v3215_v10  ;;  %v3386_v10 = vadd.f32 %v5157_v32, %v3385_v30 }
 0xcf2   : > { %v5335_v46 = vpop.eup %5334  ;;  %v3240_v22 = vmul.f32 1.442695, %v3232_v55 }
 0xcf3   : > { %v3252_v13 = vsel %vm1391_vm6, %v5335_v46, 0.0 }
 0xcf4   : > { %5336 = vpow2.f32 %v3240_v22  ;;  %3253 = vadd.xlane.f32.xlu1 %v3252_v13 }
 0xcf5   : > { %v3391_v55 = vpop.f32.mrf.mxu2 }
 0xcf6   : > { %v3392_v13 = vadd.f32 %v5157_v32, %v3391_v55 }
 0xcf7   : > { %v3218_v25 = vpop.xlane.xlu2 %3217 }
 0xcf8   : > { %v3233_v53 = vsub.f32 %v3205_v33, %v3218_v25  ;;  %v4928_v25 = vld [vmem:[%s7811_s13 + $0x58] sm:$0xff] }
 0xcf9   : > { %3833 = vmatpush.msrb.mxu0 %v4928_v25 }
 0xcfa   : > { %v5337_v21 = vpop.eup %5336  ;;  %v3242_v12 = vmul.f32 1.442695, %v3233_v53  ;;  %v4927_v53 = vld [vmem:[%s7811_s13 + $0x50] sm:$0xff] }
 0xcfb   : > { %v3255_v26 = vsel %vm1391_vm6, %v5337_v21, 0.0  ;;  %3834 = vmatpush.msrb.mxu0 %v4927_v53 }
 0xcfc   : > { %5338 = vpow2.f32 %v3242_v12  ;;  %3256 = vadd.xlane.f32.xlu2 %v3255_v26 }
 0xcfd   : > { %v3394_v22 = vpop.f32.mrf.mxu2 }
 0xcfe   : > { %v3395_v12 = vadd.f32 %v5157_v32, %v3394_v22 }
 0xcff   : > { %v3221_v3 = vpop.xlane.xlu0 %3220 }
 0xd00   : > { %v3234_v20 = vsub.f32 %v3206_v51, %v3221_v3 }
 0xd02   : > { %v5339_v18 = vpop.eup %5338  ;;  %v3244_v61 = vmul.f32 1.442695, %v3234_v20 }
 0xd03   : > { %v3258_v6 = vsel %vm1391_vm6, %v5339_v18, 0.0 }
 0xd04   : > { %5340 = vpow2.f32 %v3244_v61  ;;  %3259 = vadd.xlane.f32.xlu0 %v3258_v6 }
 0xd05   : > { %v3397_v26 = vpop.f32.mrf.mxu2 }
 0xd06   : > { %v3398_v3 = vadd.f32 %v5157_v32, %v3397_v26 }
 0xd07   : > { %v3224_v54 = vpop.xlane.xlu1 %3223 }
 0xd08   : > { %v3235_v19 = vsub.f32 %v3207_v24, %v3224_v54 }
 0xd0a   : > { %v5341_v11 = vpop.eup %5340  ;;  %v3246_v8 = vmul.f32 1.442695, %v3235_v19 }
 0xd0b   : > { %v3261_v63 = vsel %vm1391_vm6, %v5341_v11, 0.0 }
 0xd0c   : > { %5342 = vpow2.f32 %v3246_v8  ;;  %3262 = vadd.xlane.f32.xlu1 %v3261_v63 }
 0xd0d   : > { %v3400_v20 = vpop.f32.mrf.mxu2 }
 0xd0e   : > { %v3401_v61 = vadd.f32 %v5157_v32, %v3400_v20 }
 0xd0f   : > { %v3227_v40 = vpop.xlane.xlu2 %3226 }
 0xd10   : > { %v3236_v34 = vsub.f32 %v7243_v38, %v3227_v40 }
 0xd12   : > { %v5343_v4 = vpop.eup %5342  ;;  %v3248_v49 = vmul.f32 1.442695, %v3236_v34 }
 0xd13   : > { %v3264_v33 = vsel %vm1391_vm6, %v5343_v4, 0.0 }
 0xd14   : > { %5344 = vpow2.f32 %v3248_v49  ;;  %3265 = vadd.xlane.f32.xlu2 %v3264_v33 }
 0xd15   : > { %v3403_v6 = vpop.f32.mrf.mxu2 }
 0xd16   : > { %v3404_v54 = vadd.f32 %v5157_v32, %v3403_v6 }
 0xd17   : > { %v3230_v7 = vpop.xlane.xlu0 %3229 }
 0xd18   : > { %v3237_v50 = vsub.f32 %v7247_v17, %v3230_v7 }
 0xd1a   : > { %v5345_v51 = vpop.eup %5344  ;;  %v3250_v5 = vmul.f32 1.442695, %v3237_v50 }
 0xd1b   : > { %v3267_v29 = vsel %vm1391_vm6, %v5345_v51, 0.0 }
 0xd1c   : > { %5346 = vpow2.f32 %v3250_v5  ;;  %3268 = vadd.xlane.f32.xlu0 %v3267_v29 }
 0xd22   : > { %v5347_v24 = vpop.eup %5346 }
 0xd23   : > { %v3270_v15 = vsel %vm1410_vm7, %v5347_v24, 0.0 }
 0xd24   : > { %3271 = vadd.xlane.f32.xlu1 %v3270_v15 }
 0xd67   : > { %v3254_v37 = vpop.xlane.xlu1 %3253 }
 0xd68   : > { %5348 = vrcp.f32 %v3254_v37 }
 0xd6e   : > { %v5349_v38 = vpop.eup %5348 }
 0xd6f   : > { %v3280_v2 = vmul.f32 %v5349_v38, %v5335_v46  ;;  %v3257_v62 = vpop.xlane.xlu2 %3256  ;;  %v3389_v46 = vadd.f32 %v5157_v32, %v3388_v27 }
 0xd70   : > { %5350 = vrcp.f32 %v3257_v62 }
 0xd71   : > { %4918 = vmatmul.msk.f32.vlgmr.msra.gmra.mxu1 %vm1391_vm6, %v3280_v2 }
 0xd76   : > { %v5351_v31 = vpop.eup %5350 }
 0xd77   : > { %v3260_v17 = vpop.xlane.xlu0 %3259  ;;  %v3281_v1 = vmul.f32 %v5351_v31, %v5337_v21  ;;  %v4926_v21 = vld [vmem:[%s7811_s13 + $0x48] sm:$0xff] }
 0xd78   : > { %5352 = vrcp.f32 %v3260_v17  ;;  %3835 = vmatpush.msrb.mxu0 %v4926_v21 }
 0xd79   : > { %4919 = vmatmul.msk.f32.gmra.mxu1 %vm1391_vm6, %v3281_v1 }
 0xd7e   : > { %v5353_v59 = vpop.eup %5352 }
 0xd7f   : > { %v3263_v42 = vpop.xlane.xlu1 %3262  ;;  %v3282_v41 = vmul.f32 %v5353_v59, %v5339_v18  ;;  %v4925_v18 = vld [vmem:[%s7811_s13 + $0x40] sm:$0xff] }
 0xd80   : > { %5354 = vrcp.f32 %v3263_v42  ;;  %3836 = vmatpush.msrb.mxu0 %v4925_v18 }
 0xd81   : > { %4920 = vmatmul.msk.f32.gmra.mxu1 %vm1391_vm6, %v3282_v41 }
 0xd86   : > { %v5355_v56 = vpop.eup %5354 }
 0xd87   : > { %v3266_v23 = vpop.xlane.xlu2 %3265  ;;  %v3283_v52 = vmul.f32 %v5355_v56, %v5341_v11 }
 0xd88   : > { %5356 = vrcp.f32 %v3266_v23 }
 0xd89   : > { %4921 = vmatmul.msk.f32.gmra.mxu1 %vm1391_vm6, %v3283_v52 }
 0xd8e   : > { %v5357_v0 = vpop.eup %5356 }
 0xd8f   : > { %v3269_v44 = vpop.xlane.xlu0 %3268  ;;  %v3284_v45 = vmul.f32 %v5357_v0, %v5343_v4 }
 0xd90   : > { %5358 = vrcp.f32 %v3269_v44 }
 0xd91   : > { %4922 = vmatmul.msk.f32.gmra.mxu1 %vm1391_vm6, %v3284_v45 }
 0xd96   : > { %v5359_v43 = vpop.eup %5358 }
 0xd97   : > { %v3272_v35 = vpop.xlane.xlu1 %3271  ;;  %v3285_v48 = vmul.f32 %v5359_v43, %v5345_v51 }
 0xd98   : > { %5360 = vrcp.f32 %v3272_v35 }
 0xd99   : > { %4923 = vmatmul.msk.f32.gmra.mxu1 %vm1391_vm6, %v3285_v48 }
 0xd9e   : > { %v5361_v9 = vpop.eup %5360 }
 0xd9f   : > { %v3286_v14 = vmul.f32 %v5361_v9, %v5347_v24 }
 0xda1   : > { %4924 = vmatmul.msk.f32.gmra.mxu1 %vm1391_vm6, %v3286_v14 }
 0xda9   : > { %4984 = vmatmul.msk.f32.vlgmr.msrb.gmra.mxu1 %vm1303_vm4, %v3386_v10 }
 0xdb1   : > { %4985 = vmatmul.msk.f32.gmra.mxu1 %vm1303_vm4, %v3389_v46 }
 0xdb9   : > { %4986 = vmatmul.msk.f32.gmra.mxu1 %vm1303_vm4, %v3392_v13 }
 0xdc1   : > { %4987 = vmatmul.msk.f32.gmra.mxu1 %vm1303_vm4, %v3395_v12 }
 0xdc9   : > { %4988 = vmatmul.msk.f32.gmra.mxu1 %vm1303_vm4, %v3398_v3 }
 0xdd1   : > { %4989 = vmatmul.msk.f32.gmra.mxu1 %vm1303_vm4, %v3401_v61 }
 0xdd9   : > { %4990 = vmatmul.msk.f32.gmra.mxu1 %vm1303_vm4, %v3404_v54 }
 0xdee   : > { %v3328_v19 = vpop.f32.mrf.mxu1 }
 0xdef   : > { %5010 = vmatmul.msk.f32.vlgmr.msrb.gmra.mxu0 %vm1303_vm4, %v3328_v19 }
 0xdf6   : > { %v3331_v11 = vpop.f32.mrf.mxu1 }
 0xdf7   : > { %5011 = vmatmul.msk.f32.gmra.mxu0 %vm1303_vm4, %v3331_v11 }
 0xdfe   : > { %v3334_v8 = vpop.f32.mrf.mxu1 }
 0xdff   : > { %5012 = vmatmul.msk.f32.gmra.mxu0 %vm1303_vm4, %v3334_v8 }
 0xe06   : > { %v3337_v63 = vpop.f32.mrf.mxu1 }
 0xe07   : > { %5013 = vmatmul.msk.f32.gmra.mxu0 %vm1303_vm4, %v3337_v63 }
 0xe0e   : > { %v3340_v40 = vpop.f32.mrf.mxu1 }
 0xe0f   : > { %5014 = vmatmul.msk.f32.gmra.mxu0 %vm1303_vm4, %v3340_v40 }
 0xe16   : > { %v3343_v34 = vpop.f32.mrf.mxu1 }
 0xe17   : > { %5015 = vmatmul.msk.f32.gmra.mxu0 %vm1303_vm4, %v3343_v34 }
 0xe1e   : > { %v3346_v4 = vpop.f32.mrf.mxu1 }
 0xe1f   : > { %5016 = vmatmul.msk.f32.gmra.mxu0 %vm1303_vm4, %v3346_v4 }
 0xe26   : > { %v3569_v49 = vpop.f32.mrf.mxu1 }
 0xe27   : > { %v3590_v33 = vmul.f32 0.17677669, %v3569_v49 }
 0xe29   : > { %v3597_v7 = vsel %vm1391_vm6, %v3590_v33, -inf }
 0xe2a   : > { %3598 = vmax.xlane.f32.xlu2 %v3597_v7 }
 0xe2e   : > { %v3572_v50 = vpop.f32.mrf.mxu1 }
 0xe2f   : > { %v3591_v51 = vmul.f32 0.17677669, %v3572_v50 }
 0xe31   : > { %v3600_v5 = vsel %vm1391_vm6, %v3591_v51, -inf }
 0xe32   : > { %3601 = vmax.xlane.f32.xlu0 %v3600_v5 }
 0xe36   : > { %v3575_v29 = vpop.f32.mrf.mxu1 }
 0xe37   : > { %v3592_v24 = vmul.f32 0.17677669, %v3575_v29 }
 0xe39   : > { %v3603_v15 = vsel %vm1391_vm6, %v3592_v24, -inf }
 0xe3a   : > { %3604 = vmax.xlane.f32.xlu1 %v3603_v15 }
 0xe3e   : > { %v3578_v37 = vpop.f32.mrf.mxu1 }
 0xe3f   : > { %v3593_v38 = vmul.f32 0.17677669, %v3578_v37 }
 0xe41   : > { %v3606_v2 = vsel %vm1391_vm6, %v3593_v38, -inf }
 0xe42   : > { %3607 = vmax.xlane.f32.xlu2 %v3606_v2  ;;  %v5001_v2 = vld [vmem:[%s7811_s13 + $0x70] sm:$0xff] }
 0xe46   : > { %v3581_v62 = vpop.f32.mrf.mxu1 }
 0xe47   : > { %v3594_v31 = vmul.f32 0.17677669, %v3581_v62  ;;  %v5000_v62 = vld [vmem:[%s7811_s13 + $0x68] sm:$0xff] }
 0xe49   : > { %v3609_v17 = vsel %vm1391_vm6, %v3594_v31, -inf }
 0xe4a   : > { %3610 = vmax.xlane.f32.xlu0 %v3609_v17 }
 0xe4e   : > { %v3584_v1 = vpop.f32.mrf.mxu1 }
 0xe4f   : > { %v3595_v59 = vmul.f32 0.17677669, %v3584_v1 }
 0xe51   : > { %v3612_v42 = vsel %vm1391_vm6, %v3595_v59, -inf }
 0xe52   : > { %3613 = vmax.xlane.f32.xlu1 %v3612_v42 }
 0xe56   : > { %v3587_v41 = vpop.f32.mrf.mxu1 }
 0xe57   : > { %v3596_v56 = vmul.f32 0.17677669, %v3587_v41 }
 0xe59   : > { %v3615_v23 = vsel %vm1410_vm7, %v3596_v56, -inf }
 0xe5a   : > { %3616 = vmax.xlane.f32.xlu2 %v3615_v23 }
 0xe9d   : > { %v3599_v52 = vpop.xlane.xlu2 %3598 }
 0xe9e   : > { %v3618_v0 = vsub.f32 %v3590_v33, %v3599_v52 }
 0xea0   : > { %v3625_v44 = vmul.f32 1.442695, %v3618_v0 }
 0xea2   : > { %5362 = vpow2.f32 %v3625_v44 }
 0xea5   : > { %v3602_v45 = vpop.xlane.xlu0 %3601 }
 0xea6   : > { %v3619_v43 = vsub.f32 %v3591_v51, %v3602_v45  ;;  %v4999_v45 = vld [vmem:[%s7811_s13 + $0x60] sm:$0xff] }
 0xea8   : > { %v5363_v35 = vpop.eup %5362  ;;  %v3627_v48 = vmul.f32 1.442695, %v3619_v43 }
 0xea9   : > { %v3639_v30 = vsel %vm1391_vm6, %v5363_v35, 0.0 }
 0xeaa   : > { %5364 = vpow2.f32 %v3627_v48  ;;  %3640 = vadd.xlane.f32.xlu0 %v3639_v30 }
 0xead   : > { %v3605_v9 = vpop.xlane.xlu1 %3604 }
 0xeae   : > { %v3620_v14 = vsub.f32 %v3592_v24, %v3605_v9 }
 0xeb0   : > { %v5365_v27 = vpop.eup %5364  ;;  %v3629_v32 = vmul.f32 1.442695, %v3620_v14 }
 0xeb1   : > { %v3642_v10 = vsel %vm1391_vm6, %v5365_v27, 0.0 }
 0xeb2   : > { %5366 = vpow2.f32 %v3629_v32  ;;  %3643 = vadd.xlane.f32.xlu1 %v3642_v10  ;;  %v3838_v32 = vpop.f32.mrf.mxu0 }
 0xeb5   : > { %v3608_v55 = vpop.xlane.xlu2 %3607 }
 0xeb6   : > { %v3621_v46 = vsub.f32 %v3593_v38, %v3608_v55  ;;  %v5002_v38 = vld [vmem:[%s7811_s13 + $0x78] sm:$0xff] }
 0xeb7   : > { %3774 = vmatpush.msrb.mxu3 %v5002_v38 }
 0xeb8   : > { %v5367_v22 = vpop.eup %5366  ;;  %v3631_v13 = vmul.f32 1.442695, %v3621_v46 }
 0xeb9   : > { %v3645_v25 = vsel %vm1391_vm6, %v5367_v22, 0.0  ;;  %3775 = vmatpush.msrb.mxu3 %v5001_v2 }
 0xeba   : > { %5368 = vpow2.f32 %v3631_v13  ;;  %3646 = vadd.xlane.f32.xlu2 %v3645_v25  ;;  %v3841_v10 = vpop.f32.mrf.mxu0 }
 0xebb   : > { %3776 = vmatpush.msrb.mxu3 %v5000_v62 }
 0xebd   : > { %v3611_v53 = vpop.xlane.xlu0 %3610  ;;  %3777 = vmatpush.msrb.mxu3 %v4999_v45 }
 0xebe   : > { %v3622_v21 = vsub.f32 %v3594_v31, %v3611_v53 }
 0xec0   : > { %v5369_v12 = vpop.eup %5368  ;;  %v3633_v26 = vmul.f32 1.442695, %v3622_v21 }
 0xec1   : > { %v3648_v3 = vsel %vm1391_vm6, %v5369_v12, 0.0 }
 0xec2   : > { %5370 = vpow2.f32 %v3633_v26  ;;  %3649 = vadd.xlane.f32.xlu0 %v3648_v3  ;;  %v3844_v21 = vpop.f32.mrf.mxu0 }
 0xec5   : > { %v3614_v20 = vpop.xlane.xlu1 %3613 }
 0xec6   : > { %v3623_v18 = vsub.f32 %v3595_v59, %v3614_v20 }
 0xec8   : > { %v5371_v61 = vpop.eup %5370  ;;  %v3635_v6 = vmul.f32 1.442695, %v3623_v18 }
 0xec9   : > { %v3651_v54 = vsel %vm1391_vm6, %v5371_v61, 0.0 }
 0xeca   : > { %5372 = vpow2.f32 %v3635_v6  ;;  %3652 = vadd.xlane.f32.xlu1 %v3651_v54 }
 0xecd   : > { %v3617_v19 = vpop.xlane.xlu2 %3616 }
 0xece   : > { %v3624_v11 = vsub.f32 %v3596_v56, %v3617_v19 }
 0xed0   : > { %v5373_v8 = vpop.eup %5372  ;;  %v3637_v63 = vmul.f32 1.442695, %v3624_v11 }
 0xed1   : > { %v3654_v40 = vsel %vm1391_vm6, %v5373_v8, 0.0 }
 0xed2   : > { %5374 = vpow2.f32 %v3637_v63  ;;  %3655 = vadd.xlane.f32.xlu2 %v3654_v40 }
 0xed8   : > { %v5375_v34 = vpop.eup %5374 }
 0xed9   : > { %v3657_v4 = vsel %vm1410_vm7, %v5375_v34, 0.0 }
 0xeda   : > { %3658 = vadd.xlane.f32.xlu0 %v3657_v4 }
 0xf1d   : > { %v3641_v49 = vpop.xlane.xlu0 %3640 }
 0xf1e   : > { %5376 = vrcp.f32 %v3641_v49 }
 0xf24   : > { %v5377_v33 = vpop.eup %5376 }
 0xf25   : > { %v3667_v7 = vmul.f32 %v5377_v33, %v5363_v35  ;;  %v3644_v50 = vpop.xlane.xlu1 %3643 }
 0xf26   : > { %5378 = vrcp.f32 %v3644_v50 }
 0xf27   : > { %4992 = vmatmul.msk.f32.vlgmr.msrb.gmra.mxu2 %vm1391_vm6, %v3667_v7 }
 0xf2c   : > { %v5379_v51 = vpop.eup %5378 }
 0xf2d   : > { %v3647_v5 = vpop.xlane.xlu2 %3646  ;;  %v3668_v29 = vmul.f32 %v5379_v51, %v5365_v27 }
 0xf2e   : > { %5380 = vrcp.f32 %v3647_v5 }
 0xf2f   : > { %4993 = vmatmul.msk.f32.gmra.mxu2 %vm1391_vm6, %v3668_v29 }
 0xf34   : > { %v5381_v24 = vpop.eup %5380 }
 0xf35   : > { %v3650_v15 = vpop.xlane.xlu0 %3649  ;;  %v3669_v37 = vmul.f32 %v5381_v24, %v5367_v22  ;;  %v5160_v22 = vld [vmem:[%s7812_s14 + $0x1] ss:$0 sm:$0xff] }
 0xf36   : > { %5382 = vrcp.f32 %v3650_v15 }
 0xf37   : > { %4994 = vmatmul.msk.f32.gmra.mxu2 %vm1391_vm6, %v3669_v37 }
 0xf3c   : > { %v5383_v31 = vpop.eup %5382 }
 0xf3d   : > { %v3653_v17 = vpop.xlane.xlu1 %3652  ;;  %v3670_v1 = vmul.f32 %v5383_v31, %v5369_v12 }
 0xf3e   : > { %5384 = vrcp.f32 %v3653_v17 }
 0xf3f   : > { %4995 = vmatmul.msk.f32.gmra.mxu2 %vm1391_vm6, %v3670_v1 }
 0xf44   : > { %v5385_v59 = vpop.eup %5384 }
 0xf45   : > { %v3656_v42 = vpop.xlane.xlu2 %3655  ;;  %v3671_v41 = vmul.f32 %v5385_v59, %v5371_v61 }
 0xf46   : > { %5386 = vrcp.f32 %v3656_v42 }
 0xf47   : > { %4996 = vmatmul.msk.f32.gmra.mxu2 %vm1391_vm6, %v3671_v41 }
 0xf4c   : > { %v5387_v56 = vpop.eup %5386 }
 0xf4d   : > { %v3659_v23 = vpop.xlane.xlu0 %3658  ;;  %v3672_v52 = vmul.f32 %v5387_v56, %v5373_v8 }
 0xf4e   : > { %5388 = vrcp.f32 %v3659_v23 }
 0xf4f   : > { %4997 = vmatmul.msk.f32.gmra.mxu2 %vm1391_vm6, %v3672_v52 }
 0xf54   : > { %v5389_v0 = vpop.eup %5388 }
 0xf55   : > { %v3673_v44 = vmul.f32 %v5389_v0, %v5375_v34 }
 0xf57   : > { %4998 = vmatmul.msk.f32.gmra.mxu2 %vm1391_vm6, %v3673_v44 }
 0xfaa   : > { %v3715_v43 = vpop.f32.mrf.mxu2 }
 0xfab   : > { %5003 = vmatmul.msk.f32.vlgmr.msrb.gmra.mxu3 %vm1303_vm4, %v3715_v43 }
 0xfb2   : > { %v3718_v35 = vpop.f32.mrf.mxu2 }
 0xfb3   : > { %5004 = vmatmul.msk.f32.gmra.mxu3 %vm1303_vm4, %v3718_v35 }
 0xfba   : > { %v3721_v48 = vpop.f32.mrf.mxu2 }
 0xfbb   : > { %5005 = vmatmul.msk.f32.gmra.mxu3 %vm1303_vm4, %v3721_v48 }
 0xfc2   : > { %v3724_v30 = vpop.f32.mrf.mxu2 }
 0xfc3   : > { %5006 = vmatmul.msk.f32.gmra.mxu3 %vm1303_vm4, %v3724_v30 }
 0xfca   : > { %v3727_v9 = vpop.f32.mrf.mxu2 }
 0xfcb   : > { %5007 = vmatmul.msk.f32.gmra.mxu3 %vm1303_vm4, %v3727_v9 }
 0xfd2   : > { %v3730_v14 = vpop.f32.mrf.mxu2 }
 0xfd3   : > { %5008 = vmatmul.msk.f32.gmra.mxu3 %vm1303_vm4, %v3730_v14 }
 0xfda   : > { %v3733_v27 = vpop.f32.mrf.mxu2 }
 0xfdb   : > { %5009 = vmatmul.msk.f32.gmra.mxu3 %vm1303_vm4, %v3733_v27 }
0x102e   : > { %v3779_v55 = vpop.f32.mrf.mxu3 }
0x102f   : > { %v3839_v46 = vadd.f32 %v3838_v32, %v3779_v55 }
0x1031   : > { %v3859_v13 = vadd.f32 %v3839_v46, %v6828_v58  ;;  %v3847_v58 = vpop.f32.mrf.mxu0 }
0x1033   : > { %v7344_v25 = vadd.f32 %v5160_v22, %v3859_v13 }
0x1035   : > { %v3882_v53 = vsel %vm773_vm1, %v7344_v25, 0.0 }
0x1036   : > { %3883 = vadd.xlane.f32.xlu1 %v3882_v53  ;;  %v3782_v12 = vpop.f32.mrf.mxu3 }
0x1037   : > { %v3842_v26 = vadd.f32 %v3841_v10, %v3782_v12 }
0x1039   : > { %v3860_v3 = vadd.f32 %v3842_v26, %v6833_v57  ;;  %v3850_v40 = vpop.f32.mrf.mxu0 }
0x103b   : > { %v7349_v20 = vadd.f32 %v5160_v22, %v3860_v3 }
0x103d   : > { %v3885_v18 = vsel %vm773_vm1, %v7349_v20, 0.0 }
0x103e   : > { %3886 = vadd.xlane.f32.xlu2 %v3885_v18  ;;  %v3785_v61 = vpop.f32.mrf.mxu3 }
0x103f   : > { %v3845_v6 = vadd.f32 %v3844_v21, %v3785_v61 }
0x1041   : > { %v3861_v54 = vadd.f32 %v3845_v6, %v6838_v60  ;;  %v3853_v50 = vpop.f32.mrf.mxu0 }
0x1043   : > { %v7354_v19 = vadd.f32 %v5160_v22, %v3861_v54  ;;  %v4071_v54 = vld [vmem:[#allocation4 + $0xf0] sm:$0xff] }
0x1044   : > { %4109 = vmatpush.msra.mxu1 %v4071_v54 }
0x1045   : > { %v3888_v11 = vsel %vm773_vm1, %v7354_v19, 0.0 }
0x1046   : > { %3889 = vadd.xlane.f32.xlu0 %v3888_v11  ;;  %v3788_v8 = vpop.f32.mrf.mxu3  ;;  %v4072_v11 = vld [vmem:[#allocation4 + $0xf8] sm:$0xff] }
0x1047   : > { %v3848_v63 = vadd.f32 %v3847_v58, %v3788_v8  ;;  %4147 = vmatpush.msra.mxu2 %v4072_v11  ;;  %v4069_v8 = vld [vmem:[#allocation4 + $0xe0] sm:$0xff] }
0x1048   : > { %4110 = vmatpush.msra.mxu1 %v4069_v8 }
0x1049   : > { %v3862_v57 = vadd.f32 %v3848_v63, %v6843_v28  ;;  %v3856_v37 = vpop.f32.mrf.mxu0  ;;  %v4070_v63 = vld [vmem:[#allocation4 + $0xe8] sm:$0xff] }
0x104a   : > { %4148 = vmatpush.msra.mxu2 %v4070_v63 }
0x104b   : > { %v7359_v34 = vadd.f32 %v5160_v22, %v3862_v57  ;;  %v4067_v57 = vld [vmem:[#allocation4 + $0xd0] sm:$0xff] }
0x104c   : > { %4111 = vmatpush.msra.mxu1 %v4067_v57 }
0x104d   : > { %v3891_v4 = vsel %vm773_vm1, %v7359_v34, 0.0 }
0x104e   : > { %3892 = vadd.xlane.f32.xlu1 %v3891_v4  ;;  %v3791_v49 = vpop.f32.mrf.mxu3  ;;  %v4065_v4 = vld [vmem:[#allocation4 + $0xc0] sm:$0xff] }
0x104f   : > { %v3851_v33 = vadd.f32 %v3850_v40, %v3791_v49  ;;  %v4068_v40 = vld [vmem:[#allocation4 + $0xd8] sm:$0xff]  ;;  %v4066_v49 = vld [vmem:[#allocation4 + $0xc8] sm:$0xff]  ;;  %4112 = vmatpush.msra.mxu1 %v4065_v4 }
0x1050   : > { %4149 = vmatpush.msra.mxu2 %v4068_v40 }
0x1051   : > { %v3863_v60 = vadd.f32 %v3851_v33, %v6848_v36  ;;  %v4063_v33 = vld [vmem:[#allocation4 + $0xb0] sm:$0xff] }
0x1052   : > { %4150 = vmatpush.msra.mxu2 %v4066_v49  ;;  %4113 = vmatpush.msra.mxu1 %v4063_v33 }
0x1053   : > { %v7364_v7 = vadd.f32 %v5160_v22, %v3863_v60  ;;  %v4064_v60 = vld [vmem:[#allocation4 + $0xb8] sm:$0xff] }
0x1054   : > { %4151 = vmatpush.msra.mxu2 %v4064_v60 }
0x1055   : > { %v3894_v51 = vsel %vm773_vm1, %v7364_v7, 0.0 }
0x1056   : > { %3895 = vadd.xlane.f32.xlu2 %v3894_v51  ;;  %v3794_v5 = vpop.f32.mrf.mxu3  ;;  %v4062_v51 = vld [vmem:[#allocation4 + $0xa8] sm:$0xff] }
0x1057   : > { %v3854_v28 = vadd.f32 %v3853_v50, %v3794_v5  ;;  %v4061_v50 = vld [vmem:[#allocation4 + $0xa0] sm:$0xff]  ;;  %4152 = vmatpush.msra.mxu2 %v4062_v51  ;;  %v4059_v5 = vld [vmem:[#allocation4 + $0x90] sm:$0xff] }
0x1058   : > { %4114 = vmatpush.msra.mxu1 %v4061_v50 }
0x1059   : > { %v3864_v29 = vadd.f32 %v3854_v28, %v6853_v16  ;;  %v4060_v28 = vld [vmem:[#allocation4 + $0x98] sm:$0xff] }
0x105a   : > { %4115 = vmatpush.msra.mxu1 %v4059_v5  ;;  %4153 = vmatpush.msra.mxu2 %v4060_v28 }
0x105b   : > { %v7369_v24 = vadd.f32 %v5160_v22, %v3864_v29  ;;  %v4057_v29 = vld [vmem:[#allocation4 + $0x80] sm:$0xff] }
0x105c   : > { %4116 = vmatpush.msra.mxu1 %v4057_v29 }
0x105d   : > { %v3897_v15 = vsel %vm773_vm1, %v7369_v24, 0.0 }
0x105e   : > { %3898 = vadd.xlane.f32.xlu0 %v3897_v15  ;;  %v3797_v38 = vpop.f32.mrf.mxu3  ;;  %v4058_v15 = vld [vmem:[#allocation4 + $0x88] sm:$0xff] }
0x105f   : > { %v3857_v36 = vadd.f32 %v3856_v37, %v3797_v38  ;;  %4154 = vmatpush.msra.mxu2 %v4058_v15 }
0x1061   : > { %v3865_v2 = vadd.f32 %v3857_v36, %v6858_v39 }
0x1063   : > { %v7374_v62 = vadd.f32 %v5160_v22, %v3865_v2 }
0x1065   : > { %v3900_v31 = vsel %vm792_vm2, %v7374_v62, 0.0 }
0x1066   : > { %3901 = vadd.xlane.f32.xlu2 %v3900_v31 }
0x10a9   : > { %v3884_v17 = vpop.xlane.xlu1 %3883 }
0x10aa   : > { %v3903_v16 = vmul.f32 %v3884_v17, %v5723_v47 }
0x10ac   : > { %v7380_v1 = vsub.f32 %v7344_v25, %v3903_v16 }
0x10ae   : > { %v3917_v59 = vmul.f32 %v7380_v1, %v7380_v1 }
0x10b0   : > { %v3924_v42 = vsel %vm773_vm1, %v3917_v59, 0.0 }
0x10b1   : > { %3925 = vadd.xlane.f32.xlu1 %v3924_v42  ;;  %v3887_v41 = vpop.xlane.xlu2 %3886 }
0x10b2   : > { %v3904_v39 = vmul.f32 %v3887_v41, %v5723_v47 }
0x10b4   : > { %v7387_v56 = vsub.f32 %v7349_v20, %v3904_v39 }
0x10b6   : > { %v3918_v23 = vmul.f32 %v7387_v56, %v7387_v56 }
0x10b8   : > { %v3927_v52 = vsel %vm773_vm1, %v3918_v23, 0.0 }
0x10b9   : > { %v3890_v0 = vpop.xlane.xlu0 %3889  ;;  %3928 = vadd.xlane.f32.xlu0 %v3927_v52 }
0x10ba   : > { %v3905_v44 = vmul.f32 %v3890_v0, %v5723_v47 }
0x10bc   : > { %v7394_v45 = vsub.f32 %v7354_v19, %v3905_v44 }
0x10be   : > { %v3919_v43 = vmul.f32 %v7394_v45, %v7394_v45 }
0x10c0   : > { %v3930_v35 = vsel %vm773_vm1, %v3919_v43, 0.0 }
0x10c1   : > { %3931 = vadd.xlane.f32.xlu1 %v3930_v35  ;;  %v3893_v48 = vpop.xlane.xlu1 %3892 }
0x10c2   : > { %v3906_v30 = vmul.f32 %v3893_v48, %v5723_v47  ;;  %v7433_v48 = vld [vmem:[%s7813_s15 + $0x1] ss:$0 sm:$0xff] }
0x10c4   : > { %v7401_v9 = vsub.f32 %v7359_v34, %v3906_v30 }
0x10c6   : > { %v3920_v14 = vmul.f32 %v7401_v9, %v7401_v9 }
0x10c8   : > { %v3933_v27 = vsel %vm773_vm1, %v3920_v14, 0.0 }
0x10c9   : > { %3934 = vadd.xlane.f32.xlu2 %v3933_v27  ;;  %v3896_v32 = vpop.xlane.xlu2 %3895  ;;  %v7438_v27 = vld [vmem:[%s7814_s16 + $0x1] ss:$0 sm:$0xff] }
0x10ca   : > { %v3907_v10 = vmul.f32 %v3896_v32, %v5723_v47 }
0x10cc   : > { %v7408_v55 = vsub.f32 %v7364_v7, %v3907_v10 }
0x10ce   : > { %v3921_v46 = vmul.f32 %v7408_v55, %v7408_v55 }
0x10d0   : > { %v3936_v22 = vsel %vm773_vm1, %v3921_v46, 0.0 }
0x10d1   : > { %v3899_v13 = vpop.xlane.xlu0 %3898  ;;  %3937 = vadd.xlane.f32.xlu0 %v3936_v22 }
0x10d2   : > { %v3908_v53 = vmul.f32 %v3899_v13, %v5723_v47 }
0x10d4   : > { %v7415_v21 = vsub.f32 %v7369_v24, %v3908_v53 }
0x10d6   : > { %v3922_v12 = vmul.f32 %v7415_v21, %v7415_v21 }
0x10d8   : > { %v3939_v26 = vsel %vm773_vm1, %v3922_v12, 0.0 }
0x10d9   : > { %3940 = vadd.xlane.f32.xlu1 %v3939_v26  ;;  %v3902_v3 = vpop.xlane.xlu2 %3901 }
0x10da   : > { %v3909_v18 = vmul.f32 %v3902_v3, %v5723_v47 }
0x10dc   : > { %v7422_v61 = vsub.f32 %v7374_v62, %v3909_v18 }
0x10de   : > { %v3923_v6 = vmul.f32 %v7422_v61, %v7422_v61 }
0x10e0   : > { %v3942_v58 = vsel %vm792_vm2, %v3923_v6, 0.0 }
0x10e1   : > { %3943 = vadd.xlane.f32.xlu2 %v3942_v58 }
0x1124   : > { %v3926_v37 = vpop.xlane.xlu1 %3925 }
0x1125   : > { %v3945_v38 = vmul.f32 %v3926_v37, %v5723_v47 }
0x1127   : > { %v3952_v36 = vadd.f32 1e-05, %v3945_v38 }
0x1129   : > { %5390 = vrsqrt.f32 %v3952_v36  ;;  %vm3965_vm5 = vweird.f32 %v3952_v36 }
0x112c   : > { %v3929_v2 = vpop.xlane.xlu0 %3928 }
0x112d   : > { %v3946_v31 = vmul.f32 %v3929_v2, %v5723_v47 }
0x112f   : > { %v5391_v17 = vpop.eup %5390  ;;  %v3953_v16 = vadd.f32 1e-05, %v3946_v31 }
0x1130   : > { %v3960_v59 = vmul.f32 %v5391_v17, %v3952_v36  ;;  %vm3966_vm4 = vweird.f32 %v5391_v17 }
0x1131   : > { %5392 = vrsqrt.f32 %v3953_v16  ;;  %vm3967_vm6 = vmor %vm3965_vm5, %vm3966_vm4  ;;  %vm3975_vm0 = vweird.f32 %v3953_v16 }
0x1132   : > { %v3961_v42 = vmul.f32 %v5391_v17, %v3960_v59 }
0x1134   : > { %v3962_v41 = vmul.f32 0.5, %v3961_v42  ;;  %v3932_v39 = vpop.xlane.xlu1 %3931 }
0x1135   : > { %v3947_v23 = vmul.f32 %v3932_v39, %v5723_v47 }
0x1136   : > { %v3963_v52 = vsub.f32 1.5, %v3962_v41 }
0x1137   : > { %v5393_v0 = vpop.eup %5392  ;;  %v3954_v44 = vadd.f32 1e-05, %v3947_v23 }
0x1138   : > { %v3964_v43 = vmul.f32 %v5391_v17, %v3963_v52  ;;  %v3970_v35 = vmul.f32 %v5393_v0, %v3953_v16  ;;  %vm3976_vm7 = vweird.f32 %v5393_v0 }
0x1139   : > { %5394 = vrsqrt.f32 %v3954_v44  ;;  %vm3977_vm3 = vmor %vm3975_vm0, %vm3976_vm7  ;;  %vm3985_vm9 = vweird.f32 %v3954_v44 }
0x113a   : > { %v3968_v30 = vsel %vm3967_vm6, %v5391_v17, %v3964_v43  ;;  %v3971_v14 = vmul.f32 %v5393_v0, %v3970_v35 }
0x113b   : > { %v4029_v32 = vmul.f32 %v3968_v30, %v7380_v1 }
0x113c   : > { %v3972_v10 = vmul.f32 0.5, %v3971_v14  ;;  %v3935_v46 = vpop.xlane.xlu2 %3934 }
0x113d   : > { %v4039_v22 = vmul.f32 %v7433_v48, %v4029_v32  ;;  %v3948_v13 = vmul.f32 %v3935_v46, %v5723_v47 }
0x113e   : > { %v3973_v53 = vsub.f32 1.5, %v3972_v10 }
0x113f   : > { %v5395_v12 = vpop.eup %5394  ;;  %v4049_v26 = vadd.f32 %v7438_v27, %v4039_v22  ;;  %v3955_v3 = vadd.f32 1e-05, %v3948_v13 }
0x1140   : > { %v3974_v18 = vmul.f32 %v5393_v0, %v3973_v53  ;;  %v3980_v6 = vmul.f32 %v5395_v12, %v3954_v44  ;;  %vm3986_vm8 = vweird.f32 %v5395_v12 }
0x1141   : > { %5396 = vrsqrt.f32 %v3955_v3  ;;  %5021 = vmatmul.msk.f32.vlgmr.msra.gmra.mxu1 %vm773_vm1, %v4049_v26  ;;  %5028 = vmatmul.msk.f32.vlgmr.msra.gmra.mxu2 %vm773_vm1, %v4049_v26  ;;  %vm3987_vm10 = vmor %vm3985_vm9, %vm3986_vm8  ;;  %vm3995_vm12 = vweird.f32 %v3955_v3 }
0x1142   : > { %v3978_v1 = vsel %vm3977_vm3, %v5393_v0, %v3974_v18  ;;  %v3981_v58 = vmul.f32 %v5395_v12, %v3980_v6 }
0x1143   : > { %v4030_v54 = vmul.f32 %v3978_v1, %v7387_v56 }
0x1144   : > { %v3982_v11 = vmul.f32 0.5, %v3981_v58  ;;  %v3938_v8 = vpop.xlane.xlu0 %3937 }
0x1145   : > { %v3949_v63 = vmul.f32 %v3938_v8, %v5723_v47  ;;  %v4040_v57 = vmul.f32 %v7433_v48, %v4030_v54 }
0x1146   : > { %v3983_v40 = vsub.f32 1.5, %v3982_v11 }
0x1147   : > { %v5397_v4 = vpop.eup %5396  ;;  %v3956_v49 = vadd.f32 1e-05, %v3949_v63  ;;  %v4050_v33 = vadd.f32 %v7438_v27, %v4040_v57 }
0x1148   : > { %v3984_v60 = vmul.f32 %v5395_v12, %v3983_v40  ;;  %v3990_v50 = vmul.f32 %v5397_v4, %v3955_v3  ;;  %vm3996_vm11 = vweird.f32 %v5397_v4  ;;  %v5064_v40 = vld [vmem:[%s7817_s19 + $0x178] sm:$0xff] }
0x1149   : > { %5398 = vrsqrt.f32 %v3956_v49  ;;  %5022 = vmatmul.msk.f32.gmra.mxu1 %vm773_vm1, %v4050_v33  ;;  %5029 = vmatmul.msk.f32.gmra.mxu2 %vm773_vm1, %v4050_v33  ;;  %vm3997_vm13 = vmor %vm3995_vm12, %vm3996_vm11  ;;  %vm4005_vm15 = vweird.f32 %v3956_v49  ;;  %v5079_v33 = vld [vmem:[%s7817_s19 + $0x1f0] sm:$0xff] }
0x114a   : > { %v3988_v56 = vsel %vm3987_vm10, %v5395_v12, %v3984_v60  ;;  %v3991_v51 = vmul.f32 %v5397_v4, %v3990_v50  ;;  %4509 = vmatpush.msra.mxu3 %v5064_v40  ;;  %v5059_v60 = vld [vmem:[%s7817_s19 + $0x150] sm:$0xff]  ;;  %v5078_v50 = vld [vmem:[%s7817_s19 + $0x1e8] sm:$0xff] }
0x114b   : > { %v4031_v5 = vmul.f32 %v3988_v56, %v7394_v45  ;;  %v5058_v56 = vld [vmem:[%s7817_s19 + $0x148] sm:$0xff] }
0x114c   : > { %v3992_v28 = vmul.f32 0.5, %v3991_v51  ;;  %v3941_v29 = vpop.xlane.xlu1 %3940  ;;  %v5077_v51 = vld [vmem:[%s7817_s19 + $0x1e0] sm:$0xff] }
0x114d   : > { %v3950_v15 = vmul.f32 %v3941_v29, %v5723_v47  ;;  %v4041_v37 = vmul.f32 %v7433_v48, %v4031_v5  ;;  %v5057_v5 = vld [vmem:[%s7817_s19 + $0x140] sm:$0xff]  ;;  %v5056_v29 = vld [vmem:[%s7817_s19 + $0x138] sm:$0xff] }
0x114e   : > { %v3993_v38 = vsub.f32 1.5, %v3992_v28  ;;  %v5076_v28 = vld [vmem:[%s7817_s19 + $0x1d8] sm:$0xff] }
0x114f   : > { %v5399_v36 = vpop.eup %5398  ;;  %v3957_v2 = vadd.f32 1e-05, %v3950_v15  ;;  %v4051_v31 = vadd.f32 %v7438_v27, %v4041_v37  ;;  %v5075_v15 = vld [vmem:[%s7817_s19 + $0x1d0] sm:$0xff] }
0x1150   : > { %v3994_v17 = vmul.f32 %v5397_v4, %v3993_v38  ;;  %v4000_v16 = vmul.f32 %v5399_v36, %v3956_v49  ;;  %vm4006_vm14 = vweird.f32 %v5399_v36  ;;  %v5060_v49 = vld [vmem:[%s7817_s19 + $0x158] sm:$0xff]  ;;  %v5055_v37 = vld [vmem:[%s7817_s19 + $0x130] sm:$0xff]  ;;  %v5074_v38 = vld [vmem:[%s7817_s19 + $0x1c8] sm:$0xff] }
0x1151   : > { %5400 = vrsqrt.f32 %v3957_v2  ;;  %5023 = vmatmul.msk.f32.gmra.mxu1 %vm773_vm1, %v4051_v31  ;;  %5030 = vmatmul.msk.f32.gmra.mxu2 %vm773_vm1, %v4051_v31  ;;  %vm4007_vm4 = vmor %vm4005_vm15, %vm4006_vm14  ;;  %vm4015_vm6 = vweird.f32 %v3957_v2  ;;  %v5054_v31 = vld [vmem:[%s7817_s19 + $0x128] sm:$0xff] }
0x1152   : > { %v3998_v45 = vsel %vm3997_vm13, %v5397_v4, %v3994_v17  ;;  %v4001_v59 = vmul.f32 %v5399_v36, %v4000_v16  ;;  %v5063_v4 = vld [vmem:[%s7817_s19 + $0x170] sm:$0xff]  ;;  %v5073_v17 = vld [vmem:[%s7817_s19 + $0x1c0] sm:$0xff] }
0x1153   : > { %v4032_v42 = vmul.f32 %v3998_v45, %v7401_v9  ;;  %4510 = vmatpush.msra.mxu3 %v5063_v4 }
0x1154   : > { %v4002_v41 = vmul.f32 0.5, %v4001_v59  ;;  %v3944_v39 = vpop.xlane.xlu2 %3943  ;;  %v5053_v59 = vld [vmem:[%s7817_s19 + $0x120] sm:$0xff] }
0x1155   : > { %v3951_v23 = vmul.f32 %v3944_v39, %v5723_v47  ;;  %v4042_v52 = vmul.f32 %v7433_v48, %v4032_v42  ;;  %v5072_v42 = vld [vmem:[%s7817_s19 + $0x1b8] sm:$0xff] }
0x1156   : > { %v4003_v0 = vsub.f32 1.5, %v4002_v41 }
0x1157   : > { %v5401_v44 = vpop.eup %5400  ;;  %v3958_v43 = vadd.f32 1e-05, %v3951_v23  ;;  %v4052_v35 = vadd.f32 %v7438_v27, %v4042_v52  ;;  %v5052_v23 = vld [vmem:[%s7817_s19 + $0x118] sm:$0xff]  ;;  %v5071_v52 = vld [vmem:[%s7817_s19 + $0x1b0] sm:$0xff] }
0x1158   : > { %v4004_v30 = vmul.f32 %v5399_v36, %v4003_v0  ;;  %v4010_v14 = vmul.f32 %v5401_v44, %v3957_v2  ;;  %vm4016_vm5 = vweird.f32 %v5401_v44 }
0x1159   : > { %5402 = vrsqrt.f32 %v3958_v43  ;;  %5024 = vmatmul.msk.f32.gmra.mxu1 %vm773_vm1, %v4052_v35  ;;  %5031 = vmatmul.msk.f32.gmra.mxu2 %vm773_vm1, %v4052_v35  ;;  %vm4017_vm7 = vmor %vm4015_vm6, %vm4016_vm5  ;;  %vm4025_vm3 = vweird.f32 %v3958_v43 }
0x115a   : > { %v4008_v9 = vsel %vm4007_vm4, %v5399_v36, %v4004_v30  ;;  %v4011_v32 = vmul.f32 %v5401_v44, %v4010_v14  ;;  %v5020_v36 = vld [vmem:[%s7816_s18 + $0x2] sm:$0x3]  ;;  %v5050_v14 = vld [vmem:[%s7817_s19 + $0x108] sm:$0xff] }
0x115b   : > { %v4033_v47 = vmul.f32 %v4008_v9, %v7408_v55  ;;  %v7533_v2 = vperm.slane %v5020_v36, 0  ;;  %v7551_v39 = vperm.slane %v5020_v36, 1  ;;  %v5069_v9 = vld [vmem:[%s7817_s19 + $0x1a0] sm:$0xff] }
0x115c   : > { %v4012_v10 = vmul.f32 0.5, %v4011_v32 }
0x115d   : > { %v4043_v46 = vmul.f32 %v7433_v48, %v4033_v47 }
0x115e   : > { %v4013_v22 = vsub.f32 1.5, %v4012_v10 }
0x115f   : > { %v5403_v13 = vpop.eup %5402  ;;  %v4053_v53 = vadd.f32 %v7438_v27, %v4043_v46  ;;  %v5049_v46 = vld [vmem:[%s7817_s19 + $0x100] sm:$0xff] }
0x1160   : > { %v4014_v12 = vmul.f32 %v5401_v44, %v4013_v22  ;;  %v4020_v26 = vmul.f32 %v5403_v13, %v3958_v43  ;;  %vm4026_vm0 = vweird.f32 %v5403_v13  ;;  %v5070_v43 = vld [vmem:[%s7817_s19 + $0x1a8] sm:$0xff]  ;;  %v5068_v22 = vld [vmem:[%s7817_s19 + $0x198] sm:$0xff] }
0x1161   : > { %5025 = vmatmul.msk.f32.gmra.mxu1 %vm773_vm1, %v4053_v53  ;;  %5032 = vmatmul.msk.f32.gmra.mxu2 %vm773_vm1, %v4053_v53  ;;  %vm4027_vm8 = vmor %vm4025_vm3, %vm4026_vm0 }
0x1162   : > { %v4018_v3 = vsel %vm4017_vm7, %v5401_v44, %v4014_v12  ;;  %v4021_v18 = vmul.f32 %v5403_v13, %v4020_v26  ;;  %v5051_v44 = vld [vmem:[%s7817_s19 + $0x110] sm:$0xff] }
0x1163   : > { %v4034_v55 = vmul.f32 %v4018_v3, %v7415_v21  ;;  %v5067_v12 = vld [vmem:[%s7817_s19 + $0x190] sm:$0xff] }
0x1164   : > { %v4022_v6 = vmul.f32 0.5, %v4021_v18  ;;  %v5066_v18 = vld [vmem:[%s7817_s19 + $0x188] sm:$0xff] }
0x1165   : > { %v4044_v1 = vmul.f32 %v7433_v48, %v4034_v55 }
0x1166   : > { %v4023_v58 = vsub.f32 1.5, %v4022_v6 }
0x1167   : > { %v4054_v54 = vadd.f32 %v7438_v27, %v4044_v1 }
0x1168   : > { %v4024_v11 = vmul.f32 %v5403_v13, %v4023_v58  ;;  %v5065_v58 = vld [vmem:[%s7817_s19 + $0x180] sm:$0xff] }
0x1169   : > { %5026 = vmatmul.msk.f32.gmra.mxu1 %vm773_vm1, %v4054_v54  ;;  %5033 = vmatmul.msk.f32.gmra.mxu2 %vm773_vm1, %v4054_v54 }
0x116a   : > { %v4028_v8 = vsel %vm4027_vm8, %v5403_v13, %v4024_v11 }
0x116b   : > { %v4035_v63 = vmul.f32 %v4028_v8, %v7422_v61  ;;  %v5062_v61 = vld [vmem:[%s7817_s19 + $0x168] sm:$0xff] }
0x116c   : > { %4511 = vmatpush.msra.mxu3 %v5062_v61 }
0x116d   : > { %v4045_v57 = vmul.f32 %v7433_v48, %v4035_v63  ;;  %v5061_v48 = vld [vmem:[%s7817_s19 + $0x160] sm:$0xff] }
0x116e   : > { %4512 = vmatpush.msra.mxu3 %v5061_v48 }
0x116f   : > { %v4055_v21 = vadd.f32 %v7438_v27, %v4045_v57  ;;  %v5080_v27 = vld [vmem:[%s7817_s19 + $0x1f8] sm:$0xff] }
0x1170   : > { %4547 = vmatpush.msra.mxu0 %v5080_v27  ;;  %4513 = vmatpush.msra.mxu3 %v5060_v49 }
0x1171   : > { %5027 = vmatmul.msk.f32.gmra.mxu1 %vm773_vm1, %v4055_v21  ;;  %5034 = vmatmul.msk.f32.gmra.mxu2 %vm773_vm1, %v4055_v21 }
0x1172   : > { %4548 = vmatpush.msra.mxu0 %v5079_v33  ;;  %4514 = vmatpush.msra.mxu3 %v5059_v60 }
0x1174   : > { %4549 = vmatpush.msra.mxu0 %v5078_v50  ;;  %4515 = vmatpush.msra.mxu3 %v5058_v56 }
0x1176   : > { %4550 = vmatpush.msra.mxu0 %v5077_v51  ;;  %4516 = vmatpush.msra.mxu3 %v5057_v5 }
0x1178   : > { %4551 = vmatpush.msra.mxu0 %v5076_v28  ;;  %4517 = vmatpush.msra.mxu3 %v5056_v29 }
0x117a   : > { %4552 = vmatpush.msra.mxu0 %v5075_v15  ;;  %4518 = vmatpush.msra.mxu3 %v5055_v37 }
0x117c   : > { %4553 = vmatpush.msra.mxu0 %v5074_v38  ;;  %4519 = vmatpush.msra.mxu3 %v5054_v31 }
0x117e   : > { %4554 = vmatpush.msra.mxu0 %v5073_v17  ;;  %4520 = vmatpush.msra.mxu3 %v5053_v59 }
0x1180   : > { %4555 = vmatpush.msra.mxu0 %v5072_v42  ;;  %4521 = vmatpush.msra.mxu3 %v5052_v23 }
0x1182   : > { %4556 = vmatpush.msra.mxu0 %v5071_v52  ;;  %4522 = vmatpush.msra.mxu3 %v5051_v44 }
0x1184   : > { %4557 = vmatpush.msra.mxu0 %v5070_v43  ;;  %4523 = vmatpush.msra.mxu3 %v5050_v14 }
0x1186   : > { %4558 = vmatpush.msra.mxu0 %v5069_v9  ;;  %4524 = vmatpush.msra.mxu3 %v5049_v46 }
0x1188   : > { %4559 = vmatpush.msra.mxu0 %v5068_v22 }
0x118a   : > { %4560 = vmatpush.msra.mxu0 %v5067_v12 }
0x118c   : > { %4561 = vmatpush.msra.mxu0 %v5066_v18 }
0x118e   : > { %4562 = vmatpush.msra.mxu0 %v5065_v58 }
0x11be   : > { %v4118_v16 = vpop.f32.mrf.mxu1 }
0x11bf   : > { %v7542_v45 = vadd.f32 %v4118_v16, %v7533_v2 }
0x11c1   : > { %v5035_v41 = vmul.f32 -1.702, %v7542_v45 }
0x11c3   : > { %v4205_v0 = vmul.f32 1.442695, %v5035_v41 }
0x11c4   : > { %v4156_v35 = vpop.f32.mrf.mxu2 }
0x11c5   : > { %5404 = vpow2.f32 %v4205_v0  ;;  %v7566_v30 = vadd.f32 %v4156_v35, %v7551_v39 }
0x11c6   : > { %v4121_v32 = vpop.f32.mrf.mxu1 }
0x11c7   : > { %v5036_v47 = vmul.f32 -1.702, %v7566_v30  ;;  %v7576_v10 = vadd.f32 %v4121_v32, %v7533_v2 }
0x11c9   : > { %v4207_v13 = vmul.f32 1.442695, %v5036_v47  ;;  %v5037_v53 = vmul.f32 -1.702, %v7576_v10 }
0x11cb   : > { %v5405_v26 = vpop.eup %5404  ;;  %5406 = vpow2.f32 %v4207_v13  ;;  %v4209_v3 = vmul.f32 1.442695, %v5037_v53 }
0x11cc   : > { %v4233_v55 = vadd.f32 1.0, %v5405_v26  ;;  %v4159_v6 = vpop.f32.mrf.mxu2 }
0x11cd   : > { %5408 = vpow2.f32 %v4209_v3  ;;  %v7592_v1 = vadd.f32 %v4159_v6, %v7551_v39 }
0x11ce   : > { %5410 = vrcp.f32 %v4233_v55  ;;  %v4124_v54 = vpop.f32.mrf.mxu1  ;;  %v4256_v33 = vand.u32 2147483647, %v4233_v55  ;;  %v4258_v5 = vand.u32 2147483648, %v4233_v55  ;;  %vm4252_vm9 = vweird.f32 %v4233_v55 }
0x11cf   : > { %v5038_v11 = vmul.f32 -1.702, %v7592_v1  ;;  %v7599_v8 = vadd.f32 %v4124_v54, %v7533_v2 }
0x11d0   : > { %vm7615_vm11 = vcmp.eq.f32.partialorder %v4256_v33, 8.507059e+37  ;;  %v4259_v23 = vor.u32 1.1754944e-38, %v4258_v5 }
0x11d1   : > { %v5407_v63 = vpop.eup %5406  ;;  %v4211_v57 = vmul.f32 1.442695, %v5038_v11  ;;  %v5039_v21 = vmul.f32 -1.702, %v7599_v8 }
0x11d2   : > { %v7602_v40 = vadd.f32 1.0, %v5407_v63 }
0x11d3   : > { %v5409_v4 = vpop.eup %5408  ;;  %5412 = vpow2.f32 %v4211_v57  ;;  %v4213_v61 = vmul.f32 1.442695, %v5039_v21 }
0x11d4   : > { %v5411_v48 = vpop.eup %5410  ;;  %5414 = vrcp.f32 %v7602_v40  ;;  %v4162_v27 = vpop.f32.mrf.mxu2  ;;  %v7605_v60 = vadd.f32 1.0, %v5409_v4  ;;  %v4271_v31 = vand.u32 2147483647, %v7602_v40  ;;  %v4273_v17 = vand.u32 2147483648, %v7602_v40 }
0x11d5   : > { %v4248_v49 = vmul.f32 %v5411_v48, %v4233_v55  ;;  %5416 = vpow2.f32 %v4213_v61  ;;  %v7608_v50 = vadd.f32 %v4162_v27, %v7551_v39  ;;  %vm4253_vm10 = vweird.f32 %v5411_v48 }
0x11d6   : > { %v4127_v56 = vpop.f32.mrf.mxu1  ;;  %5418 = vrcp.f32 %v7605_v60  ;;  %vm4267_vm12 = vweird.f32 %v7602_v40  ;;  %vm4254_vm13 = vmor %vm4252_vm9, %vm4253_vm10  ;;  %v4286_v0 = vand.u32 2147483647, %v7605_v60  ;;  %v4288_v44 = vand.u32 2147483648, %v7605_v60 }
0x11d7   : > { %v4249_v51 = vsub.f32 1.0, %v4248_v49  ;;  %v5040_v28 = vmul.f32 -1.702, %v7608_v50  ;;  %v7613_v29 = vadd.f32 %v4127_v56, %v7533_v2  ;;  %vm7633_vm14 = vcmp.eq.f32.partialorder %v4271_v31, 8.507059e+37 }
0x11d8   : > { %v4274_v13 = vor.u32 1.1754944e-38, %v4273_v17  ;;  %vm4282_vm4 = vweird.f32 %v7605_v60  ;;  %vm7641_vm5 = vcmp.eq.f32.partialorder %v4286_v0, 8.507059e+37  ;;  %v4289_v6 = vor.u32 1.1754944e-38, %v4288_v44 }
0x11d9   : > { %v5413_v15 = vpop.eup %5412  ;;  %v4250_v37 = vmul.f32 %v5411_v48, %v4249_v51  ;;  %v4215_v59 = vmul.f32 1.442695, %v5040_v28  ;;  %v5041_v43 = vmul.f32 -1.702, %v7613_v29 }
0x11da   : > { %v5415_v36 = vpop.eup %5414  ;;  %v7621_v16 = vadd.f32 1.0, %v5413_v15 }
0x11db   : > { %v5417_v42 = vpop.eup %5416  ;;  %v4251_v41 = vadd.f32 %v5411_v48, %v4250_v37  ;;  %v4263_v52 = vmul.f32 %v5415_v36, %v7602_v40  ;;  %vm4268_vm15 = vweird.f32 %v5415_v36  ;;  %v4217_v54 = vmul.f32 1.442695, %v5041_v43 }
0x11dc   : > { %5420 = vrcp.f32 %v7621_v16  ;;  %v4165_v35 = vpop.f32.mrf.mxu2  ;;  %v5419_v14 = vpop.eup %5418  ;;  %v7629_v47 = vadd.f32 1.0, %v5417_v42  ;;  %vm4269_vm6 = vmor %vm4267_vm12, %vm4268_vm15  ;;  %vm4297_vm0 = vweird.f32 %v7621_v16  ;;  %v4301_v21 = vand.u32 2147483647, %v7621_v16 }
0x11dd   : > { %v4255_v9 = vsel %vm4254_vm13, %v5411_v48, %v4251_v41  ;;  %v4264_v32 = vsub.f32 1.0, %v4263_v52  ;;  %5422 = vpow2.f32 %v4215_v59  ;;  %v4278_v53 = vmul.f32 %v5419_v14, %v7605_v60 }
0x11de   : > { %v4260_v46 = vsel %vm7615_vm11, %v4259_v23, %v4255_v9  ;;  %v4130_v12 = vpop.f32.mrf.mxu1  ;;  %5424 = vrcp.f32 %v7629_v47  ;;  %v7646_v11 = vadd.f32 %v4165_v35, %v7551_v39  ;;  %vm4283_vm7 = vweird.f32 %v5419_v14 }
0x11df   : > { %v4457_v26 = vmul.f32 %v4260_v46, %v7542_v45  ;;  %v4265_v3 = vmul.f32 %v5415_v36, %v4264_v32  ;;  %v4279_v18 = vsub.f32 1.0, %v4278_v53  ;;  %v7649_v63 = vadd.f32 %v4130_v12, %v7533_v2  ;;  %vm4284_vm3 = vmor %vm4282_vm4, %vm4283_vm7 }
0x11e0   : > { %v4303_v27 = vand.u32 2147483648, %v7621_v16  ;;  %5426 = vpow2.f32 %v4217_v54  ;;  %v5042_v40 = vmul.f32 -1.702, %v7646_v11  ;;  %vm7670_vm8 = vcmp.eq.f32.partialorder %v4301_v21, 8.507059e+37 }
0x11e1   : > { %v4266_v58 = vadd.f32 %v5415_v36, %v4265_v3  ;;  %4525 = vmatmul.f32.vlgmr.msra.gmra.mxu3 %v4457_v26  ;;  %v4280_v57 = vmul.f32 %v5419_v14, %v4279_v18  ;;  %v5043_v37 = vmul.f32 -1.702, %v7649_v63  ;;  %v4316_v52 = vand.u32 2147483647, %v7629_v47 }
0x11e2   : > { %v5421_v45 = vpop.eup %5420  ;;  %v4304_v42 = vor.u32 1.1754944e-38, %v4303_v27  ;;  %v4219_v0 = vmul.f32 1.442695, %v5042_v40  ;;  %v4318_v35 = vand.u32 2147483648, %v7629_v47  ;;  %vm4312_vm12 = vweird.f32 %v7629_v47 }
0x11e3   : > { %v5423_v4 = vpop.eup %5422  ;;  %v4270_v61 = vsel %vm4269_vm6, %v5415_v36, %v4266_v58  ;;  %v4293_v48 = vmul.f32 %v5421_v45, %v7621_v16  ;;  %v4281_v33 = vadd.f32 %v5419_v14, %v4280_v57  ;;  %vm4298_vm9 = vweird.f32 %v5421_v45 }
0x11e4   : > { %v4275_v49 = vsel %vm7633_vm14, %v4274_v13, %v4270_v61  ;;  %v7659_v56 = vadd.f32 1.0, %v5423_v4  ;;  %v4168_v51 = vpop.f32.mrf.mxu2  ;;  %v5425_v5 = vpop.eup %5424  ;;  %vm4299_vm10 = vmor %vm4297_vm0, %vm4298_vm9  ;;  %v4319_v3 = vor.u32 1.1754944e-38, %v4318_v35  ;;  %vm4317_vm14 = vcmp.eq.f32.partialorder %v4316_v52, 8.507059e+37 }
0x11e5   : > { %v4458_v28 = vmul.f32 %v4275_v49, %v7566_v30  ;;  %v4294_v15 = vsub.f32 1.0, %v4293_v48  ;;  %v7668_v38 = vadd.f32 %v4168_v51, %v7551_v39  ;;  %v4285_v36 = vsel %vm4284_vm3, %v5419_v14, %v4281_v33 }
0x11e6   : > { %v4308_v17 = vmul.f32 %v5425_v5, %v7629_v47  ;;  %5428 = vrcp.f32 %v7659_v56  ;;  %v4133_v30 = vpop.f32.mrf.mxu1  ;;  %v4290_v60 = vsel %vm7641_vm5, %v4289_v6, %v4285_v36  ;;  %v5427_v44 = vpop.eup %5426  ;;  %v4221_v14 = vmul.f32 1.442695, %v5043_v37 }
0x11e7   : > { %v4295_v59 = vmul.f32 %v5421_v45, %v4294_v15  ;;  %4563 = vmatmul.f32.vlgmr.msra.gmra.mxu0 %v4458_v28  ;;  %v4459_v41 = vmul.f32 %v4290_v60, %v7576_v10  ;;  %v5044_v9 = vmul.f32 -1.702, %v7668_v38  ;;  %vm4313_vm11 = vweird.f32 %v5425_v5 }
0x11e8   : > { %v4309_v23 = vsub.f32 1.0, %v4308_v17  ;;  %v7684_v46 = vadd.f32 1.0, %v5427_v44  ;;  %5430 = vpow2.f32 %v4219_v0  ;;  %v7687_v13 = vadd.f32 %v4133_v30, %v7533_v2  ;;  %vm4314_vm13 = vmor %vm4312_vm12, %vm4313_vm11 }
0x11e9   : > { %v4296_v43 = vadd.f32 %v5421_v45, %v4295_v59  ;;  %4528 = vmatmul.f32.gmra.mxu3 %v4459_v41  ;;  %5432 = vpow2.f32 %v4221_v14  ;;  %v4223_v22 = vmul.f32 1.442695, %v5044_v9  ;;  %v4333_v4 = vand.u32 2147483648, %v7659_v56 }
0x11ea   : > { %v4310_v32 = vmul.f32 %v5425_v5, %v4309_v23  ;;  %5434 = vrcp.f32 %v7684_v46  ;;  %v5045_v58 = vmul.f32 -1.702, %v7687_v13  ;;  %v4331_v27 = vand.u32 2147483647, %v7659_v56 }
0x11eb   : > { %v4300_v10 = vsel %vm4299_vm10, %v5421_v45, %v4296_v43  ;;  %5436 = vpow2.f32 %v4223_v22  ;;  %vm4327_vm4 = vweird.f32 %v7659_v56  ;;  %v4334_v37 = vor.u32 1.1754944e-38, %v4333_v4 }
0x11ec   : > { %v5429_v53 = vpop.eup %5428  ;;  %v4305_v12 = vsel %vm7670_vm8, %v4304_v42, %v4300_v10  ;;  %v4311_v26 = vadd.f32 %v5425_v5, %v4310_v32  ;;  %v4171_v55 = vpop.f32.mrf.mxu2  ;;  %v4346_v36 = vand.u32 2147483647, %v7684_v46  ;;  %vm4332_vm6 = vcmp.eq.f32.partialorder %v4331_v27, 8.507059e+37 }
0x11ed   : > { %v4460_v16 = vmul.f32 %v4305_v12, %v7592_v1  ;;  %v4323_v18 = vmul.f32 %v5429_v53, %v7659_v56  ;;  %v4225_v1 = vmul.f32 1.442695, %v5045_v58  ;;  %vm4328_vm15 = vweird.f32 %v5429_v53 }
0x11ee   : > { %v4315_v6 = vsel %vm4314_vm13, %v5425_v5, %v4311_v26  ;;  %v4136_v57 = vpop.f32.mrf.mxu1  ;;  %v5431_v21 = vpop.eup %5430  ;;  %v7704_v51 = vadd.f32 %v4171_v55, %v7551_v39  ;;  %vm4329_vm5 = vmor %vm4327_vm4, %vm4328_vm15  ;;  %vm4342_vm0 = vweird.f32 %v7684_v46  ;;  %vm7721_vm3 = vcmp.eq.f32.partialorder %v4346_v36, 8.507059e+37 }
0x11ef   : > { %v4320_v54 = vsel %vm4317_vm14, %v4319_v3, %v4315_v6  ;;  %v4324_v45 = vsub.f32 1.0, %v4323_v18  ;;  %4566 = vmatmul.f32.gmra.mxu0 %v4460_v16  ;;  %v5433_v61 = vpop.eup %5432  ;;  %v7699_v49 = vadd.f32 1.0, %v5431_v21  ;;  %5438 = vpow2.f32 %v4225_v1 }
0x11f0   : > { %v4461_v47 = vmul.f32 %v4320_v54, %v7599_v8  ;;  %v5435_v33 = vpop.eup %5434  ;;  %v7701_v40 = vadd.f32 1.0, %v5433_v61  ;;  %v7707_v5 = vadd.f32 %v4136_v57, %v7533_v2  ;;  %v4348_v2 = vand.u32 2147483648, %v7684_v46 }
0x11f1   : > { %v4325_v48 = vmul.f32 %v5429_v53, %v4324_v45  ;;  %v4338_v28 = vmul.f32 %v5435_v33, %v7684_v46  ;;  %5440 = vrcp.f32 %v7699_v49  ;;  %v5437_v15 = vpop.eup %5436  ;;  %v5046_v60 = vmul.f32 -1.702, %v7704_v51 }
0x11f2   : > { %4531 = vmatmul.f32.gmra.mxu3 %v4461_v47  ;;  %5442 = vrcp.f32 %v7701_v40  ;;  %v5047_v56 = vmul.f32 -1.702, %v7707_v5  ;;  %vm4343_vm7 = vweird.f32 %v5435_v33  ;;  %v7718_v41 = vadd.f32 1.0, %v5437_v15 }
0x11f3   : > { %v4326_v8 = vadd.f32 %v5429_v53, %v4325_v48  ;;  %v4339_v17 = vsub.f32 1.0, %v4338_v28  ;;  %v4349_v35 = vor.u32 1.1754944e-38, %v4348_v2  ;;  %vm4357_vm8 = vweird.f32 %v7699_v49  ;;  %vm4344_vm9 = vmor %vm4342_vm0, %vm4343_vm7 }
0x11f4   : > { %v4174_v23 = vpop.f32.mrf.mxu2  ;;  %5444 = vrcp.f32 %v7718_v41  ;;  %v4227_v32 = vmul.f32 1.442695, %v5046_v60  ;;  %v4361_v22 = vand.u32 2147483647, %v7699_v49  ;;  %v4229_v12 = vmul.f32 1.442695, %v5047_v56 }
0x11f5   : > { %v4330_v31 = vsel %vm4329_vm5, %v5429_v53, %v4326_v8  ;;  %v4340_v42 = vmul.f32 %v5435_v33, %v4339_v17  ;;  %v5439_v52 = vpop.eup %5438  ;;  %v7731_v46 = vadd.f32 %v4174_v23, %v7551_v39  ;;  %v4363_v3 = vand.u32 2147483648, %v7699_v49 }
0x11f6   : > { %v4335_v30 = vsel %vm4332_vm6, %v4334_v37, %v4330_v31  ;;  %v7728_v9 = vadd.f32 1.0, %v5439_v52  ;;  %v4376_v39 = vand.u32 2147483647, %v7701_v40  ;;  %v4378_v6 = vand.u32 2147483648, %v7701_v40 }
0x11f7   : > { %v4462_v59 = vmul.f32 %v4335_v30, %v7608_v50  ;;  %v5441_v44 = vpop.eup %5440  ;;  %v4341_v43 = vadd.f32 %v5435_v33, %v4340_v42  ;;  %v5048_v54 = vmul.f32 -1.702, %v7731_v46  ;;  %vm4372_vm11 = vweird.f32 %v7701_v40 }
0x11f8   : > { %v5443_v50 = vpop.eup %5442  ;;  %v4353_v14 = vmul.f32 %v5441_v44, %v7699_v49  ;;  %5446 = vrcp.f32 %v7728_v9  ;;  %vm4358_vm10 = vweird.f32 %v5441_v44  ;;  %vm4362_vm13 = vcmp.eq.f32.partialorder %v4361_v22, 8.507059e+37 }
0x11f9   : > { %4569 = vmatmul.f32.gmra.mxu0 %v4462_v59  ;;  %v4345_v10 = vsel %vm4344_vm9, %v5435_v33, %v4341_v43  ;;  %v4368_v53 = vmul.f32 %v5443_v50, %v7701_v40  ;;  %5448 = vpow2.f32 %v4227_v32  ;;  %vm4373_vm12 = vweird.f32 %v5443_v50  ;;  %vm4359_vm14 = vmor %vm4357_vm8, %vm4358_vm10 }
0x11fa   : > { %v4350_v26 = vsel %vm7721_vm3, %v4349_v35, %v4345_v10  ;;  %v4354_v16 = vsub.f32 1.0, %v4353_v14  ;;  %v5445_v45 = vpop.eup %5444  ;;  %5450 = vpow2.f32 %v4229_v12  ;;  %vm4377_vm15 = vcmp.eq.f32.partialorder %v4376_v39, 8.507059e+37  ;;  %vm4374_vm4 = vmor %vm4372_vm11, %vm4373_vm12 }
0x11fb   : > { %v4463_v18 = vmul.f32 %v4350_v26, %v7613_v29  ;;  %v4369_v55 = vsub.f32 1.0, %v4368_v53  ;;  %v4364_v29 = vor.u32 1.1754944e-38, %v4363_v3  ;;  %v4383_v47 = vmul.f32 %v5445_v45, %v7718_v41 }
0x11fc   : > { %v4355_v58 = vmul.f32 %v5441_v44, %v4354_v16  ;;  %v4379_v1 = vor.u32 1.1754944e-38, %v4378_v6  ;;  %v4231_v61 = vmul.f32 1.442695, %v5048_v54  ;;  %v4391_v8 = vand.u32 2147483647, %v7718_v41 }
0x11fd   : > { %v4370_v57 = vmul.f32 %v5443_v50, %v4369_v55  ;;  %4534 = vmatmul.f32.gmra.mxu3 %v4463_v18  ;;  %v4384_v33 = vsub.f32 1.0, %v4383_v47  ;;  %v4393_v28 = vand.u32 2147483648, %v7718_v41  ;;  %vm4388_vm5 = vweird.f32 %v5445_v45 }
0x11fe   : > { %v4356_v21 = vadd.f32 %v5441_v44, %v4355_v58  ;;  %v5447_v48 = vpop.eup %5446  ;;  %5452 = vpow2.f32 %v4231_v61  ;;  %vm4387_vm6 = vweird.f32 %v7718_v41  ;;  %v4408_v23 = vand.u32 2147483648, %v7728_v9 }
0x11ff   : > { %v4371_v4 = vadd.f32 %v5443_v50, %v4370_v57  ;;  %v4398_v49 = vmul.f32 %v5447_v48, %v7728_v9  ;;  %v5449_v36 = vpop.eup %5448  ;;  %v4385_v2 = vmul.f32 %v5445_v45, %v4384_v33  ;;  %v4394_v42 = vor.u32 1.1754944e-38, %v4393_v28  ;;  %vm4389_vm7 = vmor %vm4387_vm6, %vm4388_vm5 }
0x1200   : > { %v4360_v27 = vsel %vm4359_vm14, %v5441_v44, %v4356_v21  ;;  %v5451_v30 = vpop.eup %5450  ;;  %v4244_v56 = vadd.f32 1.0, %v5449_v36  ;;  %vm4403_vm0 = vweird.f32 %v5447_v48  ;;  %vm4392_vm3 = vcmp.eq.f32.partialorder %v4391_v8, 8.507059e+37 }
0x1201   : > { %v4365_v15 = vsel %vm4362_vm13, %v4364_v29, %v4360_v27  ;;  %v4375_v37 = vsel %vm4374_vm4, %v5443_v50, %v4371_v4  ;;  %v4399_v60 = vsub.f32 1.0, %v4398_v49  ;;  %v4386_v59 = vadd.f32 %v5445_v45, %v4385_v2 }
0x1202   : > { %v4464_v31 = vmul.f32 %v4365_v15, %v7646_v11  ;;  %v4380_v17 = vsel %vm4377_vm15, %v4379_v1, %v4375_v37  ;;  %v4245_v52 = vadd.f32 1.0, %v5451_v30  ;;  %v4406_v11 = vand.u32 2147483647, %v7728_v9 }
0x1203   : > { %v4465_v40 = vmul.f32 %v4380_v17, %v7649_v63  ;;  %v4400_v0 = vmul.f32 %v5447_v48, %v4399_v60  ;;  %5454 = vrcp.f32 %v4244_v56  ;;  %v4390_v44 = vsel %vm4389_vm7, %v5445_v45, %v4386_v59 }
0x1204   : > { %4572 = vmatmul.f32.gmra.mxu0 %v4464_v31  ;;  %5456 = vrcp.f32 %v4245_v52  ;;  %v4395_v63 = vsel %vm4392_vm3, %v4394_v42, %v4390_v44  ;;  %vm4402_vm8 = vweird.f32 %v7728_v9  ;;  %v5453_v43 = vpop.eup %5452  ;;  %v4409_v50 = vor.u32 1.1754944e-38, %v4408_v23 }
0x1205   : > { %4537 = vmatmul.f32.gmra.mxu3 %v4465_v40  ;;  %v4401_v41 = vadd.f32 %v5447_v48, %v4400_v0  ;;  %v4466_v35 = vmul.f32 %v4395_v63, %v7668_v38  ;;  %vm4404_vm9 = vmor %vm4402_vm8, %vm4403_vm0  ;;  %vm4407_vm10 = vcmp.eq.f32.partialorder %v4406_v11, 8.507059e+37  ;;  %v4246_v32 = vadd.f32 1.0, %v5453_v43 }
0x1206   : > { %v4421_v9 = vand.u32 2147483647, %v4244_v56  ;;  %v4423_v18 = vand.u32 2147483648, %v4244_v56  ;;  %v4436_v39 = vand.u32 2147483647, %v4245_v52  ;;  %v4438_v6 = vand.u32 2147483648, %v4245_v52 }
0x1207   : > { %v4405_v14 = vsel %vm4404_vm9, %v5447_v48, %v4401_v41  ;;  %5458 = vrcp.f32 %v4246_v32  ;;  %vm4417_vm13 = vweird.f32 %v4244_v56  ;;  %vm4432_vm4 = vweird.f32 %v4245_v52 }
0x1208   : > { %v4410_v10 = vsel %vm4407_vm10, %v4409_v50, %v4405_v14  ;;  %vm4422_vm15 = vcmp.eq.f32.partialorder %v4421_v9, 8.507059e+37  ;;  %v4424_v57 = vor.u32 1.1754944e-38, %v4423_v18  ;;  %vm4437_vm6 = vcmp.eq.f32.partialorder %v4436_v39, 8.507059e+37 }
0x1209   : > { %v5455_v22 = vpop.eup %5454  ;;  %v4467_v53 = vmul.f32 %v4410_v10, %v7687_v13  ;;  %v4439_v47 = vor.u32 1.1754944e-38, %v4438_v6  ;;  %v4451_v48 = vand.u32 2147483647, %v4246_v32  ;;  %v4453_v27 = vand.u32 2147483648, %v4246_v32 }
0x120a   : > { %v5457_v12 = vpop.eup %5456  ;;  %v4413_v26 = vmul.f32 %v5455_v22, %v4244_v56  ;;  %vm4418_vm11 = vweird.f32 %v5455_v22  ;;  %vm4447_vm0 = vweird.f32 %v4246_v32 }
0x120b   : > { %v4428_v16 = vmul.f32 %v5457_v12, %v4245_v52  ;;  %vm4433_vm12 = vweird.f32 %v5457_v12  ;;  %vm4419_vm14 = vmor %vm4417_vm13, %vm4418_vm11  ;;  %v4454_v49 = vor.u32 1.1754944e-38, %v4453_v27  ;;  %vm4452_vm8 = vcmp.eq.f32.partialorder %v4451_v48, 8.507059e+37 }
0x120c   : > { %4575 = vmatmul.f32.gmra.mxu0 %v4466_v35  ;;  %v4414_v3 = vsub.f32 1.0, %v4413_v26  ;;  %vm4434_vm5 = vmor %vm4432_vm4, %vm4433_vm12 }
0x120d   : > { %4540 = vmatmul.f32.gmra.mxu3 %v4467_v53  ;;  %v4429_v55 = vsub.f32 1.0, %v4428_v16  ;;  %v5459_v58 = vpop.eup %5458 }
0x120e   : > { %v4415_v38 = vmul.f32 %v5455_v22, %v4414_v3  ;;  %v4443_v13 = vmul.f32 %v5459_v58, %v4246_v32  ;;  %vm4448_vm7 = vweird.f32 %v5459_v58 }
0x120f   : > { %v4430_v54 = vmul.f32 %v5457_v12, %v4429_v55  ;;  %vm4449_vm3 = vmor %vm4447_vm0, %vm4448_vm7 }
0x1210   : > { %v4416_v45 = vadd.f32 %v5455_v22, %v4415_v38  ;;  %v4444_v4 = vsub.f32 1.0, %v4443_v13 }
0x1211   : > { %v4431_v21 = vadd.f32 %v5457_v12, %v4430_v54 }
0x1212   : > { %v4420_v29 = vsel %vm4419_vm14, %v5455_v22, %v4416_v45  ;;  %v4445_v28 = vmul.f32 %v5459_v58, %v4444_v4 }
0x1213   : > { %v4425_v1 = vsel %vm4422_vm15, %v4424_v57, %v4420_v29  ;;  %v4435_v61 = vsel %vm4434_vm5, %v5457_v12, %v4431_v21 }
0x1214   : > { %v4468_v33 = vmul.f32 %v4425_v1, %v7704_v51  ;;  %v4440_v8 = vsel %vm4437_vm6, %v4439_v47, %v4435_v61  ;;  %v4446_v37 = vadd.f32 %v5459_v58, %v4445_v28  ;;  %v5163_v51 = vld [vmem:[%s7818_s20 + $0x1] ss:$0 sm:$0xff] }
0x1215   : > { %v4469_v15 = vmul.f32 %v4440_v8, %v7707_v5 }
0x1216   : > { %4578 = vmatmul.f32.gmra.mxu0 %v4468_v33  ;;  %v4450_v36 = vsel %vm4449_vm3, %v5459_v58, %v4446_v37 }
0x1217   : > { %4543 = vmatmul.f32.gmra.mxu3 %v4469_v15  ;;  %v4455_v31 = vsel %vm4452_vm8, %v4454_v49, %v4450_v36 }
0x1218   : > { %v4470_v17 = vmul.f32 %v4455_v31, %v7731_v46 }
0x121e   : > { %4581 = vmatmul.f32.gmra.mxu0 %v4470_v17 }
0x1264   : > { %v4526_v2 = vpop.f32.mrf.mxu3  ;;  %v4564_v30 = vpop.f32.mrf.mxu0 }
0x1265   : > { %v4527_v5 = vadd.f32 %v5163_v51, %v4526_v2 }
0x1267   : > { %v4565_v40 = vadd.f32 %v4564_v30, %v4527_v5 }
0x1269   : > { %v4585_v46 = vadd.f32 %v4565_v40, %v7344_v25 }
0x126b   : > { %4592 = vst.msk [vmem:[%s7772_s5] sm:$0xff] %vm773_vm1, %v4585_v46 }
0x126c   : > { %v4529_v60 = vpop.f32.mrf.mxu3  ;;  %v4567_v56 = vpop.f32.mrf.mxu0 }
0x126d   : > { %v4530_v59 = vadd.f32 %v5163_v51, %v4529_v60 }
0x126f   : > { %v4568_v42 = vadd.f32 %v4567_v56, %v4530_v59 }
0x1271   : > { %v4586_v23 = vadd.f32 %v4568_v42, %v7349_v20 }
0x1273   : > { %4593 = vst.msk [vmem:[%s7772_s5 + $0x8] sm:$0xff] %vm773_vm1, %v4586_v23 }
0x1275   : > { %v4532_v52 = vpop.f32.mrf.mxu3 }
0x1276   : > { %v4533_v0 = vadd.f32 %v5163_v51, %v4532_v52  ;;  %v4570_v11 = vpop.f32.mrf.mxu0 }
0x1278   : > { %v4571_v44 = vadd.f32 %v4570_v11, %v4533_v0 }
0x127a   : > { %v4587_v63 = vadd.f32 %v4571_v44, %v7354_v19 }
0x127c   : > { %4594 = vst.msk [vmem:[%s7772_s5 + $0x10] sm:$0xff] %vm773_vm1, %v4587_v63 }
0x1280   : > { %v4535_v25 = vpop.f32.mrf.mxu3 }
0x1281   : > { %v4536_v41 = vadd.f32 %v5163_v51, %v4535_v25  ;;  %v4573_v43 = vpop.f32.mrf.mxu0 }
0x1283   : > { %v4574_v35 = vadd.f32 %v4573_v43, %v4536_v41 }
0x1285   : > { %v4588_v50 = vadd.f32 %v4574_v35, %v7359_v34 }
0x1287   : > { %4595 = vst.msk [vmem:[%s7772_s5 + $0x18] sm:$0xff] %vm773_vm1, %v4588_v50 }
0x1288   : > { %v4538_v20 = vpop.f32.mrf.mxu3 }
0x1289   : > { %v4539_v14 = vadd.f32 %v5163_v51, %v4538_v20  ;;  %v4576_v32 = vpop.f32.mrf.mxu0 }
0x128b   : > { %v4577_v10 = vadd.f32 %v4576_v32, %v4539_v14 }
0x128d   : > { %v4589_v22 = vadd.f32 %v4577_v10, %v7364_v7 }
0x128f   : > { %4596 = vst.msk [vmem:[%s7772_s5 + $0x20] sm:$0xff] %vm773_vm1, %v4589_v22 }
0x1290   : > { %v4541_v19 = vpop.f32.mrf.mxu3 }
0x1291   : > { %v4542_v53 = vadd.f32 %v5163_v51, %v4541_v19 }
0x1293   : > { %v4579_v12 = vpop.f32.mrf.mxu0 }
0x1294   : > { %v4580_v26 = vadd.f32 %v4579_v12, %v4542_v53 }
0x1296   : > { %v4590_v16 = vadd.f32 %v4580_v26, %v7369_v24 }
0x1298   : > { %4597 = vst.msk [vmem:[%s7772_s5 + $0x28] sm:$0xff] %vm773_vm1, %v4590_v16 }
0x129a   : > { %v4544_v34 = vpop.f32.mrf.mxu3 }
0x129b   : > { %v4545_v3 = vadd.f32 %v5163_v51, %v4544_v34  ;;  %v4582_v9 = vpop.f32.mrf.mxu0 }
0x129d   : > { %v4583_v18 = vadd.f32 %v4582_v9, %v4545_v3 }
0x129f   : > { %v4591_v55 = vadd.f32 %v4583_v18, %v7374_v62 }
0x12a1   : > { %4598 = vst.msk [vmem:[%s7772_s5 + $0x30] sm:$0x3] %vm792_vm2, %v4591_v55 }
0x12a2 PF: > { %s33_s2 = sadd.s32 1, %s5534_s2  }
0x12a3   : > { %p30_p7 = scmp.ge.s32.totalorder %s33_s2, 4  }
0x12a5   :  { %32 = sbr.rel (!%p30_p7) target bundleno = 9 (0x9), region = 173 }
0x12aa   :  { %4620 = vsyncpa [#allocation3], 1 }
0x12ab   :  { %4622 = vsyncpa [#allocation3 + $0x1], 1 }
0x12ac   :  { %4623 = vsyncpa [#allocation5], 1 }

// kernel: _lambda_.3
= control target key start
LH: loop header
LB: loop body
LE: loop exit
PB: predicated region body
PF: predicated region fallthrough
CT: control target
= control target key end

     0   :  { %s11247_s0 = inlined_call_operand.vmem [shape: f32[2,50,64], index: 0, kind: input, shape index: {}]   ;;  %s11248_s1 = inlined_call_operand.vmem [shape: f32[9,49,50], index: 1, kind: input, shape index: {}]   ;;  %s11249_s2 = inlined_call_operand.vmem [shape: f32[9,64,32], index: 2, kind: input, shape index: {}]   ;;  %s11250_s3 = inlined_call_operand.vmem [shape: f32[1,32], index: 3, kind: input, shape index: {}]   ;;  %s11251_s4 = inlined_call_operand.hbm [shape: f32[32,16], index: 4, kind: input, shape index: {}]   ;;  %s11252_s5 = inlined_call_operand.vmem [shape: f32[1,16], index: 5, kind: input, shape index: {}, may-alias: {5,8}]   ;;  %s11253_s6 = inlined_call_operand.vmem [shape: f32[9,196,50], index: 6, kind: input, shape index: {}]   ;;  %s11254_s7 = inlined_call_operand.vmem [shape: f32[9,64,16], index: 7, kind: input, shape index: {}]   ;;  %s11255_s8 = inlined_call_operand.vmem [shape: f32[1,16], index: 8, kind: input, shape index: {}, may-alias: {5,8}]   ;;  %s11256_s9 = inlined_call_operand.vmem [shape: f32[16,12], index: 9, kind: input, shape index: {}]   ;;  %s11257_s10 = inlined_call_operand.vmem [shape: f32[1,12], index: 10, kind: input, shape index: {}]   ;;  %s11258_s11 = inlined_call_operand.hbm [shape: f32[16,12], index: 11, kind: input, shape index: {}]   ;;  %s11259_s12 = inlined_call_operand.vmem [shape: f32[1,12], index: 12, kind: input, shape index: {}, may-alias: {12,15,19}]   ;;  %s11260_s13 = inlined_call_operand.hbm [shape: f32[12,12], index: 13, kind: input, shape index: {}]   ;;  %s11261_s14 = inlined_call_operand.hbm [shape: f32[12,12], index: 14, kind: input, shape index: {}]   ;;  %s11262_s15 = inlined_call_operand.vmem [shape: f32[1,12], index: 15, kind: input, shape index: {}, may-alias: {12,15,19}]   ;;  %s11263_s16 = inlined_call_operand.hbm [shape: f32[12,32], index: 16, kind: input, shape index: {}]   ;;  %s11264_s17 = inlined_call_operand.hbm [shape: f32[12,32], index: 17, kind: input, shape index: {}]   ;;  %s11265_s18 = inlined_call_operand.hbm [shape: f32[32,12], index: 18, kind: input, shape index: {}]   ;;  %s11266_s19 = inlined_call_operand.vmem [shape: f32[1,12], index: 19, kind: input, shape index: {}, may-alias: {12,15,19}]   ;;  %s11267_s20 = inlined_call_operand.hbm [shape: f32[12,50], index: 20, kind: input, shape index: {}]   ;;  %s11268_s21 = inlined_call_operand.vmem [shape: f32[2,49,16], index: 21, kind: output, shape index: {0}]   ;;  %s11269_s22 = inlined_call_operand.vmem [shape: f32[2,196,12], index: 22, kind: output, shape index: {1}]   ;;  %s11270_s23 = inlined_call_operand.hbm [shape: f32[2,1,50], index: 23, kind: output, shape index: {2}]  }
   0x1   :  { %11287 = sst [smem:[#allocation31_spill]] %s11247_s0 }
   0x2   :  { %11288 = sst [smem:[#allocation32_spill]] %s11248_s1 }
   0x3   :  { %11289 = sst [smem:[#allocation33_spill]] %s11249_s2 }
   0x4   :  { %11290 = sst [smem:[#allocation34_spill]] %s11250_s3 }
   0x5   :  { %11291 = sst [smem:[#allocation35_spill]] %s11251_s4 }
   0x6   :  { %11292 = sst [smem:[#allocation36_spill]] %s11252_s5 }
   0x7   :  { %11293 = sst [smem:[#allocation37_spill]] %s11253_s6 }
   0x8   :  { %11294 = sst [smem:[#allocation38_spill]] %s11254_s7 }
   0x9   :  { %11295 = sst [smem:[#allocation39_spill]] %s11258_s11 }
   0xa   :  { %11296 = sst [smem:[#allocation40_spill]] %s11261_s14 }
   0xb   :  { %11297 = sst [smem:[#allocation41_spill]] %s11266_s19 }
   0xc   :  { %11298 = sst [smem:[#allocation42_spill]] %s11270_s23 }
   0xd   :  { %29 = vsyncpa [#allocation3], 0 }
   0xe   :  { %30 = vsyncpa [#allocation6], 0 }
   0xf   :  { %31 = vsyncpa [#allocation9], 0 }
  0x10   :  { %32 = vsyncpa [#allocation12], 0 }
  0x11   :  { %33 = vsyncpa [#allocation15], 0 }
  0x12   :  { %34 = vsyncpa [#allocation4], 0 }
  0x13   :  { %36 = vsyncpa [#allocation4 + $0x1], 0  ;;  %s8175_s4 = smov 0   ;;  %s8177_s30 = smov 0  }
  0x14   :  { %s8179_s24 = smov 0   ;;  %s8181_s25 = smov 0  }
  0x15 LB: > { %11299 = sst [smem:[#allocation23_spill]] %s8029_s4  ;;  %s8196_s5 = sadd.s32 4294967295, %s8041_s25   ;;  %s8041_s25 = sphi %s8181_s25, %s11328_s25   ;;  %s8037_s24 = sphi %s8179_s24, %s11330_s24   ;;  %s8033_s30 = sphi %s8177_s30, %s11332_s30   ;;  %s8029_s4 = sphi %s8175_s4, %s11331_s4  }
  0x16   : > { %11300 = sst [smem:[#allocation24_spill]] %s8037_s24  ;;  %s6504_s1 = sadd.s32 4294967294, %s8041_s25  }
  0x17   : > { %11301 = sst [smem:[#allocation25_spill]] %s8041_s25  ;;  %s8200_s26 = sadd.s32 1, %s8041_s25  }
  0x18   : > { %11302 = sst [smem:[#allocation26_spill]] %s8200_s26  ;;  %s547_s2 = sadd.s32 1, %s8037_s24 }
  0x19   : > { %s544_s6 = ssub.s32 %s8041_s25, %s8200_s26  ;;  %p557_p0 = scmp.ne.s32.totalorder %s8037_s24, %s8033_s30 }
  0x1a   : > { %p545_p1 = scmp.eq.s32.totalorder %s544_s6, 0  ;;  %p558_p2 = scmp.eq.s32.totalorder %s8196_s5, 1 }
  0x1b   : > { %p563_p3 = scmp.ne.s32.totalorder %s8033_s30, %s8029_s4  ;;  %p564_p4 = scmp.eq.s32.totalorder %s6504_s1, 1 }
  0x1c   : > { %s8211_s27 = scalar_select %p545_p1, %s8037_s24, %s547_s2  }
  0x1d   : > { %p8213_p5 = por %p558_p2, %p557_p0  ;;  %p8217_p6 = por %p564_p4, %p563_p3 }
  0x1e   : > { %11303 = sst [smem:[#allocation27_spill]] %s8211_s27  ;;  %p6505_p7 = scmp.ge.s32.totalorder %s8041_s25, 1 }
  0x1f   : > { %s11304_s7 = scalar_select %p8213_p5, 1, 0 }
  0x20   : > { %s11306_s28 = scalar_select %p8217_p6, 1, 0 }
  0x21   : > { %11305 = sst [smem:[#allocation28_spill]] %s11304_s7  ;;  %p571_p8 = scmp.lt.s32.totalorder %s8041_s25, 3 }
  0x22   : > { %11307 = sst [smem:[#allocation29_spill]] %s11306_s28  ;;  %p7626_p9 = scmp.eq.s32.totalorder %s8196_s5, 0 }
  0x23   : > { %p8224_p10 = pnand %p6505_p7, %p571_p8  ;;  %s11309_s11 = sld [smem:[#allocation39_spill]] }
  0x24   : > { %s11310_s14 = sld [smem:[#allocation40_spill]]  ;;  %s8043_s26 = smov [#allocation5]  }
  0x25   : > { %p7597_p11 = pneg %p8224_p10  ;;  %s625_s28 = sshll.u32 %s8043_s26, 4  ;;  %s626_s28 = int_to_ptr.vmem [resolvable:$true] %s625_s28 }
  0x26   : > { %s8044_s3 = smov 128   ;;  %s8045_s0 = smov 8  }
  0x27   : > { %p8238_p12 = pnand %p7626_p9, %p7597_p11  ;;  %s8046_s2 = smov [#allocation8]  }
  0x28   : > { %s656_s6 = sshll.u32 %s8046_s2, 4  ;;  %s685_s4 = sshll.u32 %s11264_s17, 4  ;;  %s657_s6 = int_to_ptr.vmem [resolvable:$true] %s656_s6  ;;  %s686_s4 = int_to_ptr.hbm [resolvable:$true] %s685_s4 }
  0x29   : > { %s623_s1 = sshll.u32 %s11309_s11, 4  ;;  %s11312_s23 = sld [smem:[#allocation35_spill]]  ;;  %s624_s1 = int_to_ptr.hbm [resolvable:$true] %s623_s1 }
  0x2a   : > { %s654_s27 = sshll.u32 %s11310_s14, 4  ;;  %s8047_s19 = smov [#allocation11]   ;;  %s655_s27 = int_to_ptr.hbm [resolvable:$true] %s654_s27 }
  0x2b   : > { %7603 = dma.hbm_to_vmem [thread:$0]  (!%p8238_p12), %s624_s1, 256, %s626_s28, [#allocation6], %s8044_s3, %s8044_s3, %s8045_s0  }
  0x2c   : > { %7609 = dma.hbm_to_vmem [thread:$0]  (!%p8238_p12), %s655_s27, 256, %s657_s6, [#allocation9], %s8044_s3, %s8044_s3, %s8045_s0  }
  0x2d   : > { %s687_s28 = sshll.u32 %s8047_s19, 4  ;;  %s8048_s11 = smov [#allocation2]   ;;  %s688_s28 = int_to_ptr.vmem [resolvable:$true] %s687_s28 }
  0x2e   : > { %7615 = dma.hbm_to_vmem [thread:$0]  (!%p8238_p12), %s686_s4, 256, %s688_s28, [#allocation12], %s8044_s3, %s8044_s3, %s8045_s0  }
  0x2f   : > { %s591_s7 = sshll.u32 %s11312_s23, 4  ;;  %s593_s14 = sshll.u32 %s8048_s11, 4  ;;  %s592_s7 = int_to_ptr.hbm [resolvable:$true] %s591_s7  ;;  %s594_s14 = int_to_ptr.vmem [resolvable:$true] %s593_s14 }
  0x30   : > { %s640_s27 = sshll.u32 %s11260_s13, 4  ;;  %s671_s25 = sshll.u32 %s11263_s16, 4  ;;  %s641_s27 = int_to_ptr.hbm [resolvable:$true] %s640_s27  ;;  %s672_s25 = int_to_ptr.hbm [resolvable:$true] %s671_s25 }
  0x31   : > { %7600 = dma.hbm_to_vmem [thread:$0]  (!%p8238_p12), %s592_s7, 512, %s594_s14, [#allocation3], %s8044_s3, %s8044_s3, %s8045_s0  }
  0x32   : > { %s8049_s6 = smov [#allocation7]   ;;  %s8050_s26 = smov [#allocation10]  }
  0x33   : > { %s642_s4 = sshll.u32 %s8049_s6, 4  ;;  %s673_s28 = sshll.u32 %s8050_s26, 4  ;;  %s643_s4 = int_to_ptr.vmem [resolvable:$true] %s642_s4  ;;  %s674_s28 = int_to_ptr.vmem [resolvable:$true] %s673_s28 }
  0x34   : > { %7606 = dma.hbm_to_vmem [thread:$0]  (!%p8238_p12), %s641_s27, 256, %s643_s4, [#allocation6], %s8044_s3, %s8044_s3, %s8045_s0  }
  0x35   : > { %s699_s7 = sshll.u32 %s11265_s18, 4  ;;  %s716_s19 = sshll.u32 %s11267_s20, 4  ;;  %s700_s7 = int_to_ptr.hbm [resolvable:$true] %s699_s7  ;;  %s717_s19 = int_to_ptr.hbm [resolvable:$true] %s716_s19 }
  0x36   : > { %7612 = dma.hbm_to_vmem [thread:$0]  (!%p8238_p12), %s672_s25, 256, %s674_s28, [#allocation9], %s8044_s3, %s8044_s3, %s8045_s0  }
  0x37   : > { %s8051_s23 = smov [#allocation13]   ;;  %s8052_s6 = smov [#allocation14]  }
  0x38   : > { %s701_s27 = sshll.u32 %s8051_s23, 4  ;;  %s718_s4 = sshll.u32 %s8052_s6, 4  ;;  %s702_s27 = int_to_ptr.vmem [resolvable:$true] %s701_s27  ;;  %s719_s4 = int_to_ptr.vmem [resolvable:$true] %s718_s4 }
  0x39   : > { %7618 = dma.hbm_to_vmem [thread:$0]  (!%p8238_p12), %s700_s7, 512, %s702_s27, [#allocation12], %s8044_s3, %s8044_s3, %s8045_s0  }
  0x3a   : > { %7621 = dma.hbm_to_vmem [thread:$0]  (!%p8238_p12), %s717_s19, 256, %s719_s4, [#allocation15], %s8044_s3, %s8044_s3, %s8045_s0  }
  0x3b   : > { %742 = sbr.rel (%p8224_p10) target bundleno = 2828 (0xb0c), region = 104 }
  0x40   : > { %8004 = dma.done.wait (%p7626_p9), [#allocation3], 512  }
  0x41   : > { %8006 = vsyncadd (%p7626_p9), [#allocation3], 4294966784 }
  0x42   : > { %8008 = dma.done.wait (%p7626_p9), [#allocation6], 512  }
  0x43   : > { %8010 = vsyncadd (%p7626_p9), [#allocation6], 4294966784 }
  0x44   : > { %8012 = dma.done.wait (%p7626_p9), [#allocation9], 512  }
  0x45   : > { %8014 = vsyncadd (%p7626_p9), [#allocation9], 4294966784 }
  0x46   : > { %8016 = dma.done.wait (%p7626_p9), [#allocation12], 768  }
  0x47   : > { %8018 = vsyncadd (%p7626_p9), [#allocation12], 4294966528 }
  0x48   : > { %8020 = dma.done.wait (%p7626_p9), [#allocation15], 256  }
  0x49   : > { %8022 = vsyncadd (%p7626_p9), [#allocation15], 4294967040  ;;  %p851_p13 = scmp.lt.s32.totalorder %s8196_s5, 1  ;;  %vm902_vm0 = vcmask 1041408   ;;  %s11313_s25 = sld [smem:[#allocation31_spill]]  ;;  %vm880_vm1 = vcmask 408576  }
  0x4a   : > { %s11314_s1 = sld [smem:[#allocation32_spill]]  ;;  %vm1028_vm2 = vcmask 523264   ;;  %vm2167_vm3 = vcmask 261120   ;;  %vm2227_vm4 = vcmask 130048   ;;  %vm2234_vm5 = vcmask 122880  }
  0x4b   : > { %s8324_s24 = scalar_select %p851_p13, %s8196_s5, 1  ;;  %vm6038_vm7 = vcmask 90112   ;;  %vm6068_vm8 = vcmask 1043456   ;;  %vm5957_vm10 = vcmask 97280   ;;  %vm5982_vm14 = vcmask 93184  }
  0x4c   : > { %s11315_s6 = sld [smem:[#allocation33_spill]] }
  0x4d   : > { %s7561_s29 = smul.u32 56, %s8324_s24  ;;  %s11316_s23 = sld [smem:[#allocation37_spill]] }
  0x4e   : > { %s11317_s19 = sld [smem:[#allocation38_spill]] }
  0x4f   : > { %s8332_s26 = scalar_lea.vmem %s11313_s25, %s7561_s29  ;;  %s11318_s11 = sld [smem:[#allocation34_spill]] }
  0x50   : > { %v8335_v0 = vld [vmem:[%s8332_s26 + $0x30] sm:$0x3]  ;;  %v8338_v1 = vld [vmem:[%s8332_s26 + $0x28] sm:$0xff]  ;;  %v8345_v2 = vld [vmem:[%s8332_s26 + $0x20] sm:$0xff]  ;;  %s11319_s2 = sld [smem:[#allocation36_spill]] }
  0x51   : > { %6527 = vmatpush.msk.msra.mxu2 %vm902_vm0, %v8335_v0  ;;  %6542 = vmatpush.msk.msra.mxu1 %vm902_vm0, %v8335_v0  ;;  %v8352_v3 = vld [vmem:[%s8332_s26 + $0x18] sm:$0xff]  ;;  %v8358_v4 = vld [vmem:[%s8332_s26 + $0x10] sm:$0xff]  ;;  %v8364_v5 = vld [vmem:[%s8332_s26 + $0x8] sm:$0xff]  ;;  %s11322_s7 = sld [smem:[#allocation41_spill]] }
  0x52   : > { %6579 = vmatpush.msk.msra.mxu0 %vm902_vm0, %v8335_v0  ;;  %v8370_v6 = vld [vmem:[%s8332_s26] sm:$0xff]  ;;  %v6535_v8 = vld [vmem:[%s11314_s1 + $0x38] sm:$0xff]  ;;  %v6572_v9 = vld [vmem:[%s11314_s1 + $0x70] sm:$0xff]  ;;  %s11324_s27 = sld [smem:[#allocation42_spill]] }
  0x53   : > { %916 = vmatpush.msra.mxu2 %v8338_v1  ;;  %991 = vmatpush.msra.mxu1 %v8338_v1  ;;  %v873_v7 = vld [vmem:[%s11314_s1] sm:$0xff]  ;;  %v874_v10 = vld [vmem:[%s11314_s1 + $0x8] sm:$0xff]  ;;  %v6573_v12 = vld [vmem:[%s11314_s1 + $0x78] sm:$0xff] }
  0x54   : > { %1186 = vmatpush.msra.mxu0 %v8338_v1  ;;  %v6536_v11 = vld [vmem:[%s11314_s1 + $0x40] sm:$0xff]  ;;  %v875_v13 = vld [vmem:[%s11314_s1 + $0x10] sm:$0xff]  ;;  %v876_v14 = vld [vmem:[%s11314_s1 + $0x18] sm:$0xff] }
  0x55   : > { %917 = vmatpush.msra.mxu2 %v8345_v2  ;;  %992 = vmatpush.msra.mxu1 %v8345_v2  ;;  %v877_v15 = vld [vmem:[%s11314_s1 + $0x20] sm:$0xff]  ;;  %v878_v17 = vld [vmem:[%s11314_s1 + $0x28] sm:$0xff]  ;;  %v879_v19 = vld [vmem:[%s11314_s1 + $0x30] sm:$0x1] }
  0x56   : > { %1187 = vmatpush.msra.mxu0 %v8345_v2  ;;  %v6574_v16 = vld [vmem:[%s11314_s1 + $0x80] sm:$0xff]  ;;  %v6575_v18 = vld [vmem:[%s11314_s1 + $0x88] sm:$0xff]  ;;  %v6576_v20 = vld [vmem:[%s11314_s1 + $0x90] sm:$0xff] }
  0x57   : > { %918 = vmatpush.msra.mxu2 %v8352_v3  ;;  %993 = vmatpush.msra.mxu1 %v8352_v3  ;;  %v6537_v21 = vld [vmem:[%s11314_s1 + $0x48] sm:$0xff]  ;;  %v6577_v22 = vld [vmem:[%s11314_s1 + $0x98] sm:$0xff]  ;;  %v6556_v25 = vld [vmem:[%s11315_s6 + $0x70] sm:$0xff] }
  0x58   : > { %1188 = vmatpush.msra.mxu0 %v8352_v3  ;;  %v6557_v23 = vld [vmem:[%s11315_s6 + $0x78] sm:$0xff]  ;;  %v950_v26 = vld [vmem:[%s11315_s6 + $0x30] sm:$0xff]  ;;  %v6555_v27 = vld [vmem:[%s11315_s6 + $0x68] sm:$0xff] }
  0x59   : > { %919 = vmatpush.msra.mxu2 %v8358_v4  ;;  %994 = vmatpush.msra.mxu1 %v8358_v4  ;;  %v951_v24 = vld [vmem:[%s11315_s6 + $0x38] sm:$0xff]  ;;  %v949_v28 = vld [vmem:[%s11315_s6 + $0x28] sm:$0xff]  ;;  %v6554_v29 = vld [vmem:[%s11315_s6 + $0x60] sm:$0xff] }
  0x5a   : > { %1189 = vmatpush.msra.mxu0 %v8358_v4  ;;  %1117 = vmatpush.msra.mxu3 %v951_v24  ;;  %v6594_v30 = vld [vmem:[%s11315_s6 + $0xb8] sm:$0xff]  ;;  %v6538_v31 = vld [vmem:[%s11314_s1 + $0x50] sm:$0xff]  ;;  %v948_v32 = vld [vmem:[%s11315_s6 + $0x20] sm:$0xff] }
  0x5b   : > { %920 = vmatpush.msra.mxu2 %v8364_v5  ;;  %995 = vmatpush.msra.mxu1 %v8364_v5  ;;  %v6593_v33 = vld [vmem:[%s11315_s6 + $0xb0] sm:$0xff]  ;;  %v6578_v34 = vld [vmem:[%s11314_s1 + $0xa0] sm:$0x1]  ;;  %v6553_v35 = vld [vmem:[%s11315_s6 + $0x58] sm:$0xff] }
  0x5c   : > { %1190 = vmatpush.msra.mxu0 %v8364_v5  ;;  %1118 = vmatpush.msra.mxu3 %v950_v26  ;;  %v947_v36 = vld [vmem:[%s11315_s6 + $0x18] sm:$0xff]  ;;  %v6592_v37 = vld [vmem:[%s11315_s6 + $0xa8] sm:$0xff]  ;;  %v6552_v38 = vld [vmem:[%s11315_s6 + $0x50] sm:$0xff] }
  0x5d   : > { %921 = vmatpush.msra.mxu2 %v8370_v6  ;;  %996 = vmatpush.msra.mxu1 %v8370_v6  ;;  %v946_v39 = vld [vmem:[%s11315_s6 + $0x10] sm:$0xff]  ;;  %v6551_v40 = vld [vmem:[%s11315_s6 + $0x48] sm:$0xff]  ;;  %v6539_v42 = vld [vmem:[%s11314_s1 + $0x58] sm:$0xff] }
  0x5e   : > { %6528 = vmatmul.msk.f32.vlgmr.msra.gmra.mxu2 %vm880_vm1, %v873_v7  ;;  %6543 = vmatmul.msk.f32.vlgmr.msra.gmra.mxu1 %vm880_vm1, %v6535_v8  ;;  %v945_v41 = vld [vmem:[%s11315_s6 + $0x8] sm:$0xff]  ;;  %v6540_v43 = vld [vmem:[%s11314_s1 + $0x60] sm:$0xff]  ;;  %v6590_v48 = vld [vmem:[%s11315_s6 + $0x98] sm:$0xff] }
  0x5f   : > { %7552 = vmatpush.msk.msrb.mxu2 %vm902_vm0, %v8335_v0  ;;  %1191 = vmatpush.msra.mxu0 %v8370_v6  ;;  %v6541_v44 = vld [vmem:[%s11314_s1 + $0x68] sm:$0x1]  ;;  %v6550_v45 = vld [vmem:[%s11315_s6 + $0x40] sm:$0xff]  ;;  %v6589_v49 = vld [vmem:[%s11315_s6 + $0x90] sm:$0xff] }
  0x60   : > { %6580 = vmatmul.msk.f32.vlgmr.msra.gmra.mxu0 %vm880_vm1, %v6572_v9  ;;  %1252 = vmatpush.msrb.mxu1 %v6594_v30  ;;  %v944_v46 = vld [vmem:[%s11315_s6] sm:$0xff]  ;;  %v6588_v50 = vld [vmem:[%s11315_s6 + $0x88] sm:$0xff]  ;;  %v6638_v26 = vld [vmem:[%s11314_s1 + $0x110] sm:$0x1] }
  0x61   : > { %7553 = vmatpush.msrb.mxu2 %v8338_v1  ;;  %6639 = vmatpush.msk.msrb.mxu0 %vm902_vm0, %v8335_v0  ;;  %v6591_v47 = vld [vmem:[%s11315_s6 + $0xa0] sm:$0xff]  ;;  %v6637_v24 = vld [vmem:[%s11314_s1 + $0x108] sm:$0xff]  ;;  %v6624_v30 = vld [vmem:[%s11315_s6 + $0xf8] sm:$0xff] }
  0x62   : > { %1119 = vmatpush.msra.mxu3 %v949_v28  ;;  %1253 = vmatpush.msrb.mxu1 %v6593_v33  ;;  %v6587_v51 = vld [vmem:[%s11315_s6 + $0x80] sm:$0xff]  ;;  %v6692_v28 = vld [vmem:[%s11314_s1 + $0x150] sm:$0xff] }
  0x63   : > { %7554 = vmatpush.msrb.mxu2 %v8345_v2  ;;  %1470 = vmatpush.msrb.mxu0 %v8338_v1  ;;  %v6623_v33 = vld [vmem:[%s11315_s6 + $0xf0] sm:$0xff] }
  0x64   : > { %1120 = vmatpush.msra.mxu3 %v948_v32  ;;  %1254 = vmatpush.msrb.mxu1 %v6592_v37  ;;  %v6608_v32 = vld [vmem:[%s11314_s1 + $0xd8] sm:$0x1]  ;;  %v6622_v37 = vld [vmem:[%s11315_s6 + $0xe8] sm:$0xff] }
  0x65   : > { %7555 = vmatpush.msrb.mxu2 %v8352_v3  ;;  %1471 = vmatpush.msrb.mxu0 %v8345_v2 }
  0x66   : > { %6529 = vmatmul.msk.f32.gmra.mxu2 %vm880_vm1, %v874_v10  ;;  %6544 = vmatmul.msk.f32.gmra.mxu1 %vm880_vm1, %v6536_v11 }
  0x67   : > { %7556 = vmatpush.msrb.mxu2 %v8358_v4  ;;  %1472 = vmatpush.msrb.mxu0 %v8352_v3 }
  0x68   : > { %6581 = vmatmul.msk.f32.gmra.mxu0 %vm880_vm1, %v6573_v12  ;;  %1121 = vmatpush.msra.mxu3 %v947_v36  ;;  %v6662_v36 = vld [vmem:[%s11314_s1 + $0x118] sm:$0xff] }
  0x69   : > { %7557 = vmatpush.msrb.mxu2 %v8364_v5  ;;  %1473 = vmatpush.msrb.mxu0 %v8358_v4 }
  0x6a   : > { %1122 = vmatpush.msra.mxu3 %v946_v39  ;;  %1255 = vmatpush.msrb.mxu1 %v6591_v47  ;;  %v6663_v39 = vld [vmem:[%s11314_s1 + $0x120] sm:$0xff] }
  0x6b   : > { %7558 = vmatpush.msrb.mxu2 %v8370_v6  ;;  %1474 = vmatpush.msrb.mxu0 %v8364_v5 }
  0x6c   : > { %1123 = vmatpush.msra.mxu3 %v945_v41  ;;  %1256 = vmatpush.msrb.mxu1 %v6590_v48  ;;  %v6621_v41 = vld [vmem:[%s11315_s6 + $0xe0] sm:$0xff]  ;;  %v6665_v48 = vld [vmem:[%s11314_s1 + $0x130] sm:$0xff] }
  0x6d   : > { %1475 = vmatpush.msrb.mxu0 %v8370_v6  ;;  %1058 = vmatpush.msra.mxu2 %v6557_v23  ;;  %v6636_v23 = vld [vmem:[%s11314_s1 + $0x100] sm:$0xff] }
  0x6e   : > { %6530 = vmatmul.msk.f32.gmra.mxu2 %vm880_vm1, %v875_v13  ;;  %1124 = vmatpush.msra.mxu3 %v944_v46  ;;  %v6651_v46 = vld [vmem:[%s11315_s6 + $0x120] sm:$0xff] }
  0x6f   : > { %6699 = vmatpush.msk.msra.mxu0 %vm902_vm0, %v8335_v0  ;;  %1059 = vmatpush.msra.mxu2 %v6556_v25  ;;  %v6605_v25 = vld [vmem:[%s11314_s1 + $0xc0] sm:$0xff] }
  0x70   : > { %6582 = vmatmul.msk.f32.gmra.mxu0 %vm880_vm1, %v6574_v16  ;;  %1257 = vmatpush.msrb.mxu1 %v6589_v49  ;;  %v6633_v16 = vld [vmem:[%s11314_s1 + $0xe8] sm:$0xff]  ;;  %v6697_v49 = vld [vmem:[%s11314_s1 + $0x178] sm:$0xff] }
  0x71   : > { %1754 = vmatpush.msra.mxu0 %v8338_v1  ;;  %1060 = vmatpush.msra.mxu2 %v6555_v27  ;;  %v6606_v27 = vld [vmem:[%s11314_s1 + $0xc8] sm:$0xff] }
  0x72   : > { %1258 = vmatpush.msrb.mxu1 %v6588_v50  ;;  %1394 = vmatpush.msrb.mxu3 %v6624_v30  ;;  %v6619_v50 = vld [vmem:[%s11315_s6 + $0xd0] sm:$0xff] }
  0x73   : > { %1755 = vmatpush.msra.mxu0 %v8345_v2  ;;  %1061 = vmatpush.msra.mxu2 %v6554_v29  ;;  %v6607_v29 = vld [vmem:[%s11314_s1 + $0xd0] sm:$0xff] }
  0x74   : > { %1259 = vmatpush.msrb.mxu1 %v6587_v51  ;;  %1395 = vmatpush.msrb.mxu3 %v6623_v33  ;;  %v6650_v51 = vld [vmem:[%s11315_s6 + $0x118] sm:$0xff]  ;;  %v6679_v33 = vld [vmem:[%s11315_s6 + $0x150] sm:$0xff] }
  0x75   : > { %1756 = vmatpush.msra.mxu0 %v8352_v3  ;;  %1062 = vmatpush.msra.mxu2 %v6553_v35  ;;  %v6694_v35 = vld [vmem:[%s11314_s1 + $0x160] sm:$0xff] }
  0x76   : > { %6531 = vmatmul.msk.f32.gmra.mxu2 %vm880_vm1, %v876_v14  ;;  %v6632_v14 = vld [vmem:[%s11314_s1 + $0xe0] sm:$0xff]  ;;  %1396 = vmatpush.msrb.mxu3 %v6622_v37 }
  0x77   : > { %1757 = vmatpush.msra.mxu0 %v8358_v4  ;;  %1063 = vmatpush.msra.mxu2 %v6552_v38  ;;  %v6653_v38 = vld [vmem:[%s11315_s6 + $0x130] sm:$0xff] }
  0x78   : > { %6583 = vmatmul.msk.f32.gmra.mxu0 %vm880_vm1, %v6575_v18  ;;  %v6634_v18 = vld [vmem:[%s11314_s1 + $0xf0] sm:$0xff]  ;;  %1397 = vmatpush.msrb.mxu3 %v6621_v41  ;;  %v6726_v41 = vld [vmem:[%s11314_s1 + $0x1a8] sm:$0xff] }
  0x79   : > { %1758 = vmatpush.msra.mxu0 %v8364_v5  ;;  %1064 = vmatpush.msra.mxu2 %v6551_v40  ;;  %v6695_v40 = vld [vmem:[%s11314_s1 + $0x168] sm:$0xff] }
  0x7b   : > { %1759 = vmatpush.msra.mxu0 %v8370_v6  ;;  %1065 = vmatpush.msra.mxu2 %v6550_v45  ;;  %v6620_v45 = vld [vmem:[%s11315_s6 + $0xd8] sm:$0xff] }
  0x7c   : > { %1398 = vmatpush.msrb.mxu3 %v6620_v45  ;;  %v6708_v45 = vld [vmem:[%s11315_s6 + $0x188] sm:$0xff] }
  0x7e   : > { %6532 = vmatmul.msk.f32.gmra.mxu2 %vm880_vm1, %v877_v15  ;;  %1399 = vmatpush.msrb.mxu3 %v6619_v50  ;;  %v6815_v50 = vld [vmem:[%s11316_s23 + $0xc8] sm:$0xff] }
  0x80   : > { %6584 = vmatmul.msk.f32.gmra.mxu0 %vm880_vm1, %v6576_v20  ;;  %v6603_v20 = vld [vmem:[%s11314_s1 + $0xb0] sm:$0xff] }
  0x86   : > { %6533 = vmatmul.msk.f32.gmra.mxu2 %vm880_vm1, %v878_v17 }
  0x88   : > { %6585 = vmatmul.msk.f32.gmra.mxu0 %vm880_vm1, %v6577_v22  ;;  %v6604_v22 = vld [vmem:[%s11314_s1 + $0xb8] sm:$0xff] }
  0x8e   : > { %6534 = vmatmul.msk.f32.gmra.mxu2 %vm880_vm1, %v879_v19  ;;  %v6602_v19 = vld [vmem:[%s11314_s1 + $0xa8] sm:$0xff] }
  0x90   : > { %6586 = vmatmul.msk.f32.gmra.mxu0 %vm880_vm1, %v6578_v34  ;;  %v6654_v34 = vld [vmem:[%s11315_s6 + $0x138] sm:$0xff] }
  0x91   : > { %1536 = vmatpush.msra.mxu1 %v6654_v34  ;;  %v6710_v34 = vld [vmem:[%s11315_s6 + $0x198] sm:$0xff] }
  0x93   : > { %1537 = vmatpush.msra.mxu1 %v6653_v38  ;;  %v6678_v38 = vld [vmem:[%s11315_s6 + $0x148] sm:$0xff] }
  0x96   : > { %6545 = vmatmul.msk.f32.vlgmr.msrb.gmra.mxu2 %vm880_vm1, %v6537_v21  ;;  %v6635_v21 = vld [vmem:[%s11314_s1 + $0xf8] sm:$0xff] }
  0x97   : > { %6609 = vmatpush.msk.msrb.mxu2 %vm902_vm0, %v8335_v0 }
  0x98   : > { %6640 = vmatmul.msk.f32.vlgmr.msrb.gmra.mxu0 %vm880_vm1, %v6632_v14  ;;  %v6754_v14 = vld [vmem:[%s11314_s1 + $0x1d0] sm:$0xff] }
  0x99   : > { %1328 = vmatpush.msrb.mxu2 %v8338_v1  ;;  %6759 = vmatpush.msk.msrb.mxu0 %vm902_vm0, %v8335_v0 }
  0x9b   : > { %1329 = vmatpush.msrb.mxu2 %v8345_v2  ;;  %2038 = vmatpush.msrb.mxu0 %v8338_v1 }
  0x9d   : > { %1330 = vmatpush.msrb.mxu2 %v8352_v3  ;;  %2039 = vmatpush.msrb.mxu0 %v8345_v2 }
  0x9e   : > { %6546 = vmatmul.msk.f32.gmra.mxu2 %vm880_vm1, %v6538_v31  ;;  %v6693_v31 = vld [vmem:[%s11314_s1 + $0x158] sm:$0xff] }
  0x9f   : > { %1331 = vmatpush.msrb.mxu2 %v8358_v4  ;;  %2040 = vmatpush.msrb.mxu0 %v8352_v3 }
  0xa0   : > { %6641 = vmatmul.msk.f32.gmra.mxu0 %vm880_vm1, %v6633_v16  ;;  %v6682_v16 = vld [vmem:[%s11315_s6 + $0x168] sm:$0xff] }
  0xa1   : > { %1332 = vmatpush.msrb.mxu2 %v8364_v5  ;;  %2041 = vmatpush.msrb.mxu0 %v8358_v4 }
  0xa3   : > { %1333 = vmatpush.msrb.mxu2 %v8370_v6  ;;  %2042 = vmatpush.msrb.mxu0 %v8364_v5 }
  0xa5   : > { %2043 = vmatpush.msrb.mxu0 %v8370_v6 }
  0xa6   : > { %6547 = vmatmul.msk.f32.gmra.mxu2 %vm880_vm1, %v6539_v42  ;;  %v6652_v42 = vld [vmem:[%s11315_s6 + $0x128] sm:$0xff] }
  0xa7   : > { %1538 = vmatpush.msra.mxu1 %v6652_v42 }
  0xa8   : > { %6642 = vmatmul.msk.f32.gmra.mxu0 %vm880_vm1, %v6634_v18 }
  0xa9   : > { %1539 = vmatpush.msra.mxu1 %v6651_v46  ;;  %v6727_v46 = vld [vmem:[%s11314_s1 + $0x1b0] sm:$0xff] }
  0xab   : > { %1540 = vmatpush.msra.mxu1 %v6650_v51  ;;  %v6744_v51 = vld [vmem:[%s11315_s6 + $0x1f8] sm:$0xff] }
  0xae   : > { %6548 = vmatmul.msk.f32.gmra.mxu2 %vm880_vm1, %v6540_v43  ;;  %v6664_v43 = vld [vmem:[%s11314_s1 + $0x128] sm:$0xff] }
  0xb0   : > { %6643 = vmatmul.msk.f32.gmra.mxu0 %vm880_vm1, %v6635_v21  ;;  %v6723_v21 = vld [vmem:[%s11314_s1 + $0x190] sm:$0xff] }
  0xb6   : > { %6549 = vmatmul.msk.f32.gmra.mxu2 %vm880_vm1, %v6541_v44  ;;  %v6696_v44 = vld [vmem:[%s11314_s1 + $0x170] sm:$0xff] }
  0xb8   : > { %6644 = vmatmul.msk.f32.gmra.mxu0 %vm880_vm1, %v6636_v23  ;;  %v6712_v23 = vld [vmem:[%s11315_s6 + $0x1a8] sm:$0xff] }
  0xc0   : > { %6645 = vmatmul.msk.f32.gmra.mxu0 %vm880_vm1, %v6637_v24 }
  0xc8   : > { %6646 = vmatmul.msk.f32.gmra.mxu0 %vm880_vm1, %v6638_v26  ;;  %v6756_v26 = vld [vmem:[%s11314_s1 + $0x1e0] sm:$0xff] }
  0xd0   : > { %6700 = vmatmul.msk.f32.vlgmr.msra.gmra.mxu0 %vm880_vm1, %v6692_v28  ;;  %v6724_v28 = vld [vmem:[%s11314_s1 + $0x198] sm:$0xff] }
  0xd1   : > { %6840 = vmatpush.msk.msra.mxu0 %vm902_vm0, %v8335_v0 }
  0xd3   : > { %2547 = vmatpush.msra.mxu0 %v8338_v1 }
  0xd5   : > { %2548 = vmatpush.msra.mxu0 %v8345_v2 }
  0xd7   : > { %2549 = vmatpush.msra.mxu0 %v8352_v3 }
  0xd8   : > { %6701 = vmatmul.msk.f32.gmra.mxu0 %vm880_vm1, %v6693_v31 }
  0xd9   : > { %2550 = vmatpush.msra.mxu0 %v8358_v4 }
  0xdb   : > { %v998_v52 = vpop.f32.mrf.mxu1  ;;  %2551 = vmatpush.msra.mxu0 %v8364_v5 }
  0xdc   : > { %6558 = vmatmul.msk.f32.vlgmr.msra.gmra.mxu2 %vm1028_vm2, %v998_v52 }
  0xdd   : > { %v1193_v53 = vpop.f32.mrf.mxu0  ;;  %6669 = vmatpush.msk.msra.mxu2 %vm902_vm0, %v8335_v0  ;;  %2552 = vmatpush.msra.mxu0 %v8370_v6 }
  0xde   : > { %6595 = vmatmul.msk.f32.vlgmr.msrb.gmra.mxu1 %vm1028_vm2, %v1193_v53  ;;  %v6666_v53 = vld [vmem:[%s11314_s1 + $0x138] sm:$0xff] }
  0xdf   : > { %1612 = vmatpush.msra.mxu2 %v8338_v1 }
  0xe0   : > { %6702 = vmatmul.msk.f32.gmra.mxu0 %vm880_vm1, %v6694_v35  ;;  %v6725_v35 = vld [vmem:[%s11314_s1 + $0x1a0] sm:$0xff] }
  0xe1   : > { %v923_v54 = vpop.f32.mrf.mxu2  ;;  %1613 = vmatpush.msra.mxu2 %v8345_v2 }
  0xe2   : > { %6565 = vmatmul.msk.f32.vlgmr.msra.gmra.mxu3 %vm1028_vm2, %v923_v54  ;;  %v6698_v54 = vld [vmem:[%s11314_s1 + $0x180] sm:$0x1] }
  0xe3   : > { %v1001_v55 = vpop.f32.mrf.mxu1  ;;  %1614 = vmatpush.msra.mxu2 %v8352_v3 }
  0xe4   : > { %6559 = vmatmul.msk.f32.gmra.mxu2 %vm1028_vm2, %v1001_v55  ;;  %v6618_v55 = vld [vmem:[%s11315_s6 + $0xc8] sm:$0xff] }
  0xe5   : > { %v1196_v56 = vpop.f32.mrf.mxu0  ;;  %1615 = vmatpush.msra.mxu2 %v8358_v4  ;;  %1400 = vmatpush.msrb.mxu3 %v6618_v55 }
  0xe6   : > { %6596 = vmatmul.msk.f32.gmra.mxu1 %vm1028_vm2, %v1196_v56  ;;  %v6649_v56 = vld [vmem:[%s11315_s6 + $0x110] sm:$0xff] }
  0xe7   : > { %1616 = vmatpush.msra.mxu2 %v8364_v5  ;;  %1541 = vmatpush.msra.mxu1 %v6649_v56 }
  0xe8   : > { %6703 = vmatmul.msk.f32.gmra.mxu0 %vm880_vm1, %v6695_v40  ;;  %v6709_v40 = vld [vmem:[%s11315_s6 + $0x190] sm:$0xff] }
  0xe9   : > { %v926_v57 = vpop.f32.mrf.mxu2  ;;  %1617 = vmatpush.msra.mxu2 %v8370_v6 }
  0xea   : > { %6566 = vmatmul.msk.f32.gmra.mxu3 %vm1028_vm2, %v926_v57 }
  0xed   : > { %v1199_v61 = vpop.f32.mrf.mxu0 }
  0xee   : > { %6597 = vmatmul.msk.f32.gmra.mxu1 %vm1028_vm2, %v1199_v61  ;;  %v6648_v61 = vld [vmem:[%s11315_s6 + $0x108] sm:$0xff] }
  0xef   : > { %1542 = vmatpush.msra.mxu1 %v6648_v61  ;;  %v6742_v61 = vld [vmem:[%s11315_s6 + $0x1e8] sm:$0xff] }
  0xf0   : > { %6704 = vmatmul.msk.f32.gmra.mxu0 %vm880_vm1, %v6696_v44  ;;  %v6677_v44 = vld [vmem:[%s11315_s6 + $0x140] sm:$0xff] }
  0xf1   : > { %v929_v58 = vpop.f32.mrf.mxu2 }
  0xf2   : > { %6567 = vmatmul.msk.f32.gmra.mxu3 %vm1028_vm2, %v929_v58  ;;  %v6667_v58 = vld [vmem:[%s11314_s1 + $0x140] sm:$0xff] }
  0xf5   : > { %v1202_v63 = vpop.f32.mrf.mxu0 }
  0xf6   : > { %6598 = vmatmul.msk.f32.gmra.mxu1 %vm1028_vm2, %v1202_v63  ;;  %v6684_v63 = vld [vmem:[%s11315_s6 + $0x178] sm:$0xff] }
  0xf8   : > { %6705 = vmatmul.msk.f32.gmra.mxu0 %vm880_vm1, %v6697_v49 }
  0xf9   : > { %v932_v59 = vpop.f32.mrf.mxu2 }
  0xfa   : > { %6568 = vmatmul.msk.f32.gmra.mxu3 %vm1028_vm2, %v932_v59  ;;  %v6752_v59 = vld [vmem:[%s11314_s1 + $0x1c0] sm:$0xff] }
  0xfd   : > { %v1205_v8 = vpop.f32.mrf.mxu0 }
  0xfe   : > { %6599 = vmatmul.msk.f32.gmra.mxu1 %vm1028_vm2, %v1205_v8  ;;  %v6753_v8 = vld [vmem:[%s11314_s1 + $0x1c8] sm:$0xff] }
 0x100   : > { %6706 = vmatmul.msk.f32.gmra.mxu0 %vm880_vm1, %v6698_v54  ;;  %v6728_v54 = vld [vmem:[%s11314_s1 + $0x1b8] sm:$0x1] }
 0x101   : > { %v935_v60 = vpop.f32.mrf.mxu2 }
 0x102   : > { %6569 = vmatmul.msk.f32.gmra.mxu3 %vm1028_vm2, %v935_v60  ;;  %v6617_v60 = vld [vmem:[%s11315_s6 + $0xc0] sm:$0xff] }
 0x103   : > { %1401 = vmatpush.msrb.mxu3 %v6617_v60  ;;  %v6774_v60 = vld [vmem:[%s11315_s6 + $0x238] sm:$0xff] }
 0x105   : > { %v1208_v10 = vpop.f32.mrf.mxu0  ;;  %1678 = vmatpush.msra.mxu3 %v6684_v63 }
 0x106   : > { %6600 = vmatmul.msk.f32.gmra.mxu1 %vm1028_vm2, %v1208_v10 }
 0x108   : > { %6760 = vmatmul.msk.f32.vlgmr.msrb.gmra.mxu0 %vm880_vm1, %v6752_v59  ;;  %v6816_v59 = vld [vmem:[%s11316_s23 + $0xd0] sm:$0xff] }
 0x109   : > { %v938_v62 = vpop.f32.mrf.mxu2 }
 0x10a   : > { %6570 = vmatmul.msk.f32.gmra.mxu3 %vm1028_vm2, %v938_v62 }
 0x10d   : > { %v1211_v12 = vpop.f32.mrf.mxu0 }
 0x10e   : > { %6601 = vmatmul.msk.f32.gmra.mxu1 %vm1028_vm2, %v1211_v12  ;;  %v6683_v12 = vld [vmem:[%s11315_s6 + $0x170] sm:$0xff] }
 0x10f   : > { %1679 = vmatpush.msra.mxu3 %v6683_v12  ;;  %v6741_v12 = vld [vmem:[%s11315_s6 + $0x1e0] sm:$0xff] }
 0x110   : > { %6761 = vmatmul.msk.f32.gmra.mxu0 %vm880_vm1, %v6753_v8 }
 0x111   : > { %v941_v7 = vpop.f32.mrf.mxu2  ;;  %1680 = vmatpush.msra.mxu3 %v6682_v16 }
 0x112   : > { %6571 = vmatmul.msk.f32.gmra.mxu3 %vm1028_vm2, %v941_v7  ;;  %v6647_v7 = vld [vmem:[%s11315_s6 + $0x100] sm:$0xff] }
 0x113   : > { %1543 = vmatpush.msra.mxu1 %v6647_v7 }
 0x118   : > { %6762 = vmatmul.msk.f32.gmra.mxu0 %vm880_vm1, %v6754_v14 }
 0x119   : > { %v1004_v9 = vpop.f32.mrf.mxu2 }
 0x11a   : > { %6560 = vmatmul.msk.f32.gmra.mxu2 %vm1028_vm2, %v1004_v9  ;;  %v6668_v9 = vld [vmem:[%s11314_s1 + $0x148] sm:$0x1] }
 0x121   : > { %v1007_v11 = vpop.f32.mrf.mxu2 }
 0x122   : > { %6561 = vmatmul.msk.f32.gmra.mxu2 %vm1028_vm2, %v1007_v11  ;;  %v1477_v11 = vpop.f32.mrf.mxu0 }
 0x123   : > { %6655 = vmatmul.msk.f32.vlgmr.msra.gmra.mxu1 %vm1028_vm2, %v1477_v11  ;;  %v6817_v11 = vld [vmem:[%s11316_s23 + $0xd8] sm:$0xff] }
 0x129   : > { %v1010_v13 = vpop.f32.mrf.mxu2 }
 0x12a   : > { %6562 = vmatmul.msk.f32.gmra.mxu2 %vm1028_vm2, %v1010_v13  ;;  %v6714_v13 = vld [vmem:[%s11315_s6 + $0x1b8] sm:$0xff]  ;;  %v1480_v18 = vpop.f32.mrf.mxu0 }
 0x12b   : > { %1820 = vmatpush.msrb.mxu1 %v6714_v13  ;;  %v6772_v13 = vld [vmem:[%s11315_s6 + $0x228] sm:$0xff] }
 0x12c   : > { %6656 = vmatmul.msk.f32.gmra.mxu1 %vm1028_vm2, %v1480_v18  ;;  %v6818_v18 = vld [vmem:[%s11316_s23 + $0xe0] sm:$0xff] }
 0x131   : > { %v1013_v15 = vpop.f32.mrf.mxu2 }
 0x132   : > { %6563 = vmatmul.msk.f32.gmra.mxu2 %vm1028_vm2, %v1013_v15  ;;  %v6722_v15 = vld [vmem:[%s11314_s1 + $0x188] sm:$0xff] }
 0x139   : > { %v1016_v17 = vpop.f32.mrf.mxu2 }
 0x13a   : > { %6564 = vmatmul.msk.f32.gmra.mxu2 %vm1028_vm2, %v1016_v17 }
 0x142   : > { %6610 = vmatmul.msk.f32.vlgmr.msrb.gmra.mxu2 %vm880_vm1, %v6602_v19  ;;  %v6713_v19 = vld [vmem:[%s11315_s6 + $0x1b0] sm:$0xff] }
 0x143   : > { %6729 = vmatpush.msk.msrb.mxu2 %vm902_vm0, %v8335_v0  ;;  %1821 = vmatpush.msrb.mxu1 %v6713_v19  ;;  %v6740_v19 = vld [vmem:[%s11315_s6 + $0x1d8] sm:$0xff] }
 0x145   : > { %1896 = vmatpush.msrb.mxu2 %v8338_v1  ;;  %1822 = vmatpush.msrb.mxu1 %v6712_v23 }
 0x147   : > { %1897 = vmatpush.msrb.mxu2 %v8345_v2 }
 0x149   : > { %1898 = vmatpush.msrb.mxu2 %v8352_v3 }
 0x14a   : > { %6611 = vmatmul.msk.f32.gmra.mxu2 %vm880_vm1, %v6603_v20  ;;  %v6755_v20 = vld [vmem:[%s11314_s1 + $0x1d8] sm:$0xff] }
 0x14b   : > { %1899 = vmatpush.msrb.mxu2 %v8358_v4  ;;  %6763 = vmatmul.msk.f32.gmra.mxu0 %vm880_vm1, %v6755_v20  ;;  %v6771_v20 = vld [vmem:[%s11315_s6 + $0x220] sm:$0xff] }
 0x14d   : > { %1900 = vmatpush.msrb.mxu2 %v8364_v5 }
 0x14f   : > { %1901 = vmatpush.msrb.mxu2 %v8370_v6 }
 0x152   : > { %6612 = vmatmul.msk.f32.gmra.mxu2 %vm880_vm1, %v6604_v22  ;;  %v6681_v22 = vld [vmem:[%s11315_s6 + $0x160] sm:$0xff] }
 0x153   : > { %1681 = vmatpush.msra.mxu3 %v6681_v22  ;;  %6764 = vmatmul.msk.f32.gmra.mxu0 %vm880_vm1, %v6756_v26  ;;  %v6739_v26 = vld [vmem:[%s11315_s6 + $0x1d0] sm:$0xff] }
 0x15a   : > { %6613 = vmatmul.msk.f32.gmra.mxu2 %vm880_vm1, %v6605_v25  ;;  %v1483_v25 = vpop.f32.mrf.mxu0 }
 0x15b   : > { %6657 = vmatmul.msk.f32.gmra.mxu1 %vm1028_vm2, %v1483_v25  ;;  %v8931_v63 = vpop.f32.mrf.mxu1  ;;  %v6819_v25 = vld [vmem:[%s11316_s23 + $0xe8] sm:$0xff] }
 0x15f   : > { %v8735_v47 = vpop.f32.mrf.mxu2 }
 0x162   : > { %6614 = vmatmul.msk.f32.gmra.mxu2 %vm880_vm1, %v6606_v27  ;;  %v6680_v27 = vld [vmem:[%s11315_s6 + $0x158] sm:$0xff]  ;;  %v1486_v31 = vpop.f32.mrf.mxu0 }
 0x163   : > { %1682 = vmatpush.msra.mxu3 %v6680_v27  ;;  %6658 = vmatmul.msk.f32.gmra.mxu1 %vm1028_vm2, %v1486_v31  ;;  %v8948_v14 = vpop.f32.mrf.mxu1  ;;  %v6770_v27 = vld [vmem:[%s11315_s6 + $0x218] sm:$0xff] }
 0x165   : > { %1683 = vmatpush.msra.mxu3 %v6679_v33  ;;  %v6738_v33 = vld [vmem:[%s11315_s6 + $0x1c8] sm:$0xff] }
 0x167   : > { %v8751_v52 = vpop.f32.mrf.mxu2  ;;  %1684 = vmatpush.msra.mxu3 %v6678_v38 }
 0x169   : > { %1685 = vmatpush.msra.mxu3 %v6677_v44  ;;  %v6822_v44 = vld [vmem:[%s11316_s23 + $0x100] sm:$0xff] }
 0x16a   : > { %6615 = vmatmul.msk.f32.gmra.mxu2 %vm880_vm1, %v6607_v29  ;;  %v6711_v29 = vld [vmem:[%s11315_s6 + $0x1a0] sm:$0xff]  ;;  %v1489_v37 = vpop.f32.mrf.mxu0 }
 0x16b   : > { %1823 = vmatpush.msrb.mxu1 %v6711_v29 }
 0x16c   : > { %6659 = vmatmul.msk.f32.gmra.mxu1 %vm1028_vm2, %v1489_v37  ;;  %v6821_v37 = vld [vmem:[%s11316_s23 + $0xf8] sm:$0xff] }
 0x16d   : > { %1824 = vmatpush.msrb.mxu1 %v6710_v34  ;;  %v6769_v34 = vld [vmem:[%s11315_s6 + $0x210] sm:$0xff] }
 0x16f   : > { %1825 = vmatpush.msrb.mxu1 %v6709_v40  ;;  %v6768_v40 = vld [vmem:[%s11315_s6 + $0x208] sm:$0xff] }
 0x171   : > { %1826 = vmatpush.msrb.mxu1 %v6708_v45  ;;  %v6767_v45 = vld [vmem:[%s11315_s6 + $0x200] sm:$0xff] }
 0x172   : > { %6616 = vmatmul.msk.f32.gmra.mxu2 %vm880_vm1, %v6608_v32  ;;  %v6757_v32 = vld [vmem:[%s11314_s1 + $0x1e8] sm:$0xff] }
 0x173   : > { %6765 = vmatmul.msk.f32.gmra.mxu0 %vm880_vm1, %v6757_v32  ;;  %v6820_v32 = vld [vmem:[%s11316_s23 + $0xf0] sm:$0xff] }
 0x17a   : > { %6670 = vmatmul.msk.f32.vlgmr.msra.gmra.mxu2 %vm880_vm1, %v6662_v36 }
 0x182   : > { %6671 = vmatmul.msk.f32.gmra.mxu2 %vm880_vm1, %v6663_v39  ;;  %v6758_v39 = vld [vmem:[%s11314_s1 + $0x1f0] sm:$0x1] }
 0x183   : > { %6766 = vmatmul.msk.f32.gmra.mxu0 %vm880_vm1, %v6758_v39  ;;  %v6737_v39 = vld [vmem:[%s11315_s6 + $0x1c0] sm:$0xff] }
 0x18a   : > { %6672 = vmatmul.msk.f32.gmra.mxu2 %vm880_vm1, %v6664_v43  ;;  %v1492_v43 = vpop.f32.mrf.mxu0 }
 0x18b   : > { %6660 = vmatmul.msk.f32.gmra.mxu1 %vm1028_vm2, %v1492_v43  ;;  %6841 = vmatmul.msk.f32.vlgmr.msra.gmra.mxu0 %vm880_vm1, %v6815_v50 }
 0x192   : > { %6673 = vmatmul.msk.f32.gmra.mxu2 %vm880_vm1, %v6665_v48  ;;  %v1495_v49 = vpop.f32.mrf.mxu0 }
 0x193   : > { %6661 = vmatmul.msk.f32.gmra.mxu1 %vm1028_vm2, %v1495_v49  ;;  %6842 = vmatmul.msk.f32.gmra.mxu0 %vm880_vm1, %v6816_v59  ;;  %v6873_v49 = vld [vmem:[%s11317_s19 + $0x78] sm:$0xff]  ;;  %v6871_v59 = vld [vmem:[%s11317_s19 + $0x68] sm:$0xff] }
 0x19a   : > { %6674 = vmatmul.msk.f32.gmra.mxu2 %vm880_vm1, %v6666_v53  ;;  %v6707_v53 = vld [vmem:[%s11315_s6 + $0x180] sm:$0xff]  ;;  %v1761_v56 = vpop.f32.mrf.mxu0 }
 0x19b   : > { %1827 = vmatpush.msrb.mxu1 %v6707_v53  ;;  %6843 = vmatmul.msk.f32.gmra.mxu0 %vm880_vm1, %v6817_v11  ;;  %v9075_v11 = vld [vmem:[%s8332_s26 + $0x30] sm:$0x3] }
 0x19c   : > { %6715 = vmatmul.msk.f32.vlgmr.msrb.gmra.mxu1 %vm1028_vm2, %v1761_v56 }
 0x19d   : > { %v8767_v57 = vpop.f32.mrf.mxu2  ;;  %2104 = vmatpush.msra.mxu1 %v6774_v60 }
 0x1a2   : > { %6675 = vmatmul.msk.f32.gmra.mxu2 %vm880_vm1, %v6667_v58  ;;  %v6743_v58 = vld [vmem:[%s11315_s6 + $0x1f0] sm:$0xff]  ;;  %v1764_v8 = vpop.f32.mrf.mxu0 }
 0x1a3   : > { %6844 = vmatmul.msk.f32.gmra.mxu0 %vm880_vm1, %v6818_v18 }
 0x1a4   : > { %6716 = vmatmul.msk.f32.gmra.mxu1 %vm1028_vm2, %v1764_v8  ;;  %v6826_v8 = vld [vmem:[%s11316_s23 + $0x120] sm:$0xff] }
 0x1a5   : > { %v8783_v62 = vpop.f32.mrf.mxu2 }
 0x1aa   : > { %6676 = vmatmul.msk.f32.gmra.mxu2 %vm880_vm1, %v6668_v9  ;;  %v6773_v9 = vld [vmem:[%s11315_s6 + $0x230] sm:$0xff]  ;;  %v1767_v16 = vpop.f32.mrf.mxu0 }
 0x1ab   : > { %2105 = vmatpush.msra.mxu1 %v6773_v9  ;;  %6845 = vmatmul.msk.f32.gmra.mxu0 %vm880_vm1, %v6819_v25 }
 0x1ac   : > { %6717 = vmatmul.msk.f32.gmra.mxu1 %vm1028_vm2, %v1767_v16  ;;  %v9089_v16 = vld [vmem:[%s8332_s26 + $0x20] sm:$0xff] }
 0x1ad   : > { %v8799_v10 = vpop.f32.mrf.mxu2  ;;  %2106 = vmatpush.msra.mxu1 %v6772_v13  ;;  %v9083_v13 = vld [vmem:[%s8332_s26 + $0x28] sm:$0xff] }
 0x1af   : > { %2107 = vmatpush.msra.mxu1 %v6771_v20  ;;  %v6827_v20 = vld [vmem:[%s11316_s23 + $0x128] sm:$0xff] }
 0x1b1   : > { %2108 = vmatpush.msra.mxu1 %v6770_v27 }
 0x1b2   : > { %6730 = vmatmul.msk.f32.vlgmr.msrb.gmra.mxu2 %vm880_vm1, %v6722_v15  ;;  %v1770_v23 = vpop.f32.mrf.mxu0 }
 0x1b3   : > { %6846 = vmatmul.msk.f32.gmra.mxu0 %vm880_vm1, %v6820_v32  ;;  %2109 = vmatpush.msra.mxu1 %v6769_v34  ;;  %v6868_v34 = vld [vmem:[%s11317_s19 + $0x50] sm:$0xff] }
 0x1b4   : > { %6718 = vmatmul.msk.f32.gmra.mxu1 %vm1028_vm2, %v1770_v23  ;;  %v9102_v23 = vld [vmem:[%s8332_s26 + $0x18] sm:$0xff] }
 0x1b5   : > { %v8819_v17 = vpop.f32.mrf.mxu2  ;;  %2110 = vmatpush.msra.mxu1 %v6768_v40 }
 0x1b7   : > { %2111 = vmatpush.msra.mxu1 %v6767_v45 }
 0x1b9   : > { %2721 = vmatpush.msrb.mxu1 %v6873_v49  ;;  %v6830_v49 = vld [vmem:[%s11316_s23 + $0x140] sm:$0xff] }
 0x1ba   : > { %6731 = vmatmul.msk.f32.gmra.mxu2 %vm880_vm1, %v6723_v21  ;;  %v8962_v21 = vpop.f32.mrf.mxu1  ;;  %v1773_v31 = vpop.f32.mrf.mxu0 }
 0x1bb   : > { %6847 = vmatmul.msk.f32.gmra.mxu0 %vm880_vm1, %v6821_v37 }
 0x1bc   : > { %6719 = vmatmul.msk.f32.gmra.mxu1 %vm1028_vm2, %v1773_v31 }
 0x1bd   : > { %v8839_v24 = vpop.f32.mrf.mxu2 }
 0x1c2   : > { %6732 = vmatmul.msk.f32.gmra.mxu2 %vm880_vm1, %v6724_v28  ;;  %v8976_v28 = vpop.f32.mrf.mxu3  ;;  %v8978_v29 = vpop.f32.mrf.mxu1 }
 0x1c3   : > { %6848 = vmatmul.msk.f32.gmra.mxu0 %vm880_vm1, %v6822_v44 }
 0x1c5   : > { %v1335_v30 = vpop.f32.mrf.mxu2 }
 0x1c6   : > { %6625 = vmatmul.msk.f32.vlgmr.msrb.gmra.mxu3 %vm1028_vm2, %v1335_v30 }
 0x1c7   : > { %1962 = vmatpush.msrb.mxu3 %v6744_v51  ;;  %v6824_v51 = vld [vmem:[%s11316_s23 + $0x110] sm:$0xff] }
 0x1c9   : > { %1963 = vmatpush.msrb.mxu3 %v6743_v58  ;;  %v6825_v58 = vld [vmem:[%s11316_s23 + $0x118] sm:$0xff] }
 0x1ca   : > { %6733 = vmatmul.msk.f32.gmra.mxu2 %vm880_vm1, %v6725_v35  ;;  %v8995_v38 = vpop.f32.mrf.mxu3 }
 0x1cb   : > { %1964 = vmatpush.msrb.mxu3 %v6742_v61 }
 0x1cd   : > { %v1338_v36 = vpop.f32.mrf.mxu2  ;;  %1965 = vmatpush.msrb.mxu3 %v6741_v12  ;;  %v6870_v12 = vld [vmem:[%s11317_s19 + $0x60] sm:$0xff] }
 0x1ce   : > { %6626 = vmatmul.msk.f32.gmra.mxu3 %vm1028_vm2, %v1338_v36  ;;  %v1776_v36 = vpop.f32.mrf.mxu0 }
 0x1cf   : > { %1966 = vmatpush.msrb.mxu3 %v6740_v19  ;;  %6720 = vmatmul.msk.f32.gmra.mxu1 %vm1028_vm2, %v1776_v36 }
 0x1d1   : > { %1967 = vmatpush.msrb.mxu3 %v6739_v26  ;;  %v9108_v26 = vld [vmem:[%s8332_s26 + $0x10] sm:$0xff] }
 0x1d2   : > { %6734 = vmatmul.msk.f32.gmra.mxu2 %vm880_vm1, %v6726_v41  ;;  %v9004_v41 = vpop.f32.mrf.mxu1 }
 0x1d3   : > { %1968 = vmatpush.msrb.mxu3 %v6738_v33  ;;  %v6828_v33 = vld [vmem:[%s11316_s23 + $0x130] sm:$0xff] }
 0x1d5   : > { %v1341_v42 = vpop.f32.mrf.mxu2  ;;  %1969 = vmatpush.msrb.mxu3 %v6737_v39 }
 0x1d6   : > { %6627 = vmatmul.msk.f32.gmra.mxu3 %vm1028_vm2, %v1341_v42  ;;  %v1779_v43 = vpop.f32.mrf.mxu0 }
 0x1d7   : > { %6721 = vmatmul.msk.f32.gmra.mxu1 %vm1028_vm2, %v1779_v43  ;;  %v6867_v43 = vld [vmem:[%s11317_s19 + $0x48] sm:$0xff] }
 0x1da   : > { %6735 = vmatmul.msk.f32.gmra.mxu2 %vm880_vm1, %v6727_v46 }
 0x1dd   : > { %v1344_v48 = vpop.f32.mrf.mxu2 }
 0x1de   : > { %6628 = vmatmul.msk.f32.gmra.mxu3 %vm1028_vm2, %v1344_v48  ;;  %v2045_v46 = vpop.f32.mrf.mxu0  ;;  %v6823_v48 = vld [vmem:[%s11316_s23 + $0x108] sm:$0xff] }
 0x1df   : > { %6775 = vmatmul.msk.f32.vlgmr.msra.gmra.mxu1 %vm1028_vm2, %v2045_v46  ;;  %6849 = vmatmul.msk.f32.gmra.mxu0 %vm880_vm1, %v6823_v48  ;;  %v6866_v46 = vld [vmem:[%s11317_s19 + $0x40] sm:$0xff] }
 0x1e2   : > { %6736 = vmatmul.msk.f32.gmra.mxu2 %vm880_vm1, %v6728_v54 }
 0x1e5   : > { %v1347_v55 = vpop.f32.mrf.mxu2 }
 0x1e6   : > { %6629 = vmatmul.msk.f32.gmra.mxu3 %vm1028_vm2, %v1347_v55  ;;  %v2048_v50 = vpop.f32.mrf.mxu0 }
 0x1e7   : > { %6776 = vmatmul.msk.f32.gmra.mxu1 %vm1028_vm2, %v2048_v50  ;;  %6850 = vmatmul.msk.f32.gmra.mxu0 %vm880_vm1, %v6824_v51 }
 0x1ed   : > { %v1350_v7 = vpop.f32.mrf.mxu2 }
 0x1ee   : > { %6630 = vmatmul.msk.f32.gmra.mxu3 %vm1028_vm2, %v1350_v7  ;;  %v2051_v56 = vpop.f32.mrf.mxu0 }
 0x1ef   : > { %6777 = vmatmul.msk.f32.gmra.mxu1 %vm1028_vm2, %v2051_v56  ;;  %6851 = vmatmul.msk.f32.gmra.mxu0 %vm880_vm1, %v6825_v58 }
 0x1f5   : > { %v1353_v15 = vpop.f32.mrf.mxu2 }
 0x1f6   : > { %6631 = vmatmul.msk.f32.gmra.mxu3 %vm1028_vm2, %v1353_v15  ;;  %v2054_v7 = vpop.f32.mrf.mxu0 }
 0x1f7   : > { %6778 = vmatmul.msk.f32.gmra.mxu1 %vm1028_vm2, %v2054_v7  ;;  %6852 = vmatmul.msk.f32.gmra.mxu0 %vm880_vm1, %v6826_v8  ;;  %v6832_v7 = vld [vmem:[%s11316_s23 + $0x150] sm:$0xff]  ;;  %v2162_v8 = vld [vmem:[#allocation2 + $0x18] sm:$0xff] }
 0x1f8   : > { %2201 = vmatpush.msra.mxu2 %v2162_v8 }
 0x1fd   : > { %v1619_v22 = vpop.f32.mrf.mxu2 }
 0x1fe   : > { %6685 = vmatmul.msk.f32.vlgmr.msra.gmra.mxu3 %vm1028_vm2, %v1619_v22  ;;  %v2057_v19 = vpop.f32.mrf.mxu0  ;;  %v6869_v22 = vld [vmem:[%s11317_s19 + $0x58] sm:$0xff] }
 0x1ff   : > { %6789 = vmatpush.msk.msra.mxu3 %vm902_vm0, %v8335_v0  ;;  %v9021_v0 = vpop.f32.mrf.mxu3  ;;  %6779 = vmatmul.msk.f32.gmra.mxu1 %vm1028_vm2, %v2057_v19 }
 0x200   : > { %6853 = vmatmul.msk.f32.gmra.mxu0 %vm880_vm1, %v6827_v20  ;;  %v1133_v45 = vadd.f32 %v9021_v0, %v8767_v57  ;;  %v6833_v20 = vld [vmem:[%s11316_s23 + $0x158] sm:$0xff] }
 0x201   : > { %2346 = vmatpush.msra.mxu3 %v8338_v1  ;;  %v9024_v1 = vpop.f32.mrf.mxu1 }
 0x202   : > { %v1284_v57 = vadd.f32 %v8962_v21, %v1133_v45  ;;  %v6831_v21 = vld [vmem:[%s11316_s23 + $0x148] sm:$0xff] }
 0x203   : > { %2347 = vmatpush.msra.mxu3 %v8345_v2 }
 0x205   : > { %v1622_v30 = vpop.f32.mrf.mxu2  ;;  %2348 = vmatpush.msra.mxu3 %v8352_v3 }
 0x206   : > { %6686 = vmatmul.msk.f32.gmra.mxu3 %vm1028_vm2, %v1622_v30  ;;  %v9114_v30 = vld [vmem:[%s8332_s26 + $0x8] sm:$0xff]  ;;  %v2060_v32 = vpop.f32.mrf.mxu0 }
 0x207   : > { %2349 = vmatpush.msra.mxu3 %v8358_v4  ;;  %v9038_v3 = vpop.f32.mrf.mxu3  ;;  %6780 = vmatmul.msk.f32.gmra.mxu1 %vm1028_vm2, %v2060_v32 }
 0x208   : > { %6854 = vmatmul.msk.f32.gmra.mxu0 %vm880_vm1, %v6828_v33  ;;  %v1136_v51 = vadd.f32 %v9038_v3, %v8783_v62 }
 0x209   : > { %2350 = vmatpush.msra.mxu3 %v8364_v5  ;;  %v9040_v4 = vpop.f32.mrf.mxu1 }
 0x20a   : > { %v1285_v56 = vadd.f32 %v8978_v29, %v1136_v51  ;;  %v6836_v51 = vld [vmem:[%s11316_s23 + $0x170] sm:$0xff] }
 0x20b   : > { %2351 = vmatpush.msra.mxu3 %v8370_v6  ;;  %v6872_v6 = vld [vmem:[%s11317_s19 + $0x70] sm:$0xff] }
 0x20c   : > { %2722 = vmatpush.msrb.mxu1 %v6872_v6 }
 0x20d   : > { %v1625_v35 = vpop.f32.mrf.mxu2 }
 0x20e   : > { %6687 = vmatmul.msk.f32.gmra.mxu3 %vm1028_vm2, %v1625_v35  ;;  %2723 = vmatpush.msrb.mxu1 %v6871_v59  ;;  %v9127_v35 = vld [vmem:[%s8332_s26] sm:$0xff]  ;;  %v2063_v40 = vpop.f32.mrf.mxu0 }
 0x20f   : > { %v9050_v54 = vpop.f32.mrf.mxu3  ;;  %6781 = vmatmul.msk.f32.gmra.mxu1 %vm1028_vm2, %v2063_v40 }
 0x210   : > { %2724 = vmatpush.msrb.mxu1 %v6870_v12  ;;  %v2236_v12 = vld [vmem:[%s11316_s23] sm:$0xff] }
 0x211   : > { %v9048_v53 = vpop.f32.mrf.mxu1 }
 0x212   : > { %2725 = vmatpush.msrb.mxu1 %v6869_v22 }
 0x214   : > { %2726 = vmatpush.msrb.mxu1 %v6868_v34  ;;  %v6834_v34 = vld [vmem:[%s11316_s23 + $0x160] sm:$0xff] }
 0x215   : > { %v1628_v42 = vpop.f32.mrf.mxu2 }
 0x216   : > { %6688 = vmatmul.msk.f32.gmra.mxu3 %vm1028_vm2, %v1628_v42  ;;  %v6829_v42 = vld [vmem:[%s11316_s23 + $0x138] sm:$0xff]  ;;  %2727 = vmatpush.msrb.mxu1 %v6867_v43  ;;  %v2554_v50 = vpop.f32.mrf.mxu0 }
 0x217   : > { %v9070_v9 = vpop.f32.mrf.mxu3  ;;  %6855 = vmatmul.msk.f32.gmra.mxu0 %vm880_vm1, %v6829_v42  ;;  %v2238_v42 = vld [vmem:[%s11316_s23 + $0x10] sm:$0xff] }
 0x218   : > { %2728 = vmatpush.msrb.mxu1 %v6866_v46  ;;  %v6835_v46 = vld [vmem:[%s11316_s23 + $0x168] sm:$0xff] }
 0x219   : > { %v9064_v60 = vpop.f32.mrf.mxu1  ;;  %6874 = vmatmul.msk.f32.vlgmr.msrb.gmra.mxu1 %vm1028_vm2, %v2554_v50  ;;  %v2160_v50 = vld [vmem:[#allocation2 + $0x8] sm:$0xff] }
 0x21a   : > { %7033 = vmatpush.msk.msra.mxu1 %vm902_vm0, %v9075_v11 }
 0x21c   : > { %3477 = vmatpush.msra.mxu1 %v9083_v13 }
 0x21d   : > { %v1631_v2 = vpop.f32.mrf.mxu2 }
 0x21e   : > { %6689 = vmatmul.msk.f32.gmra.mxu3 %vm1028_vm2, %v1631_v2  ;;  %3478 = vmatpush.msra.mxu1 %v9089_v16  ;;  %v2557_v58 = vpop.f32.mrf.mxu0 }
 0x21f   : > { %v9105_v25 = vpop.f32.mrf.mxu3  ;;  %6856 = vmatmul.msk.f32.gmra.mxu0 %vm880_vm1, %v6830_v49  ;;  %v2239_v49 = vld [vmem:[%s11316_s23 + $0x18] sm:$0xff] }
 0x220   : > { %3479 = vmatpush.msra.mxu1 %v9102_v23 }
 0x221   : > { %v9086_v15 = vpop.f32.mrf.mxu1  ;;  %6875 = vmatmul.msk.f32.gmra.mxu1 %vm1028_vm2, %v2557_v58  ;;  %v6837_v58 = vld [vmem:[%s11316_s23 + $0x178] sm:$0xff] }
 0x222   : > { %3480 = vmatpush.msra.mxu1 %v9108_v26 }
 0x224   : > { %3481 = vmatpush.msra.mxu1 %v9114_v30 }
 0x225   : > { %v1634_v5 = vpop.f32.mrf.mxu2 }
 0x226   : > { %6690 = vmatmul.msk.f32.gmra.mxu3 %vm1028_vm2, %v1634_v5  ;;  %3482 = vmatpush.msra.mxu1 %v9127_v35  ;;  %v2560_v19 = vpop.f32.mrf.mxu0 }
 0x227   : > { %6857 = vmatmul.msk.f32.gmra.mxu0 %vm880_vm1, %v6831_v21  ;;  %v2240_v21 = vld [vmem:[%s11316_s23 + $0x20] sm:$0xff] }
 0x228   : > { %7201 = vmatpush.msk.msrb.mxu1 %vm902_vm0, %v9075_v11 }
 0x229   : > { %v9111_v27 = vpop.f32.mrf.mxu1  ;;  %6876 = vmatmul.msk.f32.gmra.mxu1 %vm1028_vm2, %v2560_v19  ;;  %v2159_v19 = vld [vmem:[#allocation2] sm:$0xff] }
 0x22a   : > { %4265 = vmatpush.msrb.mxu1 %v9083_v13 }
 0x22c   : > { %4266 = vmatpush.msrb.mxu1 %v9089_v16 }
 0x22d   : > { %v1637_v55 = vpop.f32.mrf.mxu2 }
 0x22e   : > { %6691 = vmatmul.msk.f32.gmra.mxu3 %vm1028_vm2, %v1637_v55  ;;  %4267 = vmatpush.msrb.mxu1 %v9102_v23  ;;  %v2563_v33 = vpop.f32.mrf.mxu0 }
 0x22f   : > { %6858 = vmatmul.msk.f32.gmra.mxu0 %vm880_vm1, %v6832_v7  ;;  %v2241_v7 = vld [vmem:[%s11316_s23 + $0x28] sm:$0xff] }
 0x230   : > { %4268 = vmatpush.msrb.mxu1 %v9108_v26 }
 0x231   : > { %v9132_v37 = vpop.f32.mrf.mxu1  ;;  %6877 = vmatmul.msk.f32.gmra.mxu1 %vm1028_vm2, %v2563_v33  ;;  %v2242_v33 = vld [vmem:[%s11316_s23 + $0x30] sm:$0xff] }
 0x232   : > { %4269 = vmatpush.msrb.mxu1 %v9114_v30 }
 0x234   : > { %4270 = vmatpush.msrb.mxu1 %v9127_v35 }
 0x235   : > { %v1903_v61 = vpop.f32.mrf.mxu2 }
 0x236   : > { %6745 = vmatmul.msk.f32.vlgmr.msrb.gmra.mxu3 %vm1028_vm2, %v1903_v61  ;;  %v2566_v45 = vpop.f32.mrf.mxu0 }
 0x237   : > { %6949 = vmatpush.msk.msrb.mxu3 %vm902_vm0, %v9075_v11  ;;  %6859 = vmatmul.msk.f32.gmra.mxu0 %vm880_vm1, %v6833_v20  ;;  %v6838_v20 = vld [vmem:[%s11316_s23 + $0x180] sm:$0xff] }
 0x239   : > { %3083 = vmatpush.msrb.mxu3 %v9083_v13  ;;  %v9147_v2 = vpop.f32.mrf.mxu1  ;;  %6878 = vmatmul.msk.f32.gmra.mxu1 %vm1028_vm2, %v2566_v45 }
 0x23b   : > { %3084 = vmatpush.msrb.mxu3 %v9089_v16 }
 0x23d   : > { %v1906_v18 = vpop.f32.mrf.mxu2  ;;  %3085 = vmatpush.msrb.mxu3 %v9102_v23 }
 0x23e   : > { %6746 = vmatmul.msk.f32.gmra.mxu3 %vm1028_vm2, %v1906_v18 }
 0x23f   : > { %3086 = vmatpush.msrb.mxu3 %v9108_v26  ;;  %6860 = vmatmul.msk.f32.gmra.mxu0 %vm880_vm1, %v6834_v34 }
 0x241   : > { %3087 = vmatpush.msrb.mxu3 %v9114_v30  ;;  %v9166_v6 = vpop.f32.mrf.mxu1 }
 0x243   : > { %3088 = vmatpush.msrb.mxu3 %v9127_v35 }
 0x245   : > { %v1909_v31 = vpop.f32.mrf.mxu2 }
 0x246   : > { %6747 = vmatmul.msk.f32.gmra.mxu3 %vm1028_vm2, %v1909_v31  ;;  %v2237_v31 = vld [vmem:[%s11316_s23 + $0x8] sm:$0xff] }
 0x247   : > { %6861 = vmatmul.msk.f32.gmra.mxu0 %vm880_vm1, %v6835_v46  ;;  %v2435_v46 = vld [vmem:[%s11317_s19 + $0x38] sm:$0xff] }
 0x249   : > { %v9130_v36 = vpop.f32.mrf.mxu3  ;;  %v9181_v59 = vpop.f32.mrf.mxu1 }
 0x24d   : > { %v1912_v39 = vpop.f32.mrf.mxu2 }
 0x24e   : > { %6748 = vmatmul.msk.f32.gmra.mxu3 %vm1028_vm2, %v1912_v39  ;;  %v2161_v39 = vld [vmem:[#allocation2 + $0x10] sm:$0xff] }
 0x24f   : > { %2202 = vmatpush.msra.mxu2 %v2161_v39  ;;  %6862 = vmatmul.msk.f32.gmra.mxu0 %vm880_vm1, %v6836_v51  ;;  %v1127_v51 = vadd.f32 %v8976_v28, %v8735_v47  ;;  %v1130_v47 = vadd.f32 %v8995_v38, %v8751_v52  ;;  %v2433_v28 = vld [vmem:[%s11317_s19 + $0x28] sm:$0xff] }
 0x251   : > { %v9143_v44 = vpop.f32.mrf.mxu3  ;;  %v9199_v18 = vpop.f32.mrf.mxu1  ;;  %2203 = vmatpush.msra.mxu2 %v2160_v50 }
 0x253   : > { %2204 = vmatpush.msra.mxu2 %v2159_v19 }
 0x255   : > { %v1915_v48 = vpop.f32.mrf.mxu2  ;;  %2888 = vmatpush.msrb.mxu2 %v2435_v46 }
 0x256   : > { %6749 = vmatmul.msk.f32.gmra.mxu3 %vm1028_vm2, %v1915_v48 }
 0x257   : > { %6863 = vmatmul.msk.f32.gmra.mxu0 %vm880_vm1, %v6837_v58  ;;  %v2244_v58 = vld [vmem:[%s11316_s23 + $0x40] sm:$0xff] }
 0x259   : > { %v1409_v0 = vpop.f32.mrf.mxu3  ;;  %v9219_v32 = vpop.f32.mrf.mxu1 }
 0x25a   : > { %v9161_v5 = vadd.f32 %v1409_v0, %v1284_v57  ;;  %v2569_v0 = vpop.f32.mrf.mxu0 }
 0x25b   : > { %6879 = vmatmul.msk.f32.gmra.mxu1 %vm1028_vm2, %v2569_v0 }
 0x25d   : > { %v1918_v55 = vpop.f32.mrf.mxu2 }
 0x25e   : > { %6750 = vmatmul.msk.f32.gmra.mxu3 %vm1028_vm2, %v1918_v55 }
 0x25f   : > { %6864 = vmatmul.msk.f32.gmra.mxu0 %vm880_vm1, %v6838_v20 }
 0x261   : > { %v1412_v62 = vpop.f32.mrf.mxu3  ;;  %v9235_v43 = vpop.f32.mrf.mxu1 }
 0x262   : > { %v9178_v3 = vadd.f32 %v1412_v62, %v1285_v56  ;;  %v2572_v62 = vpop.f32.mrf.mxu0 }
 0x263   : > { %6880 = vmatmul.msk.f32.gmra.mxu1 %vm1028_vm2, %v2572_v62  ;;  %v2434_v62 = vld [vmem:[%s11317_s19 + $0x30] sm:$0xff] }
 0x264   : > { %2889 = vmatpush.msrb.mxu2 %v2434_v62 }
 0x265   : > { %v1921_v61 = vpop.f32.mrf.mxu2 }
 0x266   : > { %6751 = vmatmul.msk.f32.gmra.mxu3 %vm1028_vm2, %v1921_v61  ;;  %2890 = vmatpush.msrb.mxu2 %v2433_v28 }
 0x269   : > { %v9192_v29 = vpop.f32.mrf.mxu3  ;;  %v9247_v57 = vpop.f32.mrf.mxu1 }
 0x26e   : > { %6790 = vmatmul.msk.f32.vlgmr.msra.gmra.mxu3 %vm880_vm1, %v2236_v12  ;;  %v2575_v12 = vpop.f32.mrf.mxu0 }
 0x26f   : > { %7117 = vmatpush.msk.msra.mxu3 %vm902_vm0, %v9075_v11  ;;  %6881 = vmatmul.msk.f32.gmra.mxu1 %vm1028_vm2, %v2575_v12 }
 0x271   : > { %v9211_v22 = vpop.f32.mrf.mxu3  ;;  %3871 = vmatpush.msra.mxu3 %v9083_v13  ;;  %v9260_v56 = vpop.f32.mrf.mxu1 }
 0x273   : > { %3872 = vmatpush.msra.mxu3 %v9089_v16 }
 0x275   : > { %3873 = vmatpush.msra.mxu3 %v9102_v23 }
 0x276   : > { %6791 = vmatmul.msk.f32.gmra.mxu3 %vm880_vm1, %v2237_v31  ;;  %v2578_v39 = vpop.f32.mrf.mxu0 }
 0x277   : > { %3874 = vmatpush.msra.mxu3 %v9108_v26  ;;  %6882 = vmatmul.msk.f32.gmra.mxu1 %vm1028_vm2, %v2578_v39  ;;  %v2245_v39 = vld [vmem:[%s11316_s23 + $0x48] sm:$0xff] }
 0x279   : > { %v9229_v40 = vpop.f32.mrf.mxu3  ;;  %3875 = vmatpush.msra.mxu3 %v9114_v30  ;;  %v9273_v8 = vpop.f32.mrf.mxu1 }
 0x27b   : > { %3876 = vmatpush.msra.mxu3 %v9127_v35 }
 0x27e   : > { %6792 = vmatmul.msk.f32.gmra.mxu3 %vm880_vm1, %v2238_v42  ;;  %v6839_v42 = vld [vmem:[%s11316_s23 + $0x188] sm:$0xf]  ;;  %v2581_v50 = vpop.f32.mrf.mxu0 }
 0x27f   : > { %6865 = vmatmul.msk.f32.gmra.mxu0 %vm880_vm1, %v6839_v42  ;;  %6883 = vmatmul.msk.f32.gmra.mxu1 %vm1028_vm2, %v2581_v50 }
 0x281   : > { %v1687_v48 = vpop.f32.mrf.mxu3  ;;  %v2113_v34 = vpop.f32.mrf.mxu1 }
 0x286   : > { %6793 = vmatmul.msk.f32.gmra.mxu3 %vm880_vm1, %v2239_v49  ;;  %v2243_v49 = vld [vmem:[%s11316_s23 + $0x38] sm:$0xff]  ;;  %v2584_v19 = vpop.f32.mrf.mxu0 }
 0x287   : > { %6884 = vmatmul.msk.f32.gmra.mxu1 %vm1028_vm2, %v2584_v19 }
 0x289   : > { %v9255_v55 = vpop.f32.mrf.mxu3  ;;  %v2116_v0 = vpop.f32.mrf.mxu1 }
 0x28e   : > { %6794 = vmatmul.msk.f32.gmra.mxu3 %vm880_vm1, %v2240_v21 }
 0x291   : > { %v9268_v61 = vpop.f32.mrf.mxu3  ;;  %v2119_v12 = vpop.f32.mrf.mxu1 }
 0x296   : > { %6795 = vmatmul.msk.f32.gmra.mxu3 %vm880_vm1, %v2241_v7  ;;  %v1282_v7 = vadd.f32 %v8931_v63, %v1127_v51  ;;  %v9341_v51 = vld [vmem:[%s11318_s11] ss:$0 sm:$0xff]  ;;  %s9589_s11 = scalar_lea.vmem %s11268_s21, %s7561_s29  ;;  %s7562_s29 = smul.u32 200, %s8324_s24 }
 0x298   : > { %v1424_v20 = vadd.f32 %v9130_v36, %v1282_v7  ;;  %v1283_v36 = vadd.f32 %v8948_v14, %v1130_v47  ;;  %v2431_v47 = vld [vmem:[%s11317_s19 + $0x18] sm:$0xff]  ;;  %s11086_s4 = scalar_lea.vmem %s11269_s22, %s7562_s29 }
 0x299   : > { %v9281_v31 = vpop.f32.mrf.mxu3  ;;  %v9328_v46 = vpop.f32.mrf.mxu1 }
 0x29a   : > { %v1566_v63 = vadd.f32 %v9048_v53, %v1424_v20  ;;  %v1425_v52 = vadd.f32 %v9143_v44, %v1283_v36  ;;  %v2432_v53 = vld [vmem:[%s11317_s19 + $0x20] sm:$0xff]  ;;  %v2246_v44 = vld [vmem:[%s11316_s23 + $0x50] sm:$0xff] }
 0x29b   : > { %2891 = vmatpush.msrb.mxu2 %v2432_v53 }
 0x29c   : > { %v1708_v42 = vadd.f32 %v1687_v48, %v1566_v63  ;;  %v1567_v14 = vadd.f32 %v9064_v60, %v1425_v52  ;;  %v2247_v63 = vld [vmem:[%s11316_s23 + $0x58] sm:$0xff] }
 0x29d   : > { %2892 = vmatpush.msrb.mxu2 %v2431_v47  ;;  %v1145_v47 = vadd.f32 %v9105_v25, %v8839_v24 }
 0x29e   : > { %6796 = vmatmul.msk.f32.gmra.mxu3 %vm880_vm1, %v2242_v33  ;;  %v1850_v38 = vadd.f32 %v9181_v59, %v1708_v42  ;;  %v1709_v59 = vadd.f32 %v9255_v55, %v1567_v14  ;;  %v1568_v55 = vadd.f32 %v9086_v15, %v9161_v5  ;;  %v1139_v15 = vadd.f32 %v9050_v54, %v8799_v10 }
 0x29f   : > { %v1288_v24 = vadd.f32 %v9040_v4, %v1145_v47 }
 0x2a0   : > { %v1851_v19 = vadd.f32 %v9199_v18, %v1709_v59  ;;  %v1286_v10 = vadd.f32 %v9004_v41, %v1139_v15  ;;  %v2429_v41 = vld [vmem:[%s11317_s19 + $0x8] sm:$0xff] }
 0x2a1   : > { %v9292_v45 = vpop.f32.mrf.mxu3  ;;  %v9347_v7 = vpop.f32.mrf.mxu1 }
 0x2a6   : > { %6797 = vmatmul.msk.f32.gmra.mxu3 %vm880_vm1, %v2243_v49  ;;  %v2587_v49 = vpop.f32.mrf.mxu0 }
 0x2a7   : > { %6885 = vmatmul.msk.f32.gmra.mxu1 %vm1028_vm2, %v2587_v49 }
 0x2a9   : > { %v9304_v21 = vpop.f32.mrf.mxu3  ;;  %v9366_v49 = vpop.f32.mrf.mxu1 }
 0x2ae   : > { %6798 = vmatmul.msk.f32.gmra.mxu3 %vm880_vm1, %v2244_v58  ;;  %v2590_v58 = vpop.f32.mrf.mxu0 }
 0x2af   : > { %6886 = vmatmul.msk.f32.gmra.mxu1 %vm1028_vm2, %v2590_v58  ;;  %v2428_v58 = vld [vmem:[%s11317_s19] sm:$0xff] }
 0x2b1   : > { %v9321_v33 = vpop.f32.mrf.mxu3 }
 0x2b6   : > { %6799 = vmatmul.msk.f32.gmra.mxu3 %vm880_vm1, %v2245_v39  ;;  %v1710_v39 = vadd.f32 %v9268_v61, %v1568_v55  ;;  %v2593_v36 = vpop.f32.mrf.mxu0  ;;  %v2430_v61 = vld [vmem:[%s11317_s19 + $0x10] sm:$0xff] }
 0x2b7   : > { %6887 = vmatmul.msk.f32.gmra.mxu1 %vm1028_vm2, %v2593_v36  ;;  %2893 = vmatpush.msrb.mxu2 %v2430_v61 }
 0x2b8   : > { %v1852_v5 = vadd.f32 %v9219_v32, %v1710_v39 }
 0x2b9   : > { %v1971_v50 = vpop.f32.mrf.mxu3  ;;  %2894 = vmatpush.msrb.mxu2 %v2429_v41 }
 0x2ba   : > { %v1992_v48 = vadd.f32 %v1971_v50, %v1850_v38  ;;  %v1569_v38 = vadd.f32 %v9111_v27, %v9178_v3  ;;  %v2248_v50 = vld [vmem:[%s11316_s23 + $0x60] sm:$0xff]  ;;  %v1142_v27 = vadd.f32 %v9070_v9, %v8819_v17  ;;  %v2249_v17 = vld [vmem:[%s11316_s23 + $0x68] sm:$0xff] }
 0x2bb   : > { %2895 = vmatpush.msrb.mxu2 %v2428_v58 }
 0x2bc   : > { %v2134_v62 = vadd.f32 %v2113_v34, %v1992_v48  ;;  %v1711_v54 = vadd.f32 %v9281_v31, %v1569_v38  ;;  %v1428_v48 = vadd.f32 %v9192_v29, %v1286_v10  ;;  %v1287_v9 = vadd.f32 %v9024_v1, %v1142_v27 }
 0x2be   : > { %v2145_v60 = vadd.f32 %v9341_v51, %v2134_v62  ;;  %6800 = vmatmul.msk.f32.gmra.mxu3 %vm880_vm1, %v2246_v44  ;;  %v2596_v14 = vpop.f32.mrf.mxu0  ;;  %v1853_v3 = vadd.f32 %v9235_v43, %v1711_v54  ;;  %v1570_v62 = vadd.f32 %v9132_v37, %v1428_v48  ;;  %v1429_v37 = vadd.f32 %v9211_v22, %v1287_v9  ;;  %v7066_v22 = vld [vmem:[%s11317_s19 + $0xf8] sm:$0xff]  ;;  %v7065_v48 = vld [vmem:[%s11317_s19 + $0xf0] sm:$0xff]  ;;  %v7064_v9 = vld [vmem:[%s11317_s19 + $0xe8] sm:$0xff] }
 0x2bf   : > { %6888 = vmatmul.msk.f32.gmra.mxu1 %vm1028_vm2, %v2596_v14 }
 0x2c0   : > { %v2152_v20 = vmax.f32 %v2145_v60, 0.0  ;;  %v1712_v43 = vadd.f32 %v9292_v45, %v1570_v62  ;;  %v1571_v45 = vadd.f32 %v9147_v2, %v1429_v37  ;;  %v1430_v2 = vadd.f32 %v9229_v40, %v1288_v24  ;;  %v2255_v62 = vld [vmem:[%s11316_s23 + $0x98] sm:$0xff] }
 0x2c1   : > { %v1974_v28 = vpop.f32.mrf.mxu3  ;;  %v2259_v24 = vld [vmem:[%s11316_s23 + $0xb8] sm:$0xff] }
 0x2c2   : > { %v1993_v34 = vadd.f32 %v1974_v28, %v1851_v19  ;;  %6782 = vmatmul.msk.f32.vlgmr.msra.gmra.mxu2 %vm2167_vm3, %v2152_v20  ;;  %v1854_v28 = vadd.f32 %v9247_v57, %v1712_v43  ;;  %v1713_v25 = vadd.f32 %v9304_v21, %v1571_v45  ;;  %v1572_v4 = vadd.f32 %v9166_v6, %v1430_v2  ;;  %v2256_v43 = vld [vmem:[%s11316_s23 + $0xa0] sm:$0xff] }
 0x2c3   : > { %3651 = vmatpush.msra.mxu2 %v7066_v22  ;;  %v7009_v2 = vld [vmem:[%s11316_s23 + $0x260] sm:$0xff] }
 0x2c4   : > { %v2135_v18 = vadd.f32 %v2116_v0, %v1993_v34  ;;  %v1855_v36 = vadd.f32 %v9260_v56, %v1713_v25  ;;  %v1714_v40 = vadd.f32 %v9321_v33, %v1572_v4  ;;  %v2252_v33 = vld [vmem:[%s11316_s23 + $0x80] sm:$0xff]  ;;  %v6924_v4 = vld [vmem:[%s11316_s23 + $0x190] sm:$0xff] }
 0x2c5   : > { %3652 = vmatpush.msra.mxu2 %v7065_v48  ;;  %v7063_v25 = vld [vmem:[%s11317_s19 + $0xe0] sm:$0xff]  ;;  %v7014_v48 = vld [vmem:[%s11316_s23 + $0x288] sm:$0xff] }
 0x2c6   : > { %v2146_v42 = vadd.f32 %v9341_v51, %v2135_v18  ;;  %6801 = vmatmul.msk.f32.gmra.mxu3 %vm880_vm1, %v2247_v63  ;;  %v2599_v19 = vpop.f32.mrf.mxu0  ;;  %v2250_v63 = vld [vmem:[%s11316_s23 + $0x70] sm:$0xff]  ;;  %v1856_v6 = vadd.f32 %v9273_v8, %v1714_v40 }
 0x2c7   : > { %6889 = vmatmul.msk.f32.gmra.mxu1 %vm1028_vm2, %v2599_v19  ;;  %3653 = vmatpush.msra.mxu2 %v7064_v9  ;;  %v7011_v40 = vld [vmem:[%s11316_s23 + $0x270] sm:$0xff] }
 0x2c8   : > { %v2153_v52 = vmax.f32 %v2146_v42, 0.0 }
 0x2c9   : > { %v1977_v0 = vpop.f32.mrf.mxu3  ;;  %3654 = vmatpush.msra.mxu2 %v7063_v25 }
 0x2ca   : > { %v1994_v53 = vadd.f32 %v1977_v0, %v1852_v5  ;;  %6783 = vmatmul.msk.f32.gmra.mxu2 %vm2167_vm3, %v2153_v52 }
 0x2cc   : > { %v2136_v32 = vadd.f32 %v2119_v12, %v1994_v53  ;;  %v2131_v12 = vpop.f32.mrf.mxu1 }
 0x2ce   : > { %v2147_v44 = vadd.f32 %v9341_v51, %v2136_v32  ;;  %6802 = vmatmul.msk.f32.gmra.mxu3 %vm880_vm1, %v2248_v50  ;;  %v2602_v39 = vpop.f32.mrf.mxu0 }
 0x2cf   : > { %6890 = vmatmul.msk.f32.gmra.mxu1 %vm1028_vm2, %v2602_v39 }
 0x2d0   : > { %v2154_v59 = vmax.f32 %v2147_v44, 0.0  ;;  %v2253_v44 = vld [vmem:[%s11316_s23 + $0x88] sm:$0xff] }
 0x2d1   : > { %v1980_v31 = vpop.f32.mrf.mxu3 }
 0x2d2   : > { %v1995_v29 = vadd.f32 %v1980_v31, %v1853_v3  ;;  %6784 = vmatmul.msk.f32.gmra.mxu2 %vm2167_vm3, %v2154_v59  ;;  %v2254_v59 = vld [vmem:[%s11316_s23 + $0x90] sm:$0xff] }
 0x2d4   : > { %v2137_v60 = vadd.f32 %v9328_v46, %v1995_v29  ;;  %v9410_v34 = vpop.f32.mrf.mxu1 }
 0x2d6   : > { %v2148_v20 = vadd.f32 %v9341_v51, %v2137_v60  ;;  %6803 = vmatmul.msk.f32.gmra.mxu3 %vm880_vm1, %v2249_v17  ;;  %v2605_v61 = vpop.f32.mrf.mxu0 }
 0x2d7   : > { %6891 = vmatmul.msk.f32.gmra.mxu1 %vm1028_vm2, %v2605_v61 }
 0x2d8   : > { %v2155_v55 = vmax.f32 %v2148_v20, 0.0  ;;  %v2257_v20 = vld [vmem:[%s11316_s23 + $0xa8] sm:$0xff] }
 0x2d9   : > { %v1983_v1 = vpop.f32.mrf.mxu3 }
 0x2da   : > { %v1996_v46 = vadd.f32 %v1983_v1, %v1854_v28  ;;  %6785 = vmatmul.msk.f32.gmra.mxu2 %vm2167_vm3, %v2155_v55  ;;  %v2258_v1 = vld [vmem:[%s11316_s23 + $0xb0] sm:$0xff] }
 0x2dc   : > { %v2138_v57 = vadd.f32 %v9347_v7, %v1996_v46  ;;  %v9428_v5 = vpop.f32.mrf.mxu1  ;;  %v2251_v7 = vld [vmem:[%s11316_s23 + $0x78] sm:$0xff] }
 0x2de   : > { %v2149_v18 = vadd.f32 %v9341_v51, %v2138_v57  ;;  %6804 = vmatmul.msk.f32.gmra.mxu3 %vm880_vm1, %v2250_v63  ;;  %v2608_v10 = vpop.f32.mrf.mxu0  ;;  %v7008_v63 = vld [vmem:[%s11316_s23 + $0x258] sm:$0xff] }
 0x2df   : > { %6892 = vmatmul.msk.f32.gmra.mxu1 %vm1028_vm2, %v2608_v10 }
 0x2e0   : > { %v2156_v42 = vmax.f32 %v2149_v18, 0.0  ;;  %v2260_v18 = vld [vmem:[%s11316_s23 + $0xc0] sm:$0xf] }
 0x2e1   : > { %v1986_v15 = vpop.f32.mrf.mxu3 }
 0x2e2   : > { %v1997_v21 = vadd.f32 %v1986_v15, %v1855_v36  ;;  %6786 = vmatmul.msk.f32.gmra.mxu2 %vm2167_vm3, %v2156_v42  ;;  %v7010_v15 = vld [vmem:[%s11316_s23 + $0x268] sm:$0xff] }
 0x2e4   : > { %v2139_v52 = vadd.f32 %v9366_v49, %v1997_v21  ;;  %v9442_v50 = vpop.f32.mrf.mxu1 }
 0x2e6   : > { %v2150_v56 = vadd.f32 %v9341_v51, %v2139_v52  ;;  %6805 = vmatmul.msk.f32.gmra.mxu3 %vm880_vm1, %v2251_v7  ;;  %v2611_v27 = vpop.f32.mrf.mxu0  ;;  %v6925_v52 = vld [vmem:[%s11316_s23 + $0x198] sm:$0xff] }
 0x2e7   : > { %6893 = vmatmul.msk.f32.gmra.mxu1 %vm1028_vm2, %v2611_v27 }
 0x2e8   : > { %v2157_v0 = vmax.f32 %v2150_v56, 0.0 }
 0x2e9   : > { %v1989_v38 = vpop.f32.mrf.mxu3 }
 0x2ea   : > { %v1998_v53 = vadd.f32 %v1989_v38, %v1856_v6  ;;  %6787 = vmatmul.msk.f32.gmra.mxu2 %vm2167_vm3, %v2157_v0  ;;  %v7013_v0 = vld [vmem:[%s11316_s23 + $0x280] sm:$0xff]  ;;  %v6927_v38 = vld [vmem:[%s11316_s23 + $0x1a8] sm:$0xff] }
 0x2ec   : > { %v2140_v49 = vadd.f32 %v2131_v12, %v1998_v53  ;;  %v9451_v14 = vpop.f32.mrf.mxu1 }
 0x2ee   : > { %v2151_v54 = vadd.f32 %v9341_v51, %v2140_v49  ;;  %6806 = vmatmul.msk.f32.gmra.mxu3 %vm880_vm1, %v2252_v33  ;;  %v2614_v41 = vpop.f32.mrf.mxu0 }
 0x2ef   : > { %6894 = vmatmul.msk.f32.gmra.mxu1 %vm1028_vm2, %v2614_v41 }
 0x2f0   : > { %v2158_v8 = vmax.f32 %v2151_v54, 0.0 }
 0x2f1   : > { %v2353_v32 = vpop.f32.mrf.mxu3 }
 0x2f2   : > { %6788 = vmatmul.msk.f32.gmra.mxu2 %vm2167_vm3, %v2158_v8 }
 0x2f4   : > { %v9462_v3 = vpop.f32.mrf.mxu1 }
 0x2f6   : > { %6807 = vmatmul.msk.f32.gmra.mxu3 %vm880_vm1, %v2253_v44  ;;  %v2617_v29 = vpop.f32.mrf.mxu0  ;;  %v6928_v44 = vld [vmem:[%s11316_s23 + $0x1b0] sm:$0xff] }
 0x2f7   : > { %6895 = vmatmul.msk.f32.gmra.mxu1 %vm1028_vm2, %v2617_v29  ;;  %v6929_v29 = vld [vmem:[%s11316_s23 + $0x1b8] sm:$0xff] }
 0x2f9   : > { %v2356_v51 = vpop.f32.mrf.mxu3 }
 0x2fa   : > { %6899 = vmatmul.msk.f32.vlgmr.msrb.gmra.mxu2 %vm1028_vm2, %v2353_v32 }
 0x2fc   : > { %v9470_v12 = vpop.f32.mrf.mxu1 }
 0x2fe   : > { %6808 = vmatmul.msk.f32.gmra.mxu3 %vm880_vm1, %v2254_v59  ;;  %v2620_v60 = vpop.f32.mrf.mxu0 }
 0x2ff   : > { %6896 = vmatmul.msk.f32.gmra.mxu1 %vm1028_vm2, %v2620_v60 }
 0x301   : > { %v2359_v31 = vpop.f32.mrf.mxu3 }
 0x302   : > { %6900 = vmatmul.msk.f32.gmra.mxu2 %vm1028_vm2, %v2356_v51 }
 0x304   : > { %v9478_v17 = vpop.f32.mrf.mxu1 }
 0x306   : > { %6809 = vmatmul.msk.f32.gmra.mxu3 %vm880_vm1, %v2255_v62  ;;  %v2623_v47 = vpop.f32.mrf.mxu0 }
 0x307   : > { %6897 = vmatmul.msk.f32.gmra.mxu1 %vm1028_vm2, %v2623_v47 }
 0x309   : > { %v2362_v58 = vpop.f32.mrf.mxu3 }
 0x30a   : > { %6901 = vmatmul.msk.f32.gmra.mxu2 %vm1028_vm2, %v2359_v31 }
 0x30c   : > { %v9489_v37 = vpop.f32.mrf.mxu1 }
 0x30e   : > { %6810 = vmatmul.msk.f32.gmra.mxu3 %vm880_vm1, %v2256_v43  ;;  %v2626_v45 = vpop.f32.mrf.mxu0 }
 0x30f   : > { %6898 = vmatmul.msk.f32.gmra.mxu1 %vm1028_vm2, %v2626_v45 }
 0x311   : > { %v2365_v19 = vpop.f32.mrf.mxu3 }
 0x312   : > { %6902 = vmatmul.msk.f32.gmra.mxu2 %vm1028_vm2, %v2362_v58  ;;  %v7015_v58 = vld [vmem:[%s11316_s23 + $0x290] sm:$0xff] }
 0x314   : > { %v9497_v55 = vpop.f32.mrf.mxu1 }
 0x316   : > { %6811 = vmatmul.msk.f32.gmra.mxu3 %vm880_vm1, %v2257_v20 }
 0x317   : > { %7034 = vmatmul.msk.f32.vlgmr.msra.gmra.mxu1 %vm880_vm1, %v7008_v63  ;;  %v7061_v63 = vld [vmem:[%s11317_s19 + $0xd0] sm:$0xff] }
 0x318   : > { %7369 = vmatpush.msk.msra.mxu1 %vm902_vm0, %v9075_v11 }
 0x319   : > { %v2368_v28 = vpop.f32.mrf.mxu3 }
 0x31a   : > { %6903 = vmatmul.msk.f32.gmra.mxu2 %vm1028_vm2, %v2365_v19  ;;  %5053 = vmatpush.msra.mxu1 %v9083_v13 }
 0x31c   : > { %v9505_v22 = vpop.f32.mrf.mxu1  ;;  %5054 = vmatpush.msra.mxu1 %v9089_v16 }
 0x31e   : > { %6812 = vmatmul.msk.f32.gmra.mxu3 %vm880_vm1, %v2258_v1  ;;  %5055 = vmatpush.msra.mxu1 %v9102_v23  ;;  %v7016_v1 = vld [vmem:[%s11316_s23 + $0x298] sm:$0xff] }
 0x31f   : > { %7035 = vmatmul.msk.f32.gmra.mxu1 %vm880_vm1, %v7009_v2 }
 0x320   : > { %5056 = vmatpush.msra.mxu1 %v9108_v26 }
 0x321   : > { %v2371_v46 = vpop.f32.mrf.mxu3 }
 0x322   : > { %6904 = vmatmul.msk.f32.gmra.mxu2 %vm1028_vm2, %v2368_v28  ;;  %5057 = vmatpush.msra.mxu1 %v9114_v30  ;;  %v6930_v28 = vld [vmem:[%s11316_s23 + $0x1c0] sm:$0xff] }
 0x324   : > { %v9522_v39 = vpop.f32.mrf.mxu1  ;;  %5058 = vmatpush.msra.mxu1 %v9127_v35 }
 0x326   : > { %6813 = vmatmul.msk.f32.gmra.mxu3 %vm880_vm1, %v2259_v24 }
 0x327   : > { %7036 = vmatmul.msk.f32.gmra.mxu1 %vm880_vm1, %v7010_v15 }
 0x329   : > { %v2374_v57 = vpop.f32.mrf.mxu3 }
 0x32a   : > { %6905 = vmatmul.msk.f32.gmra.mxu2 %vm1028_vm2, %v2371_v46 }
 0x32c   : > { %v9537_v42 = vpop.f32.mrf.mxu1 }
 0x32e   : > { %6814 = vmatmul.msk.f32.gmra.mxu3 %vm880_vm1, %v2260_v18  ;;  %v7017_v18 = vld [vmem:[%s11316_s23 + $0x2a0] sm:$0xff] }
 0x32f   : > { %7037 = vmatmul.msk.f32.gmra.mxu1 %vm880_vm1, %v7011_v40 }
 0x331   : > { %v2377_v36 = vpop.f32.mrf.mxu3 }
 0x332   : > { %6906 = vmatmul.msk.f32.gmra.mxu2 %vm1028_vm2, %v2374_v57 }
 0x334   : > { %v9552_v7 = vpop.f32.mrf.mxu1 }
 0x336   : > { %6950 = vmatmul.msk.f32.vlgmr.msrb.gmra.mxu3 %vm880_vm1, %v6924_v4 }
 0x337   : > { %7285 = vmatpush.msk.msrb.mxu3 %vm902_vm0, %v9075_v11 }
 0x339   : > { %v2380_v21 = vpop.f32.mrf.mxu3  ;;  %4659 = vmatpush.msrb.mxu3 %v9083_v13  ;;  %v7062_v13 = vld [vmem:[%s11317_s19 + $0xd8] sm:$0xff] }
 0x33a   : > { %6907 = vmatmul.msk.f32.gmra.mxu2 %vm1028_vm2, %v2377_v36  ;;  %v6931_v36 = vld [vmem:[%s11316_s23 + $0x1c8] sm:$0xff] }
 0x33b   : > { %4660 = vmatpush.msrb.mxu3 %v9089_v16  ;;  %v9573_v16 = vld [vmem:[%s11319_s2] ss:$0 sm:$0xff]  ;;  %3655 = vmatpush.msra.mxu2 %v7062_v13 }
 0x33c   : > { %v9575_v61 = vpop.f32.mrf.mxu1 }
 0x33d   : > { %4661 = vmatpush.msrb.mxu3 %v9102_v23  ;;  %v7012_v23 = vld [vmem:[%s11316_s23 + $0x278] sm:$0xff]  ;;  %3656 = vmatpush.msra.mxu2 %v7061_v63 }
 0x33e   : > { %6951 = vmatmul.msk.f32.gmra.mxu3 %vm880_vm1, %v6925_v52  ;;  %7038 = vmatmul.msk.f32.gmra.mxu1 %vm880_vm1, %v7012_v23  ;;  %v7018_v23 = vld [vmem:[%s11316_s23 + $0x2a8] sm:$0xff] }
 0x33f   : > { %4662 = vmatpush.msrb.mxu3 %v9108_v26  ;;  %v6926_v26 = vld [vmem:[%s11316_s23 + $0x1a0] sm:$0xff] }
 0x341   : > { %v2383_v11 = vpop.f32.mrf.mxu3  ;;  %4663 = vmatpush.msrb.mxu3 %v9114_v30 }
 0x342   : > { %6908 = vmatmul.msk.f32.gmra.mxu2 %vm1028_vm2, %v2380_v21  ;;  %v7060_v21 = vld [vmem:[%s11317_s19 + $0xc8] sm:$0xff] }
 0x343   : > { %4664 = vmatpush.msrb.mxu3 %v9127_v35  ;;  %3657 = vmatpush.msra.mxu2 %v7060_v21 }
 0x344   : > { %v9597_v35 = vpop.f32.mrf.mxu1 }
 0x345   : > { %v2206_v30 = vpop.f32.mrf.mxu2 }
 0x346   : > { %v2207_v56 = vadd.f32 %v9573_v16, %v2206_v30  ;;  %6952 = vmatmul.msk.f32.gmra.mxu3 %vm880_vm1, %v6926_v26  ;;  %7039 = vmatmul.msk.f32.gmra.mxu1 %vm880_vm1, %v7013_v0  ;;  %v6932_v26 = vld [vmem:[%s11316_s23 + $0x1d0] sm:$0xff] }
 0x348   : > { %2228 = vst.msk [vmem:[%s9589_s11] sm:$0xff] %vm2227_vm4, %v2207_v56  ;;  %v5984_v49 = vsel %vm2227_vm4, %v2207_v56, 0.0 }
 0x349   : > { %v2386_v6 = vpop.f32.mrf.mxu3 }
 0x34a   : > { %6909 = vmatmul.msk.f32.gmra.mxu2 %vm1028_vm2, %v2383_v11 }
 0x34c   : > { %v9613_v32 = vpop.f32.mrf.mxu1 }
 0x34d   : > { %v2209_v53 = vpop.f32.mrf.mxu2 }
 0x34e   : > { %v2210_v33 = vadd.f32 %v9573_v16, %v2209_v53  ;;  %6953 = vmatmul.msk.f32.gmra.mxu3 %vm880_vm1, %v6927_v38  ;;  %7040 = vmatmul.msk.f32.gmra.mxu1 %vm880_vm1, %v7014_v48  ;;  %v6934_v48 = vld [vmem:[%s11316_s23 + $0x1e0] sm:$0xff] }
 0x350   : > { %2229 = vst.msk [vmem:[%s9589_s11 + $0x8] sm:$0xff] %vm2227_vm4, %v2210_v33  ;;  %v5985_v10 = vsel %vm2227_vm4, %v2210_v33, 0.0  ;;  %v7019_v33 = vld [vmem:[%s11316_s23 + $0x2b0] sm:$0xff] }
 0x351   : > { %v5986_v54 = vadd.f32 %v5985_v10, %v5984_v49  ;;  %v2389_v8 = vpop.f32.mrf.mxu3  ;;  %v6933_v49 = vld [vmem:[%s11316_s23 + $0x1d8] sm:$0xff] }
 0x352   : > { %6910 = vmatmul.msk.f32.gmra.mxu2 %vm1028_vm2, %v2386_v6 }
 0x354   : > { %v9628_v62 = vpop.f32.mrf.mxu1 }
 0x355   : > { %v2212_v27 = vpop.f32.mrf.mxu2 }
 0x356   : > { %v2213_v51 = vadd.f32 %v9573_v16, %v2212_v27  ;;  %6954 = vmatmul.msk.f32.gmra.mxu3 %vm880_vm1, %v6928_v44  ;;  %7041 = vmatmul.msk.f32.gmra.mxu1 %vm880_vm1, %v7015_v58  ;;  %v6981_v58 = vld [vmem:[%s11317_s19 + $0xb0] sm:$0xff] }
 0x358   : > { %2230 = vst.msk [vmem:[%s9589_s11 + $0x10] sm:$0xff] %vm2227_vm4, %v2213_v51  ;;  %v5987_v59 = vsel %vm2227_vm4, %v2213_v51, 0.0  ;;  %v7059_v51 = vld [vmem:[%s11317_s19 + $0xc0] sm:$0xff] }
 0x359   : > { %v5988_v41 = vadd.f32 %v5987_v59, %v5986_v54  ;;  %v2392_v31 = vpop.f32.mrf.mxu3  ;;  %3658 = vmatpush.msra.mxu2 %v7059_v51 }
 0x35a   : > { %6911 = vmatmul.msk.f32.gmra.mxu2 %vm1028_vm2, %v2389_v8  ;;  %v7020_v8 = vld [vmem:[%s11316_s23 + $0x2b8] sm:$0xff] }
 0x35c   : > { %v9643_v47 = vpop.f32.mrf.mxu1 }
 0x35d   : > { %v2215_v9 = vpop.f32.mrf.mxu2 }
 0x35e   : > { %v2216_v43 = vadd.f32 %v9573_v16, %v2215_v9  ;;  %6955 = vmatmul.msk.f32.gmra.mxu3 %vm880_vm1, %v6929_v29  ;;  %7042 = vmatmul.msk.f32.gmra.mxu1 %vm880_vm1, %v7016_v1  ;;  %v6935_v29 = vld [vmem:[%s11316_s23 + $0x1e8] sm:$0xff] }
 0x35f   : > { %v7022_v1 = vld [vmem:[%s11316_s23 + $0x2c8] sm:$0xff] }
 0x360   : > { %2231 = vst.msk [vmem:[%s9589_s11 + $0x18] sm:$0xff] %vm2227_vm4, %v2216_v43  ;;  %v5989_v60 = vsel %vm2227_vm4, %v2216_v43, 0.0  ;;  %v6980_v43 = vld [vmem:[%s11317_s19 + $0xa8] sm:$0xff] }
 0x361   : > { %v5990_v19 = vadd.f32 %v5989_v60, %v5988_v41  ;;  %v2395_v20 = vpop.f32.mrf.mxu3  ;;  %v6982_v41 = vld [vmem:[%s11317_s19 + $0xb8] sm:$0xff]  ;;  %v6979_v60 = vld [vmem:[%s11317_s19 + $0xa0] sm:$0xff] }
 0x362   : > { %6912 = vmatmul.msk.f32.gmra.mxu2 %vm1028_vm2, %v2392_v31  ;;  %v7021_v31 = vld [vmem:[%s11316_s23 + $0x2c0] sm:$0xff]  ;;  %3257 = vmatpush.msrb.mxu0 %v6982_v41 }
 0x364   : > { %v9661_v2 = vpop.f32.mrf.mxu1  ;;  %3258 = vmatpush.msrb.mxu0 %v6981_v58  ;;  %v6941_v58 = vld [vmem:[%s11316_s23 + $0x218] sm:$0xff] }
 0x365   : > { %v2218_v45 = vpop.f32.mrf.mxu2 }
 0x366   : > { %v2219_v46 = vadd.f32 %v9573_v16, %v2218_v45  ;;  %6956 = vmatmul.msk.f32.gmra.mxu3 %vm880_vm1, %v6930_v28  ;;  %7043 = vmatmul.msk.f32.gmra.mxu1 %vm880_vm1, %v7017_v18  ;;  %v6978_v28 = vld [vmem:[%s11317_s19 + $0x98] sm:$0xff]  ;;  %v6936_v45 = vld [vmem:[%s11316_s23 + $0x1f0] sm:$0xff] }
 0x367   : > { %3259 = vmatpush.msrb.mxu0 %v6980_v43 }
 0x368   : > { %2232 = vst.msk [vmem:[%s9589_s11 + $0x20] sm:$0xff] %vm2227_vm4, %v2219_v46  ;;  %v5991_v24 = vsel %vm2227_vm4, %v2219_v46, 0.0  ;;  %v6977_v46 = vld [vmem:[%s11317_s19 + $0x90] sm:$0xff] }
 0x369   : > { %v5992_v25 = vadd.f32 %v5991_v24, %v5990_v19  ;;  %v2398_v57 = vpop.f32.mrf.mxu3  ;;  %3260 = vmatpush.msrb.mxu0 %v6979_v60  ;;  %v6976_v24 = vld [vmem:[%s11317_s19 + $0x88] sm:$0xff] }
 0x36a   : > { %6913 = vmatmul.msk.f32.gmra.mxu2 %vm1028_vm2, %v2395_v20 }
 0x36b   : > { %3261 = vmatpush.msrb.mxu0 %v6978_v28  ;;  %v7028_v28 = vld [vmem:[%s11316_s23 + $0x2f8] sm:$0xff] }
 0x36c   : > { %v9679_v13 = vpop.f32.mrf.mxu1 }
 0x36d   : > { %v2221_v15 = vpop.f32.mrf.mxu2  ;;  %3262 = vmatpush.msrb.mxu0 %v6977_v46 }
 0x36e   : > { %v2222_v4 = vadd.f32 %v9573_v16, %v2221_v15  ;;  %6957 = vmatmul.msk.f32.gmra.mxu3 %vm880_vm1, %v6931_v36  ;;  %7044 = vmatmul.msk.f32.gmra.mxu1 %vm880_vm1, %v7018_v23  ;;  %v7023_v36 = vld [vmem:[%s11316_s23 + $0x2d0] sm:$0xff]  ;;  %v6937_v15 = vld [vmem:[%s11316_s23 + $0x1f8] sm:$0xff]  ;;  %v6938_v23 = vld [vmem:[%s11316_s23 + $0x200] sm:$0xff] }
 0x36f   : > { %3263 = vmatpush.msrb.mxu0 %v6976_v24 }
 0x370   : > { %2233 = vst.msk [vmem:[%s9589_s11 + $0x28] sm:$0xff] %vm2227_vm4, %v2222_v4  ;;  %v5993_v40 = vsel %vm2227_vm4, %v2222_v4, 0.0 }
 0x371   : > { %v5994_v52 = vadd.f32 %v5993_v40, %v5992_v25  ;;  %v2401_v11 = vpop.f32.mrf.mxu3  ;;  %v6975_v25 = vld [vmem:[%s11317_s19 + $0x80] sm:$0xff] }
 0x372   : > { %6914 = vmatmul.msk.f32.gmra.mxu2 %vm1028_vm2, %v2398_v57  ;;  %3264 = vmatpush.msrb.mxu0 %v6975_v25  ;;  %v7029_v25 = vld [vmem:[%s11316_s23 + $0x300] sm:$0xff] }
 0x374   : > { %v9694_v53 = vpop.f32.mrf.mxu1 }
 0x375   : > { %v2224_v30 = vpop.f32.mrf.mxu2 }
 0x376   : > { %v2225_v56 = vadd.f32 %v9573_v16, %v2224_v30  ;;  %6958 = vmatmul.msk.f32.gmra.mxu3 %vm880_vm1, %v6932_v26  ;;  %7045 = vmatmul.msk.f32.gmra.mxu1 %vm880_vm1, %v7019_v33 }
 0x378   : > { %2235 = vst.msk [vmem:[%s9589_s11 + $0x30] sm:$0x1] %vm2234_vm5, %v2225_v56  ;;  %v5995_v6 = vsel %vm2234_vm5, %v2225_v56, 0.0  ;;  %s849_s11 = sand.u32 1, %s8033_s30  }
 0x379   : > { %v9691_v0 = vadd.f32 %v5995_v6, %v5994_v52  ;;  %v2404_v38 = vpop.f32.mrf.mxu3  ;;  %v7234_v52 = vld [vmem:[%s11317_s19 + $0x178] sm:$0xff]  ;;  %v7025_v6 = vld [vmem:[%s11316_s23 + $0x2e0] sm:$0xff]  ;;  %s850_s24 = scalar_lea.vmem [#allocation16], %s849_s11  ;;  %s6302_s0 = scalar_lea.sflag [#allocation4], %s849_s11 }
 0x37a   : > { %6915 = vmatmul.msk.f32.gmra.mxu2 %vm1028_vm2, %v2401_v11  ;;  %v7024_v11 = vld [vmem:[%s11316_s23 + $0x2d8] sm:$0xff] }
 0x37b   : > { %11320 = vst [vmem:[#allocation30_spill] sm:$0xff] %v9691_v0  ;;  %4439 = vmatpush.msrb.mxu2 %v7234_v52  ;;  %v7232_v52 = vld [vmem:[%s11317_s19 + $0x168] sm:$0xff] }
 0x37c   : > { %v9707_v54 = vpop.f32.mrf.mxu1 }
 0x37d   : > { %v9702_v16 = vpop.f32.mrf.mxu2 }
 0x37e   : > { %6959 = vmatmul.msk.f32.gmra.mxu3 %vm880_vm1, %v6933_v49  ;;  %7046 = vmatmul.msk.f32.gmra.mxu1 %vm880_vm1, %v7020_v8  ;;  %v7026_v8 = vld [vmem:[%s11316_s23 + $0x2e8] sm:$0xff] }
 0x381   : > { %v2407_v10 = vpop.f32.mrf.mxu3 }
 0x382   : > { %6916 = vmatmul.msk.f32.gmra.mxu2 %vm1028_vm2, %v2404_v38  ;;  %v6939_v38 = vld [vmem:[%s11316_s23 + $0x208] sm:$0xff] }
 0x384   : > { %v9723_v59 = vpop.f32.mrf.mxu1 }
 0x385   : > { %v9715_v44 = vpop.f32.mrf.mxu2 }
 0x386   : > { %6960 = vmatmul.msk.f32.gmra.mxu3 %vm880_vm1, %v6934_v48  ;;  %7047 = vmatmul.msk.f32.gmra.mxu1 %vm880_vm1, %v7021_v31  ;;  %v6940_v48 = vld [vmem:[%s11316_s23 + $0x210] sm:$0xff] }
 0x387   : > { %v7233_v31 = vld [vmem:[%s11317_s19 + $0x170] sm:$0xff] }
 0x388   : > { %4440 = vmatpush.msrb.mxu2 %v7233_v31 }
 0x389   : > { %v2410_v27 = vpop.f32.mrf.mxu3 }
 0x38a   : > { %6917 = vmatmul.msk.f32.gmra.mxu2 %vm1028_vm2, %v2407_v10 }
 0x38b   : > { %4441 = vmatpush.msrb.mxu2 %v7232_v52  ;;  %v7092_v52 = vld [vmem:[%s11316_s23 + $0x320] sm:$0xff] }
 0x38c   : > { %v9748_v20 = vpop.f32.mrf.mxu1 }
 0x38d   : > { %v9737_v9 = vpop.f32.mrf.mxu2 }
 0x38e   : > { %6961 = vmatmul.msk.f32.gmra.mxu3 %vm880_vm1, %v6935_v29  ;;  %7048 = vmatmul.msk.f32.gmra.mxu1 %vm880_vm1, %v7022_v1  ;;  %v7027_v29 = vld [vmem:[%s11316_s23 + $0x2f0] sm:$0xff]  ;;  %v6942_v1 = vld [vmem:[%s11316_s23 + $0x220] sm:$0xff] }
 0x391   : > { %v2413_v19 = vpop.f32.mrf.mxu3 }
 0x392   : > { %6918 = vmatmul.msk.f32.gmra.mxu2 %vm1028_vm2, %v2410_v27 }
 0x394   : > { %v9773_v18 = vpop.f32.mrf.mxu1 }
 0x395   : > { %v9762_v63 = vpop.f32.mrf.mxu2 }
 0x396   : > { %6962 = vmatmul.msk.f32.gmra.mxu3 %vm880_vm1, %v6936_v45  ;;  %7049 = vmatmul.msk.f32.gmra.mxu1 %vm880_vm1, %v7023_v36 }
 0x399   : > { %v2416_v57 = vpop.f32.mrf.mxu3 }
 0x39a   : > { %6919 = vmatmul.msk.f32.gmra.mxu2 %vm1028_vm2, %v2413_v19 }
 0x39c   : > { %v3484_v40 = vpop.f32.mrf.mxu1 }
 0x39d   : > { %v9781_v4 = vpop.f32.mrf.mxu2 }
 0x39e   : > { %6963 = vmatmul.msk.f32.gmra.mxu3 %vm880_vm1, %v6937_v15  ;;  %7050 = vmatmul.msk.f32.gmra.mxu1 %vm880_vm1, %v7024_v11  ;;  %v6944_v11 = vld [vmem:[%s11316_s23 + $0x230] sm:$0xff] }
 0x3a1   : > { %v2419_v21 = vpop.f32.mrf.mxu3 }
 0x3a2   : > { %6920 = vmatmul.msk.f32.gmra.mxu2 %vm1028_vm2, %v2416_v57  ;;  %v6943_v57 = vld [vmem:[%s11316_s23 + $0x228] sm:$0xff] }
 0x3a4   : > { %v3487_v56 = vpop.f32.mrf.mxu1 }
 0x3a5   : > { %v9795_v26 = vpop.f32.mrf.mxu2 }
 0x3a6   : > { %6964 = vmatmul.msk.f32.gmra.mxu3 %vm880_vm1, %v6938_v23  ;;  %7051 = vmatmul.msk.f32.gmra.mxu1 %vm880_vm1, %v7025_v6  ;;  %v7031_v6 = vld [vmem:[%s11316_s23 + $0x310] sm:$0xff] }
 0x3a9   : > { %v2422_v30 = vpop.f32.mrf.mxu3 }
 0x3aa   : > { %6921 = vmatmul.msk.f32.gmra.mxu2 %vm1028_vm2, %v2419_v21 }
 0x3ac   : > { %v3490_v10 = vpop.f32.mrf.mxu1 }
 0x3ad   : > { %v9806_v33 = vpop.f32.mrf.mxu2 }
 0x3ae   : > { %6965 = vmatmul.msk.f32.gmra.mxu3 %vm880_vm1, %v6939_v38  ;;  %7052 = vmatmul.msk.f32.gmra.mxu1 %vm880_vm1, %v7026_v8  ;;  %v6945_v38 = vld [vmem:[%s11316_s23 + $0x238] sm:$0xff] }
 0x3b1   : > { %v2425_v49 = vpop.f32.mrf.mxu3 }
 0x3b2   : > { %6922 = vmatmul.msk.f32.gmra.mxu2 %vm1028_vm2, %v2422_v30 }
 0x3b4   : > { %v3493_v41 = vpop.f32.mrf.mxu1 }
 0x3b5   : > { %v9817_v27 = vpop.f32.mrf.mxu2 }
 0x3b6   : > { %6966 = vmatmul.msk.f32.gmra.mxu3 %vm880_vm1, %v6940_v48  ;;  %7053 = vmatmul.msk.f32.gmra.mxu1 %vm880_vm1, %v7027_v29  ;;  %v7032_v48 = vld [vmem:[%s11316_s23 + $0x318] sm:$0xf] }
 0x3b9   : > { %v3090_v51 = vpop.f32.mrf.mxu3 }
 0x3ba   : > { %6923 = vmatmul.msk.f32.gmra.mxu2 %vm1028_vm2, %v2425_v49  ;;  %6983 = vmatmul.msk.f32.vlgmr.msrb.gmra.mxu0 %vm1028_vm2, %v3090_v51  ;;  %v6946_v51 = vld [vmem:[%s11316_s23 + $0x240] sm:$0xff] }
 0x3bc   : > { %v3496_v19 = vpop.f32.mrf.mxu1 }
 0x3bd   : > { %v9832_v43 = vpop.f32.mrf.mxu2 }
 0x3be   : > { %6967 = vmatmul.msk.f32.gmra.mxu3 %vm880_vm1, %v6941_v58  ;;  %7054 = vmatmul.msk.f32.gmra.mxu1 %vm880_vm1, %v7028_v28  ;;  %v7176_v58 = vld [vmem:[%s11316_s23 + $0x3e8] sm:$0xff]  ;;  %v7231_v28 = vld [vmem:[%s11317_s19 + $0x160] sm:$0xff] }
 0x3bf   : > { %4442 = vmatpush.msrb.mxu2 %v7231_v28 }
 0x3c1   : > { %v3093_v60 = vpop.f32.mrf.mxu3 }
 0x3c2   : > { %6984 = vmatmul.msk.f32.gmra.mxu0 %vm1028_vm2, %v3093_v60  ;;  %7067 = vmatmul.msk.f32.vlgmr.msra.gmra.mxu2 %vm1028_vm2, %v3484_v40  ;;  %v7030_v40 = vld [vmem:[%s11316_s23 + $0x308] sm:$0xff] }
 0x3c3   : > { %v6947_v60 = vld [vmem:[%s11316_s23 + $0x248] sm:$0xff] }
 0x3c4   : > { %v3499_v24 = vpop.f32.mrf.mxu1 }
 0x3c5   : > { %v9844_v45 = vpop.f32.mrf.mxu2 }
 0x3c6   : > { %6968 = vmatmul.msk.f32.gmra.mxu3 %vm880_vm1, %v6942_v1  ;;  %7055 = vmatmul.msk.f32.gmra.mxu1 %vm880_vm1, %v7029_v25  ;;  %v6948_v25 = vld [vmem:[%s11316_s23 + $0x250] sm:$0xf] }
 0x3c9   : > { %v3096_v46 = vpop.f32.mrf.mxu3 }
 0x3ca   : > { %6985 = vmatmul.msk.f32.gmra.mxu0 %vm1028_vm2, %v3096_v46  ;;  %7068 = vmatmul.msk.f32.gmra.mxu2 %vm1028_vm2, %v3487_v56 }
 0x3cc   : > { %v3502_v21 = vpop.f32.mrf.mxu1 }
 0x3cd   : > { %v9856_v36 = vpop.f32.mrf.mxu2 }
 0x3ce   : > { %6969 = vmatmul.msk.f32.gmra.mxu3 %vm880_vm1, %v6943_v57  ;;  %7056 = vmatmul.msk.f32.gmra.mxu1 %vm880_vm1, %v7030_v40  ;;  %v7178_v40 = vld [vmem:[%s11316_s23 + $0x3f8] sm:$0xff] }
 0x3d1   : > { %v3099_v15 = vpop.f32.mrf.mxu3 }
 0x3d2   : > { %6986 = vmatmul.msk.f32.gmra.mxu0 %vm1028_vm2, %v3099_v15  ;;  %7069 = vmatmul.msk.f32.gmra.mxu2 %vm1028_vm2, %v3490_v10 }
 0x3d4   : > { %v3505_v56 = vpop.f32.mrf.mxu1 }
 0x3d5   : > { %v9871_v23 = vpop.f32.mrf.mxu2 }
 0x3d6   : > { %6970 = vmatmul.msk.f32.gmra.mxu3 %vm880_vm1, %v6944_v11  ;;  %7057 = vmatmul.msk.f32.gmra.mxu1 %vm880_vm1, %v7031_v6  ;;  %v7713_v6 = vld [vmem:[%s8332_s26 + $0x28] sm:$0xff] }
 0x3d9   : > { %v3102_v30 = vpop.f32.mrf.mxu3 }
 0x3da   : > { %6987 = vmatmul.msk.f32.gmra.mxu0 %vm1028_vm2, %v3102_v30  ;;  %7070 = vmatmul.msk.f32.gmra.mxu2 %vm1028_vm2, %v3493_v41  ;;  %v7712_v30 = vld [vmem:[%s8332_s26 + $0x30] sm:$0x3] }
 0x3dc   : > { %v3508_v8 = vpop.f32.mrf.mxu1 }
 0x3dd   : > { %v9883_v49 = vpop.f32.mrf.mxu2 }
 0x3de   : > { %6971 = vmatmul.msk.f32.gmra.mxu3 %vm880_vm1, %v6945_v38  ;;  %7058 = vmatmul.msk.f32.gmra.mxu1 %vm880_vm1, %v7032_v48  ;;  %v7093_v48 = vld [vmem:[%s11316_s23 + $0x328] sm:$0xff] }
 0x3e1   : > { %v3105_v10 = vpop.f32.mrf.mxu3 }
 0x3e2   : > { %6988 = vmatmul.msk.f32.gmra.mxu0 %vm1028_vm2, %v3105_v10  ;;  %7071 = vmatmul.msk.f32.gmra.mxu2 %vm1028_vm2, %v3496_v19  ;;  %v7179_v10 = vld [vmem:[%s11316_s23 + $0x400] sm:$0xff] }
 0x3e4   : > { %v3511_v29 = vpop.f32.mrf.mxu1 }
 0x3e5   : > { %v9895_v41 = vpop.f32.mrf.mxu2 }
 0x3e6   : > { %6972 = vmatmul.msk.f32.gmra.mxu3 %vm880_vm1, %v6946_v51  ;;  %7202 = vmatmul.msk.f32.vlgmr.msrb.gmra.mxu1 %vm880_vm1, %v7176_v58  ;;  %v7714_v51 = vld [vmem:[%s8332_s26 + $0x20] sm:$0xff]  ;;  %v7715_v58 = vld [vmem:[%s8332_s26 + $0x18] sm:$0xff] }
 0x3e9   : > { %v3108_v31 = vpop.f32.mrf.mxu3 }
 0x3ea   : > { %6989 = vmatmul.msk.f32.gmra.mxu0 %vm1028_vm2, %v3108_v31  ;;  %7072 = vmatmul.msk.f32.gmra.mxu2 %vm1028_vm2, %v3499_v24  ;;  %v7177_v24 = vld [vmem:[%s11316_s23 + $0x3f0] sm:$0xff] }
 0x3ec   : > { %v3514_v46 = vpop.f32.mrf.mxu1 }
 0x3ed   : > { %v9907_v19 = vpop.f32.mrf.mxu2 }
 0x3ee   : > { %6973 = vmatmul.msk.f32.gmra.mxu3 %vm880_vm1, %v6947_v60  ;;  %7203 = vmatmul.msk.f32.gmra.mxu1 %vm880_vm1, %v7177_v24  ;;  %v7716_v60 = vld [vmem:[%s8332_s26 + $0x10] sm:$0xff] }
 0x3f1   : > { %v3111_v1 = vpop.f32.mrf.mxu3 }
 0x3f2   : > { %6990 = vmatmul.msk.f32.gmra.mxu0 %vm1028_vm2, %v3111_v1  ;;  %7073 = vmatmul.msk.f32.gmra.mxu2 %vm1028_vm2, %v3502_v21  ;;  %v7717_v1 = vld [vmem:[%s8332_s26 + $0x8] sm:$0xff] }
 0x3f4   : > { %v3517_v21 = vpop.f32.mrf.mxu1 }
 0x3f5   : > { %v9922_v57 = vpop.f32.mrf.mxu2 }
 0x3f6   : > { %6974 = vmatmul.msk.f32.gmra.mxu3 %vm880_vm1, %v6948_v25  ;;  %7204 = vmatmul.msk.f32.gmra.mxu1 %vm880_vm1, %v7178_v40  ;;  %v7180_v25 = vld [vmem:[%s11316_s23 + $0x408] sm:$0xff]  ;;  %v7718_v40 = vld [vmem:[%s8332_s26] sm:$0xff]  ;;  %s6318_s26 = sshll.u32 %s850_s24, 4  ;;  %s6319_s26 = int_to_ptr.vmem [resolvable:$true] %s6318_s26 }
 0x3f9   : > { %v3114_v15 = vpop.f32.mrf.mxu3 }
 0x3fa   : > { %6991 = vmatmul.msk.f32.gmra.mxu0 %vm1028_vm2, %v3114_v15  ;;  %7074 = vmatmul.msk.f32.gmra.mxu2 %vm1028_vm2, %v3505_v56  ;;  %v7094_v15 = vld [vmem:[%s11316_s23 + $0x330] sm:$0xff] }
 0x3fc   : > { %v3520_v38 = vpop.f32.mrf.mxu1 }
 0x3fd   : > { %v9934_v11 = vpop.f32.mrf.mxu2 }
 0x3fe   : > { %7118 = vmatmul.msk.f32.vlgmr.msra.gmra.mxu3 %vm880_vm1, %v7092_v52  ;;  %7205 = vmatmul.msk.f32.gmra.mxu1 %vm880_vm1, %v7179_v10 }
 0x3ff   : > { %7453 = vmatpush.msk.msra.mxu3 %vm902_vm0, %v7712_v30 }
 0x401   : > { %v3117_v56 = vpop.f32.mrf.mxu3  ;;  %5447 = vmatpush.msra.mxu3 %v7713_v6  ;;  %v7095_v6 = vld [vmem:[%s11316_s23 + $0x338] sm:$0xff] }
 0x402   : > { %6992 = vmatmul.msk.f32.gmra.mxu0 %vm1028_vm2, %v3117_v56  ;;  %7075 = vmatmul.msk.f32.gmra.mxu2 %vm1028_vm2, %v3508_v8  ;;  %v7230_v8 = vld [vmem:[%s11317_s19 + $0x158] sm:$0xff]  ;;  %v7181_v56 = vld [vmem:[%s11316_s23 + $0x410] sm:$0xff] }
 0x403   : > { %5448 = vmatpush.msra.mxu3 %v7714_v51  ;;  %4443 = vmatpush.msrb.mxu2 %v7230_v8  ;;  %v7182_v51 = vld [vmem:[%s11316_s23 + $0x418] sm:$0xff] }
 0x404   : > { %v3523_v24 = vpop.f32.mrf.mxu1 }
 0x405   : > { %v9950_v31 = vpop.f32.mrf.mxu2  ;;  %5449 = vmatpush.msra.mxu3 %v7715_v58  ;;  %v7096_v58 = vld [vmem:[%s11316_s23 + $0x340] sm:$0xff] }
 0x406   : > { %7119 = vmatmul.msk.f32.gmra.mxu3 %vm880_vm1, %v7093_v48  ;;  %7206 = vmatmul.msk.f32.gmra.mxu1 %vm880_vm1, %v7180_v25  ;;  %v7097_v25 = vld [vmem:[%s11316_s23 + $0x348] sm:$0xff] }
 0x407   : > { %5450 = vmatpush.msra.mxu3 %v7716_v60  ;;  %v7229_v60 = vld [vmem:[%s11317_s19 + $0x150] sm:$0xff] }
 0x408   : > { %4444 = vmatpush.msrb.mxu2 %v7229_v60 }
 0x409   : > { %v3120_v28 = vpop.f32.mrf.mxu3  ;;  %5451 = vmatpush.msra.mxu3 %v7717_v1  ;;  %v7183_v1 = vld [vmem:[%s11316_s23 + $0x420] sm:$0xff] }
 0x40a   : > { %6993 = vmatmul.msk.f32.gmra.mxu0 %vm1028_vm2, %v3120_v28  ;;  %7076 = vmatmul.msk.f32.gmra.mxu2 %vm1028_vm2, %v3511_v29 }
 0x40b   : > { %5452 = vmatpush.msra.mxu3 %v7718_v40 }
 0x40c   : > { %v3526_v29 = vpop.f32.mrf.mxu1 }
 0x40d   : > { %v9969_v52 = vpop.f32.mrf.mxu2 }
 0x40e   : > { %7120 = vmatmul.msk.f32.gmra.mxu3 %vm880_vm1, %v7094_v15  ;;  %7207 = vmatmul.msk.f32.gmra.mxu1 %vm880_vm1, %v7181_v56  ;;  %v7098_v56 = vld [vmem:[%s11316_s23 + $0x350] sm:$0xff] }
 0x411   : > { %v3123_v30 = vpop.f32.mrf.mxu3 }
 0x412   : > { %6994 = vmatmul.msk.f32.gmra.mxu0 %vm1028_vm2, %v3123_v30  ;;  %7077 = vmatmul.msk.f32.gmra.mxu2 %vm1028_vm2, %v3514_v46  ;;  %v7184_v30 = vld [vmem:[%s11316_s23 + $0x428] sm:$0xff] }
 0x414   : > { %v3529_v46 = vpop.f32.mrf.mxu1 }
 0x415   : > { %v9981_v10 = vpop.f32.mrf.mxu2 }
 0x416   : > { %7121 = vmatmul.msk.f32.gmra.mxu3 %vm880_vm1, %v7095_v6  ;;  %7208 = vmatmul.msk.f32.gmra.mxu1 %vm880_vm1, %v7182_v51  ;;  %v7185_v51 = vld [vmem:[%s11316_s23 + $0x430] sm:$0xff] }
 0x419   : > { %v3126_v48 = vpop.f32.mrf.mxu3 }
 0x41a   : > { %6995 = vmatmul.msk.f32.gmra.mxu0 %vm1028_vm2, %v3126_v48  ;;  %7078 = vmatmul.msk.f32.gmra.mxu2 %vm1028_vm2, %v3517_v21 }
 0x41c   : > { %v3532_v28 = vpop.f32.mrf.mxu1 }
 0x41d   : > { %v9993_v8 = vpop.f32.mrf.mxu2 }
 0x41e   : > { %7122 = vmatmul.msk.f32.gmra.mxu3 %vm880_vm1, %v7096_v58  ;;  %7209 = vmatmul.msk.f32.gmra.mxu1 %vm880_vm1, %v7183_v1  ;;  %v7099_v58 = vld [vmem:[%s11316_s23 + $0x358] sm:$0xff] }
 0x421   : > { %v3129_v21 = vpop.f32.mrf.mxu3 }
 0x422   : > { %6996 = vmatmul.msk.f32.gmra.mxu0 %vm1028_vm2, %v3129_v21  ;;  %7079 = vmatmul.msk.f32.gmra.mxu2 %vm1028_vm2, %v3520_v38 }
 0x424   : > { %v3535_v38 = vpop.f32.mrf.mxu1 }
 0x425   : > { %v10008_v15 = vpop.f32.mrf.mxu2 }
 0x426   : > { %7123 = vmatmul.msk.f32.gmra.mxu3 %vm880_vm1, %v7097_v25  ;;  %7210 = vmatmul.msk.f32.gmra.mxu1 %vm880_vm1, %v7184_v30  ;;  %v7100_v30 = vld [vmem:[%s11316_s23 + $0x360] sm:$0xff] }
 0x429   : > { %v3132_v40 = vpop.f32.mrf.mxu3 }
 0x42a   : > { %6997 = vmatmul.msk.f32.gmra.mxu0 %vm1028_vm2, %v3132_v40  ;;  %7080 = vmatmul.msk.f32.gmra.mxu2 %vm1028_vm2, %v3523_v24  ;;  %v7186_v40 = vld [vmem:[%s11316_s23 + $0x438] sm:$0xff] }
 0x42c   : > { %v3538_v24 = vpop.f32.mrf.mxu1 }
 0x42d   : > { %v10020_v6 = vpop.f32.mrf.mxu2 }
 0x42e   : > { %7124 = vmatmul.msk.f32.gmra.mxu3 %vm880_vm1, %v7098_v56  ;;  %7211 = vmatmul.msk.f32.gmra.mxu1 %vm880_vm1, %v7185_v51 }
 0x431   : > { %v3135_v48 = vpop.f32.mrf.mxu3 }
 0x432   : > { %6998 = vmatmul.msk.f32.gmra.mxu0 %vm1028_vm2, %v3135_v48  ;;  %7081 = vmatmul.msk.f32.gmra.mxu2 %vm1028_vm2, %v3526_v29  ;;  %v7228_v29 = vld [vmem:[%s11317_s19 + $0x148] sm:$0xff] }
 0x433   : > { %4445 = vmatpush.msrb.mxu2 %v7228_v29  ;;  %v7187_v29 = vld [vmem:[%s11316_s23 + $0x440] sm:$0xff] }
 0x434   : > { %v3541_v25 = vpop.f32.mrf.mxu1 }
 0x435   : > { %v10032_v60 = vpop.f32.mrf.mxu2 }
 0x436   : > { %7125 = vmatmul.msk.f32.gmra.mxu3 %vm880_vm1, %v7099_v58  ;;  %7212 = vmatmul.msk.f32.gmra.mxu1 %vm880_vm1, %v7186_v40 }
 0x437   : > { %v3266_v21 = vpop.f32.mrf.mxu0 }
 0x439   : > { %v3138_v1 = vpop.f32.mrf.mxu3 }
 0x43a   : > { %6999 = vmatmul.msk.f32.gmra.mxu0 %vm1028_vm2, %v3138_v1  ;;  %7082 = vmatmul.msk.f32.gmra.mxu2 %vm1028_vm2, %v3529_v46  ;;  %v2898_v46 = vadd.f32 %v9702_v16, %v9410_v34  ;;  %v7101_v1 = vld [vmem:[%s11316_s23 + $0x368] sm:$0xff] }
 0x43c   : > { %v10055_v58 = vpop.f32.mrf.mxu1  ;;  %v3341_v40 = vadd.f32 %v3266_v21, %v2898_v46  ;;  %v7188_v21 = vld [vmem:[%s11316_s23 + $0x448] sm:$0xff]  ;;  %v7102_v46 = vld [vmem:[%s11316_s23 + $0x370] sm:$0xff] }
 0x43d   : > { %v10047_v56 = vpop.f32.mrf.mxu2 }
 0x43e   : > { %7126 = vmatmul.msk.f32.gmra.mxu3 %vm880_vm1, %v7100_v30  ;;  %7213 = vmatmul.msk.f32.gmra.mxu1 %vm880_vm1, %v7187_v29 }
 0x43f   : > { %v3269_v48 = vpop.f32.mrf.mxu0 }
 0x441   : > { %v3141_v51 = vpop.f32.mrf.mxu3 }
 0x442   : > { %7000 = vmatmul.msk.f32.gmra.mxu0 %vm1028_vm2, %v3141_v51  ;;  %7083 = vmatmul.msk.f32.gmra.mxu2 %vm1028_vm2, %v3532_v28  ;;  %v2901_v28 = vadd.f32 %v9715_v44, %v9428_v5 }
 0x444   : > { %v10071_v51 = vpop.f32.mrf.mxu1  ;;  %v3342_v29 = vadd.f32 %v3269_v48, %v2901_v28  ;;  %v7189_v28 = vld [vmem:[%s11316_s23 + $0x450] sm:$0xff] }
 0x445   : > { %v3660_v30 = vpop.f32.mrf.mxu2 }
 0x446   : > { %v10064_v0 = vadd.f32 %v3660_v30, %v3341_v40  ;;  %7127 = vmatmul.msk.f32.gmra.mxu3 %vm880_vm1, %v7101_v1  ;;  %7214 = vmatmul.msk.f32.gmra.mxu1 %vm880_vm1, %v7188_v21  ;;  %v2904_v30 = vadd.f32 %v9737_v9, %v9442_v50  ;;  %v7103_v21 = vld [vmem:[%s11316_s23 + $0x378] sm:$0xff]  ;;  %v7149_v9 = vld [vmem:[%s11317_s19 + $0x130] sm:$0xff] }
 0x447   : > { %v3272_v34 = vpop.f32.mrf.mxu0 }
 0x448   : > { %v3343_v50 = vadd.f32 %v3272_v34, %v2904_v30  ;;  %v7147_v34 = vld [vmem:[%s11317_s19 + $0x120] sm:$0xff] }
 0x449   : > { %v3144_v16 = vpop.f32.mrf.mxu3 }
 0x44a   : > { %7001 = vmatmul.msk.f32.gmra.mxu0 %vm1028_vm2, %v3144_v16  ;;  %7084 = vmatmul.msk.f32.gmra.mxu2 %vm1028_vm2, %v3535_v38  ;;  %v7227_v38 = vld [vmem:[%s11317_s19 + $0x140] sm:$0xff]  ;;  %v7150_v16 = vld [vmem:[%s11317_s19 + $0x138] sm:$0xff] }
 0x44b   : > { %4446 = vmatpush.msrb.mxu2 %v7227_v38  ;;  %4045 = vmatpush.msra.mxu0 %v7150_v16  ;;  %v2907_v38 = vadd.f32 %v9762_v63, %v9451_v14  ;;  %v7146_v16 = vld [vmem:[%s11317_s19 + $0x118] sm:$0xff]  ;;  %v7145_v14 = vld [vmem:[%s11317_s19 + $0x110] sm:$0xff] }
 0x44c   : > { %v10090_v48 = vpop.f32.mrf.mxu1 }
 0x44d   : > { %v3663_v1 = vpop.f32.mrf.mxu2  ;;  %4046 = vmatpush.msra.mxu0 %v7149_v9  ;;  %v7144_v9 = vld [vmem:[%s11317_s19 + $0x108] sm:$0xff] }
 0x44e   : > { %v10080_v40 = vadd.f32 %v3663_v1, %v3342_v29  ;;  %7128 = vmatmul.msk.f32.gmra.mxu3 %vm880_vm1, %v7102_v46  ;;  %7215 = vmatmul.msk.f32.gmra.mxu1 %vm880_vm1, %v7189_v28  ;;  %v7148_v29 = vld [vmem:[%s11317_s19 + $0x128] sm:$0xff]  ;;  %v7190_v28 = vld [vmem:[%s11316_s23 + $0x458] sm:$0xff] }
 0x44f   : > { %v3275_v5 = vpop.f32.mrf.mxu0  ;;  %4047 = vmatpush.msra.mxu0 %v7148_v29 }
 0x451   : > { %v3147_v44 = vpop.f32.mrf.mxu3  ;;  %4048 = vmatpush.msra.mxu0 %v7147_v34  ;;  %v2910_v34 = vadd.f32 %v9781_v4, %v9462_v3 }
 0x452   : > { %7002 = vmatmul.msk.f32.gmra.mxu0 %vm1028_vm2, %v3147_v44  ;;  %7085 = vmatmul.msk.f32.gmra.mxu2 %vm1028_vm2, %v3538_v24 }
 0x453   : > { %4049 = vmatpush.msra.mxu0 %v7146_v16  ;;  %v7105_v16 = vld [vmem:[%s11316_s23 + $0x388] sm:$0xff] }
 0x454   : > { %v3553_v30 = vpop.f32.mrf.mxu1 }
 0x455   : > { %v3666_v24 = vpop.f32.mrf.mxu2  ;;  %4050 = vmatpush.msra.mxu0 %v7145_v14 }
 0x456   : > { %v10105_v46 = vadd.f32 %v3666_v24, %v3343_v50  ;;  %7129 = vmatmul.msk.f32.gmra.mxu3 %vm880_vm1, %v7103_v21  ;;  %v7104_v21 = vld [vmem:[%s11316_s23 + $0x380] sm:$0xff]  ;;  %v3344_v50 = vadd.f32 %v3275_v5, %v2907_v38  ;;  %7216 = vmatmul.msk.f32.gmra.mxu1 %vm880_vm1, %v7190_v28 }
 0x457   : > { %v3278_v1 = vpop.f32.mrf.mxu0  ;;  %4051 = vmatpush.msra.mxu0 %v7144_v9  ;;  %v7143_v5 = vld [vmem:[%s11317_s19 + $0x100] sm:$0xff]  ;;  %v7106_v9 = vld [vmem:[%s11316_s23 + $0x390] sm:$0xff] }
 0x458   : > { %v7191_v38 = vld [vmem:[%s11316_s23 + $0x460] sm:$0xff]  ;;  %v3345_v28 = vadd.f32 %v3278_v1, %v2910_v34  ;;  %v7402_v1 = vld [vmem:[%s11317_s19 + $0x1f8] sm:$0xff]  ;;  %v2916_v34 = vadd.f32 %v9806_v33, %v9478_v17 }
 0x459   : > { %v3150_v44 = vpop.f32.mrf.mxu3  ;;  %4052 = vmatpush.msra.mxu0 %v7143_v5  ;;  %5227 = vmatpush.msra.mxu2 %v7402_v1  ;;  %v7108_v1 = vld [vmem:[%s11316_s23 + $0x3a0] sm:$0xff] }
 0x45a   : > { %7003 = vmatmul.msk.f32.gmra.mxu0 %vm1028_vm2, %v3150_v44  ;;  %7086 = vmatmul.msk.f32.gmra.mxu2 %vm1028_vm2, %v3541_v25 }
 0x45c   : > { %v3556_v44 = vpop.f32.mrf.mxu1 }
 0x45d   : > { %v3669_v63 = vpop.f32.mrf.mxu2 }
 0x45e   : > { %v10131_v25 = vadd.f32 %v3669_v63, %v3344_v50  ;;  %7130 = vmatmul.msk.f32.gmra.mxu3 %vm880_vm1, %v7104_v21  ;;  %7217 = vmatmul.msk.f32.gmra.mxu1 %vm880_vm1, %v7191_v38  ;;  %v7192_v63 = vld [vmem:[%s11316_s23 + $0x468] sm:$0xff] }
 0x45f   : > { %v3281_v24 = vpop.f32.mrf.mxu0 }
 0x461   : > { %v3153_v29 = vpop.f32.mrf.mxu3 }
 0x462   : > { %7004 = vmatmul.msk.f32.gmra.mxu0 %vm1028_vm2, %v3153_v29  ;;  %7087 = vmatmul.msk.f32.gmra.mxu2 %vm1028_vm2, %v10055_v58  ;;  %v2913_v58 = vadd.f32 %v9795_v26, %v9470_v12 }
 0x464   : > { %v4272_v14 = vpop.f32.mrf.mxu1  ;;  %v3346_v12 = vadd.f32 %v3281_v24, %v2913_v58  ;;  %v7193_v24 = vld [vmem:[%s11316_s23 + $0x470] sm:$0xff] }
 0x465   : > { %v3672_v21 = vpop.f32.mrf.mxu2 }
 0x466   : > { %v10152_v50 = vadd.f32 %v3672_v21, %v3345_v28  ;;  %7131 = vmatmul.msk.f32.gmra.mxu3 %vm880_vm1, %v7105_v16  ;;  %7218 = vmatmul.msk.f32.gmra.mxu1 %vm880_vm1, %v7192_v63  ;;  %v7107_v16 = vld [vmem:[%s11316_s23 + $0x398] sm:$0xff] }
 0x467   : > { %v3284_v3 = vpop.f32.mrf.mxu0 }
 0x468   : > { %v3347_v28 = vadd.f32 %v3284_v3, %v2916_v34  ;;  %v7194_v3 = vld [vmem:[%s11316_s23 + $0x478] sm:$0xff]  ;;  %v7109_v34 = vld [vmem:[%s11316_s23 + $0x3a8] sm:$0xff] }
 0x469   : > { %v3156_v4 = vpop.f32.mrf.mxu3 }
 0x46a   : > { %7005 = vmatmul.msk.f32.gmra.mxu0 %vm1028_vm2, %v3156_v4  ;;  %7088 = vmatmul.msk.f32.gmra.mxu2 %vm1028_vm2, %v10071_v51 }
 0x46c   : > { %v4275_v38 = vpop.f32.mrf.mxu1 }
 0x46d   : > { %v3675_v26 = vpop.f32.mrf.mxu2 }
 0x46e   : > { %v10170_v5 = vadd.f32 %v3675_v26, %v3346_v12  ;;  %7132 = vmatmul.msk.f32.gmra.mxu3 %vm880_vm1, %v7106_v9  ;;  %7219 = vmatmul.msk.f32.gmra.mxu1 %vm880_vm1, %v7193_v24 }
 0x46f   : > { %v3287_v51 = vpop.f32.mrf.mxu0 }
 0x471   : > { %v3159_v29 = vpop.f32.mrf.mxu3 }
 0x472   : > { %7006 = vmatmul.msk.f32.gmra.mxu0 %vm1028_vm2, %v3159_v29  ;;  %7089 = vmatmul.msk.f32.gmra.mxu2 %vm1028_vm2, %v10090_v48  ;;  %v2919_v48 = vadd.f32 %v9817_v27, %v9489_v37  ;;  %v7195_v29 = vld [vmem:[%s11316_s23 + $0x480] sm:$0xff] }
 0x474   : > { %v4278_v58 = vpop.f32.mrf.mxu1  ;;  %v3348_v63 = vadd.f32 %v3287_v51, %v2919_v48  ;;  %v7401_v51 = vld [vmem:[%s11317_s19 + $0x1f0] sm:$0xff] }
 0x475   : > { %v3678_v21 = vpop.f32.mrf.mxu2  ;;  %5228 = vmatpush.msra.mxu2 %v7401_v51 }
 0x476   : > { %v10185_v4 = vadd.f32 %v3678_v21, %v3347_v28  ;;  %7133 = vmatmul.msk.f32.gmra.mxu3 %vm880_vm1, %v7107_v16  ;;  %7220 = vmatmul.msk.f32.gmra.mxu1 %vm880_vm1, %v7194_v3  ;;  %v2925_v28 = vadd.f32 %v9844_v45, %v9505_v22 }
 0x477   : > { %v3290_v17 = vpop.f32.mrf.mxu0 }
 0x479   : > { %v3162_v33 = vpop.f32.mrf.mxu3 }
 0x47a   : > { %7007 = vmatmul.msk.f32.gmra.mxu0 %vm1028_vm2, %v3162_v33  ;;  %7090 = vmatmul.msk.f32.gmra.mxu2 %vm1028_vm2, %v3553_v30  ;;  %v2922_v30 = vadd.f32 %v9832_v43, %v9497_v55  ;;  %v7110_v33 = vld [vmem:[%s11316_s23 + $0x3b0] sm:$0xff] }
 0x47c   : > { %v4281_v26 = vpop.f32.mrf.mxu1  ;;  %v3349_v24 = vadd.f32 %v3290_v17, %v2922_v30  ;;  %v7196_v17 = vld [vmem:[%s11316_s23 + $0x488] sm:$0xff] }
 0x47d   : > { %v3681_v9 = vpop.f32.mrf.mxu2 }
 0x47e   : > { %v10199_v12 = vadd.f32 %v3681_v9, %v3348_v63  ;;  %7134 = vmatmul.msk.f32.gmra.mxu3 %vm880_vm1, %v7108_v1  ;;  %7221 = vmatmul.msk.f32.gmra.mxu1 %vm880_vm1, %v7195_v29  ;;  %v7197_v9 = vld [vmem:[%s11316_s23 + $0x490] sm:$0xff] }
 0x47f   : > { %v3293_v37 = vpop.f32.mrf.mxu0 }
 0x480   : > { %v3350_v48 = vadd.f32 %v3293_v37, %v2925_v28  ;;  %v7111_v37 = vld [vmem:[%s11316_s23 + $0x3b8] sm:$0xff]  ;;  %v2934_v28 = vadd.f32 %v9883_v49, %v9552_v7 }
 0x481   : > { %v3878_v27 = vpop.f32.mrf.mxu3 }
 0x482   : > { %7091 = vmatmul.msk.f32.gmra.mxu2 %vm1028_vm2, %v3556_v44  ;;  %7151 = vmatmul.msk.f32.vlgmr.msra.gmra.mxu0 %vm1028_vm2, %v3878_v27 }
 0x484   : > { %v4284_v21 = vpop.f32.mrf.mxu1 }
 0x485   : > { %v3684_v55 = vpop.f32.mrf.mxu2 }
 0x486   : > { %v10216_v43 = vadd.f32 %v3684_v55, %v3349_v24  ;;  %7135 = vmatmul.msk.f32.gmra.mxu3 %vm880_vm1, %v7109_v34  ;;  %7222 = vmatmul.msk.f32.gmra.mxu1 %vm880_vm1, %v7196_v17  ;;  %v7198_v34 = vld [vmem:[%s11316_s23 + $0x498] sm:$0xff]  ;;  %v7400_v24 = vld [vmem:[%s11317_s19 + $0x1e8] sm:$0xff]  ;;  %v7112_v55 = vld [vmem:[%s11316_s23 + $0x3c0] sm:$0xff] }
 0x487   : > { %v3296_v44 = vpop.f32.mrf.mxu0  ;;  %5229 = vmatpush.msra.mxu2 %v7400_v24 }
 0x489   : > { %v3881_v16 = vpop.f32.mrf.mxu3 }
 0x48a   : > { %7152 = vmatmul.msk.f32.gmra.mxu0 %vm1028_vm2, %v3881_v16  ;;  %7235 = vmatmul.msk.f32.vlgmr.msrb.gmra.mxu2 %vm1028_vm2, %v4272_v14  ;;  %v2928_v14 = vadd.f32 %v9856_v36, %v9522_v39 }
 0x48c   : > { %v4287_v63 = vpop.f32.mrf.mxu1  ;;  %v3351_v27 = vadd.f32 %v3296_v44, %v2928_v14 }
 0x48d   : > { %v3687_v3 = vpop.f32.mrf.mxu2 }
 0x48e   : > { %v10230_v1 = vadd.f32 %v3687_v3, %v3350_v48  ;;  %7136 = vmatmul.msk.f32.gmra.mxu3 %vm880_vm1, %v7110_v33  ;;  %7223 = vmatmul.msk.f32.gmra.mxu1 %vm880_vm1, %v7197_v9  ;;  %v7199_v33 = vld [vmem:[%s11316_s23 + $0x4a0] sm:$0xff]  ;;  %v7113_v48 = vld [vmem:[%s11316_s23 + $0x3c8] sm:$0xff] }
 0x48f   : > { %v3299_v22 = vpop.f32.mrf.mxu0  ;;  %v7200_v9 = vld [vmem:[%s11316_s23 + $0x4a8] sm:$0xf] }
 0x491   : > { %v3884_v45 = vpop.f32.mrf.mxu3 }
 0x492   : > { %7153 = vmatmul.msk.f32.gmra.mxu0 %vm1028_vm2, %v3884_v45  ;;  %7236 = vmatmul.msk.f32.gmra.mxu2 %vm1028_vm2, %v4275_v38  ;;  %v2931_v38 = vadd.f32 %v9871_v23, %v9537_v42 }
 0x494   : > { %v4290_v29 = vpop.f32.mrf.mxu1  ;;  %v3352_v44 = vadd.f32 %v3299_v22, %v2931_v38  ;;  %v7344_v38 = vld [vmem:[%s11316_s23 + $0x578] sm:$0xff] }
 0x495   : > { %v3690_v30 = vpop.f32.mrf.mxu2 }
 0x496   : > { %v10244_v51 = vadd.f32 %v3690_v30, %v3351_v27  ;;  %7137 = vmatmul.msk.f32.gmra.mxu3 %vm880_vm1, %v7111_v37  ;;  %7224 = vmatmul.msk.f32.gmra.mxu1 %vm880_vm1, %v7198_v34  ;;  %v7114_v37 = vld [vmem:[%s11316_s23 + $0x3d0] sm:$0xff]  ;;  %v7115_v34 = vld [vmem:[%s11316_s23 + $0x3d8] sm:$0xff] }
 0x497   : > { %v3302_v39 = vpop.f32.mrf.mxu0 }
 0x498   : > { %v3353_v3 = vadd.f32 %v3302_v39, %v2934_v28  ;;  %v7116_v28 = vld [vmem:[%s11316_s23 + $0x3e0] sm:$0xf] }
 0x499   : > { %v3887_v36 = vpop.f32.mrf.mxu3 }
 0x49a   : > { %7154 = vmatmul.msk.f32.gmra.mxu0 %vm1028_vm2, %v3887_v36  ;;  %7237 = vmatmul.msk.f32.gmra.mxu2 %vm1028_vm2, %v4278_v58 }
 0x49c   : > { %v4293_v17 = vpop.f32.mrf.mxu1 }
 0x49d   : > { %v3693_v42 = vpop.f32.mrf.mxu2 }
 0x49e   : > { %v10261_v23 = vadd.f32 %v3693_v42, %v3352_v44  ;;  %7138 = vmatmul.msk.f32.gmra.mxu3 %vm880_vm1, %v7112_v55  ;;  %7225 = vmatmul.msk.f32.gmra.mxu1 %vm880_vm1, %v7199_v33  ;;  %v2943_v42 = vadd.f32 %v9922_v57, %v9613_v32 }
 0x49f   : > { %v3305_v58 = vpop.f32.mrf.mxu0 }
 0x4a1   : > { %v3890_v16 = vpop.f32.mrf.mxu3 }
 0x4a2   : > { %7155 = vmatmul.msk.f32.gmra.mxu0 %vm1028_vm2, %v3890_v16  ;;  %7238 = vmatmul.msk.f32.gmra.mxu2 %vm1028_vm2, %v4281_v26  ;;  %v2937_v26 = vadd.f32 %v9895_v41, %v9575_v61  ;;  %v7345_v16 = vld [vmem:[%s11316_s23 + $0x580] sm:$0xff] }
 0x4a4   : > { %v4296_v14 = vpop.f32.mrf.mxu1  ;;  %v3354_v27 = vadd.f32 %v3305_v58, %v2937_v26 }
 0x4a5   : > { %v3696_v22 = vpop.f32.mrf.mxu2 }
 0x4a6   : > { %v10275_v45 = vadd.f32 %v3696_v22, %v3353_v3  ;;  %7139 = vmatmul.msk.f32.gmra.mxu3 %vm880_vm1, %v7113_v48  ;;  %7226 = vmatmul.msk.f32.gmra.mxu1 %vm880_vm1, %v7200_v9 }
 0x4a7   : > { %v3308_v7 = vpop.f32.mrf.mxu0 }
 0x4a9   : > { %v3893_v49 = vpop.f32.mrf.mxu3 }
 0x4aa   : > { %7156 = vmatmul.msk.f32.gmra.mxu0 %vm1028_vm2, %v3893_v49  ;;  %7239 = vmatmul.msk.f32.gmra.mxu2 %vm1028_vm2, %v4284_v21  ;;  %v2940_v21 = vadd.f32 %v9907_v19, %v9597_v35  ;;  %v7399_v35 = vld [vmem:[%s11317_s19 + $0x1e0] sm:$0xff]  ;;  %v7260_v49 = vld [vmem:[%s11316_s23 + $0x4b0] sm:$0xff] }
 0x4ab   : > { %5230 = vmatpush.msra.mxu2 %v7399_v35  ;;  %v7262_v35 = vld [vmem:[%s11316_s23 + $0x4c0] sm:$0xff] }
 0x4ac   : > { %v4299_v36 = vpop.f32.mrf.mxu1  ;;  %v3355_v24 = vadd.f32 %v3308_v7, %v2940_v21  ;;  %v7346_v7 = vld [vmem:[%s11316_s23 + $0x588] sm:$0xff] }
 0x4ad   : > { %v3699_v30 = vpop.f32.mrf.mxu2 }
 0x4ae   : > { %v10289_v39 = vadd.f32 %v3699_v30, %v3354_v27  ;;  %7140 = vmatmul.msk.f32.gmra.mxu3 %vm880_vm1, %v7114_v37  ;;  %7370 = vmatmul.msk.f32.vlgmr.msra.gmra.mxu1 %vm880_vm1, %v7344_v38  ;;  %v7347_v30 = vld [vmem:[%s11316_s23 + $0x590] sm:$0xff] }
 0x4af   : > { %v3311_v61 = vpop.f32.mrf.mxu0 }
 0x4b0   : > { %v3356_v33 = vadd.f32 %v3311_v61, %v2943_v42  ;;  %v7261_v61 = vld [vmem:[%s11316_s23 + $0x4b8] sm:$0xff] }
 0x4b1   : > { %v3896_v41 = vpop.f32.mrf.mxu3 }
 0x4b2   : > { %7157 = vmatmul.msk.f32.gmra.mxu0 %vm1028_vm2, %v3896_v41  ;;  %7240 = vmatmul.msk.f32.gmra.mxu2 %vm1028_vm2, %v4287_v63 }
 0x4b4   : > { %v4302_v58 = vpop.f32.mrf.mxu1 }
 0x4b5   : > { %v3702_v55 = vpop.f32.mrf.mxu2 }
 0x4b6   : > { %v10303_v44 = vadd.f32 %v3702_v55, %v3355_v24  ;;  %7141 = vmatmul.msk.f32.gmra.mxu3 %vm880_vm1, %v7115_v34  ;;  %7371 = vmatmul.msk.f32.gmra.mxu1 %vm880_vm1, %v7345_v16  ;;  %v2952_v34 = vadd.f32 %v9969_v52, %v9661_v2  ;;  %v7348_v55 = vld [vmem:[%s11316_s23 + $0x598] sm:$0xff] }
 0x4b7   : > { %v3314_v19 = vpop.f32.mrf.mxu0 }
 0x4b9   : > { %v3899_v63 = vpop.f32.mrf.mxu3 }
 0x4ba   : > { %7158 = vmatmul.msk.f32.gmra.mxu0 %vm1028_vm2, %v3899_v63  ;;  %7241 = vmatmul.msk.f32.gmra.mxu2 %vm1028_vm2, %v4290_v29  ;;  %v2946_v29 = vadd.f32 %v9934_v11, %v9628_v62 }
 0x4bc   : > { %v4305_v22 = vpop.f32.mrf.mxu1  ;;  %v3357_v26 = vadd.f32 %v3314_v19, %v2946_v29 }
 0x4bd   : > { %v3705_v48 = vpop.f32.mrf.mxu2 }
 0x4be   : > { %v10320_v3 = vadd.f32 %v3705_v48, %v3356_v33  ;;  %7142 = vmatmul.msk.f32.gmra.mxu3 %vm880_vm1, %v7116_v28  ;;  %7372 = vmatmul.msk.f32.gmra.mxu1 %vm880_vm1, %v7346_v7  ;;  %v7349_v28 = vld [vmem:[%s11316_s23 + $0x5a0] sm:$0xff]  ;;  %v7263_v33 = vld [vmem:[%s11316_s23 + $0x4c8] sm:$0xff] }
 0x4bf   : > { %v3317_v32 = vpop.f32.mrf.mxu0  ;;  %v7350_v7 = vld [vmem:[%s11316_s23 + $0x5a8] sm:$0xff] }
 0x4c1   : > { %v3902_v57 = vpop.f32.mrf.mxu3 }
 0x4c2   : > { %7159 = vmatmul.msk.f32.gmra.mxu0 %vm1028_vm2, %v3902_v57  ;;  %7242 = vmatmul.msk.f32.gmra.mxu2 %vm1028_vm2, %v4293_v17  ;;  %v2949_v17 = vadd.f32 %v9950_v31, %v9643_v47  ;;  %v7398_v47 = vld [vmem:[%s11317_s19 + $0x1d8] sm:$0xff] }
 0x4c3   : > { %5231 = vmatpush.msra.mxu2 %v7398_v47 }
 0x4c4   : > { %v4308_v27 = vpop.f32.mrf.mxu1  ;;  %v3358_v41 = vadd.f32 %v3317_v32, %v2949_v17 }
 0x4c5   : > { %v3708_v9 = vpop.f32.mrf.mxu2 }
 0x4c6   : > { %v10334_v37 = vadd.f32 %v3708_v9, %v3357_v26  ;;  %7286 = vmatmul.msk.f32.vlgmr.msrb.gmra.mxu3 %vm880_vm1, %v7260_v49  ;;  %7373 = vmatmul.msk.f32.gmra.mxu1 %vm880_vm1, %v7347_v30  ;;  %v7264_v49 = vld [vmem:[%s11316_s23 + $0x4d0] sm:$0xff] }
 0x4c7   : > { %v3320_v62 = vpop.f32.mrf.mxu0  ;;  %v7351_v30 = vld [vmem:[%s11316_s23 + $0x5b0] sm:$0xff] }
 0x4c8   : > { %v3359_v19 = vadd.f32 %v3320_v62, %v2952_v34  ;;  %v7266_v34 = vld [vmem:[%s11316_s23 + $0x4e0] sm:$0xff] }
 0x4c9   : > { %v3905_v11 = vpop.f32.mrf.mxu3 }
 0x4ca   : > { %7160 = vmatmul.msk.f32.gmra.mxu0 %vm1028_vm2, %v3905_v11  ;;  %7243 = vmatmul.msk.f32.gmra.mxu2 %vm1028_vm2, %v4296_v14  ;;  %v2961_v11 = vadd.f32 %v10008_v15, %v9707_v54 }
 0x4cc   : > { %v4311_v24 = vpop.f32.mrf.mxu1 }
 0x4cd   : > { %v3711_v21 = vpop.f32.mrf.mxu2 }
 0x4ce   : > { %v10348_v38 = vadd.f32 %v3711_v21, %v3358_v41  ;;  %7287 = vmatmul.msk.f32.gmra.mxu3 %vm880_vm1, %v7261_v61  ;;  %7374 = vmatmul.msk.f32.gmra.mxu1 %vm880_vm1, %v7348_v55  ;;  %v7265_v61 = vld [vmem:[%s11316_s23 + $0x4d8] sm:$0xff] }
 0x4cf   : > { %v3323_v31 = vpop.f32.mrf.mxu0 }
 0x4d1   : > { %v3908_v14 = vpop.f32.mrf.mxu3 }
 0x4d2   : > { %7161 = vmatmul.msk.f32.gmra.mxu0 %vm1028_vm2, %v3908_v14  ;;  %7244 = vmatmul.msk.f32.gmra.mxu2 %vm1028_vm2, %v4299_v36  ;;  %v2955_v36 = vadd.f32 %v9981_v10, %v9679_v13  ;;  %v7352_v14 = vld [vmem:[%s11316_s23 + $0x5b8] sm:$0xff] }
 0x4d4   : > { %v4314_v16 = vpop.f32.mrf.mxu1  ;;  %v3360_v48 = vadd.f32 %v3323_v31, %v2955_v36 }
 0x4d5   : > { %v3714_v63 = vpop.f32.mrf.mxu2 }
 0x4d6   : > { %v10365_v42 = vadd.f32 %v3714_v63, %v3359_v19  ;;  %7288 = vmatmul.msk.f32.gmra.mxu3 %vm880_vm1, %v7262_v35  ;;  %7375 = vmatmul.msk.f32.gmra.mxu1 %vm880_vm1, %v7349_v28 }
 0x4d7   : > { %v3326_v2 = vpop.f32.mrf.mxu0 }
 0x4d9   : > { %v3911_v52 = vpop.f32.mrf.mxu3 }
 0x4da   : > { %7162 = vmatmul.msk.f32.gmra.mxu0 %vm1028_vm2, %v3911_v52  ;;  %7245 = vmatmul.msk.f32.gmra.mxu2 %vm1028_vm2, %v4302_v58  ;;  %v2958_v58 = vadd.f32 %v9993_v8, %v9694_v53  ;;  %v7397_v8 = vld [vmem:[%s11317_s19 + $0x1d0] sm:$0xff]  ;;  %v7267_v52 = vld [vmem:[%s11316_s23 + $0x4e8] sm:$0xff] }
 0x4db   : > { %5232 = vmatpush.msra.mxu2 %v7397_v8 }
 0x4dc   : > { %v4317_v29 = vpop.f32.mrf.mxu1  ;;  %v3361_v26 = vadd.f32 %v3326_v2, %v2958_v58  ;;  %v7353_v2 = vld [vmem:[%s11316_s23 + $0x5c0] sm:$0xff] }
 0x4dd   : > { %v3717_v32 = vpop.f32.mrf.mxu2 }
 0x4de   : > { %v10379_v57 = vadd.f32 %v3717_v32, %v3360_v48  ;;  %7289 = vmatmul.msk.f32.gmra.mxu3 %vm880_vm1, %v7263_v33  ;;  %7376 = vmatmul.msk.f32.gmra.mxu1 %vm880_vm1, %v7350_v7  ;;  %v2970_v48 = vadd.f32 %v10047_v56, %v9773_v18 }
 0x4df   : > { %v3329_v13 = vpop.f32.mrf.mxu0 }
 0x4e0   : > { %v3362_v41 = vadd.f32 %v3329_v13, %v2961_v11  ;;  %v7354_v13 = vld [vmem:[%s11316_s23 + $0x5c8] sm:$0xff] }
 0x4e1   : > { %v3914_v10 = vpop.f32.mrf.mxu3 }
 0x4e2   : > { %7163 = vmatmul.msk.f32.gmra.mxu0 %vm1028_vm2, %v3914_v10  ;;  %7246 = vmatmul.msk.f32.gmra.mxu2 %vm1028_vm2, %v4305_v22  ;;  %v7268_v10 = vld [vmem:[%s11316_s23 + $0x4f0] sm:$0xff] }
 0x4e4   : > { %v4320_v17 = vpop.f32.mrf.mxu1 }
 0x4e5   : > { %v3720_v9 = vpop.f32.mrf.mxu2 }
 0x4e6   : > { %v10393_v62 = vadd.f32 %v3720_v9, %v3361_v26  ;;  %7290 = vmatmul.msk.f32.gmra.mxu3 %vm880_vm1, %v7264_v49  ;;  %7377 = vmatmul.msk.f32.gmra.mxu1 %vm880_vm1, %v7351_v30  ;;  %v7355_v26 = vld [vmem:[%s11316_s23 + $0x5d0] sm:$0xff]  ;;  %v7269_v9 = vld [vmem:[%s11316_s23 + $0x4f8] sm:$0xff] }
 0x4e7   : > { %v3332_v53 = vpop.f32.mrf.mxu0 }
 0x4e9   : > { %v3917_v22 = vpop.f32.mrf.mxu3 }
 0x4ea   : > { %7164 = vmatmul.msk.f32.gmra.mxu0 %vm1028_vm2, %v3917_v22  ;;  %7247 = vmatmul.msk.f32.gmra.mxu2 %vm1028_vm2, %v4308_v27  ;;  %v2964_v27 = vadd.f32 %v10020_v6, %v9723_v59 }
 0x4ec   : > { %v4323_v31 = vpop.f32.mrf.mxu1  ;;  %v3363_v55 = vadd.f32 %v3332_v53, %v2964_v27 }
 0x4ed   : > { %v3723_v21 = vpop.f32.mrf.mxu2 }
 0x4ee   : > { %v10410_v47 = vadd.f32 %v3723_v21, %v3362_v41  ;;  %7291 = vmatmul.msk.f32.gmra.mxu3 %vm880_vm1, %v7265_v61  ;;  %7378 = vmatmul.msk.f32.gmra.mxu1 %vm880_vm1, %v7352_v14  ;;  %v7356_v61 = vld [vmem:[%s11316_s23 + $0x5d8] sm:$0xff] }
 0x4ef   : > { %v3335_v54 = vpop.f32.mrf.mxu0 }
 0x4f1   : > { %v3920_v15 = vpop.f32.mrf.mxu3 }
 0x4f2   : > { %7165 = vmatmul.msk.f32.gmra.mxu0 %vm1028_vm2, %v3920_v15  ;;  %7248 = vmatmul.msk.f32.gmra.mxu2 %vm1028_vm2, %v4311_v24  ;;  %v2967_v24 = vadd.f32 %v10032_v60, %v9748_v20  ;;  %v7396_v60 = vld [vmem:[%s11317_s19 + $0x1c8] sm:$0xff] }
 0x4f3   : > { %5233 = vmatpush.msra.mxu2 %v7396_v60  ;;  %v7272_v60 = vld [vmem:[%s11316_s23 + $0x510] sm:$0xff] }
 0x4f4   : > { %v4326_v63 = vpop.f32.mrf.mxu1  ;;  %v3364_v36 = vadd.f32 %v3335_v54, %v2967_v24 }
 0x4f5   : > { %v3726_v35 = vpop.f32.mrf.mxu2 }
 0x4f6   : > { %v10424_v19 = vadd.f32 %v3726_v35, %v3363_v55  ;;  %7292 = vmatmul.msk.f32.gmra.mxu3 %vm880_vm1, %v7266_v34  ;;  %7379 = vmatmul.msk.f32.gmra.mxu1 %vm880_vm1, %v7353_v2  ;;  %v7357_v34 = vld [vmem:[%s11316_s23 + $0x5e0] sm:$0xff]  ;;  %v7271_v55 = vld [vmem:[%s11316_s23 + $0x508] sm:$0xff] }
 0x4f7   : > { %v3338_v59 = vpop.f32.mrf.mxu0 }
 0x4f8   : > { %v3365_v58 = vadd.f32 %v3338_v59, %v2970_v48  ;;  %v7317_v59 = vld [vmem:[%s11317_s19 + $0x1b0] sm:$0xff] }
 0x4f9   : > { %v3923_v6 = vpop.f32.mrf.mxu3  ;;  %v7313_v48 = vld [vmem:[%s11317_s19 + $0x190] sm:$0xff] }
 0x4fa   : > { %7166 = vmatmul.msk.f32.gmra.mxu0 %vm1028_vm2, %v3923_v6  ;;  %7249 = vmatmul.msk.f32.gmra.mxu2 %vm1028_vm2, %v4314_v16 }
 0x4fc   : > { %v4329_v32 = vpop.f32.mrf.mxu1 }
 0x4fd   : > { %v3729_v28 = vpop.f32.mrf.mxu2 }
 0x4fe   : > { %v10438_v33 = vadd.f32 %v3729_v28, %v3364_v36  ;;  %7293 = vmatmul.msk.f32.gmra.mxu3 %vm880_vm1, %v7267_v52  ;;  %7380 = vmatmul.msk.f32.gmra.mxu1 %vm880_vm1, %v7354_v13  ;;  %v7314_v28 = vld [vmem:[%s11317_s19 + $0x198] sm:$0xff] }
 0x4ff   : > { %v4054_v20 = vpop.f32.mrf.mxu0 }
 0x500   : > { %v4129_v53 = vadd.f32 %v4054_v20, %v10064_v0  ;;  %v7270_v0 = vld [vmem:[%s11316_s23 + $0x500] sm:$0xff]  ;;  %v7358_v20 = vld [vmem:[%s11316_s23 + $0x5e8] sm:$0xff] }
 0x501   : > { %v3926_v16 = vpop.f32.mrf.mxu3 }
 0x502   : > { %7167 = vmatmul.msk.f32.gmra.mxu0 %vm1028_vm2, %v3926_v16  ;;  %7250 = vmatmul.msk.f32.gmra.mxu2 %vm1028_vm2, %v4317_v29 }
 0x504   : > { %v10460_v29 = vpop.f32.mrf.mxu1 }
 0x505   : > { %v3732_v7 = vpop.f32.mrf.mxu2 }
 0x506   : > { %v10455_v49 = vadd.f32 %v3732_v7, %v3365_v58  ;;  %7294 = vmatmul.msk.f32.gmra.mxu3 %vm880_vm1, %v7268_v10  ;;  %7381 = vmatmul.msk.f32.gmra.mxu1 %vm880_vm1, %v7355_v26  ;;  %v7312_v10 = vld [vmem:[%s11317_s19 + $0x188] sm:$0xff]  ;;  %v7273_v26 = vld [vmem:[%s11316_s23 + $0x518] sm:$0xff] }
 0x507   : > { %v4057_v18 = vpop.f32.mrf.mxu0 }
 0x508   : > { %v4130_v41 = vadd.f32 %v4057_v18, %v10080_v40  ;;  %v7318_v40 = vld [vmem:[%s11317_s19 + $0x1b8] sm:$0xff] }
 0x509   : > { %v3929_v56 = vpop.f32.mrf.mxu3  ;;  %4833 = vmatpush.msrb.mxu0 %v7318_v40  ;;  %v7361_v40 = vld [vmem:[%s11316_s23 + $0x600] sm:$0xff] }
 0x50a   : > { %7168 = vmatmul.msk.f32.gmra.mxu0 %vm1028_vm2, %v3929_v56  ;;  %7251 = vmatmul.msk.f32.gmra.mxu2 %vm1028_vm2, %v4320_v17  ;;  %v7359_v56 = vld [vmem:[%s11316_s23 + $0x5f0] sm:$0xff] }
 0x50b   : > { %4834 = vmatpush.msrb.mxu0 %v7317_v59 }
 0x50c   : > { %v10475_v30 = vpop.f32.mrf.mxu1 }
 0x50d   : > { %v4448_v8 = vpop.f32.mrf.mxu2 }
 0x50e   : > { %v10470_v22 = vadd.f32 %v4448_v8, %v4129_v53  ;;  %7295 = vmatmul.msk.f32.gmra.mxu3 %vm880_vm1, %v7269_v9  ;;  %7382 = vmatmul.msk.f32.gmra.mxu1 %vm880_vm1, %v7356_v61  ;;  %v6012_v61 = vld [vmem:[#allocation5 + $0x8] sm:$0xff] }
 0x50f   : > { %v4060_v11 = vpop.f32.mrf.mxu0 }
 0x510   : > { %v4131_v35 = vadd.f32 %v4060_v11, %v10105_v46  ;;  %v7315_v46 = vld [vmem:[%s11317_s19 + $0x1a0] sm:$0xff] }
 0x511   : > { %v3932_v17 = vpop.f32.mrf.mxu3 }
 0x512   : > { %7169 = vmatmul.msk.f32.gmra.mxu0 %vm1028_vm2, %v3932_v17  ;;  %7252 = vmatmul.msk.f32.gmra.mxu2 %vm1028_vm2, %v4323_v31  ;;  %v7395_v31 = vld [vmem:[%s11317_s19 + $0x1c0] sm:$0xff] }
 0x513   : > { %5234 = vmatpush.msra.mxu2 %v7395_v31 }
 0x514   : > { %v10493_v14 = vpop.f32.mrf.mxu1 }
 0x515   : > { %v4451_v21 = vpop.f32.mrf.mxu2  ;;  %6030 = vmatpush.msrb.mxu2 %v6012_v61 }
 0x516   : > { %v10485_v54 = vadd.f32 %v4451_v21, %v4130_v41  ;;  %7296 = vmatmul.msk.f32.gmra.mxu3 %vm880_vm1, %v7270_v0  ;;  %7383 = vmatmul.msk.f32.gmra.mxu1 %vm880_vm1, %v7357_v34  ;;  %v7274_v0 = vld [vmem:[%s11316_s23 + $0x520] sm:$0xff] }
 0x517   : > { %v4063_v15 = vpop.f32.mrf.mxu0 }
 0x518   : > { %v4132_v16 = vadd.f32 %v4063_v15, %v10131_v25  ;;  %v7311_v25 = vld [vmem:[%s11317_s19 + $0x180] sm:$0xff] }
 0x519   : > { %v3935_v27 = vpop.f32.mrf.mxu3 }
 0x51a   : > { %7170 = vmatmul.msk.f32.gmra.mxu0 %vm1028_vm2, %v3935_v27  ;;  %7253 = vmatmul.msk.f32.gmra.mxu2 %vm1028_vm2, %v4326_v63  ;;  %v7316_v63 = vld [vmem:[%s11317_s19 + $0x1a8] sm:$0xff] }
 0x51b   : > { %4835 = vmatpush.msrb.mxu0 %v7316_v63  ;;  %v7362_v63 = vld [vmem:[%s11316_s23 + $0x608] sm:$0xff] }
 0x51c   : > { %v4341_v36 = vpop.f32.mrf.mxu1 }
 0x51d   : > { %v4454_v6 = vpop.f32.mrf.mxu2  ;;  %4836 = vmatpush.msrb.mxu0 %v7315_v46 }
 0x51e   : > { %v10509_v24 = vadd.f32 %v4454_v6, %v4131_v35  ;;  %7297 = vmatmul.msk.f32.gmra.mxu3 %vm880_vm1, %v7271_v55  ;;  %7384 = vmatmul.msk.f32.gmra.mxu1 %vm880_vm1, %v7358_v20 }
 0x51f   : > { %v4066_v2 = vpop.f32.mrf.mxu0  ;;  %4837 = vmatpush.msrb.mxu0 %v7314_v28 }
 0x520   : > { %v4133_v9 = vadd.f32 %v4066_v2, %v10152_v50  ;;  %v7360_v50 = vld [vmem:[%s11316_s23 + $0x5f8] sm:$0xff] }
 0x521   : > { %v3938_v52 = vpop.f32.mrf.mxu3  ;;  %4838 = vmatpush.msrb.mxu0 %v7313_v48 }
 0x522   : > { %7171 = vmatmul.msk.f32.gmra.mxu0 %vm1028_vm2, %v3938_v52  ;;  %7254 = vmatmul.msk.f32.gmra.mxu2 %vm1028_vm2, %v4329_v32 }
 0x523   : > { %4839 = vmatpush.msrb.mxu0 %v7312_v10 }
 0x524   : > { %v4344_v18 = vpop.f32.mrf.mxu1 }
 0x525   : > { %v4457_v32 = vpop.f32.mrf.mxu2  ;;  %4840 = vmatpush.msrb.mxu0 %v7311_v25 }
 0x526   : > { %v10534_v13 = vadd.f32 %v4457_v32, %v4132_v16  ;;  %7298 = vmatmul.msk.f32.gmra.mxu3 %vm880_vm1, %v7272_v60  ;;  %7385 = vmatmul.msk.f32.gmra.mxu1 %vm880_vm1, %v7359_v56  ;;  %v7363_v60 = vld [vmem:[%s11316_s23 + $0x610] sm:$0xff] }
 0x527   : > { %v4069_v58 = vpop.f32.mrf.mxu0 }
 0x528   : > { %v4134_v41 = vadd.f32 %v4069_v58, %v10170_v5  ;;  %v7275_v5 = vld [vmem:[%s11316_s23 + $0x528] sm:$0xff] }
 0x529   : > { %v3941_v7 = vpop.f32.mrf.mxu3 }
 0x52a   : > { %7172 = vmatmul.msk.f32.gmra.mxu0 %vm1028_vm2, %v3941_v7  ;;  %7255 = vmatmul.msk.f32.gmra.mxu2 %vm1028_vm2, %v10460_v29  ;;  %v7364_v7 = vld [vmem:[%s11316_s23 + $0x618] sm:$0xff] }
 0x52c   : > { %v5060_v17 = vpop.f32.mrf.mxu1 }
 0x52d   : > { %v4460_v53 = vpop.f32.mrf.mxu2 }
 0x52e   : > { %v10554_v8 = vadd.f32 %v4460_v53, %v4133_v9  ;;  %7299 = vmatmul.msk.f32.gmra.mxu3 %vm880_vm1, %v7273_v26  ;;  %7386 = vmatmul.msk.f32.gmra.mxu1 %vm880_vm1, %v7360_v50 }
 0x52f   : > { %v4072_v11 = vpop.f32.mrf.mxu0 }
 0x530   : > { %v4135_v34 = vadd.f32 %v4072_v11, %v10185_v4  ;;  %v7276_v4 = vld [vmem:[%s11316_s23 + $0x530] sm:$0xff] }
 0x531   : > { %v3944_v29 = vpop.f32.mrf.mxu3 }
 0x532   : > { %7173 = vmatmul.msk.f32.gmra.mxu0 %vm1028_vm2, %v3944_v29  ;;  %7256 = vmatmul.msk.f32.gmra.mxu2 %vm1028_vm2, %v10475_v30  ;;  %v7365_v29 = vld [vmem:[%s11316_s23 + $0x620] sm:$0xff] }
 0x534   : > { %v5063_v31 = vpop.f32.mrf.mxu1 }
 0x535   : > { %v4463_v21 = vpop.f32.mrf.mxu2 }
 0x536   : > { %v10568_v15 = vadd.f32 %v4463_v21, %v4134_v41  ;;  %7300 = vmatmul.msk.f32.gmra.mxu3 %vm880_vm1, %v7274_v0  ;;  %7387 = vmatmul.msk.f32.gmra.mxu1 %vm880_vm1, %v7361_v40 }
 0x537   : > { %v4075_v30 = vpop.f32.mrf.mxu0 }
 0x538   : > { %v4136_v2 = vadd.f32 %v4075_v30, %v10199_v12  ;;  %v7277_v12 = vld [vmem:[%s11316_s23 + $0x538] sm:$0xff]  ;;  %v7366_v30 = vld [vmem:[%s11316_s23 + $0x628] sm:$0xff] }
 0x539   : > { %v3947_v27 = vpop.f32.mrf.mxu3 }
 0x53a   : > { %7174 = vmatmul.msk.f32.gmra.mxu0 %vm1028_vm2, %v3947_v27  ;;  %7257 = vmatmul.msk.f32.gmra.mxu2 %vm1028_vm2, %v10493_v14 }
 0x53c   : > { %v5066_v6 = vpop.f32.mrf.mxu1 }
 0x53d   : > { %v4466_v55 = vpop.f32.mrf.mxu2 }
 0x53e   : > { %v10582_v35 = vadd.f32 %v4466_v55, %v4135_v34  ;;  %7301 = vmatmul.msk.f32.gmra.mxu3 %vm880_vm1, %v7275_v5  ;;  %7388 = vmatmul.msk.f32.gmra.mxu1 %vm880_vm1, %v7362_v63 }
 0x53f   : > { %v4078_v59 = vpop.f32.mrf.mxu0 }
 0x540   : > { %v4137_v16 = vadd.f32 %v4078_v59, %v10216_v43  ;;  %v7278_v43 = vld [vmem:[%s11316_s23 + $0x540] sm:$0xff]  ;;  %v7367_v59 = vld [vmem:[%s11316_s23 + $0x630] sm:$0xff] }
 0x541   : > { %v3950_v14 = vpop.f32.mrf.mxu3 }
 0x542   : > { %7175 = vmatmul.msk.f32.gmra.mxu0 %vm1028_vm2, %v3950_v14  ;;  %7258 = vmatmul.msk.f32.gmra.mxu2 %vm1028_vm2, %v4341_v36 }
 0x544   : > { %v5069_v20 = vpop.f32.mrf.mxu1 }
 0x545   : > { %v4469_v46 = vpop.f32.mrf.mxu2 }
 0x546   : > { %v10595_v52 = vadd.f32 %v4469_v46, %v4136_v2  ;;  %7302 = vmatmul.msk.f32.gmra.mxu3 %vm880_vm1, %v7276_v4  ;;  %7389 = vmatmul.msk.f32.gmra.mxu1 %vm880_vm1, %v7363_v60 }
 0x547   : > { %v4081_v28 = vpop.f32.mrf.mxu0 }
 0x549   : > { %v4666_v36 = vpop.f32.mrf.mxu3 }
 0x54a   : > { %7259 = vmatmul.msk.f32.gmra.mxu2 %vm1028_vm2, %v4344_v18  ;;  %7319 = vmatmul.msk.f32.vlgmr.msrb.gmra.mxu0 %vm1028_vm2, %v4666_v36  ;;  %v4138_v18 = vadd.f32 %v4081_v28, %v10230_v1  ;;  %v7279_v1 = vld [vmem:[%s11316_s23 + $0x548] sm:$0xff]  ;;  %v7368_v28 = vld [vmem:[%s11316_s23 + $0x638] sm:$0xf] }
 0x54c   : > { %v5072_v25 = vpop.f32.mrf.mxu1 }
 0x54d   : > { %v4472_v48 = vpop.f32.mrf.mxu2 }
 0x54e   : > { %v10608_v32 = vadd.f32 %v4472_v48, %v4137_v16  ;;  %7303 = vmatmul.msk.f32.gmra.mxu3 %vm880_vm1, %v7277_v12  ;;  %7390 = vmatmul.msk.f32.gmra.mxu1 %vm880_vm1, %v7364_v7 }
 0x54f   : > { %v4084_v10 = vpop.f32.mrf.mxu0 }
 0x551   : > { %v4669_v58 = vpop.f32.mrf.mxu3 }
 0x552   : > { %7320 = vmatmul.msk.f32.gmra.mxu0 %vm1028_vm2, %v4669_v58  ;;  %7403 = vmatmul.msk.f32.vlgmr.msra.gmra.mxu2 %vm1028_vm2, %v5060_v17  ;;  %v4139_v17 = vadd.f32 %v4084_v10, %v10244_v51  ;;  %v7280_v51 = vld [vmem:[%s11316_s23 + $0x550] sm:$0xff]  ;;  %v7283_v10 = vld [vmem:[%s11316_s23 + $0x568] sm:$0xff] }
 0x554   : > { %v5075_v11 = vpop.f32.mrf.mxu1 }
 0x555   : > { %v4475_v56 = vpop.f32.mrf.mxu2 }
 0x556   : > { %v10621_v26 = vadd.f32 %v4475_v56, %v4138_v18  ;;  %7304 = vmatmul.msk.f32.gmra.mxu3 %vm880_vm1, %v7278_v43  ;;  %7391 = vmatmul.msk.f32.gmra.mxu1 %vm880_vm1, %v7365_v29  ;;  %v7284_v18 = vld [vmem:[%s11316_s23 + $0x570] sm:$0xf] }
 0x557   : > { %v4087_v9 = vpop.f32.mrf.mxu0 }
 0x558   : > { %v4140_v27 = vadd.f32 %v4087_v9, %v10261_v23  ;;  %v7281_v23 = vld [vmem:[%s11316_s23 + $0x558] sm:$0xff] }
 0x559   : > { %v4672_v53 = vpop.f32.mrf.mxu3 }
 0x55a   : > { %7321 = vmatmul.msk.f32.gmra.mxu0 %vm1028_vm2, %v4672_v53  ;;  %7404 = vmatmul.msk.f32.gmra.mxu2 %vm1028_vm2, %v5063_v31 }
 0x55c   : > { %v5078_v21 = vpop.f32.mrf.mxu1 }
 0x55d   : > { %v4478_v61 = vpop.f32.mrf.mxu2 }
 0x55e   : > { %v10634_v50 = vadd.f32 %v4478_v61, %v4139_v17  ;;  %7305 = vmatmul.msk.f32.gmra.mxu3 %vm880_vm1, %v7279_v1  ;;  %7392 = vmatmul.msk.f32.gmra.mxu1 %vm880_vm1, %v7366_v30  ;;  %v7428_v1 = vld [vmem:[%s11316_s23 + $0x640] sm:$0xff]  ;;  %v7429_v30 = vld [vmem:[%s11316_s23 + $0x648] sm:$0xff] }
 0x55f   : > { %v4090_v0 = vpop.f32.mrf.mxu0 }
 0x560   : > { %v4141_v14 = vadd.f32 %v4090_v0, %v10275_v45  ;;  %v7282_v45 = vld [vmem:[%s11316_s23 + $0x560] sm:$0xff] }
 0x561   : > { %v4675_v41 = vpop.f32.mrf.mxu3 }
 0x562   : > { %7322 = vmatmul.msk.f32.gmra.mxu0 %vm1028_vm2, %v4675_v41  ;;  %7405 = vmatmul.msk.f32.gmra.mxu2 %vm1028_vm2, %v5066_v6 }
 0x564   : > { %v5081_v55 = vpop.f32.mrf.mxu1 }
 0x565   : > { %v4481_v31 = vpop.f32.mrf.mxu2 }
 0x566   : > { %v10647_v40 = vadd.f32 %v4481_v31, %v4140_v27  ;;  %7306 = vmatmul.msk.f32.gmra.mxu3 %vm880_vm1, %v7280_v51  ;;  %7393 = vmatmul.msk.f32.gmra.mxu1 %vm880_vm1, %v7367_v59  ;;  %v6011_v31 = vld [vmem:[#allocation5] sm:$0xff]  ;;  %v7430_v59 = vld [vmem:[%s11316_s23 + $0x650] sm:$0xff] }
 0x567   : > { %v4093_v5 = vpop.f32.mrf.mxu0  ;;  %6031 = vmatpush.msrb.mxu2 %v6011_v31 }
 0x568   : > { %v4142_v36 = vadd.f32 %v4093_v5, %v10289_v39 }
 0x569   : > { %v4678_v34 = vpop.f32.mrf.mxu3 }
 0x56a   : > { %7323 = vmatmul.msk.f32.gmra.mxu0 %vm1028_vm2, %v4678_v34  ;;  %7406 = vmatmul.msk.f32.gmra.mxu2 %vm1028_vm2, %v5069_v20 }
 0x56c   : > { %v5084_v46 = vpop.f32.mrf.mxu1 }
 0x56d   : > { %v4484_v6 = vpop.f32.mrf.mxu2 }
 0x56e   : > { %v10660_v63 = vadd.f32 %v4484_v6, %v4141_v14  ;;  %7307 = vmatmul.msk.f32.gmra.mxu3 %vm880_vm1, %v7281_v23  ;;  %7394 = vmatmul.msk.f32.gmra.mxu1 %vm880_vm1, %v7368_v28 }
 0x56f   : > { %v4096_v4 = vpop.f32.mrf.mxu0 }
 0x570   : > { %v4143_v39 = vadd.f32 %v4096_v4, %v10303_v44 }
 0x571   : > { %v4681_v2 = vpop.f32.mrf.mxu3 }
 0x572   : > { %7324 = vmatmul.msk.f32.gmra.mxu0 %vm1028_vm2, %v4681_v2  ;;  %7407 = vmatmul.msk.f32.gmra.mxu2 %vm1028_vm2, %v5072_v25 }
 0x574   : > { %v5087_v48 = vpop.f32.mrf.mxu1 }
 0x575   : > { %v4487_v20 = vpop.f32.mrf.mxu2 }
 0x576   : > { %v10673_v60 = vadd.f32 %v4487_v20, %v4142_v36  ;;  %7308 = vmatmul.msk.f32.gmra.mxu3 %vm880_vm1, %v7282_v45 }
 0x577   : > { %v4099_v12 = vpop.f32.mrf.mxu0 }
 0x578   : > { %v4144_v9 = vadd.f32 %v4099_v12, %v10320_v3  ;;  %v7432_v12 = vld [vmem:[%s11316_s23 + $0x660] sm:$0xff] }
 0x579   : > { %v4684_v16 = vpop.f32.mrf.mxu3 }
 0x57a   : > { %7325 = vmatmul.msk.f32.gmra.mxu0 %vm1028_vm2, %v4684_v16  ;;  %7408 = vmatmul.msk.f32.gmra.mxu2 %vm1028_vm2, %v5075_v11 }
 0x57c   : > { %v5090_v56 = vpop.f32.mrf.mxu1 }
 0x57d   : > { %v4490_v58 = vpop.f32.mrf.mxu2 }
 0x57e   : > { %v10682_v25 = vadd.f32 %v4490_v58, %v4143_v39  ;;  %7309 = vmatmul.msk.f32.gmra.mxu3 %vm880_vm1, %v7283_v10 }
 0x57f   : > { %v4102_v7 = vpop.f32.mrf.mxu0 }
 0x580   : > { %v4145_v17 = vadd.f32 %v4102_v7, %v10334_v37  ;;  %v7433_v7 = vld [vmem:[%s11316_s23 + $0x668] sm:$0xff] }
 0x581   : > { %v4687_v43 = vpop.f32.mrf.mxu3 }
 0x582   : > { %7326 = vmatmul.msk.f32.gmra.mxu0 %vm1028_vm2, %v4687_v43  ;;  %7409 = vmatmul.msk.f32.gmra.mxu2 %vm1028_vm2, %v5078_v21 }
 0x584   : > { %v5093_v0 = vpop.f32.mrf.mxu1 }
 0x585   : > { %v4493_v53 = vpop.f32.mrf.mxu2 }
 0x586   : > { %v10691_v44 = vadd.f32 %v4493_v53, %v4144_v9  ;;  %7310 = vmatmul.msk.f32.gmra.mxu3 %vm880_vm1, %v7284_v18 }
 0x587   : > { %v4105_v11 = vpop.f32.mrf.mxu0 }
 0x588   : > { %v4146_v51 = vadd.f32 %v4105_v11, %v10348_v38  ;;  %v7434_v11 = vld [vmem:[%s11316_s23 + $0x670] sm:$0xff] }
 0x589   : > { %v4690_v29 = vpop.f32.mrf.mxu3 }
 0x58a   : > { %7327 = vmatmul.msk.f32.gmra.mxu0 %vm1028_vm2, %v4690_v29  ;;  %7410 = vmatmul.msk.f32.gmra.mxu2 %vm1028_vm2, %v5081_v55 }
 0x58c   : > { %v5096_v34 = vpop.f32.mrf.mxu1 }
 0x58d   : > { %v4496_v61 = vpop.f32.mrf.mxu2 }
 0x58e   : > { %v10700_v3 = vadd.f32 %v4496_v61, %v4145_v17  ;;  %7454 = vmatmul.msk.f32.vlgmr.msra.gmra.mxu3 %vm880_vm1, %v7428_v1 }
 0x58f   : > { %v4108_v41 = vpop.f32.mrf.mxu0 }
 0x590   : > { %v4147_v38 = vadd.f32 %v4108_v41, %v10365_v42  ;;  %v7435_v41 = vld [vmem:[%s11316_s23 + $0x678] sm:$0xff] }
 0x591   : > { %v4693_v21 = vpop.f32.mrf.mxu3 }
 0x592   : > { %7328 = vmatmul.msk.f32.gmra.mxu0 %vm1028_vm2, %v4693_v21  ;;  %7411 = vmatmul.msk.f32.gmra.mxu2 %vm1028_vm2, %v5084_v46  ;;  %v7431_v46 = vld [vmem:[%s11316_s23 + $0x658] sm:$0xff] }
 0x594   : > { %v5099_v2 = vpop.f32.mrf.mxu1 }
 0x595   : > { %v4499_v27 = vpop.f32.mrf.mxu2 }
 0x596   : > { %v10709_v37 = vadd.f32 %v4499_v27, %v4146_v51  ;;  %7455 = vmatmul.msk.f32.gmra.mxu3 %vm880_vm1, %v7429_v30 }
 0x597   : > { %v4111_v5 = vpop.f32.mrf.mxu0 }
 0x598   : > { %v4148_v28 = vadd.f32 %v4111_v5, %v10379_v57  ;;  %v7436_v5 = vld [vmem:[%s11316_s23 + $0x680] sm:$0xff] }
 0x599   : > { %v4696_v55 = vpop.f32.mrf.mxu3 }
 0x59a   : > { %7329 = vmatmul.msk.f32.gmra.mxu0 %vm1028_vm2, %v4696_v55  ;;  %7412 = vmatmul.msk.f32.gmra.mxu2 %vm1028_vm2, %v5087_v48 }
 0x59c   : > { %v5102_v16 = vpop.f32.mrf.mxu1 }
 0x59d   : > { %v4502_v23 = vpop.f32.mrf.mxu2 }
 0x59e   : > { %v10718_v14 = vadd.f32 %v4502_v23, %v4147_v38  ;;  %7456 = vmatmul.msk.f32.gmra.mxu3 %vm880_vm1, %v7430_v59  ;;  %v7437_v23 = vld [vmem:[%s11316_s23 + $0x688] sm:$0xff] }
 0x59f   : > { %v4114_v6 = vpop.f32.mrf.mxu0 }
 0x5a0   : > { %v4149_v48 = vadd.f32 %v4114_v6, %v10393_v62 }
 0x5a1   : > { %v4699_v4 = vpop.f32.mrf.mxu3 }
 0x5a2   : > { %7330 = vmatmul.msk.f32.gmra.mxu0 %vm1028_vm2, %v4699_v4  ;;  %7413 = vmatmul.msk.f32.gmra.mxu2 %vm1028_vm2, %v5090_v56 }
 0x5a4   : > { %v5105_v56 = vpop.f32.mrf.mxu1 }
 0x5a5   : > { %v4505_v45 = vpop.f32.mrf.mxu2 }
 0x5a6   : > { %v10727_v42 = vadd.f32 %v4505_v45, %v4148_v28  ;;  %7457 = vmatmul.msk.f32.gmra.mxu3 %vm880_vm1, %v7431_v46  ;;  %v7438_v45 = vld [vmem:[%s11316_s23 + $0x690] sm:$0xff] }
 0x5a7   : > { %v4117_v36 = vpop.f32.mrf.mxu0 }
 0x5a8   : > { %v4150_v43 = vadd.f32 %v4117_v36, %v10410_v47 }
 0x5a9   : > { %v4702_v20 = vpop.f32.mrf.mxu3 }
 0x5aa   : > { %7331 = vmatmul.msk.f32.gmra.mxu0 %vm1028_vm2, %v4702_v20  ;;  %7414 = vmatmul.msk.f32.gmra.mxu2 %vm1028_vm2, %v5093_v0 }
 0x5ac   : > { %v5108_v61 = vpop.f32.mrf.mxu1 }
 0x5ad   : > { %v4508_v10 = vpop.f32.mrf.mxu2 }
 0x5ae   : > { %v10736_v57 = vadd.f32 %v4508_v10, %v4149_v48  ;;  %7458 = vmatmul.msk.f32.gmra.mxu3 %vm880_vm1, %v7432_v12  ;;  %v7486_v10 = vld [vmem:[%s11317_s19 + $0x238] sm:$0xff] }
 0x5af   : > { %v4120_v39 = vpop.f32.mrf.mxu0  ;;  %5621 = vmatpush.msra.mxu0 %v7486_v10 }
 0x5b0   : > { %v4151_v29 = vadd.f32 %v4120_v39, %v10424_v19  ;;  %v7485_v39 = vld [vmem:[%s11317_s19 + $0x230] sm:$0xff] }
 0x5b1   : > { %v4705_v58 = vpop.f32.mrf.mxu3  ;;  %5622 = vmatpush.msra.mxu0 %v7485_v39 }
 0x5b2   : > { %7332 = vmatmul.msk.f32.gmra.mxu0 %vm1028_vm2, %v4705_v58  ;;  %7415 = vmatmul.msk.f32.gmra.mxu2 %vm1028_vm2, %v5096_v34 }
 0x5b4   : > { %v5111_v31 = vpop.f32.mrf.mxu1 }
 0x5b5   : > { %v4511_v18 = vpop.f32.mrf.mxu2 }
 0x5b6   : > { %v10745_v62 = vadd.f32 %v4511_v18, %v4150_v43  ;;  %7459 = vmatmul.msk.f32.gmra.mxu3 %vm880_vm1, %v7433_v7  ;;  %v7484_v7 = vld [vmem:[%s11317_s19 + $0x228] sm:$0xff] }
 0x5b7   : > { %v4123_v9 = vpop.f32.mrf.mxu0  ;;  %5623 = vmatpush.msra.mxu0 %v7484_v7  ;;  %v7444_v7 = vld [vmem:[%s11316_s23 + $0x6c0] sm:$0xff] }
 0x5b8   : > { %v4152_v21 = vadd.f32 %v4123_v9, %v10438_v33 }
 0x5b9   : > { %v4708_v53 = vpop.f32.mrf.mxu3 }
 0x5ba   : > { %7333 = vmatmul.msk.f32.gmra.mxu0 %vm1028_vm2, %v4708_v53  ;;  %7416 = vmatmul.msk.f32.gmra.mxu2 %vm1028_vm2, %v5099_v2  ;;  %v7482_v53 = vld [vmem:[%s11317_s19 + $0x218] sm:$0xff] }
 0x5bc   : > { %v5114_v6 = vpop.f32.mrf.mxu1 }
 0x5bd   : > { %v4514_v1 = vpop.f32.mrf.mxu2 }
 0x5be   : > { %v10754_v47 = vadd.f32 %v4514_v1, %v4151_v29  ;;  %7460 = vmatmul.msk.f32.gmra.mxu3 %vm880_vm1, %v7434_v11  ;;  %v7440_v11 = vld [vmem:[%s11316_s23 + $0x6a0] sm:$0xff]  ;;  %v7481_v29 = vld [vmem:[%s11317_s19 + $0x210] sm:$0xff] }
 0x5bf   : > { %v4126_v17 = vpop.f32.mrf.mxu0 }
 0x5c0   : > { %v4153_v34 = vadd.f32 %v4126_v17, %v10455_v49  ;;  %v7480_v17 = vld [vmem:[%s11317_s19 + $0x208] sm:$0xff] }
 0x5c1   : > { %v4711_v0 = vpop.f32.mrf.mxu3 }
 0x5c2   : > { %7334 = vmatmul.msk.f32.gmra.mxu0 %vm1028_vm2, %v4711_v0  ;;  %7417 = vmatmul.msk.f32.gmra.mxu2 %vm1028_vm2, %v5102_v16  ;;  %v7479_v0 = vld [vmem:[%s11317_s19 + $0x200] sm:$0xff] }
 0x5c5   : > { %v4517_v30 = vpop.f32.mrf.mxu2 }
 0x5c6   : > { %v10763_v19 = vadd.f32 %v4517_v30, %v4152_v21  ;;  %7461 = vmatmul.msk.f32.gmra.mxu3 %vm880_vm1, %v7435_v41  ;;  %v7441_v30 = vld [vmem:[%s11316_s23 + $0x6a8] sm:$0xff] }
 0x5c7   : > { %v4842_v51 = vpop.f32.mrf.mxu0 }
 0x5c8   : > { %v4917_v4 = vadd.f32 %v4842_v51, %v10470_v22  ;;  %v5117_v22 = vpop.f32.mrf.mxu1 }
 0x5c9   : > { %v4714_v27 = vpop.f32.mrf.mxu3 }
 0x5ca   : > { %7335 = vmatmul.msk.f32.gmra.mxu0 %vm1028_vm2, %v4714_v27  ;;  %7418 = vmatmul.msk.f32.gmra.mxu2 %vm1028_vm2, %v5105_v56  ;;  %v7483_v56 = vld [vmem:[%s11317_s19 + $0x220] sm:$0xff] }
 0x5cb   : > { %5624 = vmatpush.msra.mxu0 %v7483_v56 }
 0x5cd   : > { %v4520_v55 = vpop.f32.mrf.mxu2  ;;  %5625 = vmatpush.msra.mxu0 %v7482_v53 }
 0x5ce   : > { %v10772_v33 = vadd.f32 %v4520_v55, %v4153_v34  ;;  %7462 = vmatmul.msk.f32.gmra.mxu3 %vm880_vm1, %v7436_v5  ;;  %v7442_v5 = vld [vmem:[%s11316_s23 + $0x6b0] sm:$0xff]  ;;  %v8053_v55 = vmov 49.0  }
 0x5cf   : > { %v4845_v59 = vpop.f32.mrf.mxu0  ;;  %5626 = vmatpush.msra.mxu0 %v7481_v29  ;;  %7691 = vrcp.f32 %v8053_v55 }
 0x5d0   : > { %v4918_v36 = vadd.f32 %v4845_v59, %v10485_v54  ;;  %v7439_v54 = vld [vmem:[%s11316_s23 + $0x698] sm:$0xff]  ;;  %v5120_v18 = vpop.f32.mrf.mxu1 }
 0x5d1   : > { %v4717_v38 = vpop.f32.mrf.mxu3  ;;  %5627 = vmatpush.msra.mxu0 %v7480_v17 }
 0x5d2   : > { %7336 = vmatmul.msk.f32.gmra.mxu0 %vm1028_vm2, %v4717_v38  ;;  %7419 = vmatmul.msk.f32.gmra.mxu2 %vm1028_vm2, %v5108_v61 }
 0x5d3   : > { %5628 = vmatpush.msra.mxu0 %v7479_v0 }
 0x5d5   : > { %v5236_v2 = vpop.f32.mrf.mxu2 }
 0x5d6   : > { %v10781_v49 = vadd.f32 %v5236_v2, %v4917_v4  ;;  %7463 = vmatmul.msk.f32.gmra.mxu3 %vm880_vm1, %v7437_v23  ;;  %v11321_v23 = vld [vmem:[#allocation30_spill] sm:$0xff]  ;;  %v7692_v2 = vpop.eup %7691 }
 0x5d7   : > { %v10784_v46 = vpop.f32.mrf.mxu0  ;;  %vm6008_vm6 = vweird.f32 %v7692_v2 }
 0x5d8   : > { %v5123_v21 = vpop.f32.mrf.mxu1 }
 0x5d9   : > { %v4720_v28 = vpop.f32.mrf.mxu3 }
 0x5da   : > { %7337 = vmatmul.msk.f32.gmra.mxu0 %vm1028_vm2, %v4720_v28  ;;  %7420 = vmatmul.msk.f32.gmra.mxu2 %vm1028_vm2, %v5111_v31  ;;  %v7443_v28 = vld [vmem:[%s11316_s23 + $0x6b8] sm:$0xff] }
 0x5dd   : > { %v5239_v20 = vpop.f32.mrf.mxu2 }
 0x5de   : > { %v10792_v12 = vadd.f32 %v5239_v20, %v4918_v36  ;;  %7464 = vmatmul.msk.f32.gmra.mxu3 %vm880_vm1, %v7438_v45  ;;  %v6004_v36 = vmul.f32 49.0, %v7692_v2 }
 0x5df   : > { %v10795_v16 = vpop.f32.mrf.mxu0 }
 0x5e0   : > { %v5126_v34 = vpop.f32.mrf.mxu1 }
 0x5e1   : > { %v4723_v48 = vpop.f32.mrf.mxu3 }
 0x5e2   : > { %7338 = vmatmul.msk.f32.gmra.mxu0 %vm1028_vm2, %v4723_v48  ;;  %7421 = vmatmul.msk.f32.gmra.mxu2 %vm1028_vm2, %v5114_v6  ;;  %v5997_v6 = vrot.slane %v11321_v23, 4 }
 0x5e4   : > { %v5998_v45 = vadd.f32 %v5997_v6, %v11321_v23 }
 0x5e5   : > { %v10808_v58 = vpop.f32.mrf.mxu2 }
 0x5e6   : > { %7465 = vmatmul.msk.f32.gmra.mxu3 %vm880_vm1, %v7439_v54  ;;  %v5999_v10 = vrot.slane %v5998_v45, 2  ;;  %v6005_v54 = vsub.f32 1.0, %v6004_v36 }
 0x5e7   : > { %v10814_v43 = vpop.f32.mrf.mxu0 }
 0x5e8   : > { %v6006_v56 = vmul.f32 %v7692_v2, %v6005_v54 }
 0x5e9   : > { %v4726_v9 = vpop.f32.mrf.mxu3 }
 0x5ea   : > { %7339 = vmatmul.msk.f32.gmra.mxu0 %vm1028_vm2, %v4726_v9  ;;  %7422 = vmatmul.msk.f32.gmra.mxu2 %vm1028_vm2, %v5117_v22  ;;  %v5129_v22 = vpop.f32.mrf.mxu1  ;;  %v6007_v17 = vadd.f32 %v7692_v2, %v6006_v56 }
 0x5ed   : > { %v10830_v1 = vpop.f32.mrf.mxu2 }
 0x5ee   : > { %7466 = vmatmul.msk.f32.gmra.mxu3 %vm880_vm1, %v7440_v11 }
 0x5ef   : > { %v10836_v61 = vpop.f32.mrf.mxu0 }
 0x5f1   : > { %v4729_v41 = vpop.f32.mrf.mxu3 }
 0x5f2   : > { %7340 = vmatmul.msk.f32.gmra.mxu0 %vm1028_vm2, %v4729_v41  ;;  %7423 = vmatmul.msk.f32.gmra.mxu2 %vm1028_vm2, %v5120_v18  ;;  %v6000_v18 = vadd.f32 %v5999_v10, %v5998_v45  ;;  %v5132_v11 = vpop.f32.mrf.mxu1  ;;  %v7445_v41 = vld [vmem:[%s11316_s23 + $0x6c8] sm:$0xff] }
 0x5f4   : > { %v6001_v29 = vrot.slane %v6000_v18, 1 }
 0x5f5   : > { %v10846_v51 = vpop.f32.mrf.mxu2 }
 0x5f6   : > { %7467 = vmatmul.msk.f32.gmra.mxu3 %vm880_vm1, %v7441_v30 }
 0x5f7   : > { %v10849_v27 = vpop.f32.mrf.mxu0 }
 0x5f9   : > { %v4732_v31 = vpop.f32.mrf.mxu3 }
 0x5fa   : > { %7341 = vmatmul.msk.f32.gmra.mxu0 %vm1028_vm2, %v4732_v31  ;;  %7424 = vmatmul.msk.f32.gmra.mxu2 %vm1028_vm2, %v5123_v21  ;;  %v6002_v21 = vadd.f32 %v6001_v29, %v6000_v18  ;;  %v6009_v31 = vsel %vm6008_vm6, %v7692_v2, %v6007_v17  ;;  %v7449_v29 = vld [vmem:[%s11316_s23 + $0x6e8] sm:$0xff] }
 0x5fc   : > { %v6010_v23 = vmul.f32 %v6009_v31, %v6002_v21 }
 0x5fd   : > { %v10856_v59 = vpop.f32.mrf.mxu2 }
 0x5fe   : > { %7468 = vmatmul.msk.f32.gmra.mxu3 %vm880_vm1, %v7442_v5 }
 0x5ff   : > { %v10859_v38 = vpop.f32.mrf.mxu0 }
 0x601   : > { %v4735_v4 = vpop.f32.mrf.mxu3 }
 0x602   : > { %7342 = vmatmul.msk.f32.gmra.mxu0 %vm1028_vm2, %v4735_v4  ;;  %7425 = vmatmul.msk.f32.gmra.mxu2 %vm1028_vm2, %v5126_v34  ;;  %v7446_v4 = vld [vmem:[%s11316_s23 + $0x6d0] sm:$0xff] }
 0x605   : > { %v10868_v20 = vpop.f32.mrf.mxu2 }
 0x606   : > { %7469 = vmatmul.msk.f32.gmra.mxu3 %vm880_vm1, %v7443_v28 }
 0x607   : > { %v4866_v48 = vpop.f32.mrf.mxu0 }
 0x608   : > { %v4925_v30 = vadd.f32 %v4866_v48, %v10608_v32 }
 0x609   : > { %v4738_v39 = vpop.f32.mrf.mxu3 }
 0x60a   : > { %7343 = vmatmul.msk.f32.gmra.mxu0 %vm1028_vm2, %v4738_v39  ;;  %7426 = vmatmul.msk.f32.gmra.mxu2 %vm1028_vm2, %v5129_v22  ;;  %v7447_v22 = vld [vmem:[%s11316_s23 + $0x6d8] sm:$0xff] }
 0x60d   : > { %v10876_v9 = vpop.f32.mrf.mxu2 }
 0x60e   : > { %7470 = vmatmul.msk.f32.gmra.mxu3 %vm880_vm1, %v7444_v7  ;;  %v7448_v7 = vld [vmem:[%s11316_s23 + $0x6e0] sm:$0xff] }
 0x60f   : > { %v4869_v53 = vpop.f32.mrf.mxu0 }
 0x610   : > { %v4926_v28 = vadd.f32 %v4869_v53, %v10621_v26 }
 0x611   : > { %v5454_v0 = vpop.f32.mrf.mxu3 }
 0x612   : > { %7427 = vmatmul.msk.f32.gmra.mxu2 %vm1028_vm2, %v5132_v11  ;;  %7487 = vmatmul.msk.f32.vlgmr.msra.gmra.mxu0 %vm1028_vm2, %v5454_v0 }
 0x615   : > { %v5260_v5 = vpop.f32.mrf.mxu2 }
 0x616   : > { %v10885_v34 = vadd.f32 %v5260_v5, %v4925_v30  ;;  %7471 = vmatmul.msk.f32.gmra.mxu3 %vm880_vm1, %v7445_v41  ;;  %v7450_v30 = vld [vmem:[%s11316_s23 + $0x6f0] sm:$0xff] }
 0x617   : > { %v4872_v55 = vpop.f32.mrf.mxu0 }
 0x618   : > { %v4927_v48 = vadd.f32 %v4872_v55, %v10634_v50 }
 0x619   : > { %v5457_v6 = vpop.f32.mrf.mxu3 }
 0x61a   : > { %7488 = vmatmul.msk.f32.gmra.mxu0 %vm1028_vm2, %v5457_v6  ;;  %7537 = vmatmul.msk.f32.vlgmr.msrb.gmra.mxu2 %vm2227_vm4, %v6010_v23  ;;  %v7451_v6 = vld [vmem:[%s11316_s23 + $0x6f8] sm:$0xff] }
 0x61d   : > { %v5263_v32 = vpop.f32.mrf.mxu2 }
 0x61e   : > { %v10894_v2 = vadd.f32 %v5263_v32, %v4926_v28  ;;  %7472 = vmatmul.msk.f32.gmra.mxu3 %vm880_vm1, %v7446_v4 }
 0x61f   : > { %v4875_v45 = vpop.f32.mrf.mxu0 }
 0x620   : > { %v4928_v18 = vadd.f32 %v4875_v45, %v10647_v40 }
 0x621   : > { %v5460_v36 = vpop.f32.mrf.mxu3 }
 0x622   : > { %7489 = vmatmul.msk.f32.gmra.mxu0 %vm1028_vm2, %v5460_v36  ;;  %v7452_v36 = vld [vmem:[%s11316_s23 + $0x700] sm:$0xf] }
 0x625   : > { %v5266_v10 = vpop.f32.mrf.mxu2 }
 0x626   : > { %v10902_v54 = vadd.f32 %v5266_v10, %v4927_v48  ;;  %7473 = vmatmul.msk.f32.gmra.mxu3 %vm880_vm1, %v7447_v22 }
 0x627   : > { %v4878_v26 = vpop.f32.mrf.mxu0 }
 0x628   : > { %v4929_v17 = vadd.f32 %v4878_v26, %v10660_v63 }
 0x629   : > { %v5463_v39 = vpop.f32.mrf.mxu3 }
 0x62a   : > { %7490 = vmatmul.msk.f32.gmra.mxu0 %vm1028_vm2, %v5463_v39 }
 0x62d   : > { %v5269_v56 = vpop.f32.mrf.mxu2 }
 0x62e   : > { %v10910_v53 = vadd.f32 %v5269_v56, %v4928_v18  ;;  %7474 = vmatmul.msk.f32.gmra.mxu3 %vm880_vm1, %v7448_v7 }
 0x62f   : > { %v4881_v50 = vpop.f32.mrf.mxu0 }
 0x630   : > { %v4930_v31 = vadd.f32 %v4881_v50, %v10673_v60 }
 0x631   : > { %v5466_v11 = vpop.f32.mrf.mxu3 }
 0x632   : > { %7491 = vmatmul.msk.f32.gmra.mxu0 %vm1028_vm2, %v5466_v11 }
 0x635   : > { %v5272_v0 = vpop.f32.mrf.mxu2 }
 0x636   : > { %v10918_v41 = vadd.f32 %v5272_v0, %v4929_v17  ;;  %7475 = vmatmul.msk.f32.gmra.mxu3 %vm880_vm1, %v7449_v29 }
 0x637   : > { %v4884_v40 = vpop.f32.mrf.mxu0 }
 0x638   : > { %v4931_v4 = vadd.f32 %v4884_v40, %v10682_v25 }
 0x639   : > { %v5469_v21 = vpop.f32.mrf.mxu3 }
 0x63a   : > { %7492 = vmatmul.msk.f32.gmra.mxu0 %vm1028_vm2, %v5469_v21 }
 0x63d   : > { %v5275_v5 = vpop.f32.mrf.mxu2 }
 0x63e   : > { %v10926_v55 = vadd.f32 %v5275_v5, %v4930_v31  ;;  %7476 = vmatmul.msk.f32.gmra.mxu3 %vm880_vm1, %v7450_v30 }
 0x63f   : > { %v4887_v63 = vpop.f32.mrf.mxu0 }
 0x640   : > { %v4932_v22 = vadd.f32 %v4887_v63, %v10691_v44 }
 0x641   : > { %v5472_v23 = vpop.f32.mrf.mxu3 }
 0x642   : > { %7493 = vmatmul.msk.f32.gmra.mxu0 %vm1028_vm2, %v5472_v23 }
 0x645   : > { %v5278_v28 = vpop.f32.mrf.mxu2 }
 0x646   : > { %v10934_v32 = vadd.f32 %v5278_v28, %v4931_v4  ;;  %7477 = vmatmul.msk.f32.gmra.mxu3 %vm880_vm1, %v7451_v6 }
 0x647   : > { %v4890_v60 = vpop.f32.mrf.mxu0 }
 0x648   : > { %v4933_v39 = vadd.f32 %v4890_v60, %v10700_v3 }
 0x649   : > { %v5475_v45 = vpop.f32.mrf.mxu3 }
 0x64a   : > { %7494 = vmatmul.msk.f32.gmra.mxu0 %vm1028_vm2, %v5475_v45 }
 0x64d   : > { %v5281_v48 = vpop.f32.mrf.mxu2 }
 0x64e   : > { %v10942_v10 = vadd.f32 %v5281_v48, %v4932_v22  ;;  %7478 = vmatmul.msk.f32.gmra.mxu3 %vm880_vm1, %v7452_v36  ;;  %v5784_v22 = vld [vmem:[%s11256_s9] sm:$0xff] }
 0x64f   : > { %v4893_v25 = vpop.f32.mrf.mxu0 }
 0x650   : > { %v4934_v44 = vadd.f32 %v4893_v25, %v10709_v37 }
 0x651   : > { %v5478_v26 = vpop.f32.mrf.mxu3 }
 0x652   : > { %7495 = vmatmul.msk.f32.gmra.mxu0 %vm1028_vm2, %v5478_v26 }
 0x655   : > { %v5284_v7 = vpop.f32.mrf.mxu2 }
 0x656   : > { %v10947_v18 = vadd.f32 %v5284_v7, %v4933_v39 }
 0x657   : > { %v4896_v56 = vpop.f32.mrf.mxu0 }
 0x658   : > { %v4935_v40 = vadd.f32 %v4896_v56, %v10718_v14 }
 0x659   : > { %v5481_v50 = vpop.f32.mrf.mxu3 }
 0x65a   : > { %7496 = vmatmul.msk.f32.gmra.mxu0 %vm1028_vm2, %v5481_v50 }
 0x65d   : > { %v5287_v11 = vpop.f32.mrf.mxu2 }
 0x65e   : > { %v10951_v29 = vadd.f32 %v5287_v11, %v4934_v44 }
 0x65f   : > { %v4899_v17 = vpop.f32.mrf.mxu0 }
 0x660   : > { %v4936_v5 = vadd.f32 %v4899_v17, %v10727_v42  ;;  %v5785_v42 = vld [vmem:[%s11256_s9 + $0x8] sm:$0xff] }
 0x661   : > { %v5484_v0 = vpop.f32.mrf.mxu3  ;;  %7559 = vmatpush.msrb.mxu1 %v5785_v42  ;;  %5879 = vmatpush.msrb.mxu0 %v5785_v42 }
 0x662   : > { %7497 = vmatmul.msk.f32.gmra.mxu0 %vm1028_vm2, %v5484_v0 }
 0x663   : > { %7560 = vmatpush.msrb.mxu1 %v5784_v22  ;;  %5880 = vmatpush.msrb.mxu0 %v5784_v22 }
 0x665   : > { %v5290_v21 = vpop.f32.mrf.mxu2 }
 0x666   : > { %v10955_v3 = vadd.f32 %v5290_v21, %v4935_v40 }
 0x667   : > { %v4902_v30 = vpop.f32.mrf.mxu0 }
 0x668   : > { %v4937_v4 = vadd.f32 %v4902_v30, %v10736_v57 }
 0x669   : > { %v5487_v31 = vpop.f32.mrf.mxu3 }
 0x66a   : > { %7498 = vmatmul.msk.f32.gmra.mxu0 %vm1028_vm2, %v5487_v31 }
 0x66d   : > { %v5293_v63 = vpop.f32.mrf.mxu2 }
 0x66e   : > { %v10959_v37 = vadd.f32 %v5293_v63, %v4936_v5 }
 0x66f   : > { %v4905_v23 = vpop.f32.mrf.mxu0 }
 0x670   : > { %v4938_v36 = vadd.f32 %v4905_v23, %v10745_v62 }
 0x671   : > { %v5490_v6 = vpop.f32.mrf.mxu3 }
 0x672   : > { %7499 = vmatmul.msk.f32.gmra.mxu0 %vm1028_vm2, %v5490_v6  ;;  %v4919_v6 = vadd.f32 %v10784_v46, %v10509_v24  ;;  %v4920_v24 = vadd.f32 %v10795_v16, %v10534_v13 }
 0x675   : > { %v5296_v28 = vpop.f32.mrf.mxu2 }
 0x676   : > { %v10963_v14 = vadd.f32 %v5296_v28, %v4937_v4  ;;  %v5313_v28 = vadd.f32 %v10808_v58, %v4919_v6  ;;  %v5314_v58 = vadd.f32 %v10830_v1, %v4920_v24 }
 0x677   : > { %v4908_v60 = vpop.f32.mrf.mxu0 }
 0x678   : > { %v4939_v39 = vadd.f32 %v4908_v60, %v10754_v47 }
 0x679   : > { %v5493_v45 = vpop.f32.mrf.mxu3 }
 0x67a   : > { %7500 = vmatmul.msk.f32.gmra.mxu0 %vm1028_vm2, %v5493_v45 }
 0x67d   : > { %v5299_v57 = vpop.f32.mrf.mxu2 }
 0x67e   : > { %v10973_v48 = vadd.f32 %v5299_v57, %v4938_v36 }
 0x67f   : > { %v4911_v25 = vpop.f32.mrf.mxu0 }
 0x680   : > { %v4940_v44 = vadd.f32 %v4911_v25, %v10763_v19  ;;  %v10993_v19 = vld [vmem:[%s11255_s8] ss:$0 sm:$0xff] }
 0x681   : > { %v5496_v26 = vpop.f32.mrf.mxu3 }
 0x682   : > { %7501 = vmatmul.msk.f32.gmra.mxu0 %vm1028_vm2, %v5496_v26 }
 0x685   : > { %v5302_v7 = vpop.f32.mrf.mxu2 }
 0x686   : > { %v10977_v56 = vadd.f32 %v5302_v7, %v4939_v39  ;;  %v4921_v7 = vadd.f32 %v10814_v43, %v10554_v8 }
 0x687   : > { %v4914_v50 = vpop.f32.mrf.mxu0 }
 0x688   : > { %v4941_v47 = vadd.f32 %v4914_v50, %v10772_v33 }
 0x689   : > { %v5499_v62 = vpop.f32.mrf.mxu3 }
 0x68a   : > { %7502 = vmatmul.msk.f32.gmra.mxu0 %vm1028_vm2, %v5499_v62  ;;  %v5315_v62 = vadd.f32 %v10846_v51, %v4921_v7 }
 0x68d   : > { %v5305_v11 = vpop.f32.mrf.mxu2 }
 0x68e   : > { %v10981_v17 = vadd.f32 %v5305_v11, %v4940_v44  ;;  %v4922_v11 = vadd.f32 %v10836_v61, %v10568_v15 }
 0x68f   : > { %v5630_v0 = vpop.f32.mrf.mxu0 }
 0x690   : > { %v10984_v40 = vadd.f32 %v5630_v0, %v10781_v49 }
 0x691   : > { %v5502_v21 = vpop.f32.mrf.mxu3 }
 0x692   : > { %7503 = vmatmul.msk.f32.gmra.mxu0 %vm1028_vm2, %v5502_v21  ;;  %v5316_v21 = vadd.f32 %v10856_v59, %v4922_v11 }
 0x695   : > { %v5308_v30 = vpop.f32.mrf.mxu2 }
 0x696   : > { %v10988_v31 = vadd.f32 %v5308_v30, %v4941_v47  ;;  %v4923_v30 = vadd.f32 %v10849_v27, %v10582_v35 }
 0x697   : > { %v5633_v5 = vpop.f32.mrf.mxu0 }
 0x698   : > { %v5706_v63 = vadd.f32 %v5633_v5, %v10792_v12 }
 0x699   : > { %v5505_v23 = vpop.f32.mrf.mxu3 }
 0x69a   : > { %v5735_v49 = vadd.f32 %v10993_v19, %v5706_v63  ;;  %7504 = vmatmul.msk.f32.gmra.mxu0 %vm1028_vm2, %v5505_v23  ;;  %v5317_v63 = vadd.f32 %v10868_v20, %v4923_v30 }
 0x69c   : > { %v5760_v33 = vmax.f32 %v5735_v49, 0.0  ;;  %v4924_v49 = vadd.f32 %v10859_v38, %v10595_v52  ;;  %v5734_v38 = vadd.f32 %v10993_v19, %v10984_v40 }
 0x69d   : > { %v11000_v4 = vpop.f32.mrf.mxu2 }
 0x69e   : > { %7513 = vmatmul.msk.f32.vlgmr.msrb.gmra.mxu1 %vm2227_vm4, %v5760_v33  ;;  %v6037_v60 = vmul.f32 %v11000_v4, %v11000_v4  ;;  %v5318_v33 = vadd.f32 %v10876_v9, %v4924_v49 }
 0x69f   : > { %v5636_v12 = vpop.f32.mrf.mxu0 }
 0x6a0   : > { %v5707_v45 = vadd.f32 %v5636_v12, %v5313_v28  ;;  %v6039_v42 = vsel %vm6038_vm7, %v6037_v60, 0.0 }
 0x6a1   : > { %v5508_v36 = vpop.f32.mrf.mxu3  ;;  %6040 = vadd.xlane.f32.xlu0 %v6039_v42 }
 0x6a2   : > { %v5736_v22 = vadd.f32 %v10993_v19, %v5707_v45  ;;  %7505 = vmatmul.msk.f32.gmra.mxu0 %vm1028_vm2, %v5508_v36 }
 0x6a4   : > { %v5761_v46 = vmax.f32 %v5736_v22, 0.0  ;;  %v5759_v22 = vmax.f32 %v5734_v38, 0.0 }
 0x6a6   : > { %7514 = vmatmul.msk.f32.gmra.mxu1 %vm2227_vm4, %v5761_v46 }
 0x6a7   : > { %v5639_v57 = vpop.f32.mrf.mxu0 }
 0x6a8   : > { %v5708_v25 = vadd.f32 %v5639_v57, %v5314_v58 }
 0x6a9   : > { %v5511_v26 = vpop.f32.mrf.mxu3 }
 0x6aa   : > { %v5737_v39 = vadd.f32 %v10993_v19, %v5708_v25  ;;  %7506 = vmatmul.msk.f32.gmra.mxu0 %vm1028_vm2, %v5511_v26 }
 0x6ac   : > { %v5762_v50 = vmax.f32 %v5737_v39, 0.0 }
 0x6ae   : > { %7515 = vmatmul.msk.f32.gmra.mxu1 %vm2227_vm4, %v5762_v50 }
 0x6af   : > { %v5642_v13 = vpop.f32.mrf.mxu0 }
 0x6b0   : > { %v5709_v16 = vadd.f32 %v5642_v13, %v5315_v62 }
 0x6b1   : > { %v5514_v1 = vpop.f32.mrf.mxu3 }
 0x6b2   : > { %v5738_v44 = vadd.f32 %v10993_v19, %v5709_v16  ;;  %7507 = vmatmul.msk.f32.gmra.mxu0 %vm1028_vm2, %v5514_v1 }
 0x6b4   : > { %v5763_v0 = vmax.f32 %v5738_v44, 0.0  ;;  %v8054_v44 = vmov 12.0  }
 0x6b5   : > { %7693 = vrcp.f32 %v8054_v44 }
 0x6b6   : > { %7516 = vmatmul.msk.f32.gmra.mxu1 %vm2227_vm4, %v5763_v0 }
 0x6b7   : > { %v5645_v8 = vpop.f32.mrf.mxu0 }
 0x6b8   : > { %v5710_v43 = vadd.f32 %v5645_v8, %v5316_v21 }
 0x6b9   : > { %v5517_v51 = vpop.f32.mrf.mxu3 }
 0x6ba   : > { %v5739_v47 = vadd.f32 %v10993_v19, %v5710_v43  ;;  %7508 = vmatmul.msk.f32.gmra.mxu0 %vm1028_vm2, %v5517_v51 }
 0x6bb   : > { %v7694_v0 = vpop.eup %7693 }
 0x6bc   : > { %v5764_v5 = vmax.f32 %v5739_v47, 0.0  ;;  %v6043_v43 = vmul.f32 12.0, %v7694_v0  ;;  %vm6047_vm9 = vweird.f32 %v7694_v0 }
 0x6be   : > { %7517 = vmatmul.msk.f32.gmra.mxu1 %vm2227_vm4, %v5764_v5  ;;  %v6044_v47 = vsub.f32 1.0, %v6043_v43 }
 0x6bf   : > { %v5648_v15 = vpop.f32.mrf.mxu0 }
 0x6c0   : > { %v5711_v61 = vadd.f32 %v5648_v15, %v5317_v63  ;;  %v6045_v63 = vmul.f32 %v7694_v0, %v6044_v47  ;;  %v6064_v15 = vld [vmem:[#allocation7 + $0x8] sm:$0xf] }
 0x6c1   : > { %v5520_v59 = vpop.f32.mrf.mxu3  ;;  %7538 = vmatpush.msk.msra.mxu2 %vm6068_vm8, %v6064_v15 }
 0x6c2   : > { %v5740_v23 = vadd.f32 %v10993_v19, %v5711_v61  ;;  %7509 = vmatmul.msk.f32.gmra.mxu0 %vm1028_vm2, %v5520_v59  ;;  %v6046_v59 = vadd.f32 %v7694_v0, %v6045_v63 }
 0x6c4   : > { %v5765_v6 = vmax.f32 %v5740_v23, 0.0 }
 0x6c6   : > { %7518 = vmatmul.msk.f32.gmra.mxu1 %vm2227_vm4, %v5765_v6  ;;  %v11071_v6 = vsel %vm6047_vm9, %v7694_v0, %v6046_v59 }
 0x6c7   : > { %v5651_v35 = vpop.f32.mrf.mxu0 }
 0x6c8   : > { %v5712_v27 = vadd.f32 %v5651_v35, %v5318_v33 }
 0x6c9   : > { %v5523_v20 = vpop.f32.mrf.mxu3 }
 0x6ca   : > { %v5741_v28 = vadd.f32 %v10993_v19, %v5712_v27  ;;  %7510 = vmatmul.msk.f32.gmra.mxu0 %vm1028_vm2, %v5523_v20 }
 0x6cc   : > { %v5766_v60 = vmax.f32 %v5741_v28, 0.0 }
 0x6ce   : > { %7519 = vmatmul.msk.f32.gmra.mxu1 %vm2227_vm4, %v5766_v60 }
 0x6cf   : > { %v5654_v12 = vpop.f32.mrf.mxu0 }
 0x6d0   : > { %v5713_v45 = vadd.f32 %v5654_v12, %v10885_v34  ;;  %v11080_v12 = vld [vmem:[%s11257_s10] ss:$0 sm:$0xff] }
 0x6d1   : > { %v5526_v42 = vpop.f32.mrf.mxu3 }
 0x6d2   : > { %v5742_v52 = vadd.f32 %v10993_v19, %v5713_v45  ;;  %7511 = vmatmul.msk.f32.gmra.mxu0 %vm1028_vm2, %v5526_v42 }
 0x6d4   : > { %v5767_v9 = vmax.f32 %v5742_v52, 0.0 }
 0x6d6   : > { %7520 = vmatmul.msk.f32.gmra.mxu1 %vm2227_vm4, %v5767_v9 }
 0x6d7   : > { %v5657_v36 = vpop.f32.mrf.mxu0 }
 0x6d8   : > { %v5714_v24 = vadd.f32 %v5657_v36, %v10894_v2 }
 0x6da   : > { %v5743_v46 = vadd.f32 %v10993_v19, %v5714_v24  ;;  %7512 = vmatmul.msk.f32.vlgmr.msrb.gmra.mxu0 %vm2227_vm4, %v5759_v22 }
 0x6dc   : > { %v5768_v34 = vmax.f32 %v5743_v46, 0.0 }
 0x6de   : > { %7521 = vmatmul.msk.f32.gmra.mxu1 %vm2227_vm4, %v5768_v34 }
 0x6df   : > { %v5660_v58 = vpop.f32.mrf.mxu0 }
 0x6e0   : > { %v5715_v57 = vadd.f32 %v5660_v58, %v10902_v54 }
 0x6e2   : > { %v5744_v25 = vadd.f32 %v10993_v19, %v5715_v57 }
 0x6e4   : > { %v5769_v40 = vmax.f32 %v5744_v25, 0.0 }
 0x6e6   : > { %7522 = vmatmul.msk.f32.gmra.mxu1 %vm2227_vm4, %v5769_v40 }
 0x6e7   : > { %v5663_v26 = vpop.f32.mrf.mxu0 }
 0x6e8   : > { %v5716_v39 = vadd.f32 %v5663_v26, %v10910_v53 }
 0x6ea   : > { %v5745_v2 = vadd.f32 %v10993_v19, %v5716_v39  ;;  %v6036_v39 = vld [vmem:[%s11259_s12] sm:$0x1] }
 0x6ec   : > { %v5770_v7 = vmax.f32 %v5745_v2, 0.0 }
 0x6ee   : > { %7523 = vmatmul.msk.f32.gmra.mxu1 %vm2227_vm4, %v5770_v7 }
 0x6ef   : > { %v5666_v50 = vpop.f32.mrf.mxu0 }
 0x6f0   : > { %v5717_v62 = vadd.f32 %v5666_v50, %v10918_v41 }
 0x6f2   : > { %v5746_v13 = vadd.f32 %v10993_v19, %v5717_v62 }
 0x6f4   : > { %v5771_v16 = vmax.f32 %v5746_v13, 0.0 }
 0x6f6   : > { %7524 = vmatmul.msk.f32.gmra.mxu1 %vm2227_vm4, %v5771_v16 }
 0x6f7   : > { %v5669_v54 = vpop.f32.mrf.mxu0 }
 0x6f8   : > { %v5718_v1 = vadd.f32 %v5669_v54, %v10926_v55 }
 0x6fa   : > { %v5747_v53 = vadd.f32 %v10993_v19, %v5718_v1 }
 0x6fc   : > { %v5772_v11 = vmax.f32 %v5747_v53, 0.0 }
 0x6fe   : > { %7525 = vmatmul.msk.f32.gmra.mxu1 %vm2227_vm4, %v5772_v11 }
 0x6ff   : > { %v5672_v21 = vpop.f32.mrf.mxu0 }
 0x700   : > { %v5719_v8 = vadd.f32 %v5672_v21, %v10934_v32  ;;  %v6063_v32 = vld [vmem:[#allocation7] sm:$0xff] }
 0x701   : > { %6087 = vmatpush.msra.mxu2 %v6063_v32 }
 0x702   : > { %v5748_v41 = vadd.f32 %v10993_v19, %v5719_v8 }
 0x704   : > { %v5773_v51 = vmax.f32 %v5748_v41, 0.0 }
 0x706   : > { %7526 = vmatmul.msk.f32.gmra.mxu1 %vm2227_vm4, %v5773_v51 }
 0x707   : > { %v5675_v30 = vpop.f32.mrf.mxu0 }
 0x708   : > { %v5720_v55 = vadd.f32 %v5675_v30, %v10942_v10 }
 0x70a   : > { %v5749_v5 = vadd.f32 %v10993_v19, %v5720_v55 }
 0x70c   : > { %v5774_v61 = vmax.f32 %v5749_v5, 0.0 }
 0x70e   : > { %7527 = vmatmul.msk.f32.gmra.mxu1 %vm2227_vm4, %v5774_v61 }
 0x70f   : > { %v5678_v23 = vpop.f32.mrf.mxu0 }
 0x710   : > { %v5721_v49 = vadd.f32 %v5678_v23, %v10947_v18 }
 0x712   : > { %v5750_v10 = vadd.f32 %v10993_v19, %v5721_v49 }
 0x714   : > { %v5775_v33 = vmax.f32 %v5750_v10, 0.0  ;;  %v6041_v35 = vpop.xlane.xlu0 %6040 }
 0x715   : > { %v6049_v27 = vmul.f32 %v11071_v6, %v6041_v35 }
 0x716   : > { %7528 = vmatmul.msk.f32.gmra.mxu1 %vm2227_vm4, %v5775_v33 }
 0x717   : > { %v6050_v20 = vadd.f32 1e-06, %v6049_v27  ;;  %v5681_v28 = vpop.f32.mrf.mxu0 }
 0x718   : > { %v5722_v60 = vadd.f32 %v5681_v28, %v10951_v29 }
 0x719   : > { %7695 = vrsqrt.f32 %v6050_v20  ;;  %vm6057_vm12 = vweird.f32 %v6050_v20 }
 0x71a   : > { %v5751_v18 = vadd.f32 %v10993_v19, %v5722_v60 }
 0x71b   : > { %v5885_v45 = vpop.f32.mrf.mxu1 }
 0x71c   : > { %v5776_v42 = vmax.f32 %v5751_v18, 0.0  ;;  %v5886_v29 = vadd.f32 %v11080_v12, %v5885_v45 }
 0x71e   : > { %5959 = vst.msk [vmem:[%s11086_s4 + $0x8] sm:$0xff] %vm5957_vm10, %v5886_v29  ;;  %7529 = vmatmul.msk.f32.gmra.mxu1 %vm2227_vm4, %v5776_v42 }
 0x71f   : > { %v7696_v52 = vpop.eup %7695  ;;  %v5684_v38 = vpop.f32.mrf.mxu0 }
 0x720   : > { %v6052_v9 = vmul.f32 %v7696_v52, %v6050_v20  ;;  %v5723_v36 = vadd.f32 %v5684_v38, %v10955_v3  ;;  %vm6058_vm11 = vweird.f32 %v7696_v52 }
 0x721   : > { %vm6059_vm13 = vmor %vm6057_vm12, %vm6058_vm11 }
 0x722   : > { %v6053_v22 = vmul.f32 %v7696_v52, %v6052_v9  ;;  %v5752_v24 = vadd.f32 %v10993_v19, %v5723_v36 }
 0x723   : > { %v5888_v46 = vpop.f32.mrf.mxu1 }
 0x724   : > { %v6054_v34 = vmul.f32 0.5, %v6053_v22  ;;  %v5777_v58 = vmax.f32 %v5752_v24, 0.0  ;;  %v5889_v57 = vadd.f32 %v11080_v12, %v5888_v46 }
 0x726   : > { %v6055_v25 = vsub.f32 1.5, %v6054_v34  ;;  %5960 = vst.msk [vmem:[%s11086_s4 + $0x10] sm:$0xff] %vm5957_vm10, %v5889_v57  ;;  %7530 = vmatmul.msk.f32.gmra.mxu1 %vm2227_vm4, %v5777_v58  ;;  %v6093_v34 = vld [vmem:[#allocation8 + $0x8] sm:$0xf]  ;;  %v6092_v58 = vld [vmem:[#allocation8] sm:$0xff] }
 0x727   : > { %v5687_v40 = vpop.f32.mrf.mxu0  ;;  %7540 = vmatpush.msk.msrb.mxu2 %vm6068_vm8, %v6093_v34 }
 0x728   : > { %v6056_v26 = vmul.f32 %v7696_v52, %v6055_v25  ;;  %v5724_v3 = vadd.f32 %v5687_v40, %v10959_v37 }
 0x729   : > { %6115 = vmatpush.msrb.mxu2 %v6092_v58 }
 0x72a   : > { %v6060_v2 = vsel %vm6059_vm13, %v7696_v52, %v6056_v26  ;;  %v5753_v7 = vadd.f32 %v10993_v19, %v5724_v3 }
 0x72b   : > { %v6061_v50 = vmul.f32 %v6060_v2, %v11000_v4  ;;  %v5891_v62 = vpop.f32.mrf.mxu1 }
 0x72c   : > { %v5778_v13 = vmax.f32 %v5753_v7, 0.0  ;;  %v5892_v16 = vadd.f32 %v11080_v12, %v5891_v62 }
 0x72d   : > { %v6062_v54 = vmul.f32 %v6061_v50, %v6036_v39 }
 0x72e   : > { %5961 = vst.msk [vmem:[%s11086_s4 + $0x18] sm:$0xff] %vm5957_vm10, %v5892_v16  ;;  %7531 = vmatmul.msk.f32.gmra.mxu1 %vm2227_vm4, %v5778_v13 }
 0x72f   : > { %v5690_v37 = vpop.f32.mrf.mxu0  ;;  %7539 = vmatmul.msk.f32.vlgmr.msra.gmra.mxu2 %vm5957_vm10, %v6062_v54 }
 0x730   : > { %v5725_v1 = vadd.f32 %v5690_v37, %v10963_v14 }
 0x732   : > { %v5754_v44 = vadd.f32 %v10993_v19, %v5725_v1 }
 0x733   : > { %v5894_v53 = vpop.f32.mrf.mxu1 }
 0x734   : > { %v5779_v11 = vmax.f32 %v5754_v44, 0.0  ;;  %v5895_v0 = vadd.f32 %v11080_v12, %v5894_v53 }
 0x736   : > { %5962 = vst.msk [vmem:[%s11086_s4 + $0x20] sm:$0xff] %vm5957_vm10, %v5895_v0  ;;  %7532 = vmatmul.msk.f32.gmra.mxu1 %vm2227_vm4, %v5779_v11 }
 0x737   : > { %v5693_v21 = vpop.f32.mrf.mxu0 }
 0x738   : > { %v5726_v8 = vadd.f32 %v5693_v21, %v10973_v48 }
 0x73a   : > { %v5755_v41 = vadd.f32 %v10993_v19, %v5726_v8 }
 0x73b   : > { %v5897_v43 = vpop.f32.mrf.mxu1 }
 0x73c   : > { %v5780_v51 = vmax.f32 %v5755_v41, 0.0  ;;  %v5898_v14 = vadd.f32 %v11080_v12, %v5897_v43 }
 0x73e   : > { %5963 = vst.msk [vmem:[%s11086_s4 + $0x28] sm:$0xff] %vm5957_vm10, %v5898_v14  ;;  %7533 = vmatmul.msk.f32.gmra.mxu1 %vm2227_vm4, %v5780_v51  ;;  %v6141_v51 = vld [vmem:[#allocation10 + $0x8] sm:$0xf]  ;;  %v6140_v14 = vld [vmem:[#allocation10] sm:$0xff] }
 0x73f   : > { %v5696_v47 = vpop.f32.mrf.mxu0  ;;  %7542 = vmatpush.msk.msra.mxu2 %vm6068_vm8, %v6141_v51 }
 0x740   : > { %v5727_v30 = vadd.f32 %v5696_v47, %v10977_v56  ;;  %v6189_v47 = vld [vmem:[#allocation11 + $0x8] sm:$0xf] }
 0x741   : > { %6163 = vmatpush.msra.mxu2 %v6140_v14 }
 0x742   : > { %v5756_v55 = vadd.f32 %v10993_v19, %v5727_v30  ;;  %v6188_v30 = vld [vmem:[#allocation11] sm:$0xff] }
 0x743   : > { %v5900_v5 = vpop.f32.mrf.mxu1 }
 0x744   : > { %v5781_v63 = vmax.f32 %v5756_v55, 0.0  ;;  %v5901_v48 = vadd.f32 %v11080_v12, %v5900_v5 }
 0x746   : > { %5964 = vst.msk [vmem:[%s11086_s4 + $0x30] sm:$0xff] %vm5957_vm10, %v5901_v48  ;;  %7534 = vmatmul.msk.f32.gmra.mxu1 %vm2227_vm4, %v5781_v63 }
 0x747   : > { %v5699_v15 = vpop.f32.mrf.mxu0 }
 0x748   : > { %v5728_v61 = vadd.f32 %v5699_v15, %v10981_v17 }
 0x74a   : > { %v5757_v32 = vadd.f32 %v10993_v19, %v5728_v61 }
 0x74b   : > { %v5903_v59 = vpop.f32.mrf.mxu1 }
 0x74c   : > { %v5782_v23 = vmax.f32 %v5757_v32, 0.0  ;;  %v5904_v56 = vadd.f32 %v11080_v12, %v5903_v59  ;;  %v6121_v59 = vld [vmem:[%s11262_s15] sm:$0x1] }
 0x74e   : > { %5965 = vst.msk [vmem:[%s11086_s4 + $0x38] sm:$0xff] %vm5957_vm10, %v5904_v56  ;;  %7535 = vmatmul.msk.f32.gmra.mxu1 %vm2227_vm4, %v5782_v23 }
 0x74f   : > { %v5702_v49 = vpop.f32.mrf.mxu0 }
 0x750   : > { %v5729_v10 = vadd.f32 %v5702_v49, %v10988_v31 }
 0x752   : > { %v5758_v33 = vadd.f32 %v10993_v19, %v5729_v10  ;;  %v6217_v10 = vld [vmem:[#allocation13 + $0x18] sm:$0xff] }
 0x753   : > { %v5906_v35 = vpop.f32.mrf.mxu1 }
 0x754   : > { %v5783_v17 = vmax.f32 %v5758_v33, 0.0  ;;  %v5907_v27 = vadd.f32 %v11080_v12, %v5906_v35  ;;  %v6216_v33 = vld [vmem:[#allocation13 + $0x10] sm:$0xff]  ;;  %v6215_v35 = vld [vmem:[#allocation13 + $0x8] sm:$0xff] }
 0x756   : > { %5966 = vst.msk [vmem:[%s11086_s4 + $0x40] sm:$0xff] %vm5957_vm10, %v5907_v27  ;;  %7536 = vmatmul.msk.f32.gmra.mxu1 %vm2227_vm4, %v5783_v17  ;;  %v6214_v17 = vld [vmem:[#allocation13] sm:$0xff] }
 0x757   : > { %v5882_v20 = vpop.f32.mrf.mxu0 }
 0x758   : > { %v5883_v28 = vadd.f32 %v11080_v12, %v5882_v20 }
 0x75a   : > { %5958 = vst.msk [vmem:[%s11086_s4] sm:$0xff] %vm5957_vm10, %v5883_v28 }
 0x75b   : > { %v5909_v60 = vpop.f32.mrf.mxu1 }
 0x75c   : > { %v5910_v31 = vadd.f32 %v11080_v12, %v5909_v60 }
 0x75e   : > { %5967 = vst.msk [vmem:[%s11086_s4 + $0x48] sm:$0xff] %vm5957_vm10, %v5910_v31 }
 0x763   : > { %v5912_v19 = vpop.f32.mrf.mxu1 }
 0x764   : > { %v5913_v18 = vadd.f32 %v11080_v12, %v5912_v19 }
 0x766   : > { %5968 = vst.msk [vmem:[%s11086_s4 + $0x50] sm:$0xff] %vm5957_vm10, %v5913_v18 }
 0x76b   : > { %v5915_v45 = vpop.f32.mrf.mxu1 }
 0x76c   : > { %v5916_v42 = vadd.f32 %v11080_v12, %v5915_v45 }
 0x76e   : > { %5969 = vst.msk [vmem:[%s11086_s4 + $0x58] sm:$0xff] %vm5957_vm10, %v5916_v42 }
 0x773   : > { %v5918_v29 = vpop.f32.mrf.mxu1 }
 0x774   : > { %v5919_v52 = vadd.f32 %v11080_v12, %v5918_v29 }
 0x776   : > { %5970 = vst.msk [vmem:[%s11086_s4 + $0x60] sm:$0xff] %vm5957_vm10, %v5919_v52 }
 0x77b   : > { %v5921_v38 = vpop.f32.mrf.mxu1 }
 0x77c   : > { %v5922_v9 = vadd.f32 %v11080_v12, %v5921_v38 }
 0x77e   : > { %5971 = vst.msk [vmem:[%s11086_s4 + $0x68] sm:$0xff] %vm5957_vm10, %v5922_v9 }
 0x783   : > { %v5924_v36 = vpop.f32.mrf.mxu1 }
 0x784   : > { %v5925_v22 = vadd.f32 %v11080_v12, %v5924_v36 }
 0x786   : > { %5972 = vst.msk [vmem:[%s11086_s4 + $0x70] sm:$0xff] %vm5957_vm10, %v5925_v22 }
 0x78b   : > { %v5927_v24 = vpop.f32.mrf.mxu1 }
 0x78c   : > { %v5928_v46 = vadd.f32 %v11080_v12, %v5927_v24 }
 0x78e   : > { %5973 = vst.msk [vmem:[%s11086_s4 + $0x78] sm:$0xff] %vm5957_vm10, %v5928_v46 }
 0x793   : > { %v5930_v57 = vpop.f32.mrf.mxu1 }
 0x794   : > { %v5931_v25 = vadd.f32 %v11080_v12, %v5930_v57 }
 0x796   : > { %5974 = vst.msk [vmem:[%s11086_s4 + $0x80] sm:$0xff] %vm5957_vm10, %v5931_v25 }
 0x79b   : > { %v5933_v40 = vpop.f32.mrf.mxu1 }
 0x79c   : > { %v5934_v26 = vadd.f32 %v11080_v12, %v5933_v40  ;;  %v6262_v40 = vld [vmem:[#allocation14 + $0x8] sm:$0xf] }
 0x79e   : > { %5975 = vst.msk [vmem:[%s11086_s4 + $0x88] sm:$0xff] %vm5957_vm10, %v5934_v26  ;;  %v6261_v26 = vld [vmem:[#allocation14] sm:$0xff] }
 0x7a3   : > { %v5936_v3 = vpop.f32.mrf.mxu1 }
 0x7a4   : > { %v5937_v39 = vadd.f32 %v11080_v12, %v5936_v3 }
 0x7a6   : > { %5976 = vst.msk [vmem:[%s11086_s4 + $0x90] sm:$0xff] %vm5957_vm10, %v5937_v39 }
 0x7ab   : > { %v5939_v2 = vpop.f32.mrf.mxu1 }
 0x7ac   : > { %v5940_v7 = vadd.f32 %v11080_v12, %v5939_v2 }
 0x7ae   : > { %5977 = vst.msk [vmem:[%s11086_s4 + $0x98] sm:$0xff] %vm5957_vm10, %v5940_v7 }
 0x7b2   : > { %v6089_v50 = vpop.f32.mrf.mxu2 }
 0x7b3   : > { %v5942_v62 = vpop.f32.mrf.mxu1  ;;  %7541 = vmatmul.msk.f32.vlgmr.msrb.gmra.mxu2 %vm5957_vm10, %v6089_v50 }
 0x7b4   : > { %v5943_v13 = vadd.f32 %v11080_v12, %v5942_v62  ;;  %7545 = vmatpush.msk.msrb.mxu2 %vm6068_vm8, %v6189_v47 }
 0x7b6   : > { %5978 = vst.msk [vmem:[%s11086_s4 + $0xa0] sm:$0xff] %vm5957_vm10, %v5943_v13  ;;  %6208 = vmatpush.msrb.mxu2 %v6188_v30 }
 0x7bb   : > { %v5945_v16 = vpop.f32.mrf.mxu1 }
 0x7bc   : > { %v5946_v54 = vadd.f32 %v11080_v12, %v5945_v16 }
 0x7be   : > { %5979 = vst.msk [vmem:[%s11086_s4 + $0xa8] sm:$0xff] %vm5957_vm10, %v5946_v54 }
 0x7c3   : > { %v5948_v37 = vpop.f32.mrf.mxu1 }
 0x7c4   : > { %v5949_v1 = vadd.f32 %v11080_v12, %v5948_v37  ;;  %v6242_v37 = vld [vmem:[%s11322_s7] sm:$0x1] }
 0x7c6   : > { %5980 = vst.msk [vmem:[%s11086_s4 + $0xb0] sm:$0xff] %vm5957_vm10, %v5949_v1 }
 0x7cb   : > { %v5951_v44 = vpop.f32.mrf.mxu1 }
 0x7cc   : > { %v5952_v53 = vadd.f32 %v11080_v12, %v5951_v44 }
 0x7ce   : > { %5981 = vst.msk [vmem:[%s11086_s4 + $0xb8] sm:$0xff] %vm5957_vm10, %v5952_v53 }
 0x7d3   : > { %v5954_v11 = vpop.f32.mrf.mxu1 }
 0x7d4   : > { %v5955_v0 = vadd.f32 %v11080_v12, %v5954_v11 }
 0x7d6   : > { %5983 = vst.msk [vmem:[%s11086_s4 + $0xc0] sm:$0xf] %vm5982_vm14, %v5955_v0  ;;  %s6316_s4 = scalar_lea.hbm %s11324_s27, %s8196_s5  ;;  %s7979_s5 = scalar_lea.hbm %s11324_s27, 2 }
 0x7d7   : > { %s6320_s3 = sshll.u32 %s6316_s4, 4  ;;  %s6321_s3 = int_to_ptr.hbm [resolvable:$true] %s6320_s3 }
 0x7d8   : > { %s7973_s25 = sshra.s32 %s6321_s3, 4  ;;  %s7974_s25 = int_to_ptr.hbm [resolvable:$true] %s7973_s25 }
 0x7d9   : > { %s7975_s28 = scalar_lea.hbm %s7974_s25, 1  ;;  %p7980_p3 = scmp.lt.s32.totalorder %s7974_s25, %s11324_s27 }
 0x7da   : > { %p7976_p0 = scmp.ne.s32.totalorder %s7974_s25, %s7975_s28  ;;  %p7981_p4 = scmp.lt.s32.totalorder %s7979_s5, %s7975_s28 }
 0x7dc   : > { %p7977_p1 = pnand %p7976_p0, %p8213_p5  ;;  %p7982_p7 = por %p7981_p4, %p7980_p3 }
 0x7de   : > { %p7978_p2 = pneg %p7977_p1 }
 0x7e0   : > { %p7983_p8 = pnand %p7982_p7, %p7978_p2 }
 0x836   : > { %v6117_v21 = vpop.f32.mrf.mxu2 }
 0x837   : > { %v11192_v8 = vadd.f32 %v6117_v21, %v11000_v4 }
 0x839   : > { %v6122_v41 = vmul.f32 %v11192_v8, %v11192_v8 }
 0x83b   : > { %v6123_v43 = vsel %vm6038_vm7, %v6122_v41, 0.0 }
 0x83c   : > { %6124 = vadd.xlane.f32.xlu0 %v6123_v43 }
 0x8af   : > { %v6125_v12 = vpop.xlane.xlu0 %6124 }
 0x8b0   : > { %v6126_v4 = vmul.f32 %v6125_v12, %v11071_v6 }
 0x8b2   : > { %v6127_v55 = vadd.f32 1e-06, %v6126_v4 }
 0x8b4   : > { %7697 = vrsqrt.f32 %v6127_v55  ;;  %vm6134_vm0 = vweird.f32 %v6127_v55 }
 0x8ba   : > { %v7698_v5 = vpop.eup %7697 }
 0x8bb   : > { %v6129_v63 = vmul.f32 %v7698_v5, %v6127_v55  ;;  %vm6135_vm15 = vweird.f32 %v7698_v5 }
 0x8bc   : > { %vm6136_vm1 = vmor %vm6134_vm0, %vm6135_vm15 }
 0x8bd   : > { %v6130_v48 = vmul.f32 %v7698_v5, %v6129_v63 }
 0x8bf   : > { %v6131_v15 = vmul.f32 0.5, %v6130_v48 }
 0x8c1   : > { %v6132_v61 = vsub.f32 1.5, %v6131_v15 }
 0x8c3   : > { %v6133_v32 = vmul.f32 %v7698_v5, %v6132_v61 }
 0x8c5   : > { %v6137_v23 = vsel %vm6136_vm1, %v7698_v5, %v6133_v32 }
 0x8c6   : > { %v6138_v56 = vmul.f32 %v6137_v23, %v11192_v8 }
 0x8c8   : > { %v6139_v49 = vmul.f32 %v6138_v56, %v6121_v59 }
 0x8ca   : > { %7543 = vmatmul.msk.f32.vlgmr.msra.gmra.mxu2 %vm5957_vm10, %v6139_v49 }
 0x8cb   : > { %6233 = vmatpush.msra.mxu2 %v6217_v10 }
 0x8cd   : > { %6234 = vmatpush.msra.mxu2 %v6216_v33 }
 0x8cf   : > { %6235 = vmatpush.msra.mxu2 %v6215_v35 }
 0x8d1   : > { %6236 = vmatpush.msra.mxu2 %v6214_v17 }
 0x8d2   : > { %7546 = vmatmul.msk.f32.vlgmr.msrb.gmra.mxu2 %vm5957_vm10, %v6139_v49 }
 0x8d3   : > { %7548 = vmatpush.msk.msrb.mxu2 %vm6068_vm8, %v6262_v40  ;;  %vm6289_vm8 = vcmask 401408  }
 0x8d5   : > { %6284 = vmatpush.msrb.mxu2 %v6261_v26 }
 0x94d   : > { %v6165_v27 = vpop.f32.mrf.mxu2 }
 0x94e   : > { %v7544_v20 = vmul.f32 -1.442695, %v6165_v27 }
 0x950   : > { %7699 = vpow2.f32 %v7544_v20 }
 0x955   : > { %v6210_v24 = vpop.f32.mrf.mxu2 }
 0x956   : > { %v7700_v28 = vpop.eup %7699 }
 0x957   : > { %v6171_v60 = vadd.f32 1.0, %v7700_v28 }
 0x959   : > { %7701 = vrcp.f32 %v6171_v60  ;;  %v6183_v45 = vand.u32 2147483648, %v6171_v60  ;;  %v6181_v29 = vand.u32 2147483647, %v6171_v60  ;;  %vm6177_vm4 = vweird.f32 %v6171_v60 }
 0x95b   : > { %v6184_v38 = vor.u32 1.1754944e-38, %v6183_v45  ;;  %vm6182_vm6 = vcmp.eq.f32.partialorder %v6181_v29, 8.507059e+37 }
 0x95f   : > { %v7702_v31 = vpop.eup %7701 }
 0x960   : > { %v6173_v19 = vmul.f32 %v7702_v31, %v6171_v60  ;;  %vm6178_vm2 = vweird.f32 %v7702_v31 }
 0x961   : > { %vm6179_vm5 = vmor %vm6177_vm4, %vm6178_vm2 }
 0x962   : > { %v6174_v18 = vsub.f32 1.0, %v6173_v19 }
 0x964   : > { %v6175_v42 = vmul.f32 %v7702_v31, %v6174_v18 }
 0x966   : > { %v6176_v52 = vadd.f32 %v7702_v31, %v6175_v42 }
 0x968   : > { %v6180_v9 = vsel %vm6179_vm5, %v7702_v31, %v6176_v52 }
 0x969   : > { %v6185_v36 = vsel %vm6182_vm6, %v6184_v38, %v6180_v9 }
 0x96a   : > { %v6187_v22 = vmul.f32 %v6185_v36, %v6165_v27 }
 0x96c   : > { %v6213_v46 = vmul.f32 %v6210_v24, %v6187_v22 }
 0x96e   : > { %7547 = vmatmul.msk.f32.vlgmr.msra.gmra.mxu2 %vm2167_vm3, %v6213_v46 }
 0x9f1   : > { %v6238_v34 = vpop.f32.mrf.mxu2 }
 0x9f2   : > { %v6241_v58 = vadd.f32 %v6238_v34, %v11192_v8 }
 0x9f4   : > { %v6243_v57 = vmul.f32 %v6241_v58, %v6241_v58 }
 0x9f6   : > { %v6244_v25 = vsel %vm6038_vm7, %v6243_v57, 0.0 }
 0x9f7   : > { %6245 = vadd.xlane.f32.xlu1 %v6244_v25 }
 0xa6a   : > { %v6246_v3 = vpop.xlane.xlu1 %6245 }
 0xa6b   : > { %v6247_v39 = vmul.f32 %v6246_v3, %v11071_v6 }
 0xa6d   : > { %v6248_v2 = vadd.f32 1e-06, %v6247_v39 }
 0xa6f   : > { %7703 = vrsqrt.f32 %v6248_v2  ;;  %vm6255_vm7 = vweird.f32 %v6248_v2 }
 0xa75   : > { %v7704_v7 = vpop.eup %7703 }
 0xa76   : > { %v6250_v50 = vmul.f32 %v7704_v7, %v6248_v2  ;;  %vm6256_vm3 = vweird.f32 %v7704_v7 }
 0xa77   : > { %vm6257_vm9 = vmor %vm6255_vm7, %vm6256_vm3 }
 0xa78   : > { %v6251_v62 = vmul.f32 %v7704_v7, %v6250_v50 }
 0xa7a   : > { %v6252_v13 = vmul.f32 0.5, %v6251_v62 }
 0xa7c   : > { %v6253_v16 = vsub.f32 1.5, %v6252_v13 }
 0xa7e   : > { %v6254_v54 = vmul.f32 %v7704_v7, %v6253_v16 }
 0xa80   : > { %v6258_v1 = vsel %vm6257_vm9, %v7704_v7, %v6254_v54 }
 0xa81   : > { %v6259_v44 = vmul.f32 %v6258_v1, %v6241_v58 }
 0xa83   : > { %v6260_v6 = vmul.f32 %v6259_v44, %v6242_v37 }
 0xa85   : > { %7549 = vmatmul.msk.f32.vlgmr.msrb.gmra.mxu2 %vm5957_vm10, %v6260_v6 }
 0xb08   : > { %v6286_v53 = vpop.f32.mrf.mxu2 }
 0xb09   : > { %6290 = vst.msk [vmem:[%s850_s24] sm:$0x1] %vm6289_vm8, %v6286_v53 }
 0xb0a   : > { %7986 = shalt.err (!%p7983_p8)
}
 0xb0b   : > { %7595 = dma.vmem_to_hbm [thread:$0]  (%p8213_p5), %s6319_s26, 16, %s6321_s3, %s6302_s0  }
 0xb0c PF: > { %s11325_s11 = sld [smem:[#allocation25_spill]] }
 0xb0d   : > { %s11326_s4 = sld [smem:[#allocation23_spill]] }
 0xb12   : > { %p7642_p9 = scmp.ge.s32.totalorder %s11325_s11, 2 }
 0xb13   : > { %s6348_s6 = sand.u32 1, %s11326_s4  }
 0xb14   : > { %p7623_p10 = pnand %p7642_p9, %p8217_p6  ;;  %s6349_s1 = scalar_lea.sflag [#allocation4], %s6348_s6 }
 0xb16   : > { %p7624_p11 = pneg %p7623_p10 }
 0xb18   : > { %8024 = dma.done.wait (%p7624_p11), %s6349_s1, 16  }
 0xb19   : > { %8026 = vsyncadd (%p7624_p11), %s6349_s1, 4294967280  ;;  %s11328_s25 = sld [smem:[#allocation26_spill]]  ;;  %s11331_s4 = smov %s8033_s30 }
 0xb1a   : > { %s11329_s28 = sld [smem:[#allocation24_spill]] }
 0xb1b   : > { %s11330_s24 = sld [smem:[#allocation27_spill]] }
 0xb1f   : > { %p39_p12 = scmp.ge.s32.totalorder %s11328_s25, 4  }
 0xb20   : > { %s11332_s30 = smov %s11329_s28 }
 0xb21   :  { %41 = sbr.rel (!%p39_p12) target bundleno = 21 (0x15), region = 228 }
 0xb26   :  { %6354 = vsyncpa [#allocation3], 1 }
 0xb27   :  { %6356 = vsyncpa [#allocation3 + $0x1], 1 }
 0xb28   :  { %6357 = vsyncpa [#allocation6], 1 }
 0xb29   :  { %6358 = vsyncpa [#allocation9], 1 }
 0xb2a   :  { %6359 = vsyncpa [#allocation12], 1 }
 0xb2b   :  { %6360 = vsyncpa [#allocation15], 1 }
 0xb2c   :  { %6361 = vsyncpa [#allocation4], 1 }
 0xb2d   :  { %6363 = vsyncpa [#allocation4 + $0x1], 1 }

</bundles_post_ra>
